<compile_context>
chip_gen: v6e
topology: v6e:2x2x1
jax: 0.10.0
libtpu: 0.0.40
codegen_flags: <defaults>
</compile_context>

<pallas_src>
import jax
import jax.numpy as jnp
from jax import lax
from jax.experimental import pallas as pl
from jax.experimental.pallas import tpu as pltpu


def _round_up(x, m):
    return ((x + m - 1) // m) * m


def gru_classifier_kernel(x_ref, fc0_w_ref, fc0_b_ref,
                          w_ih_ref, w_hh_ref, b_gi_ref, b_hn_ref,
                          fc_w_ref, fc_b_ref,
                          out_ref,
                          seq_ref, gi_ref):
    T, TB, I = x_ref.shape
    H = fc0_w_ref.shape[1]       # padded hidden size (multiple of 128)
    L = w_ih_ref.shape[0]
    O = fc_w_ref.shape[0]
    wdt = fc0_w_ref.dtype        # MXU operand dtype (f32 or bf16); gate math stays f32

    # ---- fc0 over the whole slab as ONE tall 2-D MXU matmul (not T skinny ones).
    # TODO(synk): with tiny I the contraction depth underfills the MXU; could be moved to
    #             the wrapper or I padded, but it is a single negligible pass per grid step.
    x2d = x_ref[...].reshape(T * TB, I).astype(wdt)
    seq0 = jnp.dot(x2d, fc0_w_ref[...], preferred_element_type=jnp.float32) + fc0_b_ref[...]
    seq_ref[...] = seq0.reshape(T, TB, H).astype(seq_ref.dtype)

    # ---- stacked GRU layers (PyTorch gate order [r, z, n], h0 = 0 per layer).
    unroll = True if T <= 32 else 8      # full unroll only for short sequences (vreg pressure)
    h = jnp.zeros((TB, H), jnp.float32)
    for l in range(L):
        # Input-side gate matmul hoisted out of the serial recurrence, lowered as a single
        # tall (T*TB, H) @ (H, 3H) matmul. TB % 8 == 0 and H % 128 == 0 => free reshape.
        # gi already contains b_ih (+ b_hh for the r/z slab, fused in the wrapper).
        seq2d = seq_ref[...].reshape(T * TB, H)          # already in wdt, no slab cast
        gi = jnp.dot(seq2d, w_ih_ref[l], preferred_element_type=jnp.float32) + b_gi_ref[l]
        gi_ref[...] = gi.reshape(T, TB, 3 * H)

        w_hh_l = w_hh_ref[l]       # (H, 3H), resident across the whole time loop
        b_hn_l = b_hn_ref[l]       # (1, H) hidden bias of the n gate (inside the r*(...) term)
        last_layer = (l == L - 1)

        def step(t, h_prev, w_hh_l=w_hh_l, b_hn_l=b_hn_l, last_layer=last_layer):
            gi_t = gi_ref[t]                                          # (TB, 3H)
            gh = jnp.dot(h_prev.astype(wdt), w_hh_l,
                         preferred_element_type=jnp.float32)          # (TB, 3H)
            rz = jax.nn.sigmoid(gi_t[:, :2 * H] + gh[:, :2 * H])      # fused r,z slab
            r, z = rz[:, :H], rz[:, H:]
            n = jnp.tanh(gi_t[:, 2 * H:] + r * (gh[:, 2 * H:] + b_hn_l))
            h_new = (1.0 - z) * n + z * h_prev
            if not last_layer:
                seq_ref[t] = h_new.astype(seq_ref.dtype)   # becomes next layer's input
            return h_new

        h = lax.fori_loop(0, T, step, jnp.zeros((TB, H), jnp.float32), unroll=unroll)

    # ---- out[:, -1, :] -> ReLU -> (dropout is identity at inference) -> fc head.
    h_relu = jnp.maximum(h, 0.0)
    if O == 1:
        # N=1 MXU matmul is ~0.8% utilization; use VPU multiply + lane reduction instead.
        out_ref[...] = (jnp.sum(h_relu * fc_w_ref[...], axis=-1, keepdims=True)
                        + fc_b_ref[...])
    else:
        out_ref[...] = (lax.dot_general(h_relu.astype(wdt), fc_w_ref[...].astype(wdt),
                                        (((1,), (1,)), ((), ())),
                                        preferred_element_type=jnp.float32)
                        + fc_b_ref[...])


def _pad_gate_cols(w, H, Hp):
    """Pad the last dim from 3H to 3Hp keeping the [r|z|n] gate blocks aligned per-gate."""
    pad = [(0, 0)] * (w.ndim - 1) + [(0, Hp - H)]
    gates = [jnp.pad(w[..., g * H:(g + 1) * H], pad) for g in range(3)]
    return jnp.concatenate(gates, axis=-1)


def gru_classifier(x, params, *, weights_dtype=jnp.float32, batch_tile=None):
    B, T, I = x.shape
    H = params['fc0_w'].shape[1]
    L = params['w_ih'].shape[0]
    O = params['fc_w'].shape[0]

    # ---- generation-aware VMEM budget ----
    try:
        vmem_cap = int(pltpu.get_tpu_info().vmem_capacity_bytes)
    except Exception:
        vmem_cap = 64 << 20                         # conservative fallback (v7x per-TC)
    vmem_budget = int(0.85 * vmem_cap)
    is_small_vmem = vmem_cap <= (80 << 20)          # v7x-like: 64 MiB/TC, 2 TCs per chip

    # ---- pad hidden to a 128-lane multiple and batch to an 8-sublane multiple ----
    # Zero-padding is exact: padded gate columns get sigmoid(0)=0.5 / tanh(0)=0, so padded
    # h columns stay 0 through every layer, and the padded fc_w columns are 0.
    Hp = max(128, _round_up(H, 128))
    Bp = max(8, _round_up(B, 8))
    padH = Hp - H

    fc0_w = jnp.pad(params['fc0_w'], ((0, 0), (0, padH))).astype(weights_dtype)
    fc0_b = jnp.pad(params['fc0_b'], ((0, 0), (0, padH)))
    w_ih = _pad_gate_cols(jnp.pad(params['w_ih'], ((0, 0), (0, padH), (0, 0))),
                          H, Hp).astype(weights_dtype)
    w_hh = _pad_gate_cols(jnp.pad(params['w_hh'], ((0, 0), (0, padH), (0, 0))),
                          H, Hp).astype(weights_dtype)
    b_ih = _pad_gate_cols(params['b_ih'], H, Hp)
    b_hh = _pad_gate_cols(params['b_hh'], H, Hp)
    # Fuse b_hh into b_ih for the r/z gates; keep b_hh_n separate (it sits inside r*(...)).
    b_gi = jnp.concatenate([b_ih[:, :, :2 * Hp] + b_hh[:, :, :2 * Hp],
                            b_ih[:, :, 2 * Hp:]], axis=-1)            # (L, 1, 3Hp)
    b_hn = b_hh[:, :, 2 * Hp:]                                        # (L, 1, Hp)
    fc_w = jnp.pad(params['fc_w'], ((0, 0), (0, padH)))               # (O, Hp), f32
    fc_b = params['fc_b']                                             # (1, O),  f32

    x_tm = jnp.transpose(x, (1, 0, 2))                                # time-major (T, B, I)
    if Bp != B:
        x_tm = jnp.pad(x_tm, ((0, 0), (0, Bp - B), (0, 0)))

    # ---- VMEM residency model (weights single-buffered via pl.Buffered(1)) ----
    def _nb(a):
        return int(a.size) * a.dtype.itemsize
    weight_bytes = sum(_nb(a) for a in (fc0_w, fc0_b, w_ih, w_hh, b_gi, b_hn, fc_w, fc_b))
    wbytes = jnp.dtype(weights_dtype).itemsize
    row_bytes = (2 * T * I * x.dtype.itemsize      # x block (double-buffered)
                 + 2 * O * 4                       # out block (double-buffered)
                 + T * Hp * wbytes                 # seq scratch (wdt)
                 + T * 3 * Hp * 4)                 # hoisted gi scratch (f32)
    slack = 4 << 20

    # ---- batch tile: multiple of 8, divides padded batch, as large as the budget allows ----
    if batch_tile is None:
        cand = [t for t in range(8, min(Bp, 256) + 1, 8) if Bp % t == 0] or [Bp]
        fit = [t for t in cand if weight_bytes + t * row_bytes + slack <= vmem_budget]
        tb = max(fit) if fit else min(cand)
        # On small-VMEM / dual-TC parts, prefer >= 2 grid steps so both TensorCores get work.
        if is_small_vmem and Bp // tb == 1:
            two = [t for t in cand if Bp // t >= 2]
            if two:
                tb = max(two)
    else:
        tb = batch_tile
    assert Bp % tb == 0 and tb % 8 == 0, (Bp, tb)
    nb = Bp // tb

    vmem_limit = int(min(vmem_budget,
                         max(16 << 20, 2 * weight_bytes + tb * row_bytes + slack)))

    def _const_spec(shape, buffered):
        idx = lambda b: (0,) * len(shape)
        if buffered:
            # Grid-invariant block: single-buffer it instead of the default double-buffer.
            return pl.BlockSpec(shape, idx, pipeline_mode=pl.Buffered(1))
        return pl.BlockSpec(shape, idx)

    def _build(buffered):
        grid_spec = pltpu.PrefetchScalarGridSpec(
            num_scalar_prefetch=0,
            grid=(nb,),
            in_specs=[
                pl.BlockSpec((T, tb, I), lambda b: (0, b, 0)),        # x (time-major)
                _const_spec((I, Hp), buffered),                       # fc0_w
                _const_spec((1, Hp), buffered),                       # fc0_b
                _const_spec((L, Hp, 3 * Hp), buffered),               # w_ih
                _const_spec((L, Hp, 3 * Hp), buffered),               # w_hh
                _const_spec((L, 1, 3 * Hp), buffered),                # fused gi bias
                _const_spec((L, 1, Hp), buffered),                    # b_hh (n gate)
                _const_spec((O, Hp), buffered),                       # fc_w (O, Hp)
                _const_spec((1, O), buffered),                        # fc_b
            ],
            out_specs=pl.BlockSpec((tb, O), lambda b: (b, 0)),
            scratch_shapes=[
                pltpu.VMEM((T, tb, Hp), weights_dtype),    # per-layer sequence buffer
                pltpu.VMEM((T, tb, 3 * Hp), jnp.float32),  # hoisted input-side gates
            ],
        )
        return pl.pallas_call(
            gru_classifier_kernel,
            out_shape=jax.ShapeDtypeStruct((Bp, O), jnp.float32),
            grid_spec=grid_spec,
            compiler_params=pltpu.CompilerParams(
                dimension_semantics=("parallel",),
                vmem_limit_bytes=vmem_limit),
        )

    args = (x_tm, fc0_w, fc0_b, w_ih, w_hh, b_gi, b_hn, fc_w, fc_b)
    try:
        out = _build(True)(*args)
    except Exception:
        # Fallback for Pallas versions without BlockSpec pipeline_mode support.
        out = _build(False)(*args)
    return out[:B]


def init_params(key, input_size, hidden_size, num_layers, output_size=1):
    ks = jax.random.split(key, 8)
    s_in = 1.0 / jnp.sqrt(jnp.float32(input_size))
    s_h = 1.0 / jnp.sqrt(jnp.float32(hidden_size))
    u = lambda k, shape, s: jax.random.uniform(k, shape, jnp.float32, -s, s)
    return {
        # fc0: Linear(input_size, hidden_size), weight pre-transposed to (I, H)
        'fc0_w': u(ks[0], (input_size, hidden_size), s_in),
        'fc0_b': u(ks[1], (1, hidden_size), s_in),
        # GRU: per-layer (H, 3H) input/hidden weights, gate order [r, z, n]
        'w_ih': u(ks[2], (num_layers, hidden_size, 3 * hidden_size), s_h),
        'w_hh': u(ks[3], (num_layers, hidden_size, 3 * hidden_size), s_h),
        'b_ih': u(ks[4], (num_layers, 1, 3 * hidden_size), s_h),
        'b_hh': u(ks[5], (num_layers, 1, 3 * hidden_size), s_h),
        # fc: Linear(hidden_size, output_size), PyTorch layout (O, H)
        'fc_w': u(ks[6], (output_size, hidden_size), s_h),
        'fc_b': u(ks[7], (1, output_size), s_h),
    }


def reference(x, p):
    # Pure-JAX f32 reference of the same forward pass (eval mode, dropout = identity).
    B, T, _ = x.shape
    H = p['fc0_w'].shape[1]
    L = p['w_ih'].shape[0]
    seq = jnp.einsum('bti,ih->bth', x, p['fc0_w']) + p['fc0_b'][0]
    for l in range(L):
        h = jnp.zeros((B, H), jnp.float32)
        outs = []
        for t in range(T):
            gi = seq[:, t, :] @ p['w_ih'][l] + p['b_ih'][l]
            gh = h @ p['w_hh'][l] + p['b_hh'][l]
            r = jax.nn.sigmoid(gi[:, :H] + gh[:, :H])
            z = jax.nn.sigmoid(gi[:, H:2 * H] + gh[:, H:2 * H])
            n = jnp.tanh(gi[:, 2 * H:] + r * gh[:, 2 * H:])
            h = (1.0 - z) * n + z * h
            outs.append(h)
        seq = jnp.stack(outs, axis=1)
    h = jnp.maximum(seq[:, -1, :], 0.0)
    return h @ p['fc_w'].T + p['fc_b']


if __name__ == "__main__":
    B, T = 2, 8
    INPUT_SIZE, HIDDEN_SIZE, NUM_LAYERS = 4, 32, 2
    # NOTE: dropout(p) is a no-op in eval-mode forward; implemented as identity.

    key = jax.random.PRNGKey(0)
    k_x, k_p = jax.random.split(key)
    x = jax.random.normal(k_x, (B, T, INPUT_SIZE), jnp.float32)
    params = init_params(k_p, INPUT_SIZE, HIDDEN_SIZE, NUM_LAYERS, output_size=1)

    ref = reference(x, params)

    # Exact-semantics run (f32 MXU operands): tight tolerance vs the f32 reference.
    out = jax.block_until_ready(gru_classifier(x, params, weights_dtype=jnp.float32))
    assert out.shape == (B, 1), out.shape
    assert float(jnp.max(jnp.abs(out - ref))) < 1e-4, "f32 mismatch vs JAX reference"

    # bf16-MXU-operand run (recommended production setting on v6e/v7x); f32 gate math,
    # so only weight/activation quantization drift -> looser tolerance.
    out_bf16 = jax.block_until_ready(gru_classifier(x, params, weights_dtype=jnp.bfloat16))
    assert out_bf16.shape == (B, 1), out_bf16.shape
    assert float(jnp.max(jnp.abs(out_bf16 - ref))) < 5e-2, "bf16 drift too large"

    print("KERNEL_OK")
</pallas_src>

<mosaic_0001>
module attributes {stable_mosaic.version = 11 : i64} {
  func.func @gru_classifier_kernel(%arg0: i32, %arg1: memref<8x8x4xf32, #tpu.memory_space<vmem>>, %arg2: memref<4x128xf32, #tpu.memory_space<vmem>>, %arg3: memref<1x128xf32, #tpu.memory_space<vmem>>, %arg4: memref<2x128x384xf32, #tpu.memory_space<vmem>>, %arg5: memref<2x128x384xf32, #tpu.memory_space<vmem>>, %arg6: memref<2x1x384xf32, #tpu.memory_space<vmem>>, %arg7: memref<2x1x128xf32, #tpu.memory_space<vmem>>, %arg8: memref<1x128xf32, #tpu.memory_space<vmem>>, %arg9: memref<1x1xf32, #tpu.memory_space<vmem>>, %arg10: memref<8x1xf32, #tpu.memory_space<vmem>>, %arg11: memref<8x8x128xf32, #tpu.memory_space<vmem>>, %arg12: memref<8x8x384xf32, #tpu.memory_space<vmem>>) attributes {dimension_semantics = [#tpu.dimension_semantics<parallel>], iteration_bounds = array<i64: 1>, scalar_prefetch = 0 : i64, scratch_operands = 2 : i64, tpu.core_type = #tpu.core_type<tc>, window_params = [{transform_indices = @transform_0, window_bounds = array<i64: 8, 8, 4>}, {pipeline_mode = #tpu.pipeline_mode<synchronous>, transform_indices = @transform_1, window_bounds = array<i64: 4, 128>}, {pipeline_mode = #tpu.pipeline_mode<synchronous>, transform_indices = @transform_2, window_bounds = array<i64: 1, 128>}, {pipeline_mode = #tpu.pipeline_mode<synchronous>, transform_indices = @transform_3, window_bounds = array<i64: 2, 128, 384>}, {pipeline_mode = #tpu.pipeline_mode<synchronous>, transform_indices = @transform_4, window_bounds = array<i64: 2, 128, 384>}, {pipeline_mode = #tpu.pipeline_mode<synchronous>, transform_indices = @transform_5, window_bounds = array<i64: 2, 1, 384>}, {pipeline_mode = #tpu.pipeline_mode<synchronous>, transform_indices = @transform_6, window_bounds = array<i64: 2, 1, 128>}, {pipeline_mode = #tpu.pipeline_mode<synchronous>, transform_indices = @transform_7, window_bounds = array<i64: 1, 128>}, {pipeline_mode = #tpu.pipeline_mode<synchronous>, transform_indices = @transform_8, window_bounds = array<i64: 1, 1>}, {transform_indices = @transform_9, window_bounds = array<i64: 8, 1>}]} {
    %c0 = arith.constant 0 : index
    %c0_0 = arith.constant 0 : index
    %c0_1 = arith.constant 0 : index
    %0 = vector.load %arg1[%c0, %c0_0, %c0_1] : memref<8x8x4xf32, #tpu.memory_space<vmem>>, vector<8x8x4xf32>
    %1 = vector.shape_cast %0 : vector<8x8x4xf32> to vector<64x4xf32>
    %c0_2 = arith.constant 0 : index
    %c0_3 = arith.constant 0 : index
    %2 = vector.load %arg2[%c0_2, %c0_3] : memref<4x128xf32, #tpu.memory_space<vmem>>, vector<4x128xf32>
    %cst = arith.constant dense<0.000000e+00> : vector<64x128xf32>
    %3 = tpu.matmul %1, %2, %cst {dimension_numbers = #tpu.dot_dimension_numbers<[1], [0], [0], [1], [0, 0, 1, 1], [], []>} : vector<64x4xf32>, vector<4x128xf32>, vector<64x128xf32> -> vector<64x128xf32>
    %c0_4 = arith.constant 0 : index
    %c0_5 = arith.constant 0 : index
    %4 = vector.load %arg3[%c0_4, %c0_5] : memref<1x128xf32, #tpu.memory_space<vmem>>, vector<1x128xf32>
    %5 = vector.broadcast %4 : vector<1x128xf32> to vector<64x128xf32>
    %6 = arith.addf %3, %5 : vector<64x128xf32>
    %7 = vector.shape_cast %6 : vector<64x128xf32> to vector<8x8x128xf32>
    %c0_6 = arith.constant 0 : index
    %c0_7 = arith.constant 0 : index
    %c0_8 = arith.constant 0 : index
    %8 = vector.load %arg11[%c0_6, %c0_7, %c0_8] : memref<8x8x128xf32, #tpu.memory_space<vmem>>, vector<8x8x128xf32>
    tpu.vector_store %arg11[%c0_6, %c0_7, %c0_8], %7 {strides = array<i32>} : memref<8x8x128xf32, #tpu.memory_space<vmem>>, vector<8x8x128xf32>,
    %c0_9 = arith.constant 0 : index
    %c0_10 = arith.constant 0 : index
    %c0_11 = arith.constant 0 : index
    %9 = vector.load %arg11[%c0_9, %c0_10, %c0_11] : memref<8x8x128xf32, #tpu.memory_space<vmem>>, vector<8x8x128xf32>
    %10 = vector.shape_cast %9 : vector<8x8x128xf32> to vector<64x128xf32>
    %c0_12 = arith.constant 0 : index
    %c0_13 = arith.constant 0 : index
    %c0_14 = arith.constant 0 : index
    %11 = vector.load %arg4[%c0_12, %c0_13, %c0_14] : memref<2x128x384xf32, #tpu.memory_space<vmem>>, vector<1x128x384xf32>
    %12 = vector.shape_cast %11 : vector<1x128x384xf32> to vector<128x384xf32>
    %cst_15 = arith.constant dense<0.000000e+00> : vector<64x384xf32>
    %13 = tpu.matmul %10, %12, %cst_15 {dimension_numbers = #tpu.dot_dimension_numbers<[1], [0], [0], [1], [0, 0, 1, 1], [], []>} : vector<64x128xf32>, vector<128x384xf32>, vector<64x384xf32> -> vector<64x384xf32>
    %c0_16 = arith.constant 0 : index
    %c0_17 = arith.constant 0 : index
    %c0_18 = arith.constant 0 : index
    %14 = vector.load %arg6[%c0_16, %c0_17, %c0_18] : memref<2x1x384xf32, #tpu.memory_space<vmem>>, vector<1x1x384xf32>
    %15 = vector.shape_cast %14 : vector<1x1x384xf32> to vector<1x384xf32>
    %16 = vector.broadcast %15 : vector<1x384xf32> to vector<64x384xf32>
    %17 = arith.addf %13, %16 : vector<64x384xf32>
    %18 = vector.shape_cast %17 : vector<64x384xf32> to vector<8x8x384xf32>
    %c0_19 = arith.constant 0 : index
    %c0_20 = arith.constant 0 : index
    %c0_21 = arith.constant 0 : index
    %19 = vector.load %arg12[%c0_19, %c0_20, %c0_21] : memref<8x8x384xf32, #tpu.memory_space<vmem>>, vector<8x8x384xf32>
    tpu.vector_store %arg12[%c0_19, %c0_20, %c0_21], %18 {strides = array<i32>} : memref<8x8x384xf32, #tpu.memory_space<vmem>>, vector<8x8x384xf32>,
    %c0_22 = arith.constant 0 : index
    %c0_23 = arith.constant 0 : index
    %c0_24 = arith.constant 0 : index
    %20 = vector.load %arg5[%c0_22, %c0_23, %c0_24] : memref<2x128x384xf32, #tpu.memory_space<vmem>>, vector<1x128x384xf32>
    %21 = vector.shape_cast %20 : vector<1x128x384xf32> to vector<128x384xf32>
    %c0_25 = arith.constant 0 : index
    %c0_26 = arith.constant 0 : index
    %c0_27 = arith.constant 0 : index
    %22 = vector.load %arg7[%c0_25, %c0_26, %c0_27] : memref<2x1x128xf32, #tpu.memory_space<vmem>>, vector<1x1x128xf32>
    %23 = vector.shape_cast %22 : vector<1x1x128xf32> to vector<1x128xf32>
    %cst_28 = arith.constant 0.000000e+00 : f32
    %24 = vector.broadcast %cst_28 : f32 to vector<8x128xf32>
    %c0_i32 = arith.constant 0 : i32
    %25 = arith.index_cast %c0_i32 : i32 to index
    %c0_29 = arith.constant 0 : index
    %c0_30 = arith.constant 0 : index
    %26 = vector.load %arg12[%25, %c0_29, %c0_30] : memref<8x8x384xf32, #tpu.memory_space<vmem>>, vector<1x8x384xf32>
    %27 = vector.shape_cast %26 : vector<1x8x384xf32> to vector<8x384xf32>
    %cst_31 = arith.constant dense<0.000000e+00> : vector<8x384xf32>
    %28 = tpu.matmul %24, %21, %cst_31 {dimension_numbers = #tpu.dot_dimension_numbers<[1], [0], [0], [1], [0, 0, 1, 1], [], []>} : vector<8x128xf32>, vector<128x384xf32>, vector<8x384xf32> -> vector<8x384xf32>
    %29 = vector.extract_strided_slice %27 {offsets = [0, 0], sizes = [8, 256], strides = [1, 1]} : vector<8x384xf32> to vector<8x256xf32>
    %30 = vector.extract_strided_slice %28 {offsets = [0, 0], sizes = [8, 256], strides = [1, 1]} : vector<8x384xf32> to vector<8x256xf32>
    %31 = arith.addf %29, %30 : vector<8x256xf32>
    %32 = arith.negf %31 : vector<8x256xf32>
    %33 = math.exp %32 : vector<8x256xf32>
    %cst_32 = arith.constant 1.000000e+00 : f32
    %34 = vector.broadcast %cst_32 : f32 to vector<8x256xf32>
    %35 = arith.addf %34, %33 : vector<8x256xf32>
    %36 = arith.divf %34, %35 : vector<8x256xf32>
    %37 = vector.extract_strided_slice %36 {offsets = [0, 0], sizes = [8, 128], strides = [1, 1]} : vector<8x256xf32> to vector<8x128xf32>
    %38 = vector.extract_strided_slice %36 {offsets = [0, 128], sizes = [8, 128], strides = [1, 1]} : vector<8x256xf32> to vector<8x128xf32>
    %39 = vector.extract_strided_slice %27 {offsets = [0, 256], sizes = [8, 128], strides = [1, 1]} : vector<8x384xf32> to vector<8x128xf32>
    %40 = vector.extract_strided_slice %28 {offsets = [0, 256], sizes = [8, 128], strides = [1, 1]} : vector<8x384xf32> to vector<8x128xf32>
    %41 = vector.broadcast %23 : vector<1x128xf32> to vector<8x128xf32>
    %42 = arith.addf %40, %41 : vector<8x128xf32>
    %43 = arith.mulf %37, %42 : vector<8x128xf32>
    %44 = arith.addf %39, %43 : vector<8x128xf32>
    %45 = math.tanh %44 : vector<8x128xf32>
    %cst_33 = arith.constant 1.000000e+00 : f32
    %46 = vector.broadcast %cst_33 : f32 to vector<8x128xf32>
    %47 = arith.subf %46, %38 : vector<8x128xf32>
    %48 = arith.mulf %47, %45 : vector<8x128xf32>
    %49 = arith.mulf %38, %24 : vector<8x128xf32>
    %50 = arith.addf %48, %49 : vector<8x128xf32>
    %51 = arith.index_cast %c0_i32 : i32 to index
    %c0_34 = arith.constant 0 : index
    %c0_35 = arith.constant 0 : index
    %52 = vector.load %arg11[%51, %c0_34, %c0_35] : memref<8x8x128xf32, #tpu.memory_space<vmem>>, vector<1x8x128xf32>
    %53 = vector.shape_cast %52 : vector<1x8x128xf32> to vector<8x128xf32>
    %54 = vector.shape_cast %50 : vector<8x128xf32> to vector<1x8x128xf32>
    tpu.vector_store %arg11[%51, %c0_34, %c0_35], %54 {strides = array<i32>} : memref<8x8x128xf32, #tpu.memory_space<vmem>>, vector<1x8x128xf32>,
    %c1_i32 = arith.constant 1 : i32
    %55 = arith.index_cast %c1_i32 : i32 to index
    %c0_36 = arith.constant 0 : index
    %c0_37 = arith.constant 0 : index
    %56 = vector.load %arg12[%55, %c0_36, %c0_37] : memref<8x8x384xf32, #tpu.memory_space<vmem>>, vector<1x8x384xf32>
    %57 = vector.shape_cast %56 : vector<1x8x384xf32> to vector<8x384xf32>
    %cst_38 = arith.constant dense<0.000000e+00> : vector<8x384xf32>
    %58 = tpu.matmul %50, %21, %cst_38 {dimension_numbers = #tpu.dot_dimension_numbers<[1], [0], [0], [1], [0, 0, 1, 1], [], []>} : vector<8x128xf32>, vector<128x384xf32>, vector<8x384xf32> -> vector<8x384xf32>
    %59 = vector.extract_strided_slice %57 {offsets = [0, 0], sizes = [8, 256], strides = [1, 1]} : vector<8x384xf32> to vector<8x256xf32>
    %60 = vector.extract_strided_slice %58 {offsets = [0, 0], sizes = [8, 256], strides = [1, 1]} : vector<8x384xf32> to vector<8x256xf32>
    %61 = arith.addf %59, %60 : vector<8x256xf32>
    %62 = arith.negf %61 : vector<8x256xf32>
    %63 = math.exp %62 : vector<8x256xf32>
    %cst_39 = arith.constant 1.000000e+00 : f32
    %64 = vector.broadcast %cst_39 : f32 to vector<8x256xf32>
    %65 = arith.addf %64, %63 : vector<8x256xf32>
    %66 = arith.divf %64, %65 : vector<8x256xf32>
    %67 = vector.extract_strided_slice %66 {offsets = [0, 0], sizes = [8, 128], strides = [1, 1]} : vector<8x256xf32> to vector<8x128xf32>
    %68 = vector.extract_strided_slice %66 {offsets = [0, 128], sizes = [8, 128], strides = [1, 1]} : vector<8x256xf32> to vector<8x128xf32>
    %69 = vector.extract_strided_slice %57 {offsets = [0, 256], sizes = [8, 128], strides = [1, 1]} : vector<8x384xf32> to vector<8x128xf32>
    %70 = vector.extract_strided_slice %58 {offsets = [0, 256], sizes = [8, 128], strides = [1, 1]} : vector<8x384xf32> to vector<8x128xf32>
    %71 = vector.broadcast %23 : vector<1x128xf32> to vector<8x128xf32>
    %72 = arith.addf %70, %71 : vector<8x128xf32>
    %73 = arith.mulf %67, %72 : vector<8x128xf32>
    %74 = arith.addf %69, %73 : vector<8x128xf32>
    %75 = math.tanh %74 : vector<8x128xf32>
    %cst_40 = arith.constant 1.000000e+00 : f32
    %76 = vector.broadcast %cst_40 : f32 to vector<8x128xf32>
    %77 = arith.subf %76, %68 : vector<8x128xf32>
    %78 = arith.mulf %77, %75 : vector<8x128xf32>
    %79 = arith.mulf %68, %50 : vector<8x128xf32>
    %80 = arith.addf %78, %79 : vector<8x128xf32>
    %81 = arith.index_cast %c1_i32 : i32 to index
    %c0_41 = arith.constant 0 : index
    %c0_42 = arith.constant 0 : index
    %82 = vector.load %arg11[%81, %c0_41, %c0_42] : memref<8x8x128xf32, #tpu.memory_space<vmem>>, vector<1x8x128xf32>
    %83 = vector.shape_cast %82 : vector<1x8x128xf32> to vector<8x128xf32>
    %84 = vector.shape_cast %80 : vector<8x128xf32> to vector<1x8x128xf32>
    tpu.vector_store %arg11[%81, %c0_41, %c0_42], %84 {strides = array<i32>} : memref<8x8x128xf32, #tpu.memory_space<vmem>>, vector<1x8x128xf32>,
    %c2_i32 = arith.constant 2 : i32
    %85 = arith.index_cast %c2_i32 : i32 to index
    %c0_43 = arith.constant 0 : index
    %c0_44 = arith.constant 0 : index
    %86 = vector.load %arg12[%85, %c0_43, %c0_44] : memref<8x8x384xf32, #tpu.memory_space<vmem>>, vector<1x8x384xf32>
    %87 = vector.shape_cast %86 : vector<1x8x384xf32> to vector<8x384xf32>
    %cst_45 = arith.constant dense<0.000000e+00> : vector<8x384xf32>
    %88 = tpu.matmul %80, %21, %cst_45 {dimension_numbers = #tpu.dot_dimension_numbers<[1], [0], [0], [1], [0, 0, 1, 1], [], []>} : vector<8x128xf32>, vector<128x384xf32>, vector<8x384xf32> -> vector<8x384xf32>
    %89 = vector.extract_strided_slice %87 {offsets = [0, 0], sizes = [8, 256], strides = [1, 1]} : vector<8x384xf32> to vector<8x256xf32>
    %90 = vector.extract_strided_slice %88 {offsets = [0, 0], sizes = [8, 256], strides = [1, 1]} : vector<8x384xf32> to vector<8x256xf32>
    %91 = arith.addf %89, %90 : vector<8x256xf32>
    %92 = arith.negf %91 : vector<8x256xf32>
    %93 = math.exp %92 : vector<8x256xf32>
    %cst_46 = arith.constant 1.000000e+00 : f32
    %94 = vector.broadcast %cst_46 : f32 to vector<8x256xf32>
    %95 = arith.addf %94, %93 : vector<8x256xf32>
    %96 = arith.divf %94, %95 : vector<8x256xf32>
    %97 = vector.extract_strided_slice %96 {offsets = [0, 0], sizes = [8, 128], strides = [1, 1]} : vector<8x256xf32> to vector<8x128xf32>
    %98 = vector.extract_strided_slice %96 {offsets = [0, 128], sizes = [8, 128], strides = [1, 1]} : vector<8x256xf32> to vector<8x128xf32>
    %99 = vector.extract_strided_slice %87 {offsets = [0, 256], sizes = [8, 128], strides = [1, 1]} : vector<8x384xf32> to vector<8x128xf32>
    %100 = vector.extract_strided_slice %88 {offsets = [0, 256], sizes = [8, 128], strides = [1, 1]} : vector<8x384xf32> to vector<8x128xf32>
    %101 = vector.broadcast %23 : vector<1x128xf32> to vector<8x128xf32>
    %102 = arith.addf %100, %101 : vector<8x128xf32>
    %103 = arith.mulf %97, %102 : vector<8x128xf32>
    %104 = arith.addf %99, %103 : vector<8x128xf32>
    %105 = math.tanh %104 : vector<8x128xf32>
    %cst_47 = arith.constant 1.000000e+00 : f32
    %106 = vector.broadcast %cst_47 : f32 to vector<8x128xf32>
    %107 = arith.subf %106, %98 : vector<8x128xf32>
    %108 = arith.mulf %107, %105 : vector<8x128xf32>
    %109 = arith.mulf %98, %80 : vector<8x128xf32>
    %110 = arith.addf %108, %109 : vector<8x128xf32>
    %111 = arith.index_cast %c2_i32 : i32 to index
    %c0_48 = arith.constant 0 : index
    %c0_49 = arith.constant 0 : index
    %112 = vector.load %arg11[%111, %c0_48, %c0_49] : memref<8x8x128xf32, #tpu.memory_space<vmem>>, vector<1x8x128xf32>
    %113 = vector.shape_cast %112 : vector<1x8x128xf32> to vector<8x128xf32>
    %114 = vector.shape_cast %110 : vector<8x128xf32> to vector<1x8x128xf32>
    tpu.vector_store %arg11[%111, %c0_48, %c0_49], %114 {strides = array<i32>} : memref<8x8x128xf32, #tpu.memory_space<vmem>>, vector<1x8x128xf32>,
    %c3_i32 = arith.constant 3 : i32
    %115 = arith.index_cast %c3_i32 : i32 to index
    %c0_50 = arith.constant 0 : index
    %c0_51 = arith.constant 0 : index
    %116 = vector.load %arg12[%115, %c0_50, %c0_51] : memref<8x8x384xf32, #tpu.memory_space<vmem>>, vector<1x8x384xf32>
    %117 = vector.shape_cast %116 : vector<1x8x384xf32> to vector<8x384xf32>
    %cst_52 = arith.constant dense<0.000000e+00> : vector<8x384xf32>
    %118 = tpu.matmul %110, %21, %cst_52 {dimension_numbers = #tpu.dot_dimension_numbers<[1], [0], [0], [1], [0, 0, 1, 1], [], []>} : vector<8x128xf32>, vector<128x384xf32>, vector<8x384xf32> -> vector<8x384xf32>
    %119 = vector.extract_strided_slice %117 {offsets = [0, 0], sizes = [8, 256], strides = [1, 1]} : vector<8x384xf32> to vector<8x256xf32>
    %120 = vector.extract_strided_slice %118 {offsets = [0, 0], sizes = [8, 256], strides = [1, 1]} : vector<8x384xf32> to vector<8x256xf32>
    %121 = arith.addf %119, %120 : vector<8x256xf32>
    %122 = arith.negf %121 : vector<8x256xf32>
    %123 = math.exp %122 : vector<8x256xf32>
    %cst_53 = arith.constant 1.000000e+00 : f32
    %124 = vector.broadcast %cst_53 : f32 to vector<8x256xf32>
    %125 = arith.addf %124, %123 : vector<8x256xf32>
    %126 = arith.divf %124, %125 : vector<8x256xf32>
    %127 = vector.extract_strided_slice %126 {offsets = [0, 0], sizes = [8, 128], strides = [1, 1]} : vector<8x256xf32> to vector<8x128xf32>
    %128 = vector.extract_strided_slice %126 {offsets = [0, 128], sizes = [8, 128], strides = [1, 1]} : vector<8x256xf32> to vector<8x128xf32>
    %129 = vector.extract_strided_slice %117 {offsets = [0, 256], sizes = [8, 128], strides = [1, 1]} : vector<8x384xf32> to vector<8x128xf32>
    %130 = vector.extract_strided_slice %118 {offsets = [0, 256], sizes = [8, 128], strides = [1, 1]} : vector<8x384xf32> to vector<8x128xf32>
    %131 = vector.broadcast %23 : vector<1x128xf32> to vector<8x128xf32>
    %132 = arith.addf %130, %131 : vector<8x128xf32>
    %133 = arith.mulf %127, %132 : vector<8x128xf32>
    %134 = arith.addf %129, %133 : vector<8x128xf32>
    %135 = math.tanh %134 : vector<8x128xf32>
    %cst_54 = arith.constant 1.000000e+00 : f32
    %136 = vector.broadcast %cst_54 : f32 to vector<8x128xf32>
    %137 = arith.subf %136, %128 : vector<8x128xf32>
    %138 = arith.mulf %137, %135 : vector<8x128xf32>
    %139 = arith.mulf %128, %110 : vector<8x128xf32>
    %140 = arith.addf %138, %139 : vector<8x128xf32>
    %141 = arith.index_cast %c3_i32 : i32 to index
    %c0_55 = arith.constant 0 : index
    %c0_56 = arith.constant 0 : index
    %142 = vector.load %arg11[%141, %c0_55, %c0_56] : memref<8x8x128xf32, #tpu.memory_space<vmem>>, vector<1x8x128xf32>
    %143 = vector.shape_cast %142 : vector<1x8x128xf32> to vector<8x128xf32>
    %144 = vector.shape_cast %140 : vector<8x128xf32> to vector<1x8x128xf32>
    tpu.vector_store %arg11[%141, %c0_55, %c0_56], %144 {strides = array<i32>} : memref<8x8x128xf32, #tpu.memory_space<vmem>>, vector<1x8x128xf32>,
    %c4_i32 = arith.constant 4 : i32
    %145 = arith.index_cast %c4_i32 : i32 to index
    %c0_57 = arith.constant 0 : index
    %c0_58 = arith.constant 0 : index
    %146 = vector.load %arg12[%145, %c0_57, %c0_58] : memref<8x8x384xf32, #tpu.memory_space<vmem>>, vector<1x8x384xf32>
    %147 = vector.shape_cast %146 : vector<1x8x384xf32> to vector<8x384xf32>
    %cst_59 = arith.constant dense<0.000000e+00> : vector<8x384xf32>
    %148 = tpu.matmul %140, %21, %cst_59 {dimension_numbers = #tpu.dot_dimension_numbers<[1], [0], [0], [1], [0, 0, 1, 1], [], []>} : vector<8x128xf32>, vector<128x384xf32>, vector<8x384xf32> -> vector<8x384xf32>
    %149 = vector.extract_strided_slice %147 {offsets = [0, 0], sizes = [8, 256], strides = [1, 1]} : vector<8x384xf32> to vector<8x256xf32>
    %150 = vector.extract_strided_slice %148 {offsets = [0, 0], sizes = [8, 256], strides = [1, 1]} : vector<8x384xf32> to vector<8x256xf32>
    %151 = arith.addf %149, %150 : vector<8x256xf32>
    %152 = arith.negf %151 : vector<8x256xf32>
    %153 = math.exp %152 : vector<8x256xf32>
    %cst_60 = arith.constant 1.000000e+00 : f32
    %154 = vector.broadcast %cst_60 : f32 to vector<8x256xf32>
    %155 = arith.addf %154, %153 : vector<8x256xf32>
    %156 = arith.divf %154, %155 : vector<8x256xf32>
    %157 = vector.extract_strided_slice %156 {offsets = [0, 0], sizes = [8, 128], strides = [1, 1]} : vector<8x256xf32> to vector<8x128xf32>
    %158 = vector.extract_strided_slice %156 {offsets = [0, 128], sizes = [8, 128], strides = [1, 1]} : vector<8x256xf32> to vector<8x128xf32>
    %159 = vector.extract_strided_slice %147 {offsets = [0, 256], sizes = [8, 128], strides = [1, 1]} : vector<8x384xf32> to vector<8x128xf32>
    %160 = vector.extract_strided_slice %148 {offsets = [0, 256], sizes = [8, 128], strides = [1, 1]} : vector<8x384xf32> to vector<8x128xf32>
    %161 = vector.broadcast %23 : vector<1x128xf32> to vector<8x128xf32>
    %162 = arith.addf %160, %161 : vector<8x128xf32>
    %163 = arith.mulf %157, %162 : vector<8x128xf32>
    %164 = arith.addf %159, %163 : vector<8x128xf32>
    %165 = math.tanh %164 : vector<8x128xf32>
    %cst_61 = arith.constant 1.000000e+00 : f32
    %166 = vector.broadcast %cst_61 : f32 to vector<8x128xf32>
    %167 = arith.subf %166, %158 : vector<8x128xf32>
    %168 = arith.mulf %167, %165 : vector<8x128xf32>
    %169 = arith.mulf %158, %140 : vector<8x128xf32>
    %170 = arith.addf %168, %169 : vector<8x128xf32>
    %171 = arith.index_cast %c4_i32 : i32 to index
    %c0_62 = arith.constant 0 : index
    %c0_63 = arith.constant 0 : index
    %172 = vector.load %arg11[%171, %c0_62, %c0_63] : memref<8x8x128xf32, #tpu.memory_space<vmem>>, vector<1x8x128xf32>
    %173 = vector.shape_cast %172 : vector<1x8x128xf32> to vector<8x128xf32>
    %174 = vector.shape_cast %170 : vector<8x128xf32> to vector<1x8x128xf32>
    tpu.vector_store %arg11[%171, %c0_62, %c0_63], %174 {strides = array<i32>} : memref<8x8x128xf32, #tpu.memory_space<vmem>>, vector<1x8x128xf32>,
    %c5_i32 = arith.constant 5 : i32
    %175 = arith.index_cast %c5_i32 : i32 to index
    %c0_64 = arith.constant 0 : index
    %c0_65 = arith.constant 0 : index
    %176 = vector.load %arg12[%175, %c0_64, %c0_65] : memref<8x8x384xf32, #tpu.memory_space<vmem>>, vector<1x8x384xf32>
    %177 = vector.shape_cast %176 : vector<1x8x384xf32> to vector<8x384xf32>
    %cst_66 = arith.constant dense<0.000000e+00> : vector<8x384xf32>
    %178 = tpu.matmul %170, %21, %cst_66 {dimension_numbers = #tpu.dot_dimension_numbers<[1], [0], [0], [1], [0, 0, 1, 1], [], []>} : vector<8x128xf32>, vector<128x384xf32>, vector<8x384xf32> -> vector<8x384xf32>
    %179 = vector.extract_strided_slice %177 {offsets = [0, 0], sizes = [8, 256], strides = [1, 1]} : vector<8x384xf32> to vector<8x256xf32>
    %180 = vector.extract_strided_slice %178 {offsets = [0, 0], sizes = [8, 256], strides = [1, 1]} : vector<8x384xf32> to vector<8x256xf32>
    %181 = arith.addf %179, %180 : vector<8x256xf32>
    %182 = arith.negf %181 : vector<8x256xf32>
    %183 = math.exp %182 : vector<8x256xf32>
    %cst_67 = arith.constant 1.000000e+00 : f32
    %184 = vector.broadcast %cst_67 : f32 to vector<8x256xf32>
    %185 = arith.addf %184, %183 : vector<8x256xf32>
    %186 = arith.divf %184, %185 : vector<8x256xf32>
    %187 = vector.extract_strided_slice %186 {offsets = [0, 0], sizes = [8, 128], strides = [1, 1]} : vector<8x256xf32> to vector<8x128xf32>
    %188 = vector.extract_strided_slice %186 {offsets = [0, 128], sizes = [8, 128], strides = [1, 1]} : vector<8x256xf32> to vector<8x128xf32>
    %189 = vector.extract_strided_slice %177 {offsets = [0, 256], sizes = [8, 128], strides = [1, 1]} : vector<8x384xf32> to vector<8x128xf32>
    %190 = vector.extract_strided_slice %178 {offsets = [0, 256], sizes = [8, 128], strides = [1, 1]} : vector<8x384xf32> to vector<8x128xf32>
    %191 = vector.broadcast %23 : vector<1x128xf32> to vector<8x128xf32>
    %192 = arith.addf %190, %191 : vector<8x128xf32>
    %193 = arith.mulf %187, %192 : vector<8x128xf32>
    %194 = arith.addf %189, %193 : vector<8x128xf32>
    %195 = math.tanh %194 : vector<8x128xf32>
    %cst_68 = arith.constant 1.000000e+00 : f32
    %196 = vector.broadcast %cst_68 : f32 to vector<8x128xf32>
    %197 = arith.subf %196, %188 : vector<8x128xf32>
    %198 = arith.mulf %197, %195 : vector<8x128xf32>
    %199 = arith.mulf %188, %170 : vector<8x128xf32>
    %200 = arith.addf %198, %199 : vector<8x128xf32>
    %201 = arith.index_cast %c5_i32 : i32 to index
    %c0_69 = arith.constant 0 : index
    %c0_70 = arith.constant 0 : index
    %202 = vector.load %arg11[%201, %c0_69, %c0_70] : memref<8x8x128xf32, #tpu.memory_space<vmem>>, vector<1x8x128xf32>
    %203 = vector.shape_cast %202 : vector<1x8x128xf32> to vector<8x128xf32>
    %204 = vector.shape_cast %200 : vector<8x128xf32> to vector<1x8x128xf32>
    tpu.vector_store %arg11[%201, %c0_69, %c0_70], %204 {strides = array<i32>} : memref<8x8x128xf32, #tpu.memory_space<vmem>>, vector<1x8x128xf32>,
    %c6_i32 = arith.constant 6 : i32
    %205 = arith.index_cast %c6_i32 : i32 to index
    %c0_71 = arith.constant 0 : index
    %c0_72 = arith.constant 0 : index
    %206 = vector.load %arg12[%205, %c0_71, %c0_72] : memref<8x8x384xf32, #tpu.memory_space<vmem>>, vector<1x8x384xf32>
    %207 = vector.shape_cast %206 : vector<1x8x384xf32> to vector<8x384xf32>
    %cst_73 = arith.constant dense<0.000000e+00> : vector<8x384xf32>
    %208 = tpu.matmul %200, %21, %cst_73 {dimension_numbers = #tpu.dot_dimension_numbers<[1], [0], [0], [1], [0, 0, 1, 1], [], []>} : vector<8x128xf32>, vector<128x384xf32>, vector<8x384xf32> -> vector<8x384xf32>
    %209 = vector.extract_strided_slice %207 {offsets = [0, 0], sizes = [8, 256], strides = [1, 1]} : vector<8x384xf32> to vector<8x256xf32>
    %210 = vector.extract_strided_slice %208 {offsets = [0, 0], sizes = [8, 256], strides = [1, 1]} : vector<8x384xf32> to vector<8x256xf32>
    %211 = arith.addf %209, %210 : vector<8x256xf32>
    %212 = arith.negf %211 : vector<8x256xf32>
    %213 = math.exp %212 : vector<8x256xf32>
    %cst_74 = arith.constant 1.000000e+00 : f32
    %214 = vector.broadcast %cst_74 : f32 to vector<8x256xf32>
    %215 = arith.addf %214, %213 : vector<8x256xf32>
    %216 = arith.divf %214, %215 : vector<8x256xf32>
    %217 = vector.extract_strided_slice %216 {offsets = [0, 0], sizes = [8, 128], strides = [1, 1]} : vector<8x256xf32> to vector<8x128xf32>
    %218 = vector.extract_strided_slice %216 {offsets = [0, 128], sizes = [8, 128], strides = [1, 1]} : vector<8x256xf32> to vector<8x128xf32>
    %219 = vector.extract_strided_slice %207 {offsets = [0, 256], sizes = [8, 128], strides = [1, 1]} : vector<8x384xf32> to vector<8x128xf32>
    %220 = vector.extract_strided_slice %208 {offsets = [0, 256], sizes = [8, 128], strides = [1, 1]} : vector<8x384xf32> to vector<8x128xf32>
    %221 = vector.broadcast %23 : vector<1x128xf32> to vector<8x128xf32>
    %222 = arith.addf %220, %221 : vector<8x128xf32>
    %223 = arith.mulf %217, %222 : vector<8x128xf32>
    %224 = arith.addf %219, %223 : vector<8x128xf32>
    %225 = math.tanh %224 : vector<8x128xf32>
    %cst_75 = arith.constant 1.000000e+00 : f32
    %226 = vector.broadcast %cst_75 : f32 to vector<8x128xf32>
    %227 = arith.subf %226, %218 : vector<8x128xf32>
    %228 = arith.mulf %227, %225 : vector<8x128xf32>
    %229 = arith.mulf %218, %200 : vector<8x128xf32>
    %230 = arith.addf %228, %229 : vector<8x128xf32>
    %231 = arith.index_cast %c6_i32 : i32 to index
    %c0_76 = arith.constant 0 : index
    %c0_77 = arith.constant 0 : index
    %232 = vector.load %arg11[%231, %c0_76, %c0_77] : memref<8x8x128xf32, #tpu.memory_space<vmem>>, vector<1x8x128xf32>
    %233 = vector.shape_cast %232 : vector<1x8x128xf32> to vector<8x128xf32>
    %234 = vector.shape_cast %230 : vector<8x128xf32> to vector<1x8x128xf32>
    tpu.vector_store %arg11[%231, %c0_76, %c0_77], %234 {strides = array<i32>} : memref<8x8x128xf32, #tpu.memory_space<vmem>>, vector<1x8x128xf32>,
    %c7_i32 = arith.constant 7 : i32
    %235 = arith.index_cast %c7_i32 : i32 to index
    %c0_78 = arith.constant 0 : index
    %c0_79 = arith.constant 0 : index
    %236 = vector.load %arg12[%235, %c0_78, %c0_79] : memref<8x8x384xf32, #tpu.memory_space<vmem>>, vector<1x8x384xf32>
    %237 = vector.shape_cast %236 : vector<1x8x384xf32> to vector<8x384xf32>
    %cst_80 = arith.constant dense<0.000000e+00> : vector<8x384xf32>
    %238 = tpu.matmul %230, %21, %cst_80 {dimension_numbers = #tpu.dot_dimension_numbers<[1], [0], [0], [1], [0, 0, 1, 1], [], []>} : vector<8x128xf32>, vector<128x384xf32>, vector<8x384xf32> -> vector<8x384xf32>
    %239 = vector.extract_strided_slice %237 {offsets = [0, 0], sizes = [8, 256], strides = [1, 1]} : vector<8x384xf32> to vector<8x256xf32>
    %240 = vector.extract_strided_slice %238 {offsets = [0, 0], sizes = [8, 256], strides = [1, 1]} : vector<8x384xf32> to vector<8x256xf32>
    %241 = arith.addf %239, %240 : vector<8x256xf32>
    %242 = arith.negf %241 : vector<8x256xf32>
    %243 = math.exp %242 : vector<8x256xf32>
    %cst_81 = arith.constant 1.000000e+00 : f32
    %244 = vector.broadcast %cst_81 : f32 to vector<8x256xf32>
    %245 = arith.addf %244, %243 : vector<8x256xf32>
    %246 = arith.divf %244, %245 : vector<8x256xf32>
    %247 = vector.extract_strided_slice %246 {offsets = [0, 0], sizes = [8, 128], strides = [1, 1]} : vector<8x256xf32> to vector<8x128xf32>
    %248 = vector.extract_strided_slice %246 {offsets = [0, 128], sizes = [8, 128], strides = [1, 1]} : vector<8x256xf32> to vector<8x128xf32>
    %249 = vector.extract_strided_slice %237 {offsets = [0, 256], sizes = [8, 128], strides = [1, 1]} : vector<8x384xf32> to vector<8x128xf32>
    %250 = vector.extract_strided_slice %238 {offsets = [0, 256], sizes = [8, 128], strides = [1, 1]} : vector<8x384xf32> to vector<8x128xf32>
    %251 = vector.broadcast %23 : vector<1x128xf32> to vector<8x128xf32>
    %252 = arith.addf %250, %251 : vector<8x128xf32>
    %253 = arith.mulf %247, %252 : vector<8x128xf32>
    %254 = arith.addf %249, %253 : vector<8x128xf32>
    %255 = math.tanh %254 : vector<8x128xf32>
    %cst_82 = arith.constant 1.000000e+00 : f32
    %256 = vector.broadcast %cst_82 : f32 to vector<8x128xf32>
    %257 = arith.subf %256, %248 : vector<8x128xf32>
    %258 = arith.mulf %257, %255 : vector<8x128xf32>
    %259 = arith.mulf %248, %230 : vector<8x128xf32>
    %260 = arith.addf %258, %259 : vector<8x128xf32>
    %261 = arith.index_cast %c7_i32 : i32 to index
    %c0_83 = arith.constant 0 : index
    %c0_84 = arith.constant 0 : index
    %262 = vector.load %arg11[%261, %c0_83, %c0_84] : memref<8x8x128xf32, #tpu.memory_space<vmem>>, vector<1x8x128xf32>
    %263 = vector.shape_cast %262 : vector<1x8x128xf32> to vector<8x128xf32>
    %264 = vector.shape_cast %260 : vector<8x128xf32> to vector<1x8x128xf32>
    tpu.vector_store %arg11[%261, %c0_83, %c0_84], %264 {strides = array<i32>} : memref<8x8x128xf32, #tpu.memory_space<vmem>>, vector<1x8x128xf32>,
    %c8_i32 = arith.constant 8 : i32
    %c0_85 = arith.constant 0 : index
    %c0_86 = arith.constant 0 : index
    %c0_87 = arith.constant 0 : index
    %265 = vector.load %arg11[%c0_85, %c0_86, %c0_87] : memref<8x8x128xf32, #tpu.memory_space<vmem>>, vector<8x8x128xf32>
    %266 = vector.shape_cast %265 : vector<8x8x128xf32> to vector<64x128xf32>
    %c1 = arith.constant 1 : index
    %c0_88 = arith.constant 0 : index
    %c0_89 = arith.constant 0 : index
    %267 = vector.load %arg4[%c1, %c0_88, %c0_89] : memref<2x128x384xf32, #tpu.memory_space<vmem>>, vector<1x128x384xf32>
    %268 = vector.shape_cast %267 : vector<1x128x384xf32> to vector<128x384xf32>
    %cst_90 = arith.constant dense<0.000000e+00> : vector<64x384xf32>
    %269 = tpu.matmul %266, %268, %cst_90 {dimension_numbers = #tpu.dot_dimension_numbers<[1], [0], [0], [1], [0, 0, 1, 1], [], []>} : vector<64x128xf32>, vector<128x384xf32>, vector<64x384xf32> -> vector<64x384xf32>
    %c1_91 = arith.constant 1 : index
    %c0_92 = arith.constant 0 : index
    %c0_93 = arith.constant 0 : index
    %270 = vector.load %arg6[%c1_91, %c0_92, %c0_93] : memref<2x1x384xf32, #tpu.memory_space<vmem>>, vector<1x1x384xf32>
    %271 = vector.shape_cast %270 : vector<1x1x384xf32> to vector<1x384xf32>
    %272 = vector.broadcast %271 : vector<1x384xf32> to vector<64x384xf32>
    %273 = arith.addf %269, %272 : vector<64x384xf32>
    %274 = vector.shape_cast %273 : vector<64x384xf32> to vector<8x8x384xf32>
    %c0_94 = arith.constant 0 : index
    %c0_95 = arith.constant 0 : index
    %c0_96 = arith.constant 0 : index
    %275 = vector.load %arg12[%c0_94, %c0_95, %c0_96] : memref<8x8x384xf32, #tpu.memory_space<vmem>>, vector<8x8x384xf32>
    tpu.vector_store %arg12[%c0_94, %c0_95, %c0_96], %274 {strides = array<i32>} : memref<8x8x384xf32, #tpu.memory_space<vmem>>, vector<8x8x384xf32>,
    %c1_97 = arith.constant 1 : index
    %c0_98 = arith.constant 0 : index
    %c0_99 = arith.constant 0 : index
    %276 = vector.load %arg5[%c1_97, %c0_98, %c0_99] : memref<2x128x384xf32, #tpu.memory_space<vmem>>, vector<1x128x384xf32>
    %277 = vector.shape_cast %276 : vector<1x128x384xf32> to vector<128x384xf32>
    %c1_100 = arith.constant 1 : index
    %c0_101 = arith.constant 0 : index
    %c0_102 = arith.constant 0 : index
    %278 = vector.load %arg7[%c1_100, %c0_101, %c0_102] : memref<2x1x128xf32, #tpu.memory_space<vmem>>, vector<1x1x128xf32>
    %279 = vector.shape_cast %278 : vector<1x1x128xf32> to vector<1x128xf32>
    %cst_103 = arith.constant 0.000000e+00 : f32
    %280 = vector.broadcast %cst_103 : f32 to vector<8x128xf32>
    %c0_i32_104 = arith.constant 0 : i32
    %281 = arith.index_cast %c0_i32_104 : i32 to index
    %c0_105 = arith.constant 0 : index
    %c0_106 = arith.constant 0 : index
    %282 = vector.load %arg12[%281, %c0_105, %c0_106] : memref<8x8x384xf32, #tpu.memory_space<vmem>>, vector<1x8x384xf32>
    %283 = vector.shape_cast %282 : vector<1x8x384xf32> to vector<8x384xf32>
    %cst_107 = arith.constant dense<0.000000e+00> : vector<8x384xf32>
    %284 = tpu.matmul %280, %277, %cst_107 {dimension_numbers = #tpu.dot_dimension_numbers<[1], [0], [0], [1], [0, 0, 1, 1], [], []>} : vector<8x128xf32>, vector<128x384xf32>, vector<8x384xf32> -> vector<8x384xf32>
    %285 = vector.extract_strided_slice %283 {offsets = [0, 0], sizes = [8, 256], strides = [1, 1]} : vector<8x384xf32> to vector<8x256xf32>
    %286 = vector.extract_strided_slice %284 {offsets = [0, 0], sizes = [8, 256], strides = [1, 1]} : vector<8x384xf32> to vector<8x256xf32>
    %287 = arith.addf %285, %286 : vector<8x256xf32>
    %288 = arith.negf %287 : vector<8x256xf32>
    %289 = math.exp %288 : vector<8x256xf32>
    %cst_108 = arith.constant 1.000000e+00 : f32
    %290 = vector.broadcast %cst_108 : f32 to vector<8x256xf32>
    %291 = arith.addf %290, %289 : vector<8x256xf32>
    %292 = arith.divf %290, %291 : vector<8x256xf32>
    %293 = vector.extract_strided_slice %292 {offsets = [0, 0], sizes = [8, 128], strides = [1, 1]} : vector<8x256xf32> to vector<8x128xf32>
    %294 = vector.extract_strided_slice %292 {offsets = [0, 128], sizes = [8, 128], strides = [1, 1]} : vector<8x256xf32> to vector<8x128xf32>
    %295 = vector.extract_strided_slice %283 {offsets = [0, 256], sizes = [8, 128], strides = [1, 1]} : vector<8x384xf32> to vector<8x128xf32>
    %296 = vector.extract_strided_slice %284 {offsets = [0, 256], sizes = [8, 128], strides = [1, 1]} : vector<8x384xf32> to vector<8x128xf32>
    %297 = vector.broadcast %279 : vector<1x128xf32> to vector<8x128xf32>
    %298 = arith.addf %296, %297 : vector<8x128xf32>
    %299 = arith.mulf %293, %298 : vector<8x128xf32>
    %300 = arith.addf %295, %299 : vector<8x128xf32>
    %301 = math.tanh %300 : vector<8x128xf32>
    %cst_109 = arith.constant 1.000000e+00 : f32
    %302 = vector.broadcast %cst_109 : f32 to vector<8x128xf32>
    %303 = arith.subf %302, %294 : vector<8x128xf32>
    %304 = arith.mulf %303, %301 : vector<8x128xf32>
    %305 = arith.mulf %294, %280 : vector<8x128xf32>
    %306 = arith.addf %304, %305 : vector<8x128xf32>
    %c1_i32_110 = arith.constant 1 : i32
    %307 = arith.index_cast %c1_i32_110 : i32 to index
    %c0_111 = arith.constant 0 : index
    %c0_112 = arith.constant 0 : index
    %308 = vector.load %arg12[%307, %c0_111, %c0_112] : memref<8x8x384xf32, #tpu.memory_space<vmem>>, vector<1x8x384xf32>
    %309 = vector.shape_cast %308 : vector<1x8x384xf32> to vector<8x384xf32>
    %cst_113 = arith.constant dense<0.000000e+00> : vector<8x384xf32>
    %310 = tpu.matmul %306, %277, %cst_113 {dimension_numbers = #tpu.dot_dimension_numbers<[1], [0], [0], [1], [0, 0, 1, 1], [], []>} : vector<8x128xf32>, vector<128x384xf32>, vector<8x384xf32> -> vector<8x384xf32>
    %311 = vector.extract_strided_slice %309 {offsets = [0, 0], sizes = [8, 256], strides = [1, 1]} : vector<8x384xf32> to vector<8x256xf32>
    %312 = vector.extract_strided_slice %310 {offsets = [0, 0], sizes = [8, 256], strides = [1, 1]} : vector<8x384xf32> to vector<8x256xf32>
    %313 = arith.addf %311, %312 : vector<8x256xf32>
    %314 = arith.negf %313 : vector<8x256xf32>
    %315 = math.exp %314 : vector<8x256xf32>
    %cst_114 = arith.constant 1.000000e+00 : f32
    %316 = vector.broadcast %cst_114 : f32 to vector<8x256xf32>
    %317 = arith.addf %316, %315 : vector<8x256xf32>
    %318 = arith.divf %316, %317 : vector<8x256xf32>
    %319 = vector.extract_strided_slice %318 {offsets = [0, 0], sizes = [8, 128], strides = [1, 1]} : vector<8x256xf32> to vector<8x128xf32>
    %320 = vector.extract_strided_slice %318 {offsets = [0, 128], sizes = [8, 128], strides = [1, 1]} : vector<8x256xf32> to vector<8x128xf32>
    %321 = vector.extract_strided_slice %309 {offsets = [0, 256], sizes = [8, 128], strides = [1, 1]} : vector<8x384xf32> to vector<8x128xf32>
    %322 = vector.extract_strided_slice %310 {offsets = [0, 256], sizes = [8, 128], strides = [1, 1]} : vector<8x384xf32> to vector<8x128xf32>
    %323 = vector.broadcast %279 : vector<1x128xf32> to vector<8x128xf32>
    %324 = arith.addf %322, %323 : vector<8x128xf32>
    %325 = arith.mulf %319, %324 : vector<8x128xf32>
    %326 = arith.addf %321, %325 : vector<8x128xf32>
    %327 = math.tanh %326 : vector<8x128xf32>
    %cst_115 = arith.constant 1.000000e+00 : f32
    %328 = vector.broadcast %cst_115 : f32 to vector<8x128xf32>
    %329 = arith.subf %328, %320 : vector<8x128xf32>
    %330 = arith.mulf %329, %327 : vector<8x128xf32>
    %331 = arith.mulf %320, %306 : vector<8x128xf32>
    %332 = arith.addf %330, %331 : vector<8x128xf32>
    %c2_i32_116 = arith.constant 2 : i32
    %333 = arith.index_cast %c2_i32_116 : i32 to index
    %c0_117 = arith.constant 0 : index
    %c0_118 = arith.constant 0 : index
    %334 = vector.load %arg12[%333, %c0_117, %c0_118] : memref<8x8x384xf32, #tpu.memory_space<vmem>>, vector<1x8x384xf32>
    %335 = vector.shape_cast %334 : vector<1x8x384xf32> to vector<8x384xf32>
    %cst_119 = arith.constant dense<0.000000e+00> : vector<8x384xf32>
    %336 = tpu.matmul %332, %277, %cst_119 {dimension_numbers = #tpu.dot_dimension_numbers<[1], [0], [0], [1], [0, 0, 1, 1], [], []>} : vector<8x128xf32>, vector<128x384xf32>, vector<8x384xf32> -> vector<8x384xf32>
    %337 = vector.extract_strided_slice %335 {offsets = [0, 0], sizes = [8, 256], strides = [1, 1]} : vector<8x384xf32> to vector<8x256xf32>
    %338 = vector.extract_strided_slice %336 {offsets = [0, 0], sizes = [8, 256], strides = [1, 1]} : vector<8x384xf32> to vector<8x256xf32>
    %339 = arith.addf %337, %338 : vector<8x256xf32>
    %340 = arith.negf %339 : vector<8x256xf32>
    %341 = math.exp %340 : vector<8x256xf32>
    %cst_120 = arith.constant 1.000000e+00 : f32
    %342 = vector.broadcast %cst_120 : f32 to vector<8x256xf32>
    %343 = arith.addf %342, %341 : vector<8x256xf32>
    %344 = arith.divf %342, %343 : vector<8x256xf32>
    %345 = vector.extract_strided_slice %344 {offsets = [0, 0], sizes = [8, 128], strides = [1, 1]} : vector<8x256xf32> to vector<8x128xf32>
    %346 = vector.extract_strided_slice %344 {offsets = [0, 128], sizes = [8, 128], strides = [1, 1]} : vector<8x256xf32> to vector<8x128xf32>
    %347 = vector.extract_strided_slice %335 {offsets = [0, 256], sizes = [8, 128], strides = [1, 1]} : vector<8x384xf32> to vector<8x128xf32>
    %348 = vector.extract_strided_slice %336 {offsets = [0, 256], sizes = [8, 128], strides = [1, 1]} : vector<8x384xf32> to vector<8x128xf32>
    %349 = vector.broadcast %279 : vector<1x128xf32> to vector<8x128xf32>
    %350 = arith.addf %348, %349 : vector<8x128xf32>
    %351 = arith.mulf %345, %350 : vector<8x128xf32>
    %352 = arith.addf %347, %351 : vector<8x128xf32>
    %353 = math.tanh %352 : vector<8x128xf32>
    %cst_121 = arith.constant 1.000000e+00 : f32
    %354 = vector.broadcast %cst_121 : f32 to vector<8x128xf32>
    %355 = arith.subf %354, %346 : vector<8x128xf32>
    %356 = arith.mulf %355, %353 : vector<8x128xf32>
    %357 = arith.mulf %346, %332 : vector<8x128xf32>
    %358 = arith.addf %356, %357 : vector<8x128xf32>
    %c3_i32_122 = arith.constant 3 : i32
    %359 = arith.index_cast %c3_i32_122 : i32 to index
    %c0_123 = arith.constant 0 : index
    %c0_124 = arith.constant 0 : index
    %360 = vector.load %arg12[%359, %c0_123, %c0_124] : memref<8x8x384xf32, #tpu.memory_space<vmem>>, vector<1x8x384xf32>
    %361 = vector.shape_cast %360 : vector<1x8x384xf32> to vector<8x384xf32>
    %cst_125 = arith.constant dense<0.000000e+00> : vector<8x384xf32>
    %362 = tpu.matmul %358, %277, %cst_125 {dimension_numbers = #tpu.dot_dimension_numbers<[1], [0], [0], [1], [0, 0, 1, 1], [], []>} : vector<8x128xf32>, vector<128x384xf32>, vector<8x384xf32> -> vector<8x384xf32>
    %363 = vector.extract_strided_slice %361 {offsets = [0, 0], sizes = [8, 256], strides = [1, 1]} : vector<8x384xf32> to vector<8x256xf32>
    %364 = vector.extract_strided_slice %362 {offsets = [0, 0], sizes = [8, 256], strides = [1, 1]} : vector<8x384xf32> to vector<8x256xf32>
    %365 = arith.addf %363, %364 : vector<8x256xf32>
    %366 = arith.negf %365 : vector<8x256xf32>
    %367 = math.exp %366 : vector<8x256xf32>
    %cst_126 = arith.constant 1.000000e+00 : f32
    %368 = vector.broadcast %cst_126 : f32 to vector<8x256xf32>
    %369 = arith.addf %368, %367 : vector<8x256xf32>
    %370 = arith.divf %368, %369 : vector<8x256xf32>
    %371 = vector.extract_strided_slice %370 {offsets = [0, 0], sizes = [8, 128], strides = [1, 1]} : vector<8x256xf32> to vector<8x128xf32>
    %372 = vector.extract_strided_slice %370 {offsets = [0, 128], sizes = [8, 128], strides = [1, 1]} : vector<8x256xf32> to vector<8x128xf32>
    %373 = vector.extract_strided_slice %361 {offsets = [0, 256], sizes = [8, 128], strides = [1, 1]} : vector<8x384xf32> to vector<8x128xf32>
    %374 = vector.extract_strided_slice %362 {offsets = [0, 256], sizes = [8, 128], strides = [1, 1]} : vector<8x384xf32> to vector<8x128xf32>
    %375 = vector.broadcast %279 : vector<1x128xf32> to vector<8x128xf32>
    %376 = arith.addf %374, %375 : vector<8x128xf32>
    %377 = arith.mulf %371, %376 : vector<8x128xf32>
    %378 = arith.addf %373, %377 : vector<8x128xf32>
    %379 = math.tanh %378 : vector<8x128xf32>
    %cst_127 = arith.constant 1.000000e+00 : f32
    %380 = vector.broadcast %cst_127 : f32 to vector<8x128xf32>
    %381 = arith.subf %380, %372 : vector<8x128xf32>
    %382 = arith.mulf %381, %379 : vector<8x128xf32>
    %383 = arith.mulf %372, %358 : vector<8x128xf32>
    %384 = arith.addf %382, %383 : vector<8x128xf32>
    %c4_i32_128 = arith.constant 4 : i32
    %385 = arith.index_cast %c4_i32_128 : i32 to index
    %c0_129 = arith.constant 0 : index
    %c0_130 = arith.constant 0 : index
    %386 = vector.load %arg12[%385, %c0_129, %c0_130] : memref<8x8x384xf32, #tpu.memory_space<vmem>>, vector<1x8x384xf32>
    %387 = vector.shape_cast %386 : vector<1x8x384xf32> to vector<8x384xf32>
    %cst_131 = arith.constant dense<0.000000e+00> : vector<8x384xf32>
    %388 = tpu.matmul %384, %277, %cst_131 {dimension_numbers = #tpu.dot_dimension_numbers<[1], [0], [0], [1], [0, 0, 1, 1], [], []>} : vector<8x128xf32>, vector<128x384xf32>, vector<8x384xf32> -> vector<8x384xf32>
    %389 = vector.extract_strided_slice %387 {offsets = [0, 0], sizes = [8, 256], strides = [1, 1]} : vector<8x384xf32> to vector<8x256xf32>
    %390 = vector.extract_strided_slice %388 {offsets = [0, 0], sizes = [8, 256], strides = [1, 1]} : vector<8x384xf32> to vector<8x256xf32>
    %391 = arith.addf %389, %390 : vector<8x256xf32>
    %392 = arith.negf %391 : vector<8x256xf32>
    %393 = math.exp %392 : vector<8x256xf32>
    %cst_132 = arith.constant 1.000000e+00 : f32
    %394 = vector.broadcast %cst_132 : f32 to vector<8x256xf32>
    %395 = arith.addf %394, %393 : vector<8x256xf32>
    %396 = arith.divf %394, %395 : vector<8x256xf32>
    %397 = vector.extract_strided_slice %396 {offsets = [0, 0], sizes = [8, 128], strides = [1, 1]} : vector<8x256xf32> to vector<8x128xf32>
    %398 = vector.extract_strided_slice %396 {offsets = [0, 128], sizes = [8, 128], strides = [1, 1]} : vector<8x256xf32> to vector<8x128xf32>
    %399 = vector.extract_strided_slice %387 {offsets = [0, 256], sizes = [8, 128], strides = [1, 1]} : vector<8x384xf32> to vector<8x128xf32>
    %400 = vector.extract_strided_slice %388 {offsets = [0, 256], sizes = [8, 128], strides = [1, 1]} : vector<8x384xf32> to vector<8x128xf32>
    %401 = vector.broadcast %279 : vector<1x128xf32> to vector<8x128xf32>
    %402 = arith.addf %400, %401 : vector<8x128xf32>
    %403 = arith.mulf %397, %402 : vector<8x128xf32>
    %404 = arith.addf %399, %403 : vector<8x128xf32>
    %405 = math.tanh %404 : vector<8x128xf32>
    %cst_133 = arith.constant 1.000000e+00 : f32
    %406 = vector.broadcast %cst_133 : f32 to vector<8x128xf32>
    %407 = arith.subf %406, %398 : vector<8x128xf32>
    %408 = arith.mulf %407, %405 : vector<8x128xf32>
    %409 = arith.mulf %398, %384 : vector<8x128xf32>
    %410 = arith.addf %408, %409 : vector<8x128xf32>
    %c5_i32_134 = arith.constant 5 : i32
    %411 = arith.index_cast %c5_i32_134 : i32 to index
    %c0_135 = arith.constant 0 : index
    %c0_136 = arith.constant 0 : index
    %412 = vector.load %arg12[%411, %c0_135, %c0_136] : memref<8x8x384xf32, #tpu.memory_space<vmem>>, vector<1x8x384xf32>
    %413 = vector.shape_cast %412 : vector<1x8x384xf32> to vector<8x384xf32>
    %cst_137 = arith.constant dense<0.000000e+00> : vector<8x384xf32>
    %414 = tpu.matmul %410, %277, %cst_137 {dimension_numbers = #tpu.dot_dimension_numbers<[1], [0], [0], [1], [0, 0, 1, 1], [], []>} : vector<8x128xf32>, vector<128x384xf32>, vector<8x384xf32> -> vector<8x384xf32>
    %415 = vector.extract_strided_slice %413 {offsets = [0, 0], sizes = [8, 256], strides = [1, 1]} : vector<8x384xf32> to vector<8x256xf32>
    %416 = vector.extract_strided_slice %414 {offsets = [0, 0], sizes = [8, 256], strides = [1, 1]} : vector<8x384xf32> to vector<8x256xf32>
    %417 = arith.addf %415, %416 : vector<8x256xf32>
    %418 = arith.negf %417 : vector<8x256xf32>
    %419 = math.exp %418 : vector<8x256xf32>
    %cst_138 = arith.constant 1.000000e+00 : f32
    %420 = vector.broadcast %cst_138 : f32 to vector<8x256xf32>
    %421 = arith.addf %420, %419 : vector<8x256xf32>
    %422 = arith.divf %420, %421 : vector<8x256xf32>
    %423 = vector.extract_strided_slice %422 {offsets = [0, 0], sizes = [8, 128], strides = [1, 1]} : vector<8x256xf32> to vector<8x128xf32>
    %424 = vector.extract_strided_slice %422 {offsets = [0, 128], sizes = [8, 128], strides = [1, 1]} : vector<8x256xf32> to vector<8x128xf32>
    %425 = vector.extract_strided_slice %413 {offsets = [0, 256], sizes = [8, 128], strides = [1, 1]} : vector<8x384xf32> to vector<8x128xf32>
    %426 = vector.extract_strided_slice %414 {offsets = [0, 256], sizes = [8, 128], strides = [1, 1]} : vector<8x384xf32> to vector<8x128xf32>
    %427 = vector.broadcast %279 : vector<1x128xf32> to vector<8x128xf32>
    %428 = arith.addf %426, %427 : vector<8x128xf32>
    %429 = arith.mulf %423, %428 : vector<8x128xf32>
    %430 = arith.addf %425, %429 : vector<8x128xf32>
    %431 = math.tanh %430 : vector<8x128xf32>
    %cst_139 = arith.constant 1.000000e+00 : f32
    %432 = vector.broadcast %cst_139 : f32 to vector<8x128xf32>
    %433 = arith.subf %432, %424 : vector<8x128xf32>
    %434 = arith.mulf %433, %431 : vector<8x128xf32>
    %435 = arith.mulf %424, %410 : vector<8x128xf32>
    %436 = arith.addf %434, %435 : vector<8x128xf32>
    %c6_i32_140 = arith.constant 6 : i32
    %437 = arith.index_cast %c6_i32_140 : i32 to index
    %c0_141 = arith.constant 0 : index
    %c0_142 = arith.constant 0 : index
    %438 = vector.load %arg12[%437, %c0_141, %c0_142] : memref<8x8x384xf32, #tpu.memory_space<vmem>>, vector<1x8x384xf32>
    %439 = vector.shape_cast %438 : vector<1x8x384xf32> to vector<8x384xf32>
    %cst_143 = arith.constant dense<0.000000e+00> : vector<8x384xf32>
    %440 = tpu.matmul %436, %277, %cst_143 {dimension_numbers = #tpu.dot_dimension_numbers<[1], [0], [0], [1], [0, 0, 1, 1], [], []>} : vector<8x128xf32>, vector<128x384xf32>, vector<8x384xf32> -> vector<8x384xf32>
    %441 = vector.extract_strided_slice %439 {offsets = [0, 0], sizes = [8, 256], strides = [1, 1]} : vector<8x384xf32> to vector<8x256xf32>
    %442 = vector.extract_strided_slice %440 {offsets = [0, 0], sizes = [8, 256], strides = [1, 1]} : vector<8x384xf32> to vector<8x256xf32>
    %443 = arith.addf %441, %442 : vector<8x256xf32>
    %444 = arith.negf %443 : vector<8x256xf32>
    %445 = math.exp %444 : vector<8x256xf32>
    %cst_144 = arith.constant 1.000000e+00 : f32
    %446 = vector.broadcast %cst_144 : f32 to vector<8x256xf32>
    %447 = arith.addf %446, %445 : vector<8x256xf32>
    %448 = arith.divf %446, %447 : vector<8x256xf32>
    %449 = vector.extract_strided_slice %448 {offsets = [0, 0], sizes = [8, 128], strides = [1, 1]} : vector<8x256xf32> to vector<8x128xf32>
    %450 = vector.extract_strided_slice %448 {offsets = [0, 128], sizes = [8, 128], strides = [1, 1]} : vector<8x256xf32> to vector<8x128xf32>
    %451 = vector.extract_strided_slice %439 {offsets = [0, 256], sizes = [8, 128], strides = [1, 1]} : vector<8x384xf32> to vector<8x128xf32>
    %452 = vector.extract_strided_slice %440 {offsets = [0, 256], sizes = [8, 128], strides = [1, 1]} : vector<8x384xf32> to vector<8x128xf32>
    %453 = vector.broadcast %279 : vector<1x128xf32> to vector<8x128xf32>
    %454 = arith.addf %452, %453 : vector<8x128xf32>
    %455 = arith.mulf %449, %454 : vector<8x128xf32>
    %456 = arith.addf %451, %455 : vector<8x128xf32>
    %457 = math.tanh %456 : vector<8x128xf32>
    %cst_145 = arith.constant 1.000000e+00 : f32
    %458 = vector.broadcast %cst_145 : f32 to vector<8x128xf32>
    %459 = arith.subf %458, %450 : vector<8x128xf32>
    %460 = arith.mulf %459, %457 : vector<8x128xf32>
    %461 = arith.mulf %450, %436 : vector<8x128xf32>
    %462 = arith.addf %460, %461 : vector<8x128xf32>
    %c7_i32_146 = arith.constant 7 : i32
    %463 = arith.index_cast %c7_i32_146 : i32 to index
    %c0_147 = arith.constant 0 : index
    %c0_148 = arith.constant 0 : index
    %464 = vector.load %arg12[%463, %c0_147, %c0_148] : memref<8x8x384xf32, #tpu.memory_space<vmem>>, vector<1x8x384xf32>
    %465 = vector.shape_cast %464 : vector<1x8x384xf32> to vector<8x384xf32>
    %cst_149 = arith.constant dense<0.000000e+00> : vector<8x384xf32>
    %466 = tpu.matmul %462, %277, %cst_149 {dimension_numbers = #tpu.dot_dimension_numbers<[1], [0], [0], [1], [0, 0, 1, 1], [], []>} : vector<8x128xf32>, vector<128x384xf32>, vector<8x384xf32> -> vector<8x384xf32>
    %467 = vector.extract_strided_slice %465 {offsets = [0, 0], sizes = [8, 256], strides = [1, 1]} : vector<8x384xf32> to vector<8x256xf32>
    %468 = vector.extract_strided_slice %466 {offsets = [0, 0], sizes = [8, 256], strides = [1, 1]} : vector<8x384xf32> to vector<8x256xf32>
    %469 = arith.addf %467, %468 : vector<8x256xf32>
    %470 = arith.negf %469 : vector<8x256xf32>
    %471 = math.exp %470 : vector<8x256xf32>
    %cst_150 = arith.constant 1.000000e+00 : f32
    %472 = vector.broadcast %cst_150 : f32 to vector<8x256xf32>
    %473 = arith.addf %472, %471 : vector<8x256xf32>
    %474 = arith.divf %472, %473 : vector<8x256xf32>
    %475 = vector.extract_strided_slice %474 {offsets = [0, 0], sizes = [8, 128], strides = [1, 1]} : vector<8x256xf32> to vector<8x128xf32>
    %476 = vector.extract_strided_slice %474 {offsets = [0, 128], sizes = [8, 128], strides = [1, 1]} : vector<8x256xf32> to vector<8x128xf32>
    %477 = vector.extract_strided_slice %465 {offsets = [0, 256], sizes = [8, 128], strides = [1, 1]} : vector<8x384xf32> to vector<8x128xf32>
    %478 = vector.extract_strided_slice %466 {offsets = [0, 256], sizes = [8, 128], strides = [1, 1]} : vector<8x384xf32> to vector<8x128xf32>
    %479 = vector.broadcast %279 : vector<1x128xf32> to vector<8x128xf32>
    %480 = arith.addf %478, %479 : vector<8x128xf32>
    %481 = arith.mulf %475, %480 : vector<8x128xf32>
    %482 = arith.addf %477, %481 : vector<8x128xf32>
    %483 = math.tanh %482 : vector<8x128xf32>
    %cst_151 = arith.constant 1.000000e+00 : f32
    %484 = vector.broadcast %cst_151 : f32 to vector<8x128xf32>
    %485 = arith.subf %484, %476 : vector<8x128xf32>
    %486 = arith.mulf %485, %483 : vector<8x128xf32>
    %487 = arith.mulf %476, %462 : vector<8x128xf32>
    %488 = arith.addf %486, %487 : vector<8x128xf32>
    %c8_i32_152 = arith.constant 8 : i32
    %cst_153 = arith.constant 0.000000e+00 : f32
    %489 = vector.broadcast %cst_153 : f32 to vector<8x128xf32>
    %490 = arith.maximumf %488, %489 : vector<8x128xf32>
    %c0_154 = arith.constant 0 : index
    %c0_155 = arith.constant 0 : index
    %491 = vector.load %arg8[%c0_154, %c0_155] : memref<1x128xf32, #tpu.memory_space<vmem>>, vector<1x128xf32>
    %492 = vector.broadcast %491 : vector<1x128xf32> to vector<8x128xf32>
    %493 = arith.mulf %490, %492 : vector<8x128xf32>
    %cst_156 = arith.constant dense<0.000000e+00> : vector<8xf32>
    %494 = vector.multi_reduction <add>, %493, %cst_156 [1] : vector<8x128xf32> to vector<8xf32>
    %495 = vector.shape_cast %494 : vector<8xf32> to vector<8x1xf32>
    %c0_157 = arith.constant 0 : index
    %c0_158 = arith.constant 0 : index
    %496 = vector.load %arg9[%c0_157, %c0_158] : memref<1x1xf32, #tpu.memory_space<vmem>>, vector<1x1xf32>
    %497 = vector.broadcast %496 : vector<1x1xf32> to vector<8x1xf32>
    %498 = arith.addf %495, %497 : vector<8x1xf32>
    %c0_159 = arith.constant 0 : index
    %c0_160 = arith.constant 0 : index
    %499 = vector.load %arg10[%c0_159, %c0_160] : memref<8x1xf32, #tpu.memory_space<vmem>>, vector<8x1xf32>
    tpu.vector_store %arg10[%c0_159, %c0_160], %498 {strides = array<i32>} : memref<8x1xf32, #tpu.memory_space<vmem>>, vector<8x1xf32>,
    return
  }
  func.func @transform_0(%arg0: i32) -> (i32, i32, i32) {
    %c0_i32 = arith.constant 0 : i32
    %c0_i32_0 = arith.constant 0 : i32
    %c0_i32_1 = arith.constant 0 : i32
    return %c0_i32, %arg0, %c0_i32_0 : i32, i32, i32
  }
  func.func @transform_1(%arg0: i32) -> (i32, i32) {
    %c0_i32 = arith.constant 0 : i32
    %c0_i32_0 = arith.constant 0 : i32
    %c0_i32_1 = arith.constant 0 : i32
    return %c0_i32, %c0_i32_0 : i32, i32
  }
  func.func @transform_2(%arg0: i32) -> (i32, i32) {
    %c0_i32 = arith.constant 0 : i32
    %c0_i32_0 = arith.constant 0 : i32
    %c0_i32_1 = arith.constant 0 : i32
    return %c0_i32, %c0_i32_0 : i32, i32
  }
  func.func @transform_3(%arg0: i32) -> (i32, i32, i32) {
    %c0_i32 = arith.constant 0 : i32
    %c0_i32_0 = arith.constant 0 : i32
    %c0_i32_1 = arith.constant 0 : i32
    %c0_i32_2 = arith.constant 0 : i32
    return %c0_i32, %c0_i32_0, %c0_i32_1 : i32, i32, i32
  }
  func.func @transform_4(%arg0: i32) -> (i32, i32, i32) {
    %c0_i32 = arith.constant 0 : i32
    %c0_i32_0 = arith.constant 0 : i32
    %c0_i32_1 = arith.constant 0 : i32
    %c0_i32_2 = arith.constant 0 : i32
    return %c0_i32, %c0_i32_0, %c0_i32_1 : i32, i32, i32
  }
  func.func @transform_5(%arg0: i32) -> (i32, i32, i32) {
    %c0_i32 = arith.constant 0 : i32
    %c0_i32_0 = arith.constant 0 : i32
    %c0_i32_1 = arith.constant 0 : i32
    %c0_i32_2 = arith.constant 0 : i32
    return %c0_i32, %c0_i32_0, %c0_i32_1 : i32, i32, i32
  }
  func.func @transform_6(%arg0: i32) -> (i32, i32, i32) {
    %c0_i32 = arith.constant 0 : i32
    %c0_i32_0 = arith.constant 0 : i32
    %c0_i32_1 = arith.constant 0 : i32
    %c0_i32_2 = arith.constant 0 : i32
    return %c0_i32, %c0_i32_0, %c0_i32_1 : i32, i32, i32
  }
  func.func @transform_7(%arg0: i32) -> (i32, i32) {
    %c0_i32 = arith.constant 0 : i32
    %c0_i32_0 = arith.constant 0 : i32
    %c0_i32_1 = arith.constant 0 : i32
    return %c0_i32, %c0_i32_0 : i32, i32
  }
  func.func @transform_8(%arg0: i32) -> (i32, i32) {
    %c0_i32 = arith.constant 0 : i32
    %c0_i32_0 = arith.constant 0 : i32
    %c0_i32_1 = arith.constant 0 : i32
    return %c0_i32, %c0_i32_0 : i32, i32
  }
  func.func @transform_9(%arg0: i32) -> (i32, i32) {
    %c0_i32 = arith.constant 0 : i32
    %c0_i32_0 = arith.constant 0 : i32
    return %arg0, %c0_i32 : i32, i32
  }
}

module attributes {stable_mosaic.version = 11 : i64} {
  func.func @gru_classifier_kernel(%arg0: i32, %arg1: memref<8x8x4xf32, #tpu.memory_space<vmem>>, %arg2: memref<4x128xf32, #tpu.memory_space<vmem>>, %arg3: memref<1x128xf32, #tpu.memory_space<vmem>>, %arg4: memref<2x128x384xf32, #tpu.memory_space<vmem>>, %arg5: memref<2x128x384xf32, #tpu.memory_space<vmem>>, %arg6: memref<2x1x384xf32, #tpu.memory_space<vmem>>, %arg7: memref<2x1x128xf32, #tpu.memory_space<vmem>>, %arg8: memref<1x128xf32, #tpu.memory_space<vmem>>, %arg9: memref<1x1xf32, #tpu.memory_space<vmem>>, %arg10: memref<8x1xf32, #tpu.memory_space<vmem>>, %arg11: memref<8x8x128xf32, #tpu.memory_space<vmem>>, %arg12: memref<8x8x384xf32, #tpu.memory_space<vmem>>) attributes {dimension_semantics = [#tpu.dimension_semantics<parallel>], iteration_bounds = array<i64: 1>, scalar_prefetch = 0 : i64, scratch_operands = 2 : i64, tpu.core_type = #tpu.core_type<tc>, window_params = [{transform_indices = @transform_0, window_bounds = array<i64: 8, 8, 4>}, {pipeline_mode = #tpu.pipeline_mode<synchronous>, transform_indices = @transform_1, window_bounds = array<i64: 4, 128>}, {pipeline_mode = #tpu.pipeline_mode<synchronous>, transform_indices = @transform_2, window_bounds = array<i64: 1, 128>}, {pipeline_mode = #tpu.pipeline_mode<synchronous>, transform_indices = @transform_3, window_bounds = array<i64: 2, 128, 384>}, {pipeline_mode = #tpu.pipeline_mode<synchronous>, transform_indices = @transform_4, window_bounds = array<i64: 2, 128, 384>}, {pipeline_mode = #tpu.pipeline_mode<synchronous>, transform_indices = @transform_5, window_bounds = array<i64: 2, 1, 384>}, {pipeline_mode = #tpu.pipeline_mode<synchronous>, transform_indices = @transform_6, window_bounds = array<i64: 2, 1, 128>}, {pipeline_mode = #tpu.pipeline_mode<synchronous>, transform_indices = @transform_7, window_bounds = array<i64: 1, 128>}, {pipeline_mode = #tpu.pipeline_mode<synchronous>, transform_indices = @transform_8, window_bounds = array<i64: 1, 1>}, {transform_indices = @transform_9, window_bounds = array<i64: 8, 1>}]} {
    %c0 = arith.constant 0 : index
    %c0_0 = arith.constant 0 : index
    %c0_1 = arith.constant 0 : index
    %0 = vector.load %arg1[%c0, %c0_0, %c0_1] : memref<8x8x4xf32, #tpu.memory_space<vmem>>, vector<8x8x4xf32>
    %1 = vector.shape_cast %0 : vector<8x8x4xf32> to vector<64x4xf32>
    %c0_2 = arith.constant 0 : index
    %c0_3 = arith.constant 0 : index
    %2 = vector.load %arg2[%c0_2, %c0_3] : memref<4x128xf32, #tpu.memory_space<vmem>>, vector<4x128xf32>
    %cst = arith.constant dense<0.000000e+00> : vector<64x128xf32>
    %3 = tpu.matmul %1, %2, %cst {dimension_numbers = #tpu.dot_dimension_numbers<[1], [0], [0], [1], [0, 0, 1, 1], [], []>} : vector<64x4xf32>, vector<4x128xf32>, vector<64x128xf32> -> vector<64x128xf32>
    %c0_4 = arith.constant 0 : index
    %c0_5 = arith.constant 0 : index
    %4 = vector.load %arg3[%c0_4, %c0_5] : memref<1x128xf32, #tpu.memory_space<vmem>>, vector<1x128xf32>
    %5 = vector.broadcast %4 : vector<1x128xf32> to vector<64x128xf32>
    %6 = arith.addf %3, %5 : vector<64x128xf32>
    %7 = vector.shape_cast %6 : vector<64x128xf32> to vector<8x8x128xf32>
    %c0_6 = arith.constant 0 : index
    %c0_7 = arith.constant 0 : index
    %c0_8 = arith.constant 0 : index
    %8 = vector.load %arg11[%c0_6, %c0_7, %c0_8] : memref<8x8x128xf32, #tpu.memory_space<vmem>>, vector<8x8x128xf32>
    tpu.vector_store %arg11[%c0_6, %c0_7, %c0_8], %7 {strides = array<i32>} : memref<8x8x128xf32, #tpu.memory_space<vmem>>, vector<8x8x128xf32>,
    %c0_9 = arith.constant 0 : index
    %c0_10 = arith.constant 0 : index
    %c0_11 = arith.constant 0 : index
    %9 = vector.load %arg11[%c0_9, %c0_10, %c0_11] : memref<8x8x128xf32, #tpu.memory_space<vmem>>, vector<8x8x128xf32>
    %10 = vector.shape_cast %9 : vector<8x8x128xf32> to vector<64x128xf32>
    %c0_12 = arith.constant 0 : index
    %c0_13 = arith.constant 0 : index
    %c0_14 = arith.constant 0 : index
    %11 = vector.load %arg4[%c0_12, %c0_13, %c0_14] : memref<2x128x384xf32, #tpu.memory_space<vmem>>, vector<1x128x384xf32>
    %12 = vector.shape_cast %11 : vector<1x128x384xf32> to vector<128x384xf32>
    %cst_15 = arith.constant dense<0.000000e+00> : vector<64x384xf32>
    %13 = tpu.matmul %10, %12, %cst_15 {dimension_numbers = #tpu.dot_dimension_numbers<[1], [0], [0], [1], [0, 0, 1, 1], [], []>} : vector<64x128xf32>, vector<128x384xf32>, vector<64x384xf32> -> vector<64x384xf32>
    %c0_16 = arith.constant 0 : index
    %c0_17 = arith.constant 0 : index
    %c0_18 = arith.constant 0 : index
    %14 = vector.load %arg6[%c0_16, %c0_17, %c0_18] : memref<2x1x384xf32, #tpu.memory_space<vmem>>, vector<1x1x384xf32>
    %15 = vector.shape_cast %14 : vector<1x1x384xf32> to vector<1x384xf32>
    %16 = vector.broadcast %15 : vector<1x384xf32> to vector<64x384xf32>
    %17 = arith.addf %13, %16 : vector<64x384xf32>
    %18 = vector.shape_cast %17 : vector<64x384xf32> to vector<8x8x384xf32>
    %c0_19 = arith.constant 0 : index
    %c0_20 = arith.constant 0 : index
    %c0_21 = arith.constant 0 : index
    %19 = vector.load %arg12[%c0_19, %c0_20, %c0_21] : memref<8x8x384xf32, #tpu.memory_space<vmem>>, vector<8x8x384xf32>
    tpu.vector_store %arg12[%c0_19, %c0_20, %c0_21], %18 {strides = array<i32>} : memref<8x8x384xf32, #tpu.memory_space<vmem>>, vector<8x8x384xf32>,
    %c0_22 = arith.constant 0 : index
    %c0_23 = arith.constant 0 : index
    %c0_24 = arith.constant 0 : index
    %20 = vector.load %arg5[%c0_22, %c0_23, %c0_24] : memref<2x128x384xf32, #tpu.memory_space<vmem>>, vector<1x128x384xf32>
    %21 = vector.shape_cast %20 : vector<1x128x384xf32> to vector<128x384xf32>
    %c0_25 = arith.constant 0 : index
    %c0_26 = arith.constant 0 : index
    %c0_27 = arith.constant 0 : index
    %22 = vector.load %arg7[%c0_25, %c0_26, %c0_27] : memref<2x1x128xf32, #tpu.memory_space<vmem>>, vector<1x1x128xf32>
    %23 = vector.shape_cast %22 : vector<1x1x128xf32> to vector<1x128xf32>
    %cst_28 = arith.constant 0.000000e+00 : f32
    %24 = vector.broadcast %cst_28 : f32 to vector<8x128xf32>
    %c0_i32 = arith.constant 0 : i32
    %25 = arith.index_cast %c0_i32 : i32 to index
    %c0_29 = arith.constant 0 : index
    %c0_30 = arith.constant 0 : index
    %26 = vector.load %arg12[%25, %c0_29, %c0_30] : memref<8x8x384xf32, #tpu.memory_space<vmem>>, vector<1x8x384xf32>
    %27 = vector.shape_cast %26 : vector<1x8x384xf32> to vector<8x384xf32>
    %cst_31 = arith.constant dense<0.000000e+00> : vector<8x384xf32>
    %28 = tpu.matmul %24, %21, %cst_31 {dimension_numbers = #tpu.dot_dimension_numbers<[1], [0], [0], [1], [0, 0, 1, 1], [], []>} : vector<8x128xf32>, vector<128x384xf32>, vector<8x384xf32> -> vector<8x384xf32>
    %29 = vector.extract_strided_slice %27 {offsets = [0, 0], sizes = [8, 256], strides = [1, 1]} : vector<8x384xf32> to vector<8x256xf32>
    %30 = vector.extract_strided_slice %28 {offsets = [0, 0], sizes = [8, 256], strides = [1, 1]} : vector<8x384xf32> to vector<8x256xf32>
    %31 = arith.addf %29, %30 : vector<8x256xf32>
    %32 = arith.negf %31 : vector<8x256xf32>
    %33 = math.exp %32 : vector<8x256xf32>
    %cst_32 = arith.constant 1.000000e+00 : f32
    %34 = vector.broadcast %cst_32 : f32 to vector<8x256xf32>
    %35 = arith.addf %34, %33 : vector<8x256xf32>
    %36 = arith.divf %34, %35 : vector<8x256xf32>
    %37 = vector.extract_strided_slice %36 {offsets = [0, 0], sizes = [8, 128], strides = [1, 1]} : vector<8x256xf32> to vector<8x128xf32>
    %38 = vector.extract_strided_slice %36 {offsets = [0, 128], sizes = [8, 128], strides = [1, 1]} : vector<8x256xf32> to vector<8x128xf32>
    %39 = vector.extract_strided_slice %27 {offsets = [0, 256], sizes = [8, 128], strides = [1, 1]} : vector<8x384xf32> to vector<8x128xf32>
    %40 = vector.extract_strided_slice %28 {offsets = [0, 256], sizes = [8, 128], strides = [1, 1]} : vector<8x384xf32> to vector<8x128xf32>
    %41 = vector.broadcast %23 : vector<1x128xf32> to vector<8x128xf32>
    %42 = arith.addf %40, %41 : vector<8x128xf32>
    %43 = arith.mulf %37, %42 : vector<8x128xf32>
    %44 = arith.addf %39, %43 : vector<8x128xf32>
    %45 = math.tanh %44 : vector<8x128xf32>
    %cst_33 = arith.constant 1.000000e+00 : f32
    %46 = vector.broadcast %cst_33 : f32 to vector<8x128xf32>
    %47 = arith.subf %46, %38 : vector<8x128xf32>
    %48 = arith.mulf %47, %45 : vector<8x128xf32>
    %49 = arith.mulf %38, %24 : vector<8x128xf32>
    %50 = arith.addf %48, %49 : vector<8x128xf32>
    %51 = arith.index_cast %c0_i32 : i32 to index
    %c0_34 = arith.constant 0 : index
    %c0_35 = arith.constant 0 : index
    %52 = vector.load %arg11[%51, %c0_34, %c0_35] : memref<8x8x128xf32, #tpu.memory_space<vmem>>, vector<1x8x128xf32>
    %53 = vector.shape_cast %52 : vector<1x8x128xf32> to vector<8x128xf32>
    %54 = vector.shape_cast %50 : vector<8x128xf32> to vector<1x8x128xf32>
    tpu.vector_store %arg11[%51, %c0_34, %c0_35], %54 {strides = array<i32>} : memref<8x8x128xf32, #tpu.memory_space<vmem>>, vector<1x8x128xf32>,
    %c1_i32 = arith.constant 1 : i32
    %55 = arith.index_cast %c1_i32 : i32 to index
    %c0_36 = arith.constant 0 : index
    %c0_37 = arith.constant 0 : index
    %56 = vector.load %arg12[%55, %c0_36, %c0_37] : memref<8x8x384xf32, #tpu.memory_space<vmem>>, vector<1x8x384xf32>
    %57 = vector.shape_cast %56 : vector<1x8x384xf32> to vector<8x384xf32>
    %cst_38 = arith.constant dense<0.000000e+00> : vector<8x384xf32>
    %58 = tpu.matmul %50, %21, %cst_38 {dimension_numbers = #tpu.dot_dimension_numbers<[1], [0], [0], [1], [0, 0, 1, 1], [], []>} : vector<8x128xf32>, vector<128x384xf32>, vector<8x384xf32> -> vector<8x384xf32>
    %59 = vector.extract_strided_slice %57 {offsets = [0, 0], sizes = [8, 256], strides = [1, 1]} : vector<8x384xf32> to vector<8x256xf32>
    %60 = vector.extract_strided_slice %58 {offsets = [0, 0], sizes = [8, 256], strides = [1, 1]} : vector<8x384xf32> to vector<8x256xf32>
    %61 = arith.addf %59, %60 : vector<8x256xf32>
    %62 = arith.negf %61 : vector<8x256xf32>
    %63 = math.exp %62 : vector<8x256xf32>
    %cst_39 = arith.constant 1.000000e+00 : f32
    %64 = vector.broadcast %cst_39 : f32 to vector<8x256xf32>
    %65 = arith.addf %64, %63 : vector<8x256xf32>
    %66 = arith.divf %64, %65 : vector<8x256xf32>
    %67 = vector.extract_strided_slice %66 {offsets = [0, 0], sizes = [8, 128], strides = [1, 1]} : vector<8x256xf32> to vector<8x128xf32>
    %68 = vector.extract_strided_slice %66 {offsets = [0, 128], sizes = [8, 128], strides = [1, 1]} : vector<8x256xf32> to vector<8x128xf32>
    %69 = vector.extract_strided_slice %57 {offsets = [0, 256], sizes = [8, 128], strides = [1, 1]} : vector<8x384xf32> to vector<8x128xf32>
    %70 = vector.extract_strided_slice %58 {offsets = [0, 256], sizes = [8, 128], strides = [1, 1]} : vector<8x384xf32> to vector<8x128xf32>
    %71 = vector.broadcast %23 : vector<1x128xf32> to vector<8x128xf32>
    %72 = arith.addf %70, %71 : vector<8x128xf32>
    %73 = arith.mulf %67, %72 : vector<8x128xf32>
    %74 = arith.addf %69, %73 : vector<8x128xf32>
    %75 = math.tanh %74 : vector<8x128xf32>
    %cst_40 = arith.constant 1.000000e+00 : f32
    %76 = vector.broadcast %cst_40 : f32 to vector<8x128xf32>
    %77 = arith.subf %76, %68 : vector<8x128xf32>
    %78 = arith.mulf %77, %75 : vector<8x128xf32>
    %79 = arith.mulf %68, %50 : vector<8x128xf32>
    %80 = arith.addf %78, %79 : vector<8x128xf32>
    %81 = arith.index_cast %c1_i32 : i32 to index
    %c0_41 = arith.constant 0 : index
    %c0_42 = arith.constant 0 : index
    %82 = vector.load %arg11[%81, %c0_41, %c0_42] : memref<8x8x128xf32, #tpu.memory_space<vmem>>, vector<1x8x128xf32>
    %83 = vector.shape_cast %82 : vector<1x8x128xf32> to vector<8x128xf32>
    %84 = vector.shape_cast %80 : vector<8x128xf32> to vector<1x8x128xf32>
    tpu.vector_store %arg11[%81, %c0_41, %c0_42], %84 {strides = array<i32>} : memref<8x8x128xf32, #tpu.memory_space<vmem>>, vector<1x8x128xf32>,
    %c2_i32 = arith.constant 2 : i32
    %85 = arith.index_cast %c2_i32 : i32 to index
    %c0_43 = arith.constant 0 : index
    %c0_44 = arith.constant 0 : index
    %86 = vector.load %arg12[%85, %c0_43, %c0_44] : memref<8x8x384xf32, #tpu.memory_space<vmem>>, vector<1x8x384xf32>
    %87 = vector.shape_cast %86 : vector<1x8x384xf32> to vector<8x384xf32>
    %cst_45 = arith.constant dense<0.000000e+00> : vector<8x384xf32>
    %88 = tpu.matmul %80, %21, %cst_45 {dimension_numbers = #tpu.dot_dimension_numbers<[1], [0], [0], [1], [0, 0, 1, 1], [], []>} : vector<8x128xf32>, vector<128x384xf32>, vector<8x384xf32> -> vector<8x384xf32>
    %89 = vector.extract_strided_slice %87 {offsets = [0, 0], sizes = [8, 256], strides = [1, 1]} : vector<8x384xf32> to vector<8x256xf32>
    %90 = vector.extract_strided_slice %88 {offsets = [0, 0], sizes = [8, 256], strides = [1, 1]} : vector<8x384xf32> to vector<8x256xf32>
    %91 = arith.addf %89, %90 : vector<8x256xf32>
    %92 = arith.negf %91 : vector<8x256xf32>
    %93 = math.exp %92 : vector<8x256xf32>
    %cst_46 = arith.constant 1.000000e+00 : f32
    %94 = vector.broadcast %cst_46 : f32 to vector<8x256xf32>
    %95 = arith.addf %94, %93 : vector<8x256xf32>
    %96 = arith.divf %94, %95 : vector<8x256xf32>
    %97 = vector.extract_strided_slice %96 {offsets = [0, 0], sizes = [8, 128], strides = [1, 1]} : vector<8x256xf32> to vector<8x128xf32>
    %98 = vector.extract_strided_slice %96 {offsets = [0, 128], sizes = [8, 128], strides = [1, 1]} : vector<8x256xf32> to vector<8x128xf32>
    %99 = vector.extract_strided_slice %87 {offsets = [0, 256], sizes = [8, 128], strides = [1, 1]} : vector<8x384xf32> to vector<8x128xf32>
    %100 = vector.extract_strided_slice %88 {offsets = [0, 256], sizes = [8, 128], strides = [1, 1]} : vector<8x384xf32> to vector<8x128xf32>
    %101 = vector.broadcast %23 : vector<1x128xf32> to vector<8x128xf32>
    %102 = arith.addf %100, %101 : vector<8x128xf32>
    %103 = arith.mulf %97, %102 : vector<8x128xf32>
    %104 = arith.addf %99, %103 : vector<8x128xf32>
    %105 = math.tanh %104 : vector<8x128xf32>
    %cst_47 = arith.constant 1.000000e+00 : f32
    %106 = vector.broadcast %cst_47 : f32 to vector<8x128xf32>
    %107 = arith.subf %106, %98 : vector<8x128xf32>
    %108 = arith.mulf %107, %105 : vector<8x128xf32>
    %109 = arith.mulf %98, %80 : vector<8x128xf32>
    %110 = arith.addf %108, %109 : vector<8x128xf32>
    %111 = arith.index_cast %c2_i32 : i32 to index
    %c0_48 = arith.constant 0 : index
    %c0_49 = arith.constant 0 : index
    %112 = vector.load %arg11[%111, %c0_48, %c0_49] : memref<8x8x128xf32, #tpu.memory_space<vmem>>, vector<1x8x128xf32>
    %113 = vector.shape_cast %112 : vector<1x8x128xf32> to vector<8x128xf32>
    %114 = vector.shape_cast %110 : vector<8x128xf32> to vector<1x8x128xf32>
    tpu.vector_store %arg11[%111, %c0_48, %c0_49], %114 {strides = array<i32>} : memref<8x8x128xf32, #tpu.memory_space<vmem>>, vector<1x8x128xf32>,
    %c3_i32 = arith.constant 3 : i32
    %115 = arith.index_cast %c3_i32 : i32 to index
    %c0_50 = arith.constant 0 : index
    %c0_51 = arith.constant 0 : index
    %116 = vector.load %arg12[%115, %c0_50, %c0_51] : memref<8x8x384xf32, #tpu.memory_space<vmem>>, vector<1x8x384xf32>
    %117 = vector.shape_cast %116 : vector<1x8x384xf32> to vector<8x384xf32>
    %cst_52 = arith.constant dense<0.000000e+00> : vector<8x384xf32>
    %118 = tpu.matmul %110, %21, %cst_52 {dimension_numbers = #tpu.dot_dimension_numbers<[1], [0], [0], [1], [0, 0, 1, 1], [], []>} : vector<8x128xf32>, vector<128x384xf32>, vector<8x384xf32> -> vector<8x384xf32>
    %119 = vector.extract_strided_slice %117 {offsets = [0, 0], sizes = [8, 256], strides = [1, 1]} : vector<8x384xf32> to vector<8x256xf32>
    %120 = vector.extract_strided_slice %118 {offsets = [0, 0], sizes = [8, 256], strides = [1, 1]} : vector<8x384xf32> to vector<8x256xf32>
    %121 = arith.addf %119, %120 : vector<8x256xf32>
    %122 = arith.negf %121 : vector<8x256xf32>
    %123 = math.exp %122 : vector<8x256xf32>
    %cst_53 = arith.constant 1.000000e+00 : f32
    %124 = vector.broadcast %cst_53 : f32 to vector<8x256xf32>
    %125 = arith.addf %124, %123 : vector<8x256xf32>
    %126 = arith.divf %124, %125 : vector<8x256xf32>
    %127 = vector.extract_strided_slice %126 {offsets = [0, 0], sizes = [8, 128], strides = [1, 1]} : vector<8x256xf32> to vector<8x128xf32>
    %128 = vector.extract_strided_slice %126 {offsets = [0, 128], sizes = [8, 128], strides = [1, 1]} : vector<8x256xf32> to vector<8x128xf32>
    %129 = vector.extract_strided_slice %117 {offsets = [0, 256], sizes = [8, 128], strides = [1, 1]} : vector<8x384xf32> to vector<8x128xf32>
    %130 = vector.extract_strided_slice %118 {offsets = [0, 256], sizes = [8, 128], strides = [1, 1]} : vector<8x384xf32> to vector<8x128xf32>
    %131 = vector.broadcast %23 : vector<1x128xf32> to vector<8x128xf32>
    %132 = arith.addf %130, %131 : vector<8x128xf32>
    %133 = arith.mulf %127, %132 : vector<8x128xf32>
    %134 = arith.addf %129, %133 : vector<8x128xf32>
    %135 = math.tanh %134 : vector<8x128xf32>
    %cst_54 = arith.constant 1.000000e+00 : f32
    %136 = vector.broadcast %cst_54 : f32 to vector<8x128xf32>
    %137 = arith.subf %136, %128 : vector<8x128xf32>
    %138 = arith.mulf %137, %135 : vector<8x128xf32>
    %139 = arith.mulf %128, %110 : vector<8x128xf32>
    %140 = arith.addf %138, %139 : vector<8x128xf32>
    %141 = arith.index_cast %c3_i32 : i32 to index
    %c0_55 = arith.constant 0 : index
    %c0_56 = arith.constant 0 : index
    %142 = vector.load %arg11[%141, %c0_55, %c0_56] : memref<8x8x128xf32, #tpu.memory_space<vmem>>, vector<1x8x128xf32>
    %143 = vector.shape_cast %142 : vector<1x8x128xf32> to vector<8x128xf32>
    %144 = vector.shape_cast %140 : vector<8x128xf32> to vector<1x8x128xf32>
    tpu.vector_store %arg11[%141, %c0_55, %c0_56], %144 {strides = array<i32>} : memref<8x8x128xf32, #tpu.memory_space<vmem>>, vector<1x8x128xf32>,
    %c4_i32 = arith.constant 4 : i32
    %145 = arith.index_cast %c4_i32 : i32 to index
    %c0_57 = arith.constant 0 : index
    %c0_58 = arith.constant 0 : index
    %146 = vector.load %arg12[%145, %c0_57, %c0_58] : memref<8x8x384xf32, #tpu.memory_space<vmem>>, vector<1x8x384xf32>
    %147 = vector.shape_cast %146 : vector<1x8x384xf32> to vector<8x384xf32>
    %cst_59 = arith.constant dense<0.000000e+00> : vector<8x384xf32>
    %148 = tpu.matmul %140, %21, %cst_59 {dimension_numbers = #tpu.dot_dimension_numbers<[1], [0], [0], [1], [0, 0, 1, 1], [], []>} : vector<8x128xf32>, vector<128x384xf32>, vector<8x384xf32> -> vector<8x384xf32>
    %149 = vector.extract_strided_slice %147 {offsets = [0, 0], sizes = [8, 256], strides = [1, 1]} : vector<8x384xf32> to vector<8x256xf32>
    %150 = vector.extract_strided_slice %148 {offsets = [0, 0], sizes = [8, 256], strides = [1, 1]} : vector<8x384xf32> to vector<8x256xf32>
    %151 = arith.addf %149, %150 : vector<8x256xf32>
    %152 = arith.negf %151 : vector<8x256xf32>
    %153 = math.exp %152 : vector<8x256xf32>
    %cst_60 = arith.constant 1.000000e+00 : f32
    %154 = vector.broadcast %cst_60 : f32 to vector<8x256xf32>
    %155 = arith.addf %154, %153 : vector<8x256xf32>
    %156 = arith.divf %154, %155 : vector<8x256xf32>
    %157 = vector.extract_strided_slice %156 {offsets = [0, 0], sizes = [8, 128], strides = [1, 1]} : vector<8x256xf32> to vector<8x128xf32>
    %158 = vector.extract_strided_slice %156 {offsets = [0, 128], sizes = [8, 128], strides = [1, 1]} : vector<8x256xf32> to vector<8x128xf32>
    %159 = vector.extract_strided_slice %147 {offsets = [0, 256], sizes = [8, 128], strides = [1, 1]} : vector<8x384xf32> to vector<8x128xf32>
    %160 = vector.extract_strided_slice %148 {offsets = [0, 256], sizes = [8, 128], strides = [1, 1]} : vector<8x384xf32> to vector<8x128xf32>
    %161 = vector.broadcast %23 : vector<1x128xf32> to vector<8x128xf32>
    %162 = arith.addf %160, %161 : vector<8x128xf32>
    %163 = arith.mulf %157, %162 : vector<8x128xf32>
    %164 = arith.addf %159, %163 : vector<8x128xf32>
    %165 = math.tanh %164 : vector<8x128xf32>
    %cst_61 = arith.constant 1.000000e+00 : f32
    %166 = vector.broadcast %cst_61 : f32 to vector<8x128xf32>
    %167 = arith.subf %166, %158 : vector<8x128xf32>
    %168 = arith.mulf %167, %165 : vector<8x128xf32>
    %169 = arith.mulf %158, %140 : vector<8x128xf32>
    %170 = arith.addf %168, %169 : vector<8x128xf32>
    %171 = arith.index_cast %c4_i32 : i32 to index
    %c0_62 = arith.constant 0 : index
    %c0_63 = arith.constant 0 : index
    %172 = vector.load %arg11[%171, %c0_62, %c0_63] : memref<8x8x128xf32, #tpu.memory_space<vmem>>, vector<1x8x128xf32>
    %173 = vector.shape_cast %172 : vector<1x8x128xf32> to vector<8x128xf32>
    %174 = vector.shape_cast %170 : vector<8x128xf32> to vector<1x8x128xf32>
    tpu.vector_store %arg11[%171, %c0_62, %c0_63], %174 {strides = array<i32>} : memref<8x8x128xf32, #tpu.memory_space<vmem>>, vector<1x8x128xf32>,
    %c5_i32 = arith.constant 5 : i32
    %175 = arith.index_cast %c5_i32 : i32 to index
    %c0_64 = arith.constant 0 : index
    %c0_65 = arith.constant 0 : index
    %176 = vector.load %arg12[%175, %c0_64, %c0_65] : memref<8x8x384xf32, #tpu.memory_space<vmem>>, vector<1x8x384xf32>
    %177 = vector.shape_cast %176 : vector<1x8x384xf32> to vector<8x384xf32>
    %cst_66 = arith.constant dense<0.000000e+00> : vector<8x384xf32>
    %178 = tpu.matmul %170, %21, %cst_66 {dimension_numbers = #tpu.dot_dimension_numbers<[1], [0], [0], [1], [0, 0, 1, 1], [], []>} : vector<8x128xf32>, vector<128x384xf32>, vector<8x384xf32> -> vector<8x384xf32>
    %179 = vector.extract_strided_slice %177 {offsets = [0, 0], sizes = [8, 256], strides = [1, 1]} : vector<8x384xf32> to vector<8x256xf32>
    %180 = vector.extract_strided_slice %178 {offsets = [0, 0], sizes = [8, 256], strides = [1, 1]} : vector<8x384xf32> to vector<8x256xf32>
    %181 = arith.addf %179, %180 : vector<8x256xf32>
    %182 = arith.negf %181 : vector<8x256xf32>
    %183 = math.exp %182 : vector<8x256xf32>
    %cst_67 = arith.constant 1.000000e+00 : f32
    %184 = vector.broadcast %cst_67 : f32 to vector<8x256xf32>
    %185 = arith.addf %184, %183 : vector<8x256xf32>
    %186 = arith.divf %184, %185 : vector<8x256xf32>
    %187 = vector.extract_strided_slice %186 {offsets = [0, 0], sizes = [8, 128], strides = [1, 1]} : vector<8x256xf32> to vector<8x128xf32>
    %188 = vector.extract_strided_slice %186 {offsets = [0, 128], sizes = [8, 128], strides = [1, 1]} : vector<8x256xf32> to vector<8x128xf32>
    %189 = vector.extract_strided_slice %177 {offsets = [0, 256], sizes = [8, 128], strides = [1, 1]} : vector<8x384xf32> to vector<8x128xf32>
    %190 = vector.extract_strided_slice %178 {offsets = [0, 256], sizes = [8, 128], strides = [1, 1]} : vector<8x384xf32> to vector<8x128xf32>
    %191 = vector.broadcast %23 : vector<1x128xf32> to vector<8x128xf32>
    %192 = arith.addf %190, %191 : vector<8x128xf32>
    %193 = arith.mulf %187, %192 : vector<8x128xf32>
    %194 = arith.addf %189, %193 : vector<8x128xf32>
    %195 = math.tanh %194 : vector<8x128xf32>
    %cst_68 = arith.constant 1.000000e+00 : f32
    %196 = vector.broadcast %cst_68 : f32 to vector<8x128xf32>
    %197 = arith.subf %196, %188 : vector<8x128xf32>
    %198 = arith.mulf %197, %195 : vector<8x128xf32>
    %199 = arith.mulf %188, %170 : vector<8x128xf32>
    %200 = arith.addf %198, %199 : vector<8x128xf32>
    %201 = arith.index_cast %c5_i32 : i32 to index
    %c0_69 = arith.constant 0 : index
    %c0_70 = arith.constant 0 : index
    %202 = vector.load %arg11[%201, %c0_69, %c0_70] : memref<8x8x128xf32, #tpu.memory_space<vmem>>, vector<1x8x128xf32>
    %203 = vector.shape_cast %202 : vector<1x8x128xf32> to vector<8x128xf32>
    %204 = vector.shape_cast %200 : vector<8x128xf32> to vector<1x8x128xf32>
    tpu.vector_store %arg11[%201, %c0_69, %c0_70], %204 {strides = array<i32>} : memref<8x8x128xf32, #tpu.memory_space<vmem>>, vector<1x8x128xf32>,
    %c6_i32 = arith.constant 6 : i32
    %205 = arith.index_cast %c6_i32 : i32 to index
    %c0_71 = arith.constant 0 : index
    %c0_72 = arith.constant 0 : index
    %206 = vector.load %arg12[%205, %c0_71, %c0_72] : memref<8x8x384xf32, #tpu.memory_space<vmem>>, vector<1x8x384xf32>
    %207 = vector.shape_cast %206 : vector<1x8x384xf32> to vector<8x384xf32>
    %cst_73 = arith.constant dense<0.000000e+00> : vector<8x384xf32>
    %208 = tpu.matmul %200, %21, %cst_73 {dimension_numbers = #tpu.dot_dimension_numbers<[1], [0], [0], [1], [0, 0, 1, 1], [], []>} : vector<8x128xf32>, vector<128x384xf32>, vector<8x384xf32> -> vector<8x384xf32>
    %209 = vector.extract_strided_slice %207 {offsets = [0, 0], sizes = [8, 256], strides = [1, 1]} : vector<8x384xf32> to vector<8x256xf32>
    %210 = vector.extract_strided_slice %208 {offsets = [0, 0], sizes = [8, 256], strides = [1, 1]} : vector<8x384xf32> to vector<8x256xf32>
    %211 = arith.addf %209, %210 : vector<8x256xf32>
    %212 = arith.negf %211 : vector<8x256xf32>
    %213 = math.exp %212 : vector<8x256xf32>
    %cst_74 = arith.constant 1.000000e+00 : f32
    %214 = vector.broadcast %cst_74 : f32 to vector<8x256xf32>
    %215 = arith.addf %214, %213 : vector<8x256xf32>
    %216 = arith.divf %214, %215 : vector<8x256xf32>
    %217 = vector.extract_strided_slice %216 {offsets = [0, 0], sizes = [8, 128], strides = [1, 1]} : vector<8x256xf32> to vector<8x128xf32>
    %218 = vector.extract_strided_slice %216 {offsets = [0, 128], sizes = [8, 128], strides = [1, 1]} : vector<8x256xf32> to vector<8x128xf32>
    %219 = vector.extract_strided_slice %207 {offsets = [0, 256], sizes = [8, 128], strides = [1, 1]} : vector<8x384xf32> to vector<8x128xf32>
    %220 = vector.extract_strided_slice %208 {offsets = [0, 256], sizes = [8, 128], strides = [1, 1]} : vector<8x384xf32> to vector<8x128xf32>
    %221 = vector.broadcast %23 : vector<1x128xf32> to vector<8x128xf32>
    %222 = arith.addf %220, %221 : vector<8x128xf32>
    %223 = arith.mulf %217, %222 : vector<8x128xf32>
    %224 = arith.addf %219, %223 : vector<8x128xf32>
    %225 = math.tanh %224 : vector<8x128xf32>
    %cst_75 = arith.constant 1.000000e+00 : f32
    %226 = vector.broadcast %cst_75 : f32 to vector<8x128xf32>
    %227 = arith.subf %226, %218 : vector<8x128xf32>
    %228 = arith.mulf %227, %225 : vector<8x128xf32>
    %229 = arith.mulf %218, %200 : vector<8x128xf32>
    %230 = arith.addf %228, %229 : vector<8x128xf32>
    %231 = arith.index_cast %c6_i32 : i32 to index
    %c0_76 = arith.constant 0 : index
    %c0_77 = arith.constant 0 : index
    %232 = vector.load %arg11[%231, %c0_76, %c0_77] : memref<8x8x128xf32, #tpu.memory_space<vmem>>, vector<1x8x128xf32>
    %233 = vector.shape_cast %232 : vector<1x8x128xf32> to vector<8x128xf32>
    %234 = vector.shape_cast %230 : vector<8x128xf32> to vector<1x8x128xf32>
    tpu.vector_store %arg11[%231, %c0_76, %c0_77], %234 {strides = array<i32>} : memref<8x8x128xf32, #tpu.memory_space<vmem>>, vector<1x8x128xf32>,
    %c7_i32 = arith.constant 7 : i32
    %235 = arith.index_cast %c7_i32 : i32 to index
    %c0_78 = arith.constant 0 : index
    %c0_79 = arith.constant 0 : index
    %236 = vector.load %arg12[%235, %c0_78, %c0_79] : memref<8x8x384xf32, #tpu.memory_space<vmem>>, vector<1x8x384xf32>
    %237 = vector.shape_cast %236 : vector<1x8x384xf32> to vector<8x384xf32>
    %cst_80 = arith.constant dense<0.000000e+00> : vector<8x384xf32>
    %238 = tpu.matmul %230, %21, %cst_80 {dimension_numbers = #tpu.dot_dimension_numbers<[1], [0], [0], [1], [0, 0, 1, 1], [], []>} : vector<8x128xf32>, vector<128x384xf32>, vector<8x384xf32> -> vector<8x384xf32>
    %239 = vector.extract_strided_slice %237 {offsets = [0, 0], sizes = [8, 256], strides = [1, 1]} : vector<8x384xf32> to vector<8x256xf32>
    %240 = vector.extract_strided_slice %238 {offsets = [0, 0], sizes = [8, 256], strides = [1, 1]} : vector<8x384xf32> to vector<8x256xf32>
    %241 = arith.addf %239, %240 : vector<8x256xf32>
    %242 = arith.negf %241 : vector<8x256xf32>
    %243 = math.exp %242 : vector<8x256xf32>
    %cst_81 = arith.constant 1.000000e+00 : f32
    %244 = vector.broadcast %cst_81 : f32 to vector<8x256xf32>
    %245 = arith.addf %244, %243 : vector<8x256xf32>
    %246 = arith.divf %244, %245 : vector<8x256xf32>
    %247 = vector.extract_strided_slice %246 {offsets = [0, 0], sizes = [8, 128], strides = [1, 1]} : vector<8x256xf32> to vector<8x128xf32>
    %248 = vector.extract_strided_slice %246 {offsets = [0, 128], sizes = [8, 128], strides = [1, 1]} : vector<8x256xf32> to vector<8x128xf32>
    %249 = vector.extract_strided_slice %237 {offsets = [0, 256], sizes = [8, 128], strides = [1, 1]} : vector<8x384xf32> to vector<8x128xf32>
    %250 = vector.extract_strided_slice %238 {offsets = [0, 256], sizes = [8, 128], strides = [1, 1]} : vector<8x384xf32> to vector<8x128xf32>
    %251 = vector.broadcast %23 : vector<1x128xf32> to vector<8x128xf32>
    %252 = arith.addf %250, %251 : vector<8x128xf32>
    %253 = arith.mulf %247, %252 : vector<8x128xf32>
    %254 = arith.addf %249, %253 : vector<8x128xf32>
    %255 = math.tanh %254 : vector<8x128xf32>
    %cst_82 = arith.constant 1.000000e+00 : f32
    %256 = vector.broadcast %cst_82 : f32 to vector<8x128xf32>
    %257 = arith.subf %256, %248 : vector<8x128xf32>
    %258 = arith.mulf %257, %255 : vector<8x128xf32>
    %259 = arith.mulf %248, %230 : vector<8x128xf32>
    %260 = arith.addf %258, %259 : vector<8x128xf32>
    %261 = arith.index_cast %c7_i32 : i32 to index
    %c0_83 = arith.constant 0 : index
    %c0_84 = arith.constant 0 : index
    %262 = vector.load %arg11[%261, %c0_83, %c0_84] : memref<8x8x128xf32, #tpu.memory_space<vmem>>, vector<1x8x128xf32>
    %263 = vector.shape_cast %262 : vector<1x8x128xf32> to vector<8x128xf32>
    %264 = vector.shape_cast %260 : vector<8x128xf32> to vector<1x8x128xf32>
    tpu.vector_store %arg11[%261, %c0_83, %c0_84], %264 {strides = array<i32>} : memref<8x8x128xf32, #tpu.memory_space<vmem>>, vector<1x8x128xf32>,
    %c8_i32 = arith.constant 8 : i32
    %c0_85 = arith.constant 0 : index
    %c0_86 = arith.constant 0 : index
    %c0_87 = arith.constant 0 : index
    %265 = vector.load %arg11[%c0_85, %c0_86, %c0_87] : memref<8x8x128xf32, #tpu.memory_space<vmem>>, vector<8x8x128xf32>
    %266 = vector.shape_cast %265 : vector<8x8x128xf32> to vector<64x128xf32>
    %c1 = arith.constant 1 : index
    %c0_88 = arith.constant 0 : index
    %c0_89 = arith.constant 0 : index
    %267 = vector.load %arg4[%c1, %c0_88, %c0_89] : memref<2x128x384xf32, #tpu.memory_space<vmem>>, vector<1x128x384xf32>
    %268 = vector.shape_cast %267 : vector<1x128x384xf32> to vector<128x384xf32>
    %cst_90 = arith.constant dense<0.000000e+00> : vector<64x384xf32>
    %269 = tpu.matmul %266, %268, %cst_90 {dimension_numbers = #tpu.dot_dimension_numbers<[1], [0], [0], [1], [0, 0, 1, 1], [], []>} : vector<64x128xf32>, vector<128x384xf32>, vector<64x384xf32> -> vector<64x384xf32>
    %c1_91 = arith.constant 1 : index
    %c0_92 = arith.constant 0 : index
    %c0_93 = arith.constant 0 : index
    %270 = vector.load %arg6[%c1_91, %c0_92, %c0_93] : memref<2x1x384xf32, #tpu.memory_space<vmem>>, vector<1x1x384xf32>
    %271 = vector.shape_cast %270 : vector<1x1x384xf32> to vector<1x384xf32>
    %272 = vector.broadcast %271 : vector<1x384xf32> to vector<64x384xf32>
    %273 = arith.addf %269, %272 : vector<64x384xf32>
    %274 = vector.shape_cast %273 : vector<64x384xf32> to vector<8x8x384xf32>
    %c0_94 = arith.constant 0 : index
    %c0_95 = arith.constant 0 : index
    %c0_96 = arith.constant 0 : index
    %275 = vector.load %arg12[%c0_94, %c0_95, %c0_96] : memref<8x8x384xf32, #tpu.memory_space<vmem>>, vector<8x8x384xf32>
    tpu.vector_store %arg12[%c0_94, %c0_95, %c0_96], %274 {strides = array<i32>} : memref<8x8x384xf32, #tpu.memory_space<vmem>>, vector<8x8x384xf32>,
    %c1_97 = arith.constant 1 : index
    %c0_98 = arith.constant 0 : index
    %c0_99 = arith.constant 0 : index
    %276 = vector.load %arg5[%c1_97, %c0_98, %c0_99] : memref<2x128x384xf32, #tpu.memory_space<vmem>>, vector<1x128x384xf32>
    %277 = vector.shape_cast %276 : vector<1x128x384xf32> to vector<128x384xf32>
    %c1_100 = arith.constant 1 : index
    %c0_101 = arith.constant 0 : index
    %c0_102 = arith.constant 0 : index
    %278 = vector.load %arg7[%c1_100, %c0_101, %c0_102] : memref<2x1x128xf32, #tpu.memory_space<vmem>>, vector<1x1x128xf32>
    %279 = vector.shape_cast %278 : vector<1x1x128xf32> to vector<1x128xf32>
    %cst_103 = arith.constant 0.000000e+00 : f32
    %280 = vector.broadcast %cst_103 : f32 to vector<8x128xf32>
    %c0_i32_104 = arith.constant 0 : i32
    %281 = arith.index_cast %c0_i32_104 : i32 to index
    %c0_105 = arith.constant 0 : index
    %c0_106 = arith.constant 0 : index
    %282 = vector.load %arg12[%281, %c0_105, %c0_106] : memref<8x8x384xf32, #tpu.memory_space<vmem>>, vector<1x8x384xf32>
    %283 = vector.shape_cast %282 : vector<1x8x384xf32> to vector<8x384xf32>
    %cst_107 = arith.constant dense<0.000000e+00> : vector<8x384xf32>
    %284 = tpu.matmul %280, %277, %cst_107 {dimension_numbers = #tpu.dot_dimension_numbers<[1], [0], [0], [1], [0, 0, 1, 1], [], []>} : vector<8x128xf32>, vector<128x384xf32>, vector<8x384xf32> -> vector<8x384xf32>
    %285 = vector.extract_strided_slice %283 {offsets = [0, 0], sizes = [8, 256], strides = [1, 1]} : vector<8x384xf32> to vector<8x256xf32>
    %286 = vector.extract_strided_slice %284 {offsets = [0, 0], sizes = [8, 256], strides = [1, 1]} : vector<8x384xf32> to vector<8x256xf32>
    %287 = arith.addf %285, %286 : vector<8x256xf32>
    %288 = arith.negf %287 : vector<8x256xf32>
    %289 = math.exp %288 : vector<8x256xf32>
    %cst_108 = arith.constant 1.000000e+00 : f32
    %290 = vector.broadcast %cst_108 : f32 to vector<8x256xf32>
    %291 = arith.addf %290, %289 : vector<8x256xf32>
    %292 = arith.divf %290, %291 : vector<8x256xf32>
    %293 = vector.extract_strided_slice %292 {offsets = [0, 0], sizes = [8, 128], strides = [1, 1]} : vector<8x256xf32> to vector<8x128xf32>
    %294 = vector.extract_strided_slice %292 {offsets = [0, 128], sizes = [8, 128], strides = [1, 1]} : vector<8x256xf32> to vector<8x128xf32>
    %295 = vector.extract_strided_slice %283 {offsets = [0, 256], sizes = [8, 128], strides = [1, 1]} : vector<8x384xf32> to vector<8x128xf32>
    %296 = vector.extract_strided_slice %284 {offsets = [0, 256], sizes = [8, 128], strides = [1, 1]} : vector<8x384xf32> to vector<8x128xf32>
    %297 = vector.broadcast %279 : vector<1x128xf32> to vector<8x128xf32>
    %298 = arith.addf %296, %297 : vector<8x128xf32>
    %299 = arith.mulf %293, %298 : vector<8x128xf32>
    %300 = arith.addf %295, %299 : vector<8x128xf32>
    %301 = math.tanh %300 : vector<8x128xf32>
    %cst_109 = arith.constant 1.000000e+00 : f32
    %302 = vector.broadcast %cst_109 : f32 to vector<8x128xf32>
    %303 = arith.subf %302, %294 : vector<8x128xf32>
    %304 = arith.mulf %303, %301 : vector<8x128xf32>
    %305 = arith.mulf %294, %280 : vector<8x128xf32>
    %306 = arith.addf %304, %305 : vector<8x128xf32>
    %c1_i32_110 = arith.constant 1 : i32
    %307 = arith.index_cast %c1_i32_110 : i32 to index
    %c0_111 = arith.constant 0 : index
    %c0_112 = arith.constant 0 : index
    %308 = vector.load %arg12[%307, %c0_111, %c0_112] : memref<8x8x384xf32, #tpu.memory_space<vmem>>, vector<1x8x384xf32>
    %309 = vector.shape_cast %308 : vector<1x8x384xf32> to vector<8x384xf32>
    %cst_113 = arith.constant dense<0.000000e+00> : vector<8x384xf32>
    %310 = tpu.matmul %306, %277, %cst_113 {dimension_numbers = #tpu.dot_dimension_numbers<[1], [0], [0], [1], [0, 0, 1, 1], [], []>} : vector<8x128xf32>, vector<128x384xf32>, vector<8x384xf32> -> vector<8x384xf32>
    %311 = vector.extract_strided_slice %309 {offsets = [0, 0], sizes = [8, 256], strides = [1, 1]} : vector<8x384xf32> to vector<8x256xf32>
    %312 = vector.extract_strided_slice %310 {offsets = [0, 0], sizes = [8, 256], strides = [1, 1]} : vector<8x384xf32> to vector<8x256xf32>
    %313 = arith.addf %311, %312 : vector<8x256xf32>
    %314 = arith.negf %313 : vector<8x256xf32>
    %315 = math.exp %314 : vector<8x256xf32>
    %cst_114 = arith.constant 1.000000e+00 : f32
    %316 = vector.broadcast %cst_114 : f32 to vector<8x256xf32>
    %317 = arith.addf %316, %315 : vector<8x256xf32>
    %318 = arith.divf %316, %317 : vector<8x256xf32>
    %319 = vector.extract_strided_slice %318 {offsets = [0, 0], sizes = [8, 128], strides = [1, 1]} : vector<8x256xf32> to vector<8x128xf32>
    %320 = vector.extract_strided_slice %318 {offsets = [0, 128], sizes = [8, 128], strides = [1, 1]} : vector<8x256xf32> to vector<8x128xf32>
    %321 = vector.extract_strided_slice %309 {offsets = [0, 256], sizes = [8, 128], strides = [1, 1]} : vector<8x384xf32> to vector<8x128xf32>
    %322 = vector.extract_strided_slice %310 {offsets = [0, 256], sizes = [8, 128], strides = [1, 1]} : vector<8x384xf32> to vector<8x128xf32>
    %323 = vector.broadcast %279 : vector<1x128xf32> to vector<8x128xf32>
    %324 = arith.addf %322, %323 : vector<8x128xf32>
    %325 = arith.mulf %319, %324 : vector<8x128xf32>
    %326 = arith.addf %321, %325 : vector<8x128xf32>
    %327 = math.tanh %326 : vector<8x128xf32>
    %cst_115 = arith.constant 1.000000e+00 : f32
    %328 = vector.broadcast %cst_115 : f32 to vector<8x128xf32>
    %329 = arith.subf %328, %320 : vector<8x128xf32>
    %330 = arith.mulf %329, %327 : vector<8x128xf32>
    %331 = arith.mulf %320, %306 : vector<8x128xf32>
    %332 = arith.addf %330, %331 : vector<8x128xf32>
    %c2_i32_116 = arith.constant 2 : i32
    %333 = arith.index_cast %c2_i32_116 : i32 to index
    %c0_117 = arith.constant 0 : index
    %c0_118 = arith.constant 0 : index
    %334 = vector.load %arg12[%333, %c0_117, %c0_118] : memref<8x8x384xf32, #tpu.memory_space<vmem>>, vector<1x8x384xf32>
    %335 = vector.shape_cast %334 : vector<1x8x384xf32> to vector<8x384xf32>
    %cst_119 = arith.constant dense<0.000000e+00> : vector<8x384xf32>
    %336 = tpu.matmul %332, %277, %cst_119 {dimension_numbers = #tpu.dot_dimension_numbers<[1], [0], [0], [1], [0, 0, 1, 1], [], []>} : vector<8x128xf32>, vector<128x384xf32>, vector<8x384xf32> -> vector<8x384xf32>
    %337 = vector.extract_strided_slice %335 {offsets = [0, 0], sizes = [8, 256], strides = [1, 1]} : vector<8x384xf32> to vector<8x256xf32>
    %338 = vector.extract_strided_slice %336 {offsets = [0, 0], sizes = [8, 256], strides = [1, 1]} : vector<8x384xf32> to vector<8x256xf32>
    %339 = arith.addf %337, %338 : vector<8x256xf32>
    %340 = arith.negf %339 : vector<8x256xf32>
    %341 = math.exp %340 : vector<8x256xf32>
    %cst_120 = arith.constant 1.000000e+00 : f32
    %342 = vector.broadcast %cst_120 : f32 to vector<8x256xf32>
    %343 = arith.addf %342, %341 : vector<8x256xf32>
    %344 = arith.divf %342, %343 : vector<8x256xf32>
    %345 = vector.extract_strided_slice %344 {offsets = [0, 0], sizes = [8, 128], strides = [1, 1]} : vector<8x256xf32> to vector<8x128xf32>
    %346 = vector.extract_strided_slice %344 {offsets = [0, 128], sizes = [8, 128], strides = [1, 1]} : vector<8x256xf32> to vector<8x128xf32>
    %347 = vector.extract_strided_slice %335 {offsets = [0, 256], sizes = [8, 128], strides = [1, 1]} : vector<8x384xf32> to vector<8x128xf32>
    %348 = vector.extract_strided_slice %336 {offsets = [0, 256], sizes = [8, 128], strides = [1, 1]} : vector<8x384xf32> to vector<8x128xf32>
    %349 = vector.broadcast %279 : vector<1x128xf32> to vector<8x128xf32>
    %350 = arith.addf %348, %349 : vector<8x128xf32>
    %351 = arith.mulf %345, %350 : vector<8x128xf32>
    %352 = arith.addf %347, %351 : vector<8x128xf32>
    %353 = math.tanh %352 : vector<8x128xf32>
    %cst_121 = arith.constant 1.000000e+00 : f32
    %354 = vector.broadcast %cst_121 : f32 to vector<8x128xf32>
    %355 = arith.subf %354, %346 : vector<8x128xf32>
    %356 = arith.mulf %355, %353 : vector<8x128xf32>
    %357 = arith.mulf %346, %332 : vector<8x128xf32>
    %358 = arith.addf %356, %357 : vector<8x128xf32>
    %c3_i32_122 = arith.constant 3 : i32
    %359 = arith.index_cast %c3_i32_122 : i32 to index
    %c0_123 = arith.constant 0 : index
    %c0_124 = arith.constant 0 : index
    %360 = vector.load %arg12[%359, %c0_123, %c0_124] : memref<8x8x384xf32, #tpu.memory_space<vmem>>, vector<1x8x384xf32>
    %361 = vector.shape_cast %360 : vector<1x8x384xf32> to vector<8x384xf32>
    %cst_125 = arith.constant dense<0.000000e+00> : vector<8x384xf32>
    %362 = tpu.matmul %358, %277, %cst_125 {dimension_numbers = #tpu.dot_dimension_numbers<[1], [0], [0], [1], [0, 0, 1, 1], [], []>} : vector<8x128xf32>, vector<128x384xf32>, vector<8x384xf32> -> vector<8x384xf32>
    %363 = vector.extract_strided_slice %361 {offsets = [0, 0], sizes = [8, 256], strides = [1, 1]} : vector<8x384xf32> to vector<8x256xf32>
    %364 = vector.extract_strided_slice %362 {offsets = [0, 0], sizes = [8, 256], strides = [1, 1]} : vector<8x384xf32> to vector<8x256xf32>
    %365 = arith.addf %363, %364 : vector<8x256xf32>
    %366 = arith.negf %365 : vector<8x256xf32>
    %367 = math.exp %366 : vector<8x256xf32>
    %cst_126 = arith.constant 1.000000e+00 : f32
    %368 = vector.broadcast %cst_126 : f32 to vector<8x256xf32>
    %369 = arith.addf %368, %367 : vector<8x256xf32>
    %370 = arith.divf %368, %369 : vector<8x256xf32>
    %371 = vector.extract_strided_slice %370 {offsets = [0, 0], sizes = [8, 128], strides = [1, 1]} : vector<8x256xf32> to vector<8x128xf32>
    %372 = vector.extract_strided_slice %370 {offsets = [0, 128], sizes = [8, 128], strides = [1, 1]} : vector<8x256xf32> to vector<8x128xf32>
    %373 = vector.extract_strided_slice %361 {offsets = [0, 256], sizes = [8, 128], strides = [1, 1]} : vector<8x384xf32> to vector<8x128xf32>
    %374 = vector.extract_strided_slice %362 {offsets = [0, 256], sizes = [8, 128], strides = [1, 1]} : vector<8x384xf32> to vector<8x128xf32>
    %375 = vector.broadcast %279 : vector<1x128xf32> to vector<8x128xf32>
    %376 = arith.addf %374, %375 : vector<8x128xf32>
    %377 = arith.mulf %371, %376 : vector<8x128xf32>
    %378 = arith.addf %373, %377 : vector<8x128xf32>
    %379 = math.tanh %378 : vector<8x128xf32>
    %cst_127 = arith.constant 1.000000e+00 : f32
    %380 = vector.broadcast %cst_127 : f32 to vector<8x128xf32>
    %381 = arith.subf %380, %372 : vector<8x128xf32>
    %382 = arith.mulf %381, %379 : vector<8x128xf32>
    %383 = arith.mulf %372, %358 : vector<8x128xf32>
    %384 = arith.addf %382, %383 : vector<8x128xf32>
    %c4_i32_128 = arith.constant 4 : i32
    %385 = arith.index_cast %c4_i32_128 : i32 to index
    %c0_129 = arith.constant 0 : index
    %c0_130 = arith.constant 0 : index
    %386 = vector.load %arg12[%385, %c0_129, %c0_130] : memref<8x8x384xf32, #tpu.memory_space<vmem>>, vector<1x8x384xf32>
    %387 = vector.shape_cast %386 : vector<1x8x384xf32> to vector<8x384xf32>
    %cst_131 = arith.constant dense<0.000000e+00> : vector<8x384xf32>
    %388 = tpu.matmul %384, %277, %cst_131 {dimension_numbers = #tpu.dot_dimension_numbers<[1], [0], [0], [1], [0, 0, 1, 1], [], []>} : vector<8x128xf32>, vector<128x384xf32>, vector<8x384xf32> -> vector<8x384xf32>
    %389 = vector.extract_strided_slice %387 {offsets = [0, 0], sizes = [8, 256], strides = [1, 1]} : vector<8x384xf32> to vector<8x256xf32>
    %390 = vector.extract_strided_slice %388 {offsets = [0, 0], sizes = [8, 256], strides = [1, 1]} : vector<8x384xf32> to vector<8x256xf32>
    %391 = arith.addf %389, %390 : vector<8x256xf32>
    %392 = arith.negf %391 : vector<8x256xf32>
    %393 = math.exp %392 : vector<8x256xf32>
    %cst_132 = arith.constant 1.000000e+00 : f32
    %394 = vector.broadcast %cst_132 : f32 to vector<8x256xf32>
    %395 = arith.addf %394, %393 : vector<8x256xf32>
    %396 = arith.divf %394, %395 : vector<8x256xf32>
    %397 = vector.extract_strided_slice %396 {offsets = [0, 0], sizes = [8, 128], strides = [1, 1]} : vector<8x256xf32> to vector<8x128xf32>
    %398 = vector.extract_strided_slice %396 {offsets = [0, 128], sizes = [8, 128], strides = [1, 1]} : vector<8x256xf32> to vector<8x128xf32>
    %399 = vector.extract_strided_slice %387 {offsets = [0, 256], sizes = [8, 128], strides = [1, 1]} : vector<8x384xf32> to vector<8x128xf32>
    %400 = vector.extract_strided_slice %388 {offsets = [0, 256], sizes = [8, 128], strides = [1, 1]} : vector<8x384xf32> to vector<8x128xf32>
    %401 = vector.broadcast %279 : vector<1x128xf32> to vector<8x128xf32>
    %402 = arith.addf %400, %401 : vector<8x128xf32>
    %403 = arith.mulf %397, %402 : vector<8x128xf32>
    %404 = arith.addf %399, %403 : vector<8x128xf32>
    %405 = math.tanh %404 : vector<8x128xf32>
    %cst_133 = arith.constant 1.000000e+00 : f32
    %406 = vector.broadcast %cst_133 : f32 to vector<8x128xf32>
    %407 = arith.subf %406, %398 : vector<8x128xf32>
    %408 = arith.mulf %407, %405 : vector<8x128xf32>
    %409 = arith.mulf %398, %384 : vector<8x128xf32>
    %410 = arith.addf %408, %409 : vector<8x128xf32>
    %c5_i32_134 = arith.constant 5 : i32
    %411 = arith.index_cast %c5_i32_134 : i32 to index
    %c0_135 = arith.constant 0 : index
    %c0_136 = arith.constant 0 : index
    %412 = vector.load %arg12[%411, %c0_135, %c0_136] : memref<8x8x384xf32, #tpu.memory_space<vmem>>, vector<1x8x384xf32>
    %413 = vector.shape_cast %412 : vector<1x8x384xf32> to vector<8x384xf32>
    %cst_137 = arith.constant dense<0.000000e+00> : vector<8x384xf32>
    %414 = tpu.matmul %410, %277, %cst_137 {dimension_numbers = #tpu.dot_dimension_numbers<[1], [0], [0], [1], [0, 0, 1, 1], [], []>} : vector<8x128xf32>, vector<128x384xf32>, vector<8x384xf32> -> vector<8x384xf32>
    %415 = vector.extract_strided_slice %413 {offsets = [0, 0], sizes = [8, 256], strides = [1, 1]} : vector<8x384xf32> to vector<8x256xf32>
    %416 = vector.extract_strided_slice %414 {offsets = [0, 0], sizes = [8, 256], strides = [1, 1]} : vector<8x384xf32> to vector<8x256xf32>
    %417 = arith.addf %415, %416 : vector<8x256xf32>
    %418 = arith.negf %417 : vector<8x256xf32>
    %419 = math.exp %418 : vector<8x256xf32>
    %cst_138 = arith.constant 1.000000e+00 : f32
    %420 = vector.broadcast %cst_138 : f32 to vector<8x256xf32>
    %421 = arith.addf %420, %419 : vector<8x256xf32>
    %422 = arith.divf %420, %421 : vector<8x256xf32>
    %423 = vector.extract_strided_slice %422 {offsets = [0, 0], sizes = [8, 128], strides = [1, 1]} : vector<8x256xf32> to vector<8x128xf32>
    %424 = vector.extract_strided_slice %422 {offsets = [0, 128], sizes = [8, 128], strides = [1, 1]} : vector<8x256xf32> to vector<8x128xf32>
    %425 = vector.extract_strided_slice %413 {offsets = [0, 256], sizes = [8, 128], strides = [1, 1]} : vector<8x384xf32> to vector<8x128xf32>
    %426 = vector.extract_strided_slice %414 {offsets = [0, 256], sizes = [8, 128], strides = [1, 1]} : vector<8x384xf32> to vector<8x128xf32>
    %427 = vector.broadcast %279 : vector<1x128xf32> to vector<8x128xf32>
    %428 = arith.addf %426, %427 : vector<8x128xf32>
    %429 = arith.mulf %423, %428 : vector<8x128xf32>
    %430 = arith.addf %425, %429 : vector<8x128xf32>
    %431 = math.tanh %430 : vector<8x128xf32>
    %cst_139 = arith.constant 1.000000e+00 : f32
    %432 = vector.broadcast %cst_139 : f32 to vector<8x128xf32>
    %433 = arith.subf %432, %424 : vector<8x128xf32>
    %434 = arith.mulf %433, %431 : vector<8x128xf32>
    %435 = arith.mulf %424, %410 : vector<8x128xf32>
    %436 = arith.addf %434, %435 : vector<8x128xf32>
    %c6_i32_140 = arith.constant 6 : i32
    %437 = arith.index_cast %c6_i32_140 : i32 to index
    %c0_141 = arith.constant 0 : index
    %c0_142 = arith.constant 0 : index
    %438 = vector.load %arg12[%437, %c0_141, %c0_142] : memref<8x8x384xf32, #tpu.memory_space<vmem>>, vector<1x8x384xf32>
    %439 = vector.shape_cast %438 : vector<1x8x384xf32> to vector<8x384xf32>
    %cst_143 = arith.constant dense<0.000000e+00> : vector<8x384xf32>
    %440 = tpu.matmul %436, %277, %cst_143 {dimension_numbers = #tpu.dot_dimension_numbers<[1], [0], [0], [1], [0, 0, 1, 1], [], []>} : vector<8x128xf32>, vector<128x384xf32>, vector<8x384xf32> -> vector<8x384xf32>
    %441 = vector.extract_strided_slice %439 {offsets = [0, 0], sizes = [8, 256], strides = [1, 1]} : vector<8x384xf32> to vector<8x256xf32>
    %442 = vector.extract_strided_slice %440 {offsets = [0, 0], sizes = [8, 256], strides = [1, 1]} : vector<8x384xf32> to vector<8x256xf32>
    %443 = arith.addf %441, %442 : vector<8x256xf32>
    %444 = arith.negf %443 : vector<8x256xf32>
    %445 = math.exp %444 : vector<8x256xf32>
    %cst_144 = arith.constant 1.000000e+00 : f32
    %446 = vector.broadcast %cst_144 : f32 to vector<8x256xf32>
    %447 = arith.addf %446, %445 : vector<8x256xf32>
    %448 = arith.divf %446, %447 : vector<8x256xf32>
    %449 = vector.extract_strided_slice %448 {offsets = [0, 0], sizes = [8, 128], strides = [1, 1]} : vector<8x256xf32> to vector<8x128xf32>
    %450 = vector.extract_strided_slice %448 {offsets = [0, 128], sizes = [8, 128], strides = [1, 1]} : vector<8x256xf32> to vector<8x128xf32>
    %451 = vector.extract_strided_slice %439 {offsets = [0, 256], sizes = [8, 128], strides = [1, 1]} : vector<8x384xf32> to vector<8x128xf32>
    %452 = vector.extract_strided_slice %440 {offsets = [0, 256], sizes = [8, 128], strides = [1, 1]} : vector<8x384xf32> to vector<8x128xf32>
    %453 = vector.broadcast %279 : vector<1x128xf32> to vector<8x128xf32>
    %454 = arith.addf %452, %453 : vector<8x128xf32>
    %455 = arith.mulf %449, %454 : vector<8x128xf32>
    %456 = arith.addf %451, %455 : vector<8x128xf32>
    %457 = math.tanh %456 : vector<8x128xf32>
    %cst_145 = arith.constant 1.000000e+00 : f32
    %458 = vector.broadcast %cst_145 : f32 to vector<8x128xf32>
    %459 = arith.subf %458, %450 : vector<8x128xf32>
    %460 = arith.mulf %459, %457 : vector<8x128xf32>
    %461 = arith.mulf %450, %436 : vector<8x128xf32>
    %462 = arith.addf %460, %461 : vector<8x128xf32>
    %c7_i32_146 = arith.constant 7 : i32
    %463 = arith.index_cast %c7_i32_146 : i32 to index
    %c0_147 = arith.constant 0 : index
    %c0_148 = arith.constant 0 : index
    %464 = vector.load %arg12[%463, %c0_147, %c0_148] : memref<8x8x384xf32, #tpu.memory_space<vmem>>, vector<1x8x384xf32>
    %465 = vector.shape_cast %464 : vector<1x8x384xf32> to vector<8x384xf32>
    %cst_149 = arith.constant dense<0.000000e+00> : vector<8x384xf32>
    %466 = tpu.matmul %462, %277, %cst_149 {dimension_numbers = #tpu.dot_dimension_numbers<[1], [0], [0], [1], [0, 0, 1, 1], [], []>} : vector<8x128xf32>, vector<128x384xf32>, vector<8x384xf32> -> vector<8x384xf32>
    %467 = vector.extract_strided_slice %465 {offsets = [0, 0], sizes = [8, 256], strides = [1, 1]} : vector<8x384xf32> to vector<8x256xf32>
    %468 = vector.extract_strided_slice %466 {offsets = [0, 0], sizes = [8, 256], strides = [1, 1]} : vector<8x384xf32> to vector<8x256xf32>
    %469 = arith.addf %467, %468 : vector<8x256xf32>
    %470 = arith.negf %469 : vector<8x256xf32>
    %471 = math.exp %470 : vector<8x256xf32>
    %cst_150 = arith.constant 1.000000e+00 : f32
    %472 = vector.broadcast %cst_150 : f32 to vector<8x256xf32>
    %473 = arith.addf %472, %471 : vector<8x256xf32>
    %474 = arith.divf %472, %473 : vector<8x256xf32>
    %475 = vector.extract_strided_slice %474 {offsets = [0, 0], sizes = [8, 128], strides = [1, 1]} : vector<8x256xf32> to vector<8x128xf32>
    %476 = vector.extract_strided_slice %474 {offsets = [0, 128], sizes = [8, 128], strides = [1, 1]} : vector<8x256xf32> to vector<8x128xf32>
    %477 = vector.extract_strided_slice %465 {offsets = [0, 256], sizes = [8, 128], strides = [1, 1]} : vector<8x384xf32> to vector<8x128xf32>
    %478 = vector.extract_strided_slice %466 {offsets = [0, 256], sizes = [8, 128], strides = [1, 1]} : vector<8x384xf32> to vector<8x128xf32>
    %479 = vector.broadcast %279 : vector<1x128xf32> to vector<8x128xf32>
    %480 = arith.addf %478, %479 : vector<8x128xf32>
    %481 = arith.mulf %475, %480 : vector<8x128xf32>
    %482 = arith.addf %477, %481 : vector<8x128xf32>
    %483 = math.tanh %482 : vector<8x128xf32>
    %cst_151 = arith.constant 1.000000e+00 : f32
    %484 = vector.broadcast %cst_151 : f32 to vector<8x128xf32>
    %485 = arith.subf %484, %476 : vector<8x128xf32>
    %486 = arith.mulf %485, %483 : vector<8x128xf32>
    %487 = arith.mulf %476, %462 : vector<8x128xf32>
    %488 = arith.addf %486, %487 : vector<8x128xf32>
    %c8_i32_152 = arith.constant 8 : i32
    %cst_153 = arith.constant 0.000000e+00 : f32
    %489 = vector.broadcast %cst_153 : f32 to vector<8x128xf32>
    %490 = arith.maximumf %488, %489 : vector<8x128xf32>
    %c0_154 = arith.constant 0 : index
    %c0_155 = arith.constant 0 : index
    %491 = vector.load %arg8[%c0_154, %c0_155] : memref<1x128xf32, #tpu.memory_space<vmem>>, vector<1x128xf32>
    %492 = vector.broadcast %491 : vector<1x128xf32> to vector<8x128xf32>
    %493 = arith.mulf %490, %492 : vector<8x128xf32>
    %cst_156 = arith.constant dense<0.000000e+00> : vector<8xf32>
    %494 = vector.multi_reduction <add>, %493, %cst_156 [1] : vector<8x128xf32> to vector<8xf32>
    %495 = vector.shape_cast %494 : vector<8xf32> to vector<8x1xf32>
    %c0_157 = arith.constant 0 : index
    %c0_158 = arith.constant 0 : index
    %496 = vector.load %arg9[%c0_157, %c0_158] : memref<1x1xf32, #tpu.memory_space<vmem>>, vector<1x1xf32>
    %497 = vector.broadcast %496 : vector<1x1xf32> to vector<8x1xf32>
    %498 = arith.addf %495, %497 : vector<8x1xf32>
    %c0_159 = arith.constant 0 : index
    %c0_160 = arith.constant 0 : index
    %499 = vector.load %arg10[%c0_159, %c0_160] : memref<8x1xf32, #tpu.memory_space<vmem>>, vector<8x1xf32>
    tpu.vector_store %arg10[%c0_159, %c0_160], %498 {strides = array<i32>} : memref<8x1xf32, #tpu.memory_space<vmem>>, vector<8x1xf32>,
    return
  }
  func.func @transform_0(%arg0: i32) -> (i32, i32, i32) {
    %c0_i32 = arith.constant 0 : i32
    %c0_i32_0 = arith.constant 0 : i32
    %c0_i32_1 = arith.constant 0 : i32
    return %c0_i32, %arg0, %c0_i32_0 : i32, i32, i32
  }
  func.func @transform_1(%arg0: i32) -> (i32, i32) {
    %c0_i32 = arith.constant 0 : i32
    %c0_i32_0 = arith.constant 0 : i32
    %c0_i32_1 = arith.constant 0 : i32
    return %c0_i32, %c0_i32_0 : i32, i32
  }
  func.func @transform_2(%arg0: i32) -> (i32, i32) {
    %c0_i32 = arith.constant 0 : i32
    %c0_i32_0 = arith.constant 0 : i32
    %c0_i32_1 = arith.constant 0 : i32
    return %c0_i32, %c0_i32_0 : i32, i32
  }
  func.func @transform_3(%arg0: i32) -> (i32, i32, i32) {
    %c0_i32 = arith.constant 0 : i32
    %c0_i32_0 = arith.constant 0 : i32
    %c0_i32_1 = arith.constant 0 : i32
    %c0_i32_2 = arith.constant 0 : i32
    return %c0_i32, %c0_i32_0, %c0_i32_1 : i32, i32, i32
  }
  func.func @transform_4(%arg0: i32) -> (i32, i32, i32) {
    %c0_i32 = arith.constant 0 : i32
    %c0_i32_0 = arith.constant 0 : i32
    %c0_i32_1 = arith.constant 0 : i32
    %c0_i32_2 = arith.constant 0 : i32
    return %c0_i32, %c0_i32_0, %c0_i32_1 : i32, i32, i32
  }
  func.func @transform_5(%arg0: i32) -> (i32, i32, i32) {
    %c0_i32 = arith.constant 0 : i32
    %c0_i32_0 = arith.constant 0 : i32
    %c0_i32_1 = arith.constant 0 : i32
    %c0_i32_2 = arith.constant 0 : i32
    return %c0_i32, %c0_i32_0, %c0_i32_1 : i32, i32, i32
  }
  func.func @transform_6(%arg0: i32) -> (i32, i32, i32) {
    %c0_i32 = arith.constant 0 : i32
    %c0_i32_0 = arith.constant 0 : i32
    %c0_i32_1 = arith.constant 0 : i32
    %c0_i32_2 = arith.constant 0 : i32
    return %c0_i32, %c0_i32_0, %c0_i32_1 : i32, i32, i32
  }
  func.func @transform_7(%arg0: i32) -> (i32, i32) {
    %c0_i32 = arith.constant 0 : i32
    %c0_i32_0 = arith.constant 0 : i32
    %c0_i32_1 = arith.constant 0 : i32
    return %c0_i32, %c0_i32_0 : i32, i32
  }
  func.func @transform_8(%arg0: i32) -> (i32, i32) {
    %c0_i32 = arith.constant 0 : i32
    %c0_i32_0 = arith.constant 0 : i32
    %c0_i32_1 = arith.constant 0 : i32
    return %c0_i32, %c0_i32_0 : i32, i32
  }
  func.func @transform_9(%arg0: i32) -> (i32, i32) {
    %c0_i32 = arith.constant 0 : i32
    %c0_i32_0 = arith.constant 0 : i32
    return %arg0, %c0_i32 : i32, i32
  }
}

</mosaic_0001>

<bundles_post_ra>
// kernel: tpu_custom_call.1
= control target key start
LH: loop header
LB: loop body
LE: loop exit
PB: predicated region body
PF: predicated region fallthrough
CT: control target
= control target key end

     0   :  { %s6901_s0 = inlined_call_operand.vmem [shape: f32[8,8,4], index: 0, kind: input, shape index: {}]   ;;  %s6902_s1 = inlined_call_operand.vmem [shape: f32[4,128], index: 1, kind: input, shape index: {}]   ;;  %s6903_s2 = inlined_call_operand.vmem [shape: f32[1,128], index: 2, kind: input, shape index: {}]   ;;  %s6904_s3 = inlined_call_operand.hbm [shape: f32[2,128,384], index: 3, kind: input, shape index: {}]   ;;  %s6905_s4 = inlined_call_operand.hbm [shape: f32[2,128,384], index: 4, kind: input, shape index: {}]   ;;  %s6906_s5 = inlined_call_operand.vmem [shape: f32[2,1,384], index: 5, kind: input, shape index: {}]   ;;  %s6907_s6 = inlined_call_operand.vmem [shape: f32[2,1,128], index: 6, kind: input, shape index: {}]   ;;  %s6908_s7 = inlined_call_operand.vmem [shape: f32[1,128], index: 7, kind: input, shape index: {}]   ;;  %s6909_s8 = inlined_call_operand.<no memory space> [shape: f32[1,1], index: 8, kind: input, shape index: {}]   ;;  %s6910_s9 = inlined_call_operand.vmem [shape: f32[8,1], index: 9, kind: output, shape index: {}]  }
   0x1   :  { %v14_v0 = vstv %s6909_s8 }
   0x2   :  { %15 = vst [vmem:[#allocation4] sm:$0x1] %v14_v0 }
   0x3   :  { %16 = vsyncpa [#allocation6], 0 }
   0x4   :  { %17 = vsyncpa [#allocation8], 0  ;;  %s5016_s11 = smov [#allocation5]  }
   0x5   :  { %s29_s12 = sshll.u32 %s5016_s11, 4  ;;  %s30_s12 = int_to_ptr.vmem [resolvable:$true] %s29_s12 }
   0x6   :  { %s4980_s13 = scalar_lea.vmem %s30_s12, 12288  ;;  %p4985_p1 = scmp.lt.s32.totalorder %s30_s12, %s30_s12 }
   0x7   :  { %p4981_p0 = scmp.ne.s32.totalorder %s30_s12, %s4980_s13  ;;  %p4986_p2 = scmp.lt.s32.totalorder %s4980_s13, %s4980_s13 }
   0x9   :  { %p4987_p3 = por %p4986_p2, %p4985_p1 }
   0xb   :  { %p4988_p4 = pnand %p4987_p3, %p4981_p0 }
   0xd   :  { %4991 = shalt.err (!%p4988_p4)
}
   0xe   :  { %s5017_s14 = smov 384   ;;  %s5018_s15 = smov 24  }
   0xf   :  { %35 = dma.hbm_to_vmem [thread:$0]  %s6904_s3, 12288, %s30_s12, [#allocation6], %s5017_s14, %s5017_s14, %s5018_s15  }
  0x10   :  { %s5019_s8 = smov [#allocation7]  }
  0x11   :  { %s41_s18 = sshll.u32 %s5019_s8, 4  ;;  %s42_s18 = int_to_ptr.vmem [resolvable:$true] %s41_s18 }
  0x12   :  { %s5000_s19 = scalar_lea.vmem %s42_s18, 12288  ;;  %p5005_p6 = scmp.lt.s32.totalorder %s42_s18, %s42_s18 }
  0x13   :  { %p5001_p5 = scmp.ne.s32.totalorder %s42_s18, %s5000_s19  ;;  %p5006_p7 = scmp.lt.s32.totalorder %s5000_s19, %s5000_s19 }
  0x15   :  { %p5007_p8 = por %p5006_p7, %p5005_p6 }
  0x17   :  { %p5008_p9 = pnand %p5007_p8, %p5001_p5 }
  0x19   :  { %5011 = shalt.err (!%p5008_p9)
}
  0x1a   :  { %47 = dma.hbm_to_vmem [thread:$0]  %s6905_s4, 12288, %s42_s18, [#allocation8], %s5017_s14, %s5017_s14, %s5018_s15  }
  0x1b   :  { %5012 = dma.done.wait [#allocation6], 12288  }
  0x1c   :  { %5013 = vsyncadd [#allocation6], 4294955008 }
  0x1d   :  { %5014 = dma.done.wait [#allocation8], 12288  }
  0x1e   :  { %5015 = vsyncadd [#allocation8], 4294955008  ;;  %vm103_vm0 = vcmask 1043456   ;;  %vm78_vm1 = vcmask 31744   ;;  %v70_v1 = vld [vmem:[%s6902_s1] sm:$0xf] }
  0x1f   :  { %v62_v2 = vld [vmem:[%s6901_s0] sm:$0xff]  ;;  %v63_v3 = vld [vmem:[%s6901_s0 + $0x8] sm:$0xff]  ;;  %4046 = vmatprep.subr.msk.mxu0 %vm103_vm0, %v70_v1  ;;  %v64_v4 = vld [vmem:[%s6901_s0 + $0x10] sm:$0xff]  ;;  %v6912_v58 = vmov 0.0   ;;  %vm5021_vm2 = vmmov 0   ;;  %vm3661_vm3 = vcmask 7168  }
  0x20   :  { %4048 = vmatprep.mubr.msk.f32.mxu0 %vm78_vm1, %v62_v2  ;;  %4047 = vmatpush3.msk.msra.mxu0 %vm103_vm0, %v70_v1  ;;  %v274_v5 = vld [vmem:[#allocation5 + $0x170] sm:$0xff]  ;;  %v273_v6 = vld [vmem:[#allocation5 + $0x168] sm:$0xff]  ;;  %v271_v7 = vld [vmem:[#allocation5 + $0x158] sm:$0xff] }
  0x21   :  { %4049 = vmatmul.mubr.msk.f32.vlgmr.msra.gmra.mxu0 %vm78_vm1, %v63_v3  ;;  %v65_v8 = vld [vmem:[%s6901_s0 + $0x18] sm:$0xff]  ;;  %293 = vmatprep.subr.mxu1 %v274_v5  ;;  %v66_v11 = vld [vmem:[%s6901_s0 + $0x20] sm:$0xff]  ;;  %v265_v15 = vld [vmem:[#allocation5 + $0x128] sm:$0xff] }
  0x22   :  { %4051 = vmatprep.mubr.msk.f32.mxu0 %vm78_vm1, %v64_v4  ;;  %v275_v9 = vld [vmem:[#allocation5 + $0x178] sm:$0xff]  ;;  %v270_v10 = vld [vmem:[#allocation5 + $0x150] sm:$0xff]  ;;  %294 = vmatpush1.msra.mxu1 %v273_v6  ;;  %v268_v12 = vld [vmem:[#allocation5 + $0x140] sm:$0xff] }
  0x23   :  { %4060 = vmatprep.subr.mxu0 %v275_v9  ;;  %295 = vmatprep.subr.mxu1 %v271_v7  ;;  %v272_v13 = vld [vmem:[#allocation5 + $0x160] sm:$0xff]  ;;  %v267_v14 = vld [vmem:[#allocation5 + $0x138] sm:$0xff]  ;;  %v269_v17 = vld [vmem:[#allocation5 + $0x148] sm:$0xff] }
  0x24   :  { %4061 = vmatpush3.msra.mxu0 %v275_v9  ;;  %296 = vmatpush1.msra.mxu1 %v270_v10  ;;  %v67_v16 = vld [vmem:[%s6901_s0 + $0x28] sm:$0xff]  ;;  %v68_v18 = vld [vmem:[%s6901_s0 + $0x30] sm:$0xff]  ;;  %v69_v23 = vld [vmem:[%s6901_s0 + $0x38] sm:$0xff] }
  0x25   :  { %4052 = vmatmul.mubr.msk.f32.gmra.mxu0 %vm78_vm1, %v65_v8  ;;  %297 = vmatprep.subr.mxu1 %v268_v12  ;;  %v264_v19 = vld [vmem:[#allocation5 + $0x120] sm:$0xff]  ;;  %v262_v20 = vld [vmem:[#allocation5 + $0x110] sm:$0xff]  ;;  %v261_v22 = vld [vmem:[#allocation5 + $0x108] sm:$0xff] }
  0x26   :  { %4054 = vmatprep.mubr.msk.f32.mxu0 %vm78_vm1, %v66_v11  ;;  %4062 = vmatprep.subr.mxu0 %v272_v13  ;;  %v266_v21 = vld [vmem:[#allocation5 + $0x130] sm:$0xff]  ;;  %v259_v24 = vld [vmem:[#allocation5 + $0xf8] sm:$0xff]  ;;  %v256_v27 = vld [vmem:[#allocation5 + $0xe0] sm:$0xff] }
  0x27   :  { %298 = vmatpush1.msra.mxu1 %v267_v14  ;;  %4063 = vmatpush3.msra.mxu0 %v272_v13  ;;  %v258_v25 = vld [vmem:[#allocation5 + $0xf0] sm:$0xff]  ;;  %v263_v26 = vld [vmem:[#allocation5 + $0x118] sm:$0xff]  ;;  %v260_v29 = vld [vmem:[#allocation5 + $0x100] sm:$0xff] }
  0x28   :  { %299 = vmatprep.subr.mxu1 %v265_v15  ;;  %4064 = vmatprep.subr.mxu0 %v269_v17  ;;  %v255_v28 = vld [vmem:[#allocation5 + $0xd8] sm:$0xff]  ;;  %v253_v30 = vld [vmem:[#allocation5 + $0xc8] sm:$0xff]  ;;  %v252_v31 = vld [vmem:[#allocation5 + $0xc0] sm:$0xff] }
  0x29   :  { %4055 = vmatmul.mubr.msk.f32.gmra.mxu0 %vm78_vm1, %v67_v16  ;;  %300 = vmatpush1.msra.mxu1 %v264_v19  ;;  %v257_v32 = vld [vmem:[#allocation5 + $0xe8] sm:$0xff]  ;;  %v250_v33 = vld [vmem:[#allocation5 + $0xb0] sm:$0xff]  ;;  %v247_v36 = vld [vmem:[#allocation5 + $0x98] sm:$0xff] }
  0x2a   :  { %4057 = vmatprep.mubr.msk.f32.mxu0 %vm78_vm1, %v68_v18  ;;  %4065 = vmatpush3.msra.mxu0 %v269_v17  ;;  %v249_v34 = vld [vmem:[#allocation5 + $0xa8] sm:$0xff]  ;;  %v254_v35 = vld [vmem:[#allocation5 + $0xd0] sm:$0xff]  ;;  %v251_v38 = vld [vmem:[#allocation5 + $0xb8] sm:$0xff] }
  0x2b   :  { %301 = vmatprep.subr.mxu1 %v262_v20  ;;  %4066 = vmatprep.subr.mxu0 %v266_v21  ;;  %v246_v37 = vld [vmem:[#allocation5 + $0x90] sm:$0xff]  ;;  %v244_v39 = vld [vmem:[#allocation5 + $0x80] sm:$0xff]  ;;  %v243_v40 = vld [vmem:[#allocation5 + $0x78] sm:$0xff] }
  0x2c   :  { %302 = vmatpush1.msra.mxu1 %v261_v22  ;;  %4067 = vmatpush3.msra.mxu0 %v266_v21  ;;  %v248_v41 = vld [vmem:[#allocation5 + $0xa0] sm:$0xff]  ;;  %v241_v42 = vld [vmem:[#allocation5 + $0x68] sm:$0xff]  ;;  %v238_v45 = vld [vmem:[#allocation5 + $0x50] sm:$0xff] }
  0x2d   :  { %4058 = vmatmul.mubr.msk.f32.gmra.mxu0 %vm78_vm1, %v69_v23  ;;  %303 = vmatprep.subr.mxu1 %v259_v24  ;;  %v240_v43 = vld [vmem:[#allocation5 + $0x60] sm:$0xff]  ;;  %v245_v44 = vld [vmem:[#allocation5 + $0x88] sm:$0xff]  ;;  %v242_v47 = vld [vmem:[#allocation5 + $0x70] sm:$0xff] }
  0x2e   :  { %304 = vmatpush1.msra.mxu1 %v258_v25  ;;  %4068 = vmatprep.subr.mxu0 %v263_v26  ;;  %v237_v46 = vld [vmem:[#allocation5 + $0x48] sm:$0xff]  ;;  %v235_v48 = vld [vmem:[#allocation5 + $0x38] sm:$0xff]  ;;  %v234_v49 = vld [vmem:[#allocation5 + $0x30] sm:$0xff] }
  0x2f   :  { %305 = vmatprep.subr.mxu1 %v256_v27  ;;  %4069 = vmatpush3.msra.mxu0 %v263_v26  ;;  %v239_v50 = vld [vmem:[#allocation5 + $0x58] sm:$0xff]  ;;  %v236_v51 = vld [vmem:[#allocation5 + $0x40] sm:$0xff]  ;;  %v233_v54 = vld [vmem:[#allocation5 + $0x28] sm:$0xff] }
  0x30   :  { %306 = vmatpush1.msra.mxu1 %v255_v28  ;;  %4070 = vmatprep.subr.mxu0 %v260_v29  ;;  %v232_v52 = vld [vmem:[#allocation5 + $0x20] sm:$0xff]  ;;  %v231_v53 = vld [vmem:[#allocation5 + $0x18] sm:$0xff]  ;;  %v229_v55 = vld [vmem:[#allocation5 + $0x8] sm:$0xff] }
  0x31   :  { %307 = vmatprep.subr.mxu1 %v253_v30  ;;  %4071 = vmatpush3.msra.mxu0 %v260_v29  ;;  %v228_v56 = vld [vmem:[#allocation5] sm:$0xff]  ;;  %v230_v57 = vld [vmem:[#allocation5 + $0x10] sm:$0xff]  ;;  %v3669_v61 = vld [vmem:[%s6903_s2] ss:$0 sm:$0xff] }
  0x32   :  { %308 = vmatpush1.msra.mxu1 %v252_v31  ;;  %4072 = vmatprep.subr.mxu0 %v257_v32  ;;  %v5117_v59 = vld [vmem:[#allocation7 + $0x170] sm:$0xff]  ;;  %v5124_v0 = vld [vmem:[#allocation7 + $0x168] sm:$0xff]  ;;  %v5126_v3 = vld [vmem:[#allocation7 + $0x158] sm:$0xff] }
  0x33   :  { %309 = vmatprep.subr.mxu1 %v250_v33  ;;  %4073 = vmatpush3.msra.mxu0 %v257_v32  ;;  %6964 = vst [vmem:[#allocation11_spill] sm:$0xff] %v5117_v59  ;;  %v5128_v4 = vld [vmem:[#allocation7 + $0x150] sm:$0xff]  ;;  %v5130_v5 = vld [vmem:[#allocation7 + $0x178] sm:$0xff]  ;;  %v5133_v7 = vld [vmem:[#allocation7 + $0x140] sm:$0xff] }
  0x34   :  { %310 = vmatpush1.msra.mxu1 %v249_v34  ;;  %4074 = vmatprep.subr.mxu0 %v254_v35  ;;  %v5137_v10 = vld [vmem:[#allocation7 + $0x138] sm:$0xff]  ;;  %v5140_v11 = vld [vmem:[#allocation7 + $0x128] sm:$0xff]  ;;  %v5144_v13 = vld [vmem:[#allocation7 + $0x120] sm:$0xff] }
  0x35   :  { %311 = vmatprep.subr.mxu1 %v247_v36  ;;  %4075 = vmatpush3.msra.mxu0 %v254_v35  ;;  %v5147_v14 = vld [vmem:[#allocation7 + $0x110] sm:$0xff]  ;;  %v5150_v17 = vld [vmem:[#allocation7 + $0x108] sm:$0xff]  ;;  %v5154_v19 = vld [vmem:[#allocation7 + $0xf8] sm:$0xff] }
  0x36   :  { %312 = vmatpush1.msra.mxu1 %v246_v37  ;;  %4076 = vmatprep.subr.mxu0 %v251_v38  ;;  %v5157_v21 = vld [vmem:[#allocation7 + $0xf0] sm:$0xff]  ;;  %v5161_v22 = vld [vmem:[#allocation7 + $0xe0] sm:$0xff]  ;;  %v5164_v24 = vld [vmem:[#allocation7 + $0xd8] sm:$0xff] }
  0x37   :  { %313 = vmatprep.subr.mxu1 %v244_v39  ;;  %4077 = vmatpush3.msra.mxu0 %v251_v38  ;;  %v5167_v26 = vld [vmem:[#allocation7 + $0xc8] sm:$0xff]  ;;  %v5170_v28 = vld [vmem:[#allocation7 + $0xc0] sm:$0xff]  ;;  %v5174_v29 = vld [vmem:[#allocation7 + $0xb0] sm:$0xff] }
  0x38   :  { %314 = vmatpush1.msra.mxu1 %v243_v40  ;;  %4078 = vmatprep.subr.mxu0 %v248_v41  ;;  %v5177_v30 = vld [vmem:[#allocation7 + $0xa8] sm:$0xff]  ;;  %v5180_v31 = vld [vmem:[#allocation7 + $0x98] sm:$0xff]  ;;  %v5183_v32 = vld [vmem:[#allocation7 + $0x90] sm:$0xff] }
  0x39   :  { %315 = vmatprep.subr.mxu1 %v241_v42  ;;  %4079 = vmatpush3.msra.mxu0 %v248_v41  ;;  %v5185_v33 = vld [vmem:[#allocation7 + $0x160] sm:$0xff]  ;;  %v5192_v35 = vld [vmem:[#allocation7 + $0x78] sm:$0xff]  ;;  %v5196_v36 = vld [vmem:[#allocation7 + $0x68] sm:$0xff] }
  0x3a   :  { %316 = vmatpush1.msra.mxu1 %v240_v43  ;;  %4080 = vmatprep.subr.mxu0 %v245_v44  ;;  %v5189_v34 = vld [vmem:[#allocation7 + $0x80] sm:$0xff]  ;;  %v5202_v38 = vld [vmem:[#allocation7 + $0x148] sm:$0xff]  ;;  %v5206_v39 = vld [vmem:[#allocation7 + $0x50] sm:$0xff] }
  0x3b   :  { %317 = vmatprep.subr.mxu1 %v238_v45  ;;  %4081 = vmatpush3.msra.mxu0 %v245_v44  ;;  %v5200_v37 = vld [vmem:[#allocation7 + $0x60] sm:$0xff]  ;;  %v5209_v40 = vld [vmem:[#allocation7 + $0x48] sm:$0xff]  ;;  %v5213_v41 = vld [vmem:[#allocation7 + $0x38] sm:$0xff] }
  0x3c   :  { %318 = vmatpush1.msra.mxu1 %v237_v46  ;;  %4082 = vmatprep.subr.mxu0 %v242_v47  ;;  %v5217_v42 = vld [vmem:[#allocation7 + $0x30] sm:$0xff]  ;;  %v5223_v44 = vld [vmem:[#allocation7 + $0x20] sm:$0xff]  ;;  %v5226_v45 = vld [vmem:[#allocation7 + $0x18] sm:$0xff] }
  0x3d   :  { %319 = vmatprep.subr.mxu1 %v235_v48  ;;  %4083 = vmatpush3.msra.mxu0 %v242_v47  ;;  %v5219_v43 = vld [vmem:[#allocation7 + $0x130] sm:$0xff]  ;;  %6965 = vst [vmem:[#allocation12_spill] sm:$0xff] %v5226_v45  ;;  %v5230_v46 = vld [vmem:[#allocation7 + $0x8] sm:$0xff]  ;;  %v5234_v47 = vld [vmem:[#allocation7] sm:$0xff] }
  0x3e   :  { %320 = vmatpush1.msra.mxu1 %v234_v49  ;;  %4084 = vmatprep.subr.mxu0 %v239_v50  ;;  %6966 = vst [vmem:[#allocation13_spill] sm:$0xff] %v5230_v46  ;;  %6967 = vst [vmem:[#allocation14_spill] sm:$0xff] %v5234_v47  ;;  %v5236_v48 = vld [vmem:[#allocation7 + $0x118] sm:$0xff]  ;;  %v5242_v49 = vld [vmem:[#allocation7 + $0x100] sm:$0xff] }
  0x3f   :  { %4085 = vmatpush3.msra.mxu0 %v239_v50  ;;  %321 = vmatprep.subr.mxu1 %v232_v52  ;;  %v5248_v50 = vld [vmem:[#allocation7 + $0xe8] sm:$0xff]  ;;  %v5260_v52 = vld [vmem:[#allocation7 + $0xb8] sm:$0xff] }
  0x40   :  { %4086 = vmatprep.subr.mxu0 %v236_v51  ;;  %322 = vmatpush1.msra.mxu1 %v231_v53  ;;  %v5266_v53 = vld [vmem:[#allocation7 + $0xa0] sm:$0xff] }
  0x41   :  { %4087 = vmatpush3.msra.mxu0 %v236_v51  ;;  %323 = vmatprep.subr.mxu1 %v229_v55  ;;  %v5254_v51 = vld [vmem:[#allocation7 + $0xd0] sm:$0xff] }
  0x42   :  { %4088 = vmatprep.subr.mxu0 %v233_v54  ;;  %324 = vmatpush1.msra.mxu1 %v228_v56  ;;  %v5278_v55 = vld [vmem:[#allocation7 + $0x70] sm:$0xff]  ;;  %v5284_v56 = vld [vmem:[#allocation7 + $0x58] sm:$0xff] }
  0x43   :  { %4089 = vmatpush3.msra.mxu0 %v233_v54  ;;  %357 = vmatprep.mubr.f32.mxu1 %v6912_v58  ;;  %v5272_v54 = vld [vmem:[#allocation7 + $0x88] sm:$0xff] }
  0x44   :  { %4090 = vmatprep.subr.mxu0 %v230_v57  ;;  %587 = vmatprep.subr.mxu1 %v5117_v59 }
  0x45   :  { %4091 = vmatpush3.msra.mxu0 %v230_v57  ;;  %v5290_v57 = vld [vmem:[#allocation7 + $0x40] sm:$0xff] }
  0x46   :  { %4104 = vmatprep.subr.mxu0 %v6912_v58 }
  0xe1   :  { %v4050_v60 = vpop.f32.mrf.mxu0 }
  0xe2   :  { %v179_v1 = vadd.f32 %v4050_v60, %v3669_v61  ;;  %v5296_v60 = vld [vmem:[#allocation7 + $0x28] sm:$0xff] }
  0xe3   :  { %v173_v62 = vpop.f32.mrf.mxu0  ;;  %6968 = vst [vmem:[#allocation15_spill] sm:$0xff] %v5296_v60 }
  0xe4   :  { %v174_v63 = vadd.f32 %v3669_v61, %v173_v62  ;;  %v278_v62 = vlaneseq }
  0xe5   :  { %v4053_v2 = vpop.f32.mrf.mxu0 }
  0xe6   :  { %358 = vmatmul.mubr.f32.vlgmr.msra.gmra.mxu1 %v174_v63  ;;  %4092 = vmatprep.mubr.f32.mxu0 %v174_v63  ;;  %v189_v8 = vadd.f32 %v4053_v2, %v3669_v61  ;;  %v5361_v63 = vshrl.u32 %v278_v62, 7  ;;  %v276_v2 = vld [vmem:[%s6906_s5] sm:$0x7] }
  0xe7   :  { %588 = vmatpush1.msra.mxu1 %v5124_v0  ;;  %v183_v6 = vpop.f32.mrf.mxu0  ;;  %4093 = vmatmul.mubr.f32.vlgmr.msra.gmra.mxu0 %v179_v1 }
  0xe8   :  { %v184_v9 = vadd.f32 %v3669_v61, %v183_v6  ;;  %589 = vmatprep.subr.mxu1 %v5126_v3  ;;  %363 = vmatprep.mubr.f32.mxu1 %v6912_v58  ;;  %6970 = vst [vmem:[#allocation17_spill] sm:$0xff] %v5361_v63 }
  0xe9   :  { %590 = vmatpush1.msra.mxu1 %v5128_v4  ;;  %v4056_v12 = vpop.f32.mrf.mxu0  ;;  %4105 = vmatpush3.msra.mxu0 %v5130_v5 }
  0xea   :  { %591 = vmatprep.subr.mxu1 %v5133_v7  ;;  %364 = vmatmul.mubr.f32.gmra.mxu1 %v179_v1  ;;  %v199_v18 = vadd.f32 %v4056_v12, %v3669_v61  ;;  %v6911_v1 = vsub.s32 2, %v5361_v63 }
  0xeb   :  { %4095 = vmatprep.mubr.f32.mxu0 %v184_v9  ;;  %592 = vmatpush1.msra.mxu1 %v5137_v10  ;;  %v193_v15 = vpop.f32.mrf.mxu0 }
  0xec   :  { %4096 = vmatmul.mubr.f32.gmra.mxu0 %v189_v8  ;;  %593 = vmatprep.subr.mxu1 %v5140_v11  ;;  %v194_v16 = vadd.f32 %v3669_v61, %v193_v15  ;;  %v5369_v6 = vrot.slane %v276_v2, %v6911_v1  ;;  %v6925_v15 = vsub.s32 1, %v5361_v63 }
  0xed   :  { %594 = vmatpush1.msra.mxu1 %v5144_v13  ;;  %369 = vmatprep.mubr.f32.mxu1 %v6912_v58  ;;  %v4059_v20 = vpop.f32.mrf.mxu0 }
  0xee   :  { %595 = vmatprep.subr.mxu1 %v5147_v14  ;;  %370 = vmatmul.mubr.f32.gmra.mxu1 %v184_v9  ;;  %v209_v27 = vadd.f32 %v4059_v20, %v3669_v61 }
  0xef   :  { %596 = vmatpush1.msra.mxu1 %v5150_v17  ;;  %375 = vmatprep.mubr.f32.mxu1 %v6912_v58  ;;  %v203_v23 = vpop.f32.mrf.mxu0 }
  0xf0   :  { %597 = vmatprep.subr.mxu1 %v5154_v19  ;;  %4098 = vmatprep.mubr.f32.mxu0 %v194_v16  ;;  %v204_v25 = vadd.f32 %v3669_v61, %v203_v23  ;;  %v5302_v61 = vld [vmem:[#allocation7 + $0x10] sm:$0xff] }
  0xf1   :  { %598 = vmatpush1.msra.mxu1 %v5157_v21  ;;  %4099 = vmatmul.mubr.f32.gmra.mxu0 %v199_v18  ;;  %6969 = vst [vmem:[#allocation16_spill] sm:$0xff] %v5302_v61 }
  0xf2   :  { %599 = vmatprep.subr.mxu1 %v5161_v22  ;;  %376 = vmatmul.mubr.f32.gmra.mxu1 %v189_v8  ;;  %v6920_v8 = vsub.s32 0, %v5361_v63 }
  0xf3   :  { %600 = vmatpush1.msra.mxu1 %v5164_v24  ;;  %381 = vmatprep.mubr.f32.mxu1 %v6912_v58 }
  0xf4   :  { %601 = vmatprep.subr.mxu1 %v5167_v26  ;;  %4101 = vmatprep.mubr.f32.mxu0 %v204_v25  ;;  %v281_v20 = vrot.slane %v276_v2, %v6920_v8 }
  0xf5   :  { %602 = vmatpush1.msra.mxu1 %v5170_v28  ;;  %4102 = vmatmul.mubr.f32.gmra.mxu0 %v209_v27 }
  0xf6   :  { %603 = vmatprep.subr.mxu1 %v5174_v29  ;;  %382 = vmatmul.mubr.f32.gmra.mxu1 %v194_v16 }
  0xf7   :  { %604 = vmatpush1.msra.mxu1 %v5177_v30  ;;  %387 = vmatprep.mubr.f32.mxu1 %v6912_v58 }
  0xf8   :  { %605 = vmatprep.subr.mxu1 %v5180_v31  ;;  %4106 = vmatprep.subr.mxu0 %v6912_v58 }
  0xf9   :  { %606 = vmatpush1.msra.mxu1 %v5183_v32  ;;  %4107 = vmatpush3.msra.mxu0 %v5185_v33 }
  0xfa   :  { %607 = vmatprep.subr.mxu1 %v5189_v34  ;;  %388 = vmatmul.mubr.f32.gmra.mxu1 %v199_v18 }
  0xfb   :  { %608 = vmatpush1.msra.mxu1 %v5192_v35  ;;  %393 = vmatprep.mubr.f32.mxu1 %v6912_v58 }
  0xfc   :  { %609 = vmatprep.subr.mxu1 %v5196_v36  ;;  %4108 = vmatprep.subr.mxu0 %v6912_v58 }
  0xfd   :  { %610 = vmatpush1.msra.mxu1 %v5200_v37  ;;  %4109 = vmatpush3.msra.mxu0 %v5202_v38 }
  0xfe   :  { %611 = vmatprep.subr.mxu1 %v5206_v39  ;;  %394 = vmatmul.mubr.f32.gmra.mxu1 %v204_v25 }
  0xff   :  { %612 = vmatpush1.msra.mxu1 %v5209_v40  ;;  %399 = vmatprep.mubr.f32.mxu1 %v6912_v58 }
 0x100   :  { %613 = vmatprep.subr.mxu1 %v5213_v41  ;;  %4110 = vmatprep.subr.mxu0 %v6912_v58 }
 0x101   :  { %614 = vmatpush1.msra.mxu1 %v5217_v42  ;;  %4111 = vmatpush3.msra.mxu0 %v5219_v43 }
 0x102   :  { %615 = vmatprep.subr.mxu1 %v5223_v44  ;;  %400 = vmatmul.mubr.f32.gmra.mxu1 %v209_v27  ;;  %v285_v27 = vrot.slane %v276_v2, %v6925_v15 }
 0x103   :  { %616 = vmatpush1.msra.mxu1 %v5226_v45  ;;  %651 = vmatprep.mubr.f32.mxu1 %v6912_v58 }
 0x104   :  { %617 = vmatprep.subr.mxu1 %v5230_v46  ;;  %4112 = vmatprep.subr.mxu0 %v6912_v58 }
 0x105   :  { %618 = vmatpush1.msra.mxu1 %v5234_v47  ;;  %4113 = vmatpush3.msra.mxu0 %v5236_v48 }
 0x106   :  { %652 = vmatmul.mubr.f32.vlgmr.msra.gmra.mxu1 %v6912_v58  ;;  %4114 = vmatprep.subr.mxu0 %v6912_v58 }
 0x107   :  { %4115 = vmatpush3.msra.mxu0 %v5242_v49  ;;  %4136 = vmatprep.mubr.msk.f32.mxu0 %vm5021_vm2, %v6912_v58 }
 0x108   :  { %4116 = vmatprep.subr.mxu0 %v6912_v58  ;;  %761 = vmatprep.subr.mxu1 %v5117_v59 }
 0x109   :  { %4117 = vmatpush3.msra.mxu0 %v5248_v50  ;;  %762 = vmatpush1.msra.mxu1 %v5124_v0 }
 0x10a   :  { %4118 = vmatprep.subr.mxu0 %v6912_v58  ;;  %763 = vmatprep.subr.mxu1 %v5126_v3 }
 0x10b   :  { %4119 = vmatpush3.msra.mxu0 %v5254_v51  ;;  %764 = vmatpush1.msra.mxu1 %v5128_v4 }
 0x10c   :  { %4120 = vmatprep.subr.mxu0 %v6912_v58  ;;  %765 = vmatprep.subr.mxu1 %v5133_v7 }
 0x10d   :  { %4121 = vmatpush3.msra.mxu0 %v5260_v52  ;;  %766 = vmatpush1.msra.mxu1 %v5137_v10 }
 0x10e   :  { %4122 = vmatprep.subr.mxu0 %v6912_v58  ;;  %767 = vmatprep.subr.mxu1 %v5140_v11 }
 0x10f   :  { %4123 = vmatpush3.msra.mxu0 %v5266_v53  ;;  %768 = vmatpush1.msra.mxu1 %v5144_v13 }
 0x110   :  { %4124 = vmatprep.subr.mxu0 %v6912_v58  ;;  %769 = vmatprep.subr.mxu1 %v5147_v14 }
 0x111   :  { %4125 = vmatpush3.msra.mxu0 %v5272_v54  ;;  %770 = vmatpush1.msra.mxu1 %v5150_v17 }
 0x112   :  { %4126 = vmatprep.subr.mxu0 %v6912_v58  ;;  %771 = vmatprep.subr.mxu1 %v5154_v19 }
 0x113   :  { %4127 = vmatpush3.msra.mxu0 %v5278_v55  ;;  %772 = vmatpush1.msra.mxu1 %v5157_v21 }
 0x114   :  { %4128 = vmatprep.subr.mxu0 %v6912_v58  ;;  %773 = vmatprep.subr.mxu1 %v5161_v22 }
 0x115   :  { %4129 = vmatpush3.msra.mxu0 %v5284_v56  ;;  %774 = vmatpush1.msra.mxu1 %v5164_v24 }
 0x116   :  { %4130 = vmatprep.subr.mxu0 %v6912_v58  ;;  %775 = vmatprep.subr.mxu1 %v5167_v26 }
 0x117   :  { %4131 = vmatpush3.msra.mxu0 %v5290_v57  ;;  %776 = vmatpush1.msra.mxu1 %v5170_v28 }
 0x118   :  { %4132 = vmatprep.subr.mxu0 %v6912_v58  ;;  %777 = vmatprep.subr.mxu1 %v5174_v29 }
 0x119   :  { %4133 = vmatpush3.msra.mxu0 %v5296_v60  ;;  %778 = vmatpush1.msra.mxu1 %v5177_v30 }
 0x11a   :  { %4134 = vmatprep.subr.mxu0 %v6912_v58  ;;  %779 = vmatprep.subr.mxu1 %v5180_v31 }
 0x11b   :  { %4135 = vmatpush3.msra.mxu0 %v5302_v61  ;;  %780 = vmatpush1.msra.mxu1 %v5183_v32 }
 0x11c   :  { %4137 = vmatmul.mubr.f32.vlgmr.msra.gmra.mxu0 %v6912_v58  ;;  %4139 = vmatprep.subr.mxu0 %v6912_v58 }
 0x11d   :  { %4140 = vmatpush3.msra.mxu0 %v5130_v5  ;;  %781 = vmatprep.subr.mxu1 %v5189_v34 }
 0x11e   :  { %4141 = vmatprep.subr.mxu0 %v6912_v58  ;;  %782 = vmatpush1.msra.mxu1 %v5192_v35 }
 0x11f   :  { %4142 = vmatpush3.msra.mxu0 %v5185_v33  ;;  %783 = vmatprep.subr.mxu1 %v5196_v36 }
 0x120   :  { %4143 = vmatprep.subr.mxu0 %v6912_v58  ;;  %784 = vmatpush1.msra.mxu1 %v5200_v37 }
 0x121   :  { %4144 = vmatpush3.msra.mxu0 %v5202_v38  ;;  %785 = vmatprep.subr.mxu1 %v5206_v39 }
 0x122   :  { %4145 = vmatprep.subr.mxu0 %v6912_v58  ;;  %786 = vmatpush1.msra.mxu1 %v5209_v40 }
 0x123   :  { %4146 = vmatpush3.msra.mxu0 %v5219_v43  ;;  %787 = vmatprep.subr.mxu1 %v5213_v41 }
 0x124   :  { %4147 = vmatprep.subr.mxu0 %v6912_v58  ;;  %788 = vmatpush1.msra.mxu1 %v5217_v42 }
 0x125   :  { %4148 = vmatpush3.msra.mxu0 %v5236_v48  ;;  %789 = vmatprep.subr.mxu1 %v5223_v44 }
 0x126   :  { %4149 = vmatprep.subr.mxu0 %v6912_v58  ;;  %790 = vmatpush1.msra.mxu1 %v5226_v45 }
 0x127   :  { %4150 = vmatpush3.msra.mxu0 %v5242_v49  ;;  %791 = vmatprep.subr.mxu1 %v5230_v46 }
 0x128   :  { %4151 = vmatprep.subr.mxu0 %v6912_v58  ;;  %792 = vmatpush1.msra.mxu1 %v5234_v47 }
 0x129   :  { %4152 = vmatpush3.msra.mxu0 %v5248_v50  ;;  %825 = vmatprep.mubr.f32.mxu1 %v6912_v58 }
 0x12a   :  { %4153 = vmatprep.subr.mxu0 %v6912_v58  ;;  %4171 = vmatprep.mubr.msk.f32.mxu0 %vm5021_vm2, %v6912_v58 }
 0x12b   :  { %4154 = vmatpush3.msra.mxu0 %v5254_v51  ;;  %930 = vmatprep.subr.mxu1 %v5117_v59 }
 0x12c   :  { %4155 = vmatprep.subr.mxu0 %v6912_v58 }
 0x12d   :  { %4156 = vmatpush3.msra.mxu0 %v5260_v52 }
 0x12e   :  { %4157 = vmatprep.subr.mxu0 %v6912_v58 }
 0x12f   :  { %4158 = vmatpush3.msra.mxu0 %v5266_v53 }
 0x130   :  { %4159 = vmatprep.subr.mxu0 %v6912_v58 }
 0x131   :  { %4160 = vmatpush3.msra.mxu0 %v5272_v54 }
 0x132   :  { %4161 = vmatprep.subr.mxu0 %v6912_v58 }
 0x133   :  { %4162 = vmatpush3.msra.mxu0 %v5278_v55 }
 0x134   :  { %4163 = vmatprep.subr.mxu0 %v6912_v58 }
 0x135   :  { %4164 = vmatpush3.msra.mxu0 %v5284_v56 }
 0x136   :  { %4165 = vmatprep.subr.mxu0 %v6912_v58 }
 0x137   :  { %4166 = vmatpush3.msra.mxu0 %v5290_v57 }
 0x138   :  { %4167 = vmatprep.subr.mxu0 %v6912_v58 }
 0x139   :  { %4168 = vmatpush3.msra.mxu0 %v5296_v60 }
 0x13a   :  { %4169 = vmatprep.subr.mxu0 %v6912_v58 }
 0x13b   :  { %4170 = vmatpush3.msra.mxu0 %v5302_v61 }
 0x13c   :  { %4174 = vmatprep.subr.mxu0 %v6912_v58 }
 0x1a6   :  { %v359_v9 = vpop.f32.mrf.mxu1 }
 0x1a7   :  { %v4094_v12 = vpop.f32.mrf.mxu0 }
 0x1a8   :  { %v5374_v16 = vadd.f32 %v4094_v12, %v5369_v6  ;;  %v361_v18 = vpop.f32.mrf.mxu1 }
 0x1a9   :  { %v472_v23 = vpop.f32.mrf.mxu0  ;;  %v362_v45 = vadd.f32 %v361_v18, %v285_v27 }
 0x1aa   :  { %6971 = vst [vmem:[#allocation18_spill] sm:$0xff] %v5374_v16  ;;  %v365_v25 = vpop.f32.mrf.mxu1  ;;  %v473_v18 = vadd.f32 %v472_v23, %v5369_v6  ;;  %v6994_v23 = vld [vmem:[#allocation12_spill] sm:$0xff] }
 0x1ab   :  { %v5380_v62 = vadd.f32 %v365_v25, %v281_v20 }
 0x1ac   :  { %v4097_v1 = vpop.f32.mrf.mxu0  ;;  %v367_v58 = vpop.f32.mrf.mxu1 }
 0x1ad   :  { %6972 = vst [vmem:[#allocation19_spill] sm:$0xff] %v5380_v62  ;;  %v5383_v59 = vadd.f32 %v4097_v1, %v5369_v6  ;;  %v5385_v61 = vadd.f32 %v367_v58, %v285_v27 }
 0x1ae   :  { %v482_v12 = vpop.f32.mrf.mxu0  ;;  %v371_v16 = vpop.f32.mrf.mxu1 }
 0x1af   :  { %6973 = vst [vmem:[#allocation20_spill] sm:$0xff] %v5383_v59  ;;  %6974 = vst [vmem:[#allocation21_spill] sm:$0xff] %v5385_v61  ;;  %v5388_v47 = vadd.f32 %v482_v12, %v5369_v6  ;;  %v5390_v8 = vadd.f32 %v371_v16, %v281_v20 }
 0x1b0   :  { %v373_v46 = vpop.f32.mrf.mxu1 }
 0x1b1   :  { %6975 = vst [vmem:[#allocation22_spill] sm:$0xff] %v5388_v47  ;;  %6976 = vst [vmem:[#allocation23_spill] sm:$0xff] %v5390_v8  ;;  %v5392_v60 = vadd.f32 %v373_v46, %v285_v27  ;;  %v4100_v2 = vpop.f32.mrf.mxu0 }
 0x1b2   :  { %v377_v25 = vpop.f32.mrf.mxu1  ;;  %v5395_v15 = vadd.f32 %v4100_v2, %v5369_v6 }
 0x1b3   :  { %6977 = vst [vmem:[#allocation24_spill] sm:$0xff] %v5392_v60  ;;  %v5397_v63 = vadd.f32 %v377_v25, %v281_v20  ;;  %v492_v1 = vpop.f32.mrf.mxu0 }
 0x1b4   :  { %6978 = vst [vmem:[#allocation25_spill] sm:$0xff] %v5395_v15  ;;  %v379_v58 = vpop.f32.mrf.mxu1  ;;  %v5400_v59 = vadd.f32 %v492_v1, %v5369_v6 }
 0x1b5   :  { %6979 = vst [vmem:[#allocation26_spill] sm:$0xff] %v5397_v63  ;;  %v5402_v61 = vadd.f32 %v379_v58, %v285_v27  ;;  %v4103_v12 = vpop.f32.mrf.mxu0 }
 0x1b6   :  { %6980 = vst [vmem:[#allocation27_spill] sm:$0xff] %v5400_v59  ;;  %v383_v16 = vpop.f32.mrf.mxu1  ;;  %v5405_v47 = vadd.f32 %v4103_v12, %v5369_v6 }
 0x1b7   :  { %6981 = vst [vmem:[#allocation28_spill] sm:$0xff] %v5402_v61  ;;  %v5407_v46 = vadd.f32 %v383_v16, %v281_v20  ;;  %v502_v60 = vpop.f32.mrf.mxu0 }
 0x1b8   :  { %6982 = vst [vmem:[#allocation29_spill] sm:$0xff] %v5405_v47  ;;  %v385_v8 = vpop.f32.mrf.mxu1  ;;  %v5410_v2 = vadd.f32 %v502_v60, %v5369_v6  ;;  %v360_v60 = vadd.f32 %v359_v9, %v281_v20  ;;  %v5429_v9 = vld [vmem:[%s6907_s6] ss:$0 sm:$0xff]  ;;  %v6993_v6 = vmov 0.0  }
 0x1b9   :  { %6983 = vst [vmem:[#allocation30_spill] sm:$0xff] %v5407_v46  ;;  %v5412_v25 = vadd.f32 %v385_v8, %v285_v27 }
 0x1ba   :  { %6984 = vst [vmem:[#allocation31_spill] sm:$0xff] %v5410_v2  ;;  %v389_v15 = vpop.f32.mrf.mxu1 }
 0x1bb   :  { %6985 = vst [vmem:[#allocation32_spill] sm:$0xff] %v5412_v25  ;;  %v5414_v63 = vadd.f32 %v389_v15, %v281_v20 }
 0x1bc   :  { %v391_v1 = vpop.f32.mrf.mxu1 }
 0x1bd   :  { %6986 = vst [vmem:[#allocation33_spill] sm:$0xff] %v5414_v63  ;;  %v5416_v58 = vadd.f32 %v391_v1, %v285_v27 }
 0x1be   :  { %v395_v59 = vpop.f32.mrf.mxu1 }
 0x1bf   :  { %6987 = vst [vmem:[#allocation34_spill] sm:$0xff] %v5416_v58  ;;  %v5418_v61 = vadd.f32 %v395_v59, %v281_v20 }
 0x1c0   :  { %v397_v12 = vpop.f32.mrf.mxu1 }
 0x1c1   :  { %6988 = vst [vmem:[#allocation35_spill] sm:$0xff] %v5418_v61  ;;  %v5420_v47 = vadd.f32 %v397_v12, %v285_v27 }
 0x1c2   :  { %v401_v16 = vpop.f32.mrf.mxu1 }
 0x1c3   :  { %6989 = vst [vmem:[#allocation36_spill] sm:$0xff] %v5420_v47  ;;  %v5422_v46 = vadd.f32 %v401_v16, %v281_v20 }
 0x1c4   :  { %v403_v62 = vpop.f32.mrf.mxu1 }
 0x1c5   :  { %6990 = vst [vmem:[#allocation37_spill] sm:$0xff] %v5422_v46  ;;  %v5424_v2 = vadd.f32 %v403_v62, %v285_v27 }
 0x1c6   :  { %v653_v8 = vpop.f32.mrf.mxu1 }
 0x1c7   :  { %6991 = vst [vmem:[#allocation38_spill] sm:$0xff] %v5424_v2  ;;  %v728_v25 = vadd.f32 %v653_v8, %v360_v60 }
 0x1c8   :  { %v655_v63 = vpop.f32.mrf.mxu1 }
 0x1c9   :  { %v3679_v15 = vmul.f32 -1.442695, %v728_v25  ;;  %v729_v1 = vadd.f32 %v655_v63, %v362_v45 }
 0x1cb   :  { %4714 = vpow2.f32 %v3679_v15  ;;  %v3680_v58 = vmul.f32 -1.442695, %v729_v1  ;;  %v6995_v15 = vld [vmem:[#allocation15_spill] sm:$0xff]  ;;  %v6996_v1 = vld [vmem:[#allocation13_spill] sm:$0xff] }
 0x1cd   :  { %4716 = vpow2.f32 %v3680_v58 }
 0x1d8   :  { %v4715_v59 = vpop.eup %4714 }
 0x1d9   :  { %v736_v61 = vadd.f32 1.0, %v4715_v59  ;;  %v6997_v59 = vld [vmem:[#allocation14_spill] sm:$0xff] }
 0x1da   :  { %v4717_v16 = vpop.eup %4716 }
 0x1db   :  { %4718 = vrcp.f32 %v736_v61  ;;  %v737_v20 = vadd.f32 1.0, %v4717_v16  ;;  %v6999_v16 = vld [vmem:[#allocation11_spill] sm:$0xff] }
 0x1dc   :  { %v724_v12 = vpop.f32.mrf.mxu0 }
 0x1dd   :  { %v748_v62 = vadd.f32 %v5429_v9, %v724_v12  ;;  %4720 = vrcp.f32 %v737_v20  ;;  %v6998_v12 = vld [vmem:[#allocation16_spill] sm:$0xff] }
 0x1de   :  { %v4138_v47 = vpop.f32.mrf.mxu0 }
 0x1e8   :  { %v4719_v25 = vpop.eup %4718 }
 0x1e9   :  { %v749_v45 = vmul.f32 %v4719_v25, %v748_v62  ;;  %v7000_v25 = vld [vmem:[#allocation19_spill] sm:$0xff] }
 0x1ea   :  { %v4721_v27 = vpop.eup %4720 }
 0x1eb   :  { %v750_v63 = vadd.f32 %v749_v45, %v473_v18  ;;  %v752_v61 = vsub.f32 1.0, %v4721_v27  ;;  %v754_v60 = vmul.f32 0.0, %v4721_v27 }
 0x1ed   :  { %4722 = vtanh.f32 %v750_v63 }
 0x1fa   :  { %v4723_v58 = vpop.eup %4722 }
 0x1fb   :  { %v753_v47 = vmul.f32 %v4723_v58, %v752_v61  ;;  %v7001_v61 = vld [vmem:[#allocation21_spill] sm:$0xff] }
 0x1fd   :  { %v5433_v8 = vadd.f32 %v754_v60, %v753_v47 }
 0x1ff   :  { %6992 = vst [vmem:[#allocation39_spill] sm:$0xff] %v5433_v8  ;;  %826 = vmatmul.mubr.f32.vlgmr.msra.gmra.mxu1 %v5433_v8  ;;  %4172 = vmatmul.mubr.f32.vlgmr.msra.gmra.mxu0 %v5433_v8 }
 0x200   :  { %931 = vmatpush1.msra.mxu1 %v5124_v0  ;;  %4175 = vmatpush3.msra.mxu0 %v5130_v5 }
 0x201   :  { %932 = vmatprep.subr.mxu1 %v5126_v3  ;;  %4176 = vmatprep.subr.mxu0 %v6993_v6 }
 0x202   :  { %933 = vmatpush1.msra.mxu1 %v5128_v4  ;;  %4177 = vmatpush3.msra.mxu0 %v5185_v33 }
 0x203   :  { %934 = vmatprep.subr.mxu1 %v5133_v7  ;;  %4178 = vmatprep.subr.mxu0 %v6993_v6 }
 0x204   :  { %935 = vmatpush1.msra.mxu1 %v5137_v10  ;;  %4179 = vmatpush3.msra.mxu0 %v5202_v38 }
 0x205   :  { %936 = vmatprep.subr.mxu1 %v5140_v11  ;;  %4180 = vmatprep.subr.mxu0 %v6993_v6 }
 0x206   :  { %937 = vmatpush1.msra.mxu1 %v5144_v13  ;;  %4181 = vmatpush3.msra.mxu0 %v5219_v43 }
 0x207   :  { %938 = vmatprep.subr.mxu1 %v5147_v14  ;;  %4182 = vmatprep.subr.mxu0 %v6993_v6 }
 0x208   :  { %939 = vmatpush1.msra.mxu1 %v5150_v17  ;;  %4183 = vmatpush3.msra.mxu0 %v5236_v48 }
 0x209   :  { %940 = vmatprep.subr.mxu1 %v5154_v19  ;;  %4184 = vmatprep.subr.mxu0 %v6993_v6 }
 0x20a   :  { %941 = vmatpush1.msra.mxu1 %v5157_v21  ;;  %4185 = vmatpush3.msra.mxu0 %v5242_v49 }
 0x20b   :  { %942 = vmatprep.subr.mxu1 %v5161_v22  ;;  %4186 = vmatprep.subr.mxu0 %v6993_v6 }
 0x20c   :  { %943 = vmatpush1.msra.mxu1 %v5164_v24  ;;  %4187 = vmatpush3.msra.mxu0 %v5248_v50 }
 0x20d   :  { %944 = vmatprep.subr.mxu1 %v5167_v26  ;;  %4188 = vmatprep.subr.mxu0 %v6993_v6 }
 0x20e   :  { %945 = vmatpush1.msra.mxu1 %v5170_v28  ;;  %4189 = vmatpush3.msra.mxu0 %v5254_v51 }
 0x20f   :  { %946 = vmatprep.subr.mxu1 %v5174_v29  ;;  %4190 = vmatprep.subr.mxu0 %v6993_v6 }
 0x210   :  { %947 = vmatpush1.msra.mxu1 %v5177_v30  ;;  %4191 = vmatpush3.msra.mxu0 %v5260_v52 }
 0x211   :  { %948 = vmatprep.subr.mxu1 %v5180_v31  ;;  %4192 = vmatprep.subr.mxu0 %v6993_v6 }
 0x212   :  { %949 = vmatpush1.msra.mxu1 %v5183_v32  ;;  %4193 = vmatpush3.msra.mxu0 %v5266_v53 }
 0x213   :  { %950 = vmatprep.subr.mxu1 %v5189_v34  ;;  %4194 = vmatprep.subr.mxu0 %v6993_v6 }
 0x214   :  { %951 = vmatpush1.msra.mxu1 %v5192_v35  ;;  %4195 = vmatpush3.msra.mxu0 %v5272_v54 }
 0x215   :  { %952 = vmatprep.subr.mxu1 %v5196_v36  ;;  %4196 = vmatprep.subr.mxu0 %v6993_v6 }
 0x216   :  { %953 = vmatpush1.msra.mxu1 %v5200_v37  ;;  %4197 = vmatpush3.msra.mxu0 %v5278_v55 }
 0x217   :  { %954 = vmatprep.subr.mxu1 %v5206_v39  ;;  %4198 = vmatprep.subr.mxu0 %v6993_v6 }
 0x218   :  { %955 = vmatpush1.msra.mxu1 %v5209_v40  ;;  %4199 = vmatpush3.msra.mxu0 %v5284_v56 }
 0x219   :  { %956 = vmatprep.subr.mxu1 %v5213_v41  ;;  %4200 = vmatprep.subr.mxu0 %v6993_v6 }
 0x21a   :  { %957 = vmatpush1.msra.mxu1 %v5217_v42  ;;  %4201 = vmatpush3.msra.mxu0 %v5290_v57 }
 0x21b   :  { %958 = vmatprep.subr.mxu1 %v5223_v44  ;;  %4202 = vmatprep.subr.mxu0 %v6993_v6 }
 0x21c   :  { %959 = vmatpush1.msra.mxu1 %v6994_v23  ;;  %4203 = vmatpush3.msra.mxu0 %v6995_v15  ;;  %v7002_v15 = vld [vmem:[#allocation18_spill] sm:$0xff] }
 0x21d   :  { %960 = vmatprep.subr.mxu1 %v6996_v1  ;;  %4204 = vmatprep.subr.mxu0 %v6993_v6 }
 0x21e   :  { %961 = vmatpush1.msra.mxu1 %v6997_v59  ;;  %994 = vmatprep.mubr.f32.mxu1 %v6993_v6 }
 0x21f   :  { %4205 = vmatpush3.msra.mxu0 %v6998_v12  ;;  %4206 = vmatprep.mubr.msk.f32.mxu0 %vm5021_vm2, %v6993_v6 }
 0x220   :  { %1099 = vmatprep.subr.mxu1 %v6999_v16  ;;  %4209 = vmatprep.subr.mxu0 %v6993_v6 }
 0x2bf   :  { %v827_v20 = vpop.f32.mrf.mxu1  ;;  %v898_v62 = vpop.f32.mrf.mxu0 }
 0x2c0   :  { %v902_v18 = vadd.f32 %v827_v20, %v7000_v25  ;;  %v916_v16 = vadd.f32 %v5429_v9, %v898_v62  ;;  %v7009_v62 = vld [vmem:[#allocation23_spill] sm:$0xff] }
 0x2c1   :  { %v4173_v45 = vpop.f32.mrf.mxu0  ;;  %v829_v27 = vpop.f32.mrf.mxu1 }
 0x2c2   :  { %v3682_v63 = vmul.f32 -1.442695, %v902_v18  ;;  %v903_v58 = vadd.f32 %v829_v27, %v7001_v61 }
 0x2c4   :  { %4724 = vpow2.f32 %v3682_v63  ;;  %v3683_v47 = vmul.f32 -1.442695, %v903_v58 }
 0x2c6   :  { %4726 = vpow2.f32 %v3683_v47 }
 0x2d1   :  { %v4725_v60 = vpop.eup %4724 }
 0x2d2   :  { %v910_v2 = vadd.f32 1.0, %v4725_v60 }
 0x2d3   :  { %v4727_v46 = vpop.eup %4726 }
 0x2d4   :  { %4728 = vrcp.f32 %v910_v2  ;;  %v911_v12 = vadd.f32 1.0, %v4727_v46  ;;  %v7004_v46 = vld [vmem:[#allocation15_spill] sm:$0xff]  ;;  %v7005_v2 = vld [vmem:[#allocation13_spill] sm:$0xff] }
 0x2d6   :  { %4730 = vrcp.f32 %v911_v12 }
 0x2e1   :  { %v4729_v59 = vpop.eup %4728 }
 0x2e2   :  { %v917_v1 = vmul.f32 %v4729_v59, %v916_v16  ;;  %v7008_v59 = vld [vmem:[#allocation11_spill] sm:$0xff] }
 0x2e3   :  { %v4731_v25 = vpop.eup %4730 }
 0x2e4   :  { %v918_v20 = vadd.f32 %v917_v1, %v7002_v15  ;;  %v920_v18 = vsub.f32 1.0, %v4731_v25  ;;  %v922_v27 = vmul.f32 %v4731_v25, %v5433_v8  ;;  %v7006_v15 = vld [vmem:[#allocation14_spill] sm:$0xff]  ;;  %v7007_v1 = vld [vmem:[#allocation16_spill] sm:$0xff] }
 0x2e5   :  { %v7010_v25 = vld [vmem:[#allocation24_spill] sm:$0xff] }
 0x2e6   :  { %4732 = vtanh.f32 %v918_v20 }
 0x2f3   :  { %v4733_v45 = vpop.eup %4732 }
 0x2f4   :  { %v921_v63 = vmul.f32 %v4733_v45, %v920_v18 }
 0x2f6   :  { %v5509_v61 = vadd.f32 %v922_v27, %v921_v63 }
 0x2f8   :  { %7003 = vst [vmem:[#allocation12_spill] sm:$0xff] %v5509_v61  ;;  %995 = vmatmul.mubr.f32.vlgmr.msra.gmra.mxu1 %v5509_v61  ;;  %4207 = vmatmul.mubr.f32.vlgmr.msra.gmra.mxu0 %v5509_v61 }
 0x2f9   :  { %1100 = vmatpush1.msra.mxu1 %v5124_v0  ;;  %4210 = vmatpush3.msra.mxu0 %v5130_v5 }
 0x2fa   :  { %1101 = vmatprep.subr.mxu1 %v5126_v3  ;;  %4211 = vmatprep.subr.mxu0 %v6993_v6 }
 0x2fb   :  { %1102 = vmatpush1.msra.mxu1 %v5128_v4  ;;  %4212 = vmatpush3.msra.mxu0 %v5185_v33 }
 0x2fc   :  { %1103 = vmatprep.subr.mxu1 %v5133_v7  ;;  %4213 = vmatprep.subr.mxu0 %v6993_v6 }
 0x2fd   :  { %1104 = vmatpush1.msra.mxu1 %v5137_v10  ;;  %4214 = vmatpush3.msra.mxu0 %v5202_v38 }
 0x2fe   :  { %1105 = vmatprep.subr.mxu1 %v5140_v11  ;;  %4215 = vmatprep.subr.mxu0 %v6993_v6 }
 0x2ff   :  { %1106 = vmatpush1.msra.mxu1 %v5144_v13  ;;  %4216 = vmatpush3.msra.mxu0 %v5219_v43 }
 0x300   :  { %1107 = vmatprep.subr.mxu1 %v5147_v14  ;;  %4217 = vmatprep.subr.mxu0 %v6993_v6 }
 0x301   :  { %1108 = vmatpush1.msra.mxu1 %v5150_v17  ;;  %4218 = vmatpush3.msra.mxu0 %v5236_v48 }
 0x302   :  { %1109 = vmatprep.subr.mxu1 %v5154_v19  ;;  %4219 = vmatprep.subr.mxu0 %v6993_v6 }
 0x303   :  { %1110 = vmatpush1.msra.mxu1 %v5157_v21  ;;  %4220 = vmatpush3.msra.mxu0 %v5242_v49 }
 0x304   :  { %1111 = vmatprep.subr.mxu1 %v5161_v22  ;;  %4221 = vmatprep.subr.mxu0 %v6993_v6 }
 0x305   :  { %1112 = vmatpush1.msra.mxu1 %v5164_v24  ;;  %4222 = vmatpush3.msra.mxu0 %v5248_v50 }
 0x306   :  { %1113 = vmatprep.subr.mxu1 %v5167_v26  ;;  %4223 = vmatprep.subr.mxu0 %v6993_v6 }
 0x307   :  { %1114 = vmatpush1.msra.mxu1 %v5170_v28  ;;  %4224 = vmatpush3.msra.mxu0 %v5254_v51 }
 0x308   :  { %1115 = vmatprep.subr.mxu1 %v5174_v29  ;;  %4225 = vmatprep.subr.mxu0 %v6993_v6 }
 0x309   :  { %1116 = vmatpush1.msra.mxu1 %v5177_v30  ;;  %4226 = vmatpush3.msra.mxu0 %v5260_v52 }
 0x30a   :  { %1117 = vmatprep.subr.mxu1 %v5180_v31  ;;  %4227 = vmatprep.subr.mxu0 %v6993_v6 }
 0x30b   :  { %1118 = vmatpush1.msra.mxu1 %v5183_v32  ;;  %4228 = vmatpush3.msra.mxu0 %v5266_v53 }
 0x30c   :  { %1119 = vmatprep.subr.mxu1 %v5189_v34  ;;  %4229 = vmatprep.subr.mxu0 %v6993_v6 }
 0x30d   :  { %1120 = vmatpush1.msra.mxu1 %v5192_v35  ;;  %4230 = vmatpush3.msra.mxu0 %v5272_v54 }
 0x30e   :  { %1121 = vmatprep.subr.mxu1 %v5196_v36  ;;  %4231 = vmatprep.subr.mxu0 %v6993_v6 }
 0x30f   :  { %1122 = vmatpush1.msra.mxu1 %v5200_v37  ;;  %4232 = vmatpush3.msra.mxu0 %v5278_v55 }
 0x310   :  { %1123 = vmatprep.subr.mxu1 %v5206_v39  ;;  %4233 = vmatprep.subr.mxu0 %v6993_v6 }
 0x311   :  { %1124 = vmatpush1.msra.mxu1 %v5209_v40  ;;  %4234 = vmatpush3.msra.mxu0 %v5284_v56 }
 0x312   :  { %1125 = vmatprep.subr.mxu1 %v5213_v41  ;;  %4235 = vmatprep.subr.mxu0 %v6993_v6 }
 0x313   :  { %1126 = vmatpush1.msra.mxu1 %v5217_v42  ;;  %4236 = vmatpush3.msra.mxu0 %v5290_v57 }
 0x314   :  { %1127 = vmatprep.subr.mxu1 %v5223_v44  ;;  %4237 = vmatprep.subr.mxu0 %v6993_v6 }
 0x315   :  { %1128 = vmatpush1.msra.mxu1 %v6994_v23  ;;  %4238 = vmatpush3.msra.mxu0 %v7004_v46  ;;  %v7011_v46 = vld [vmem:[#allocation22_spill] sm:$0xff] }
 0x316   :  { %1129 = vmatprep.subr.mxu1 %v7005_v2  ;;  %4239 = vmatprep.subr.mxu0 %v6993_v6 }
 0x317   :  { %1130 = vmatpush1.msra.mxu1 %v7006_v15  ;;  %1163 = vmatprep.mubr.f32.mxu1 %v6993_v6 }
 0x318   :  { %4240 = vmatpush3.msra.mxu0 %v7007_v1  ;;  %4241 = vmatprep.mubr.msk.f32.mxu0 %vm5021_vm2, %v6993_v6 }
 0x319   :  { %1268 = vmatprep.subr.mxu1 %v7008_v59  ;;  %4244 = vmatprep.subr.mxu0 %v6993_v6 }
 0x3b8   :  { %v996_v12 = vpop.f32.mrf.mxu1  ;;  %v1067_v16 = vpop.f32.mrf.mxu0 }
 0x3b9   :  { %v1071_v58 = vadd.f32 %v996_v12, %v7009_v62  ;;  %v1085_v59 = vadd.f32 %v5429_v9, %v1067_v16  ;;  %v5690_v16 = vld [vmem:[#allocation7 + $0x148] sm:$0xff] }
 0x3ba   :  { %v4208_v47 = vpop.f32.mrf.mxu0  ;;  %v998_v20 = vpop.f32.mrf.mxu1 }
 0x3bb   :  { %v3684_v60 = vmul.f32 -1.442695, %v1071_v58  ;;  %v1072_v18 = vadd.f32 %v998_v20, %v7010_v25 }
 0x3bd   :  { %4734 = vpow2.f32 %v3684_v60  ;;  %v3685_v45 = vmul.f32 -1.442695, %v1072_v18  ;;  %v5693_v18 = vld [vmem:[#allocation7 + $0x128] sm:$0xff] }
 0x3bf   :  { %4736 = vpow2.f32 %v3685_v45  ;;  %v5697_v45 = vld [vmem:[#allocation7 + $0x120] sm:$0xff] }
 0x3ca   :  { %v4735_v63 = vpop.eup %4734 }
 0x3cb   :  { %v1079_v27 = vadd.f32 1.0, %v4735_v63  ;;  %v5701_v63 = vld [vmem:[#allocation7 + $0x110] sm:$0xff] }
 0x3cc   :  { %v4737_v8 = vpop.eup %4736 }
 0x3cd   :  { %4738 = vrcp.f32 %v1079_v27  ;;  %v1080_v1 = vadd.f32 1.0, %v4737_v8  ;;  %v5670_v8 = vld [vmem:[#allocation7 + $0x178] sm:$0xff]  ;;  %v5705_v27 = vld [vmem:[#allocation7 + $0x108] sm:$0xff] }
 0x3cf   :  { %4740 = vrcp.f32 %v1080_v1  ;;  %v5687_v1 = vld [vmem:[#allocation7 + $0x138] sm:$0xff] }
 0x3da   :  { %v4739_v15 = vpop.eup %4738 }
 0x3db   :  { %v1086_v2 = vmul.f32 %v4739_v15, %v1085_v59  ;;  %v5683_v15 = vld [vmem:[#allocation7 + $0x140] sm:$0xff]  ;;  %v5709_v59 = vld [vmem:[#allocation7 + $0xf8] sm:$0xff] }
 0x3dc   :  { %v4741_v62 = vpop.eup %4740 }
 0x3dd   :  { %v1087_v12 = vadd.f32 %v1086_v2, %v7011_v46  ;;  %v1089_v58 = vsub.f32 1.0, %v4741_v62  ;;  %v1091_v20 = vmul.f32 %v4741_v62, %v5509_v61  ;;  %v5677_v46 = vld [vmem:[#allocation7 + $0x150] sm:$0xff]  ;;  %v5680_v2 = vld [vmem:[#allocation7 + $0x160] sm:$0xff]  ;;  %v5721_v62 = vld [vmem:[#allocation7 + $0xd8] sm:$0xff] }
 0x3df   :  { %4742 = vtanh.f32 %v1087_v12  ;;  %v5713_v12 = vld [vmem:[#allocation7 + $0xf0] sm:$0xff] }
 0x3ec   :  { %v4743_v47 = vpop.eup %4742 }
 0x3ed   :  { %v1090_v60 = vmul.f32 %v4743_v47, %v1089_v58  ;;  %v5729_v58 = vld [vmem:[#allocation7 + $0xc0] sm:$0xff]  ;;  %v5737_v47 = vld [vmem:[#allocation7 + $0xa8] sm:$0xff] }
 0x3ef   :  { %v5585_v25 = vadd.f32 %v1091_v20, %v1090_v60  ;;  %v5745_v60 = vld [vmem:[#allocation7 + $0x90] sm:$0xff]  ;;  %v5753_v20 = vld [vmem:[#allocation7 + $0x78] sm:$0xff] }
 0x3f1   :  { %7012 = vst [vmem:[#allocation19_spill] sm:$0xff] %v5585_v25  ;;  %1164 = vmatmul.mubr.f32.vlgmr.msra.gmra.mxu1 %v5585_v25  ;;  %4242 = vmatmul.mubr.f32.vlgmr.msra.gmra.mxu0 %v5585_v25 }
 0x3f2   :  { %1269 = vmatpush1.msra.mxu1 %v5124_v0  ;;  %4245 = vmatpush3.msra.mxu0 %v5130_v5  ;;  %v7013_v0 = vld [vmem:[#allocation15_spill] sm:$0xff]  ;;  %v7016_v5 = vld [vmem:[#allocation16_spill] sm:$0xff] }
 0x3f3   :  { %1270 = vmatprep.subr.mxu1 %v5126_v3  ;;  %4246 = vmatprep.subr.mxu0 %v6993_v6  ;;  %v7014_v3 = vld [vmem:[#allocation13_spill] sm:$0xff] }
 0x3f4   :  { %1271 = vmatpush1.msra.mxu1 %v5128_v4  ;;  %4247 = vmatpush3.msra.mxu0 %v5185_v33  ;;  %v7015_v4 = vld [vmem:[#allocation14_spill] sm:$0xff] }
 0x3f5   :  { %1272 = vmatprep.subr.mxu1 %v5133_v7  ;;  %4248 = vmatprep.subr.mxu0 %v6993_v6  ;;  %v5654_v7 = vld [vmem:[#allocation7 + $0x170] sm:$0xff] }
 0x3f6   :  { %1273 = vmatpush1.msra.mxu1 %v5137_v10  ;;  %4249 = vmatpush3.msra.mxu0 %v5202_v38 }
 0x3f7   :  { %1274 = vmatprep.subr.mxu1 %v5140_v11  ;;  %4250 = vmatprep.subr.mxu0 %v6993_v6 }
 0x3f8   :  { %1275 = vmatpush1.msra.mxu1 %v5144_v13  ;;  %4251 = vmatpush3.msra.mxu0 %v5219_v43  ;;  %v7017_v13 = vld [vmem:[#allocation26_spill] sm:$0xff] }
 0x3f9   :  { %1276 = vmatprep.subr.mxu1 %v5147_v14  ;;  %4252 = vmatprep.subr.mxu0 %v6993_v6 }
 0x3fa   :  { %1277 = vmatpush1.msra.mxu1 %v5150_v17  ;;  %4253 = vmatpush3.msra.mxu0 %v5236_v48 }
 0x3fb   :  { %1278 = vmatprep.subr.mxu1 %v5154_v19  ;;  %4254 = vmatprep.subr.mxu0 %v6993_v6 }
 0x3fc   :  { %1279 = vmatpush1.msra.mxu1 %v5157_v21  ;;  %4255 = vmatpush3.msra.mxu0 %v5242_v49 }
 0x3fd   :  { %1280 = vmatprep.subr.mxu1 %v5161_v22  ;;  %4256 = vmatprep.subr.mxu0 %v6993_v6  ;;  %v7018_v22 = vld [vmem:[#allocation28_spill] sm:$0xff] }
 0x3fe   :  { %1281 = vmatpush1.msra.mxu1 %v5164_v24  ;;  %4257 = vmatpush3.msra.mxu0 %v5248_v50 }
 0x3ff   :  { %1282 = vmatprep.subr.mxu1 %v5167_v26  ;;  %4258 = vmatprep.subr.mxu0 %v6993_v6 }
 0x400   :  { %1283 = vmatpush1.msra.mxu1 %v5170_v28  ;;  %4259 = vmatpush3.msra.mxu0 %v5254_v51 }
 0x401   :  { %1284 = vmatprep.subr.mxu1 %v5174_v29  ;;  %4260 = vmatprep.subr.mxu0 %v6993_v6 }
 0x402   :  { %1285 = vmatpush1.msra.mxu1 %v5177_v30  ;;  %4261 = vmatpush3.msra.mxu0 %v5260_v52 }
 0x403   :  { %1286 = vmatprep.subr.mxu1 %v5180_v31  ;;  %4262 = vmatprep.subr.mxu0 %v6993_v6 }
 0x404   :  { %1287 = vmatpush1.msra.mxu1 %v5183_v32  ;;  %4263 = vmatpush3.msra.mxu0 %v5266_v53 }
 0x405   :  { %1288 = vmatprep.subr.mxu1 %v5189_v34  ;;  %4264 = vmatprep.subr.mxu0 %v6993_v6 }
 0x406   :  { %1289 = vmatpush1.msra.mxu1 %v5192_v35  ;;  %4265 = vmatpush3.msra.mxu0 %v5272_v54  ;;  %v7019_v35 = vld [vmem:[#allocation20_spill] sm:$0xff] }
 0x407   :  { %1290 = vmatprep.subr.mxu1 %v5196_v36  ;;  %4266 = vmatprep.subr.mxu0 %v6993_v6 }
 0x408   :  { %1291 = vmatpush1.msra.mxu1 %v5200_v37  ;;  %4267 = vmatpush3.msra.mxu0 %v5278_v55 }
 0x409   :  { %1292 = vmatprep.subr.mxu1 %v5206_v39  ;;  %4268 = vmatprep.subr.mxu0 %v6993_v6 }
 0x40a   :  { %1293 = vmatpush1.msra.mxu1 %v5209_v40  ;;  %4269 = vmatpush3.msra.mxu0 %v5284_v56 }
 0x40b   :  { %1294 = vmatprep.subr.mxu1 %v5213_v41  ;;  %4270 = vmatprep.subr.mxu0 %v6993_v6 }
 0x40c   :  { %1295 = vmatpush1.msra.mxu1 %v5217_v42  ;;  %4271 = vmatpush3.msra.mxu0 %v5290_v57 }
 0x40d   :  { %1296 = vmatprep.subr.mxu1 %v5223_v44  ;;  %4272 = vmatprep.subr.mxu0 %v6993_v6  ;;  %v5667_v44 = vld [vmem:[#allocation7 + $0x168] sm:$0xff] }
 0x40e   :  { %1297 = vmatpush1.msra.mxu1 %v6994_v23  ;;  %4273 = vmatpush3.msra.mxu0 %v7013_v0  ;;  %v5673_v23 = vld [vmem:[#allocation7 + $0x158] sm:$0xff] }
 0x40f   :  { %1298 = vmatprep.subr.mxu1 %v7014_v3  ;;  %4274 = vmatprep.subr.mxu0 %v6993_v6  ;;  %v5761_v3 = vld [vmem:[#allocation7 + $0x60] sm:$0xff] }
 0x410   :  { %1299 = vmatpush1.msra.mxu1 %v7015_v4  ;;  %1332 = vmatprep.mubr.f32.mxu1 %v6993_v6  ;;  %v5769_v4 = vld [vmem:[#allocation7 + $0x48] sm:$0xff] }
 0x411   :  { %4275 = vmatpush3.msra.mxu0 %v7016_v5  ;;  %4276 = vmatprep.mubr.msk.f32.mxu0 %vm5021_vm2, %v6993_v6 }
 0x412   :  { %1437 = vmatprep.subr.mxu1 %v5654_v7  ;;  %4279 = vmatprep.subr.mxu0 %v6993_v6 }
 0x4b1   :  { %v1165_v10 = vpop.f32.mrf.mxu1  ;;  %v1236_v11 = vpop.f32.mrf.mxu0 }
 0x4b2   :  { %v1240_v14 = vadd.f32 %v1165_v10, %v7017_v13  ;;  %v1254_v32 = vadd.f32 %v5429_v9, %v1236_v11  ;;  %v5777_v10 = vld [vmem:[#allocation7 + $0x30] sm:$0xff]  ;;  %v5785_v11 = vld [vmem:[#allocation7 + $0x18] sm:$0xff]  ;;  %v5793_v13 = vld [vmem:[#allocation7] sm:$0xff] }
 0x4b3   :  { %v4243_v17 = vpop.f32.mrf.mxu0  ;;  %v1167_v21 = vpop.f32.mrf.mxu1  ;;  %7022 = vst [vmem:[#allocation11_spill] sm:$0xff] %v5793_v13 }
 0x4b4   :  { %v3686_v19 = vmul.f32 -1.442695, %v1240_v14  ;;  %v1241_v24 = vadd.f32 %v1167_v21, %v7018_v22  ;;  %v7023_v14 = vld [vmem:[#allocation30_spill] sm:$0xff] }
 0x4b6   :  { %4744 = vpow2.f32 %v3686_v19  ;;  %v3687_v26 = vmul.f32 -1.442695, %v1241_v24  ;;  %v7024_v24 = vld [vmem:[#allocation32_spill] sm:$0xff] }
 0x4b8   :  { %4746 = vpow2.f32 %v3687_v26 }
 0x4c3   :  { %v4745_v28 = vpop.eup %4744 }
 0x4c4   :  { %v1248_v29 = vadd.f32 1.0, %v4745_v28 }
 0x4c5   :  { %v4747_v30 = vpop.eup %4746 }
 0x4c6   :  { %4748 = vrcp.f32 %v1248_v29  ;;  %v1249_v31 = vadd.f32 1.0, %v4747_v30 }
 0x4c8   :  { %4750 = vrcp.f32 %v1249_v31 }
 0x4d3   :  { %v4749_v33 = vpop.eup %4748 }
 0x4d4   :  { %v1255_v34 = vmul.f32 %v4749_v33, %v1254_v32 }
 0x4d5   :  { %v4751_v37 = vpop.eup %4750 }
 0x4d6   :  { %v1256_v36 = vadd.f32 %v1255_v34, %v7019_v35  ;;  %v1258_v38 = vsub.f32 1.0, %v4751_v37  ;;  %v1260_v41 = vmul.f32 %v4751_v37, %v5585_v25  ;;  %v7025_v35 = vld [vmem:[#allocation27_spill] sm:$0xff] }
 0x4d8   :  { %4752 = vtanh.f32 %v1256_v36 }
 0x4e5   :  { %v4753_v39 = vpop.eup %4752 }
 0x4e6   :  { %v1259_v40 = vmul.f32 %v4753_v39, %v1258_v38 }
 0x4e8   :  { %v5663_v42 = vadd.f32 %v1260_v41, %v1259_v40 }
 0x4ea   :  { %7020 = vst [vmem:[#allocation21_spill] sm:$0xff] %v5663_v42  ;;  %1333 = vmatmul.mubr.f32.vlgmr.msra.gmra.mxu1 %v5663_v42  ;;  %4277 = vmatmul.mubr.f32.vlgmr.msra.gmra.mxu0 %v5663_v42 }
 0x4eb   :  { %1438 = vmatpush1.msra.mxu1 %v5667_v44  ;;  %4280 = vmatpush3.msra.mxu0 %v5670_v8 }
 0x4ec   :  { %1439 = vmatprep.subr.mxu1 %v5673_v23  ;;  %4281 = vmatprep.subr.mxu0 %v6993_v6 }
 0x4ed   :  { %1440 = vmatpush1.msra.mxu1 %v5677_v46  ;;  %4282 = vmatpush3.msra.mxu0 %v5680_v2 }
 0x4ee   :  { %1441 = vmatprep.subr.mxu1 %v5683_v15  ;;  %4283 = vmatprep.subr.mxu0 %v6993_v6 }
 0x4ef   :  { %1442 = vmatpush1.msra.mxu1 %v5687_v1  ;;  %4284 = vmatpush3.msra.mxu0 %v5690_v16 }
 0x4f0   :  { %1443 = vmatprep.subr.mxu1 %v5693_v18  ;;  %4285 = vmatprep.subr.mxu0 %v6993_v6 }
 0x4f1   :  { %1444 = vmatpush1.msra.mxu1 %v5697_v45  ;;  %4286 = vmatpush3.msra.mxu0 %v5219_v43  ;;  %v5717_v43 = vld [vmem:[#allocation7 + $0xe0] sm:$0xff] }
 0x4f2   :  { %1445 = vmatprep.subr.mxu1 %v5701_v63  ;;  %4287 = vmatprep.subr.mxu0 %v6993_v6 }
 0x4f3   :  { %1446 = vmatpush1.msra.mxu1 %v5705_v27  ;;  %4288 = vmatpush3.msra.mxu0 %v5236_v48  ;;  %v5725_v48 = vld [vmem:[#allocation7 + $0xc8] sm:$0xff] }
 0x4f4   :  { %1447 = vmatprep.subr.mxu1 %v5709_v59  ;;  %4289 = vmatprep.subr.mxu0 %v6993_v6 }
 0x4f5   :  { %1448 = vmatpush1.msra.mxu1 %v5713_v12  ;;  %4290 = vmatpush3.msra.mxu0 %v5242_v49  ;;  %v5733_v49 = vld [vmem:[#allocation7 + $0xb0] sm:$0xff] }
 0x4f6   :  { %1449 = vmatprep.subr.mxu1 %v5717_v43  ;;  %4291 = vmatprep.subr.mxu0 %v6993_v6 }
 0x4f7   :  { %1450 = vmatpush1.msra.mxu1 %v5721_v62  ;;  %4292 = vmatpush3.msra.mxu0 %v5248_v50  ;;  %v5741_v50 = vld [vmem:[#allocation7 + $0x98] sm:$0xff] }
 0x4f8   :  { %1451 = vmatprep.subr.mxu1 %v5725_v48  ;;  %4293 = vmatprep.subr.mxu0 %v6993_v6 }
 0x4f9   :  { %1452 = vmatpush1.msra.mxu1 %v5729_v58  ;;  %4294 = vmatpush3.msra.mxu0 %v5254_v51  ;;  %v5749_v51 = vld [vmem:[#allocation7 + $0x80] sm:$0xff] }
 0x4fa   :  { %1453 = vmatprep.subr.mxu1 %v5733_v49  ;;  %4295 = vmatprep.subr.mxu0 %v6993_v6 }
 0x4fb   :  { %1454 = vmatpush1.msra.mxu1 %v5737_v47  ;;  %4296 = vmatpush3.msra.mxu0 %v5260_v52  ;;  %v5757_v52 = vld [vmem:[#allocation7 + $0x68] sm:$0xff] }
 0x4fc   :  { %1455 = vmatprep.subr.mxu1 %v5741_v50  ;;  %4297 = vmatprep.subr.mxu0 %v6993_v6 }
 0x4fd   :  { %1456 = vmatpush1.msra.mxu1 %v5745_v60  ;;  %4298 = vmatpush3.msra.mxu0 %v5266_v53  ;;  %v5765_v53 = vld [vmem:[#allocation7 + $0x50] sm:$0xff] }
 0x4fe   :  { %1457 = vmatprep.subr.mxu1 %v5749_v51  ;;  %4299 = vmatprep.subr.mxu0 %v6993_v6 }
 0x4ff   :  { %1458 = vmatpush1.msra.mxu1 %v5753_v20  ;;  %4300 = vmatpush3.msra.mxu0 %v5272_v54  ;;  %v5773_v54 = vld [vmem:[#allocation7 + $0x38] sm:$0xff] }
 0x500   :  { %1459 = vmatprep.subr.mxu1 %v5757_v52  ;;  %4301 = vmatprep.subr.mxu0 %v6993_v6 }
 0x501   :  { %1460 = vmatpush1.msra.mxu1 %v5761_v3  ;;  %4302 = vmatpush3.msra.mxu0 %v5278_v55  ;;  %v5781_v55 = vld [vmem:[#allocation7 + $0x20] sm:$0xff] }
 0x502   :  { %1461 = vmatprep.subr.mxu1 %v5765_v53  ;;  %4303 = vmatprep.subr.mxu0 %v6993_v6 }
 0x503   :  { %1462 = vmatpush1.msra.mxu1 %v5769_v4  ;;  %4304 = vmatpush3.msra.mxu0 %v5284_v56  ;;  %v5789_v56 = vld [vmem:[#allocation7 + $0x8] sm:$0xff] }
 0x504   :  { %1463 = vmatprep.subr.mxu1 %v5773_v54  ;;  %4305 = vmatprep.subr.mxu0 %v6993_v6  ;;  %7021 = vst [vmem:[#allocation18_spill] sm:$0xff] %v5789_v56 }
 0x505   :  { %1464 = vmatpush1.msra.mxu1 %v5777_v10  ;;  %4306 = vmatpush3.msra.mxu0 %v5290_v57 }
 0x506   :  { %1465 = vmatprep.subr.mxu1 %v5781_v55  ;;  %4307 = vmatprep.subr.mxu0 %v6993_v6 }
 0x507   :  { %1466 = vmatpush1.msra.mxu1 %v5785_v11  ;;  %4308 = vmatpush3.msra.mxu0 %v7013_v0 }
 0x508   :  { %1467 = vmatprep.subr.mxu1 %v5789_v56  ;;  %4309 = vmatprep.subr.mxu0 %v6993_v6 }
 0x509   :  { %1468 = vmatpush1.msra.mxu1 %v5793_v13  ;;  %1501 = vmatprep.mubr.f32.mxu1 %v6993_v6 }
 0x50a   :  { %4310 = vmatpush3.msra.mxu0 %v7016_v5  ;;  %4311 = vmatprep.mubr.msk.f32.mxu0 %vm5021_vm2, %v6993_v6 }
 0x50b   :  { %1606 = vmatprep.subr.mxu1 %v5654_v7  ;;  %4314 = vmatprep.subr.mxu0 %v6993_v6 }
 0x5aa   :  { %v1334_v57 = vpop.f32.mrf.mxu1  ;;  %v1405_v0 = vpop.f32.mrf.mxu0 }
 0x5ab   :  { %v1409_v17 = vadd.f32 %v1334_v57, %v7023_v14  ;;  %v1423_v32 = vadd.f32 %v5429_v9, %v1405_v0  ;;  %v5824_v0 = vld [vmem:[#allocation7 + $0x130] sm:$0xff]  ;;  %v5830_v14 = vld [vmem:[#allocation7 + $0x118] sm:$0xff] }
 0x5ac   :  { %v4278_v19 = vpop.f32.mrf.mxu0  ;;  %v1336_v22 = vpop.f32.mrf.mxu1 }
 0x5ad   :  { %v3688_v21 = vmul.f32 -1.442695, %v1409_v17  ;;  %v1410_v26 = vadd.f32 %v1336_v22, %v7024_v24  ;;  %v5836_v17 = vld [vmem:[#allocation7 + $0x100] sm:$0xff]  ;;  %v5842_v19 = vld [vmem:[#allocation7 + $0xe8] sm:$0xff]  ;;  %v5854_v22 = vld [vmem:[#allocation7 + $0xb8] sm:$0xff] }
 0x5ae   :  { %v5860_v24 = vld [vmem:[#allocation7 + $0xa0] sm:$0xff] }
 0x5af   :  { %4754 = vpow2.f32 %v3688_v21  ;;  %v3689_v28 = vmul.f32 -1.442695, %v1410_v26  ;;  %v5848_v21 = vld [vmem:[#allocation7 + $0xd0] sm:$0xff]  ;;  %v5866_v26 = vld [vmem:[#allocation7 + $0x88] sm:$0xff] }
 0x5b1   :  { %4756 = vpow2.f32 %v3689_v28  ;;  %v5872_v28 = vld [vmem:[#allocation7 + $0x70] sm:$0xff] }
 0x5bc   :  { %v4755_v5 = vpop.eup %4754 }
 0x5bd   :  { %v1417_v29 = vadd.f32 1.0, %v4755_v5  ;;  %v5878_v5 = vld [vmem:[#allocation7 + $0x58] sm:$0xff] }
 0x5be   :  { %v4757_v30 = vpop.eup %4756 }
 0x5bf   :  { %4758 = vrcp.f32 %v1417_v29  ;;  %v1418_v31 = vadd.f32 1.0, %v4757_v30  ;;  %v5884_v29 = vld [vmem:[#allocation7 + $0x40] sm:$0xff]  ;;  %v5890_v30 = vld [vmem:[#allocation7 + $0x28] sm:$0xff] }
 0x5c0   :  { %7026 = vst [vmem:[#allocation23_spill] sm:$0xff] %v5890_v30 }
 0x5c1   :  { %4760 = vrcp.f32 %v1418_v31  ;;  %v5897_v31 = vld [vmem:[#allocation7 + $0x10] sm:$0xff] }
 0x5c2   :  { %7027 = vst [vmem:[#allocation24_spill] sm:$0xff] %v5897_v31 }
 0x5cc   :  { %v4759_v33 = vpop.eup %4758 }
 0x5cd   :  { %v1424_v34 = vmul.f32 %v4759_v33, %v1423_v32 }
 0x5ce   :  { %v4761_v37 = vpop.eup %4760 }
 0x5cf   :  { %v1425_v36 = vadd.f32 %v1424_v34, %v7025_v35  ;;  %v1427_v38 = vsub.f32 1.0, %v4761_v37  ;;  %v1429_v41 = vmul.f32 %v4761_v37, %v5663_v42  ;;  %v7028_v34 = vld [vmem:[#allocation33_spill] sm:$0xff] }
 0x5d1   :  { %4762 = vtanh.f32 %v1425_v36 }
 0x5de   :  { %v4763_v39 = vpop.eup %4762 }
 0x5df   :  { %v1428_v40 = vmul.f32 %v4763_v39, %v1427_v38  ;;  %v7029_v39 = vld [vmem:[#allocation34_spill] sm:$0xff] }
 0x5e1   :  { %v5807_v57 = vadd.f32 %v1429_v41, %v1428_v40 }
 0x5e3   :  { %1502 = vmatmul.mubr.f32.vlgmr.msra.gmra.mxu1 %v5807_v57  ;;  %4312 = vmatmul.mubr.f32.vlgmr.msra.gmra.mxu0 %v5807_v57 }
 0x5e4   :  { %1607 = vmatpush1.msra.mxu1 %v5667_v44  ;;  %4315 = vmatpush3.msra.mxu0 %v5670_v8 }
 0x5e5   :  { %1608 = vmatprep.subr.mxu1 %v5673_v23  ;;  %4316 = vmatprep.subr.mxu0 %v6993_v6 }
 0x5e6   :  { %1609 = vmatpush1.msra.mxu1 %v5677_v46  ;;  %4317 = vmatpush3.msra.mxu0 %v5680_v2 }
 0x5e7   :  { %1610 = vmatprep.subr.mxu1 %v5683_v15  ;;  %4318 = vmatprep.subr.mxu0 %v6993_v6 }
 0x5e8   :  { %1611 = vmatpush1.msra.mxu1 %v5687_v1  ;;  %4319 = vmatpush3.msra.mxu0 %v5690_v16 }
 0x5e9   :  { %1612 = vmatprep.subr.mxu1 %v5693_v18  ;;  %4320 = vmatprep.subr.mxu0 %v6993_v6 }
 0x5ea   :  { %1613 = vmatpush1.msra.mxu1 %v5697_v45  ;;  %4321 = vmatpush3.msra.mxu0 %v5824_v0 }
 0x5eb   :  { %1614 = vmatprep.subr.mxu1 %v5701_v63  ;;  %4322 = vmatprep.subr.mxu0 %v6993_v6 }
 0x5ec   :  { %1615 = vmatpush1.msra.mxu1 %v5705_v27  ;;  %4323 = vmatpush3.msra.mxu0 %v5830_v14 }
 0x5ed   :  { %1616 = vmatprep.subr.mxu1 %v5709_v59  ;;  %4324 = vmatprep.subr.mxu0 %v6993_v6 }
 0x5ee   :  { %1617 = vmatpush1.msra.mxu1 %v5713_v12  ;;  %4325 = vmatpush3.msra.mxu0 %v5836_v17 }
 0x5ef   :  { %1618 = vmatprep.subr.mxu1 %v5717_v43  ;;  %4326 = vmatprep.subr.mxu0 %v6993_v6 }
 0x5f0   :  { %1619 = vmatpush1.msra.mxu1 %v5721_v62  ;;  %4327 = vmatpush3.msra.mxu0 %v5842_v19 }
 0x5f1   :  { %1620 = vmatprep.subr.mxu1 %v5725_v48  ;;  %4328 = vmatprep.subr.mxu0 %v6993_v6 }
 0x5f2   :  { %1621 = vmatpush1.msra.mxu1 %v5729_v58  ;;  %4329 = vmatpush3.msra.mxu0 %v5848_v21 }
 0x5f3   :  { %1622 = vmatprep.subr.mxu1 %v5733_v49  ;;  %4330 = vmatprep.subr.mxu0 %v6993_v6 }
 0x5f4   :  { %1623 = vmatpush1.msra.mxu1 %v5737_v47  ;;  %4331 = vmatpush3.msra.mxu0 %v5854_v22 }
 0x5f5   :  { %1624 = vmatprep.subr.mxu1 %v5741_v50  ;;  %4332 = vmatprep.subr.mxu0 %v6993_v6 }
 0x5f6   :  { %1625 = vmatpush1.msra.mxu1 %v5745_v60  ;;  %4333 = vmatpush3.msra.mxu0 %v5860_v24 }
 0x5f7   :  { %1626 = vmatprep.subr.mxu1 %v5749_v51  ;;  %4334 = vmatprep.subr.mxu0 %v6993_v6 }
 0x5f8   :  { %1627 = vmatpush1.msra.mxu1 %v5753_v20  ;;  %4335 = vmatpush3.msra.mxu0 %v5866_v26 }
 0x5f9   :  { %1628 = vmatprep.subr.mxu1 %v5757_v52  ;;  %4336 = vmatprep.subr.mxu0 %v6993_v6 }
 0x5fa   :  { %1629 = vmatpush1.msra.mxu1 %v5761_v3  ;;  %4337 = vmatpush3.msra.mxu0 %v5872_v28 }
 0x5fb   :  { %1630 = vmatprep.subr.mxu1 %v5765_v53  ;;  %4338 = vmatprep.subr.mxu0 %v6993_v6 }
 0x5fc   :  { %1631 = vmatpush1.msra.mxu1 %v5769_v4  ;;  %4339 = vmatpush3.msra.mxu0 %v5878_v5 }
 0x5fd   :  { %1632 = vmatprep.subr.mxu1 %v5773_v54  ;;  %4340 = vmatprep.subr.mxu0 %v6993_v6 }
 0x5fe   :  { %1633 = vmatpush1.msra.mxu1 %v5777_v10  ;;  %4341 = vmatpush3.msra.mxu0 %v5884_v29 }
 0x5ff   :  { %1634 = vmatprep.subr.mxu1 %v5781_v55  ;;  %4342 = vmatprep.subr.mxu0 %v6993_v6 }
 0x600   :  { %1635 = vmatpush1.msra.mxu1 %v5785_v11  ;;  %4343 = vmatpush3.msra.mxu0 %v5890_v30  ;;  %v7030_v30 = vld [vmem:[#allocation25_spill] sm:$0xff] }
 0x601   :  { %1636 = vmatprep.subr.mxu1 %v5789_v56  ;;  %4344 = vmatprep.subr.mxu0 %v6993_v6 }
 0x602   :  { %1637 = vmatpush1.msra.mxu1 %v5793_v13  ;;  %1670 = vmatprep.mubr.f32.mxu1 %v6993_v6 }
 0x603   :  { %4345 = vmatpush3.msra.mxu0 %v5897_v31  ;;  %4346 = vmatprep.mubr.msk.f32.mxu0 %vm5021_vm2, %v6993_v6 }
 0x604   :  { %1775 = vmatprep.subr.mxu1 %v5654_v7  ;;  %4349 = vmatprep.subr.mxu0 %v6993_v6 }
 0x6a3   :  { %v1503_v32 = vpop.f32.mrf.mxu1  ;;  %v1574_v33 = vpop.f32.mrf.mxu0 }
 0x6a4   :  { %v1578_v35 = vadd.f32 %v1503_v32, %v7028_v34  ;;  %v1592_v7 = vadd.f32 %v5429_v9, %v1574_v33  ;;  %v7031_v9 = vld [vmem:[#allocation23_spill] sm:$0xff]  ;;  %v1976_v33 = vld [vmem:[#allocation5 + $0x258] sm:$0xff] }
 0x6a5   :  { %v4313_v36 = vpop.f32.mrf.mxu0  ;;  %v1505_v38 = vpop.f32.mrf.mxu1 }
 0x6a6   :  { %v3690_v37 = vmul.f32 -1.442695, %v1578_v35  ;;  %v1579_v40 = vadd.f32 %v1505_v38, %v7029_v39 }
 0x6a8   :  { %4764 = vpow2.f32 %v3690_v37  ;;  %v3691_v41 = vmul.f32 -1.442695, %v1579_v40  ;;  %v1974_v40 = vld [vmem:[#allocation5 + $0x248] sm:$0xff] }
 0x6aa   :  { %4766 = vpow2.f32 %v3691_v41  ;;  %v1975_v41 = vld [vmem:[#allocation5 + $0x250] sm:$0xff] }
 0x6b5   :  { %v4765_v42 = vpop.eup %4764 }
 0x6b6   :  { %v1586_v25 = vadd.f32 1.0, %v4765_v42  ;;  %v7034_v42 = vld [vmem:[#allocation24_spill] sm:$0xff] }
 0x6b7   :  { %v4767_v61 = vpop.eup %4766 }
 0x6b8   :  { %4768 = vrcp.f32 %v1586_v25  ;;  %v1587_v31 = vadd.f32 1.0, %v4767_v61  ;;  %v7032_v61 = vld [vmem:[#allocation18_spill] sm:$0xff]  ;;  %v7033_v25 = vld [vmem:[#allocation11_spill] sm:$0xff] }
 0x6ba   :  { %4770 = vrcp.f32 %v1587_v31  ;;  %v1978_v31 = vld [vmem:[#allocation5 + $0x268] sm:$0xff] }
 0x6c5   :  { %v4769_v13 = vpop.eup %4768 }
 0x6c6   :  { %v1593_v56 = vmul.f32 %v4769_v13, %v1592_v7  ;;  %v1990_v13 = vld [vmem:[#allocation5 + $0x2c8] sm:$0xff]  ;;  %v1973_v7 = vld [vmem:[#allocation5 + $0x240] sm:$0xff] }
 0x6c7   :  { %v4771_v34 = vpop.eup %4770 }
 0x6c8   :  { %v1594_v32 = vadd.f32 %v1593_v56, %v7030_v30  ;;  %v1596_v35 = vsub.f32 1.0, %v4771_v34  ;;  %v1598_v38 = vmul.f32 %v4771_v34, %v5807_v57  ;;  %v1989_v56 = vld [vmem:[#allocation5 + $0x2c0] sm:$0xff]  ;;  %v1972_v34 = vld [vmem:[#allocation5 + $0x238] sm:$0xff] }
 0x6c9   :  { %v1977_v30 = vld [vmem:[#allocation5 + $0x260] sm:$0xff] }
 0x6ca   :  { %4772 = vtanh.f32 %v1594_v32  ;;  %v1971_v32 = vld [vmem:[#allocation5 + $0x230] sm:$0xff] }
 0x6d7   :  { %v4773_v36 = vpop.eup %4772 }
 0x6d8   :  { %v1597_v37 = vmul.f32 %v4773_v36, %v1596_v35  ;;  %v1970_v35 = vld [vmem:[#allocation5 + $0x228] sm:$0xff]  ;;  %v1968_v36 = vld [vmem:[#allocation5 + $0x218] sm:$0xff] }
 0x6da   :  { %v5909_v39 = vadd.f32 %v1598_v38, %v1597_v37  ;;  %v1969_v37 = vld [vmem:[#allocation5 + $0x220] sm:$0xff]  ;;  %v1967_v38 = vld [vmem:[#allocation5 + $0x210] sm:$0xff] }
 0x6dc   :  { %1671 = vmatmul.mubr.f32.vlgmr.msra.gmra.mxu1 %v5909_v39  ;;  %4347 = vmatmul.mubr.f32.vlgmr.msra.gmra.mxu0 %v5909_v39 }
 0x6dd   :  { %1776 = vmatpush1.msra.mxu1 %v5667_v44  ;;  %4350 = vmatpush3.msra.mxu0 %v5670_v8  ;;  %v1995_v44 = vld [vmem:[#allocation5 + $0x2f0] sm:$0xff]  ;;  %v1996_v8 = vld [vmem:[#allocation5 + $0x2f8] sm:$0xff] }
 0x6de   :  { %1777 = vmatprep.subr.mxu1 %v5673_v23  ;;  %4351 = vmatprep.subr.mxu0 %v6993_v6 }
 0x6df   :  { %1778 = vmatpush1.msra.mxu1 %v5677_v46  ;;  %4352 = vmatpush3.msra.mxu0 %v5680_v2  ;;  %v7035_v2 = vld [vmem:[#allocation35_spill] sm:$0xff] }
 0x6e0   :  { %1779 = vmatprep.subr.mxu1 %v5683_v15  ;;  %4353 = vmatprep.subr.mxu0 %v6993_v6 }
 0x6e1   :  { %1780 = vmatpush1.msra.mxu1 %v5687_v1  ;;  %4354 = vmatpush3.msra.mxu0 %v5690_v16 }
 0x6e2   :  { %1781 = vmatprep.subr.mxu1 %v5693_v18  ;;  %4355 = vmatprep.subr.mxu0 %v6993_v6 }
 0x6e3   :  { %1782 = vmatpush1.msra.mxu1 %v5697_v45  ;;  %4356 = vmatpush3.msra.mxu0 %v5824_v0  ;;  %v7036_v45 = vld [vmem:[#allocation36_spill] sm:$0xff]  ;;  %v1988_v0 = vld [vmem:[#allocation5 + $0x2b8] sm:$0xff] }
 0x6e4   :  { %1783 = vmatprep.subr.mxu1 %v5701_v63  ;;  %4357 = vmatprep.subr.mxu0 %v6993_v6 }
 0x6e5   :  { %1784 = vmatpush1.msra.mxu1 %v5705_v27  ;;  %4358 = vmatpush3.msra.mxu0 %v5830_v14  ;;  %v7038_v14 = vld [vmem:[#allocation39_spill] sm:$0xff] }
 0x6e6   :  { %1785 = vmatprep.subr.mxu1 %v5709_v59  ;;  %4359 = vmatprep.subr.mxu0 %v6993_v6 }
 0x6e7   :  { %1786 = vmatpush1.msra.mxu1 %v5713_v12  ;;  %4360 = vmatpush3.msra.mxu0 %v5836_v17  ;;  %v1986_v17 = vld [vmem:[#allocation5 + $0x2a8] sm:$0xff] }
 0x6e8   :  { %1787 = vmatprep.subr.mxu1 %v5717_v43  ;;  %4361 = vmatprep.subr.mxu0 %v6993_v6 }
 0x6e9   :  { %1788 = vmatpush1.msra.mxu1 %v5721_v62  ;;  %4362 = vmatpush3.msra.mxu0 %v5842_v19  ;;  %v1987_v19 = vld [vmem:[#allocation5 + $0x2b0] sm:$0xff] }
 0x6ea   :  { %1789 = vmatprep.subr.mxu1 %v5725_v48  ;;  %4363 = vmatprep.subr.mxu0 %v6993_v6  ;;  %v5983_v48 = vld [vmem:[%s6907_s6] ss:$0 sm:$0xff] }
 0x6eb   :  { %1790 = vmatpush1.msra.mxu1 %v5729_v58  ;;  %4364 = vmatpush3.msra.mxu0 %v5848_v21  ;;  %v1985_v21 = vld [vmem:[#allocation5 + $0x2a0] sm:$0xff] }
 0x6ec   :  { %1791 = vmatprep.subr.mxu1 %v5733_v49  ;;  %4365 = vmatprep.subr.mxu0 %v6993_v6 }
 0x6ed   :  { %1792 = vmatpush1.msra.mxu1 %v5737_v47  ;;  %4366 = vmatpush3.msra.mxu0 %v5854_v22  ;;  %v1983_v22 = vld [vmem:[#allocation5 + $0x290] sm:$0xff] }
 0x6ee   :  { %1793 = vmatprep.subr.mxu1 %v5741_v50  ;;  %4367 = vmatprep.subr.mxu0 %v6993_v6  ;;  %v7037_v50 = vld [vmem:[#allocation31_spill] sm:$0xff] }
 0x6ef   :  { %1794 = vmatpush1.msra.mxu1 %v5745_v60  ;;  %4368 = vmatpush3.msra.mxu0 %v5860_v24  ;;  %v1984_v24 = vld [vmem:[#allocation5 + $0x298] sm:$0xff] }
 0x6f0   :  { %1795 = vmatprep.subr.mxu1 %v5749_v51  ;;  %4369 = vmatprep.subr.mxu0 %v6993_v6 }
 0x6f1   :  { %1796 = vmatpush1.msra.mxu1 %v5753_v20  ;;  %4370 = vmatpush3.msra.mxu0 %v5866_v26  ;;  %v1982_v26 = vld [vmem:[#allocation5 + $0x288] sm:$0xff] }
 0x6f2   :  { %1797 = vmatprep.subr.mxu1 %v5757_v52  ;;  %4371 = vmatprep.subr.mxu0 %v6993_v6 }
 0x6f3   :  { %1798 = vmatpush1.msra.mxu1 %v5761_v3  ;;  %4372 = vmatpush3.msra.mxu0 %v5872_v28  ;;  %v1980_v28 = vld [vmem:[#allocation5 + $0x278] sm:$0xff] }
 0x6f4   :  { %1799 = vmatprep.subr.mxu1 %v5765_v53  ;;  %4373 = vmatprep.subr.mxu0 %v6993_v6 }
 0x6f5   :  { %1800 = vmatpush1.msra.mxu1 %v5769_v4  ;;  %4374 = vmatpush3.msra.mxu0 %v5878_v5  ;;  %v1981_v5 = vld [vmem:[#allocation5 + $0x280] sm:$0xff] }
 0x6f6   :  { %1801 = vmatprep.subr.mxu1 %v5773_v54  ;;  %4375 = vmatprep.subr.mxu0 %v6993_v6  ;;  %v1994_v54 = vld [vmem:[#allocation5 + $0x2e8] sm:$0xff] }
 0x6f7   :  { %1802 = vmatpush1.msra.mxu1 %v5777_v10  ;;  %4376 = vmatpush3.msra.mxu0 %v5884_v29  ;;  %v1992_v10 = vld [vmem:[#allocation5 + $0x2d8] sm:$0xff]  ;;  %v1979_v29 = vld [vmem:[#allocation5 + $0x270] sm:$0xff] }
 0x6f8   :  { %1803 = vmatprep.subr.mxu1 %v5781_v55  ;;  %4377 = vmatprep.subr.mxu0 %v6993_v6  ;;  %v1993_v55 = vld [vmem:[#allocation5 + $0x2e0] sm:$0xff] }
 0x6f9   :  { %1804 = vmatpush1.msra.mxu1 %v5785_v11  ;;  %4378 = vmatpush3.msra.mxu0 %v7031_v9  ;;  %v1991_v11 = vld [vmem:[#allocation5 + $0x2d0] sm:$0xff]  ;;  %v1965_v9 = vld [vmem:[#allocation5 + $0x200] sm:$0xff] }
 0x6fa   :  { %1805 = vmatprep.subr.mxu1 %v7032_v61  ;;  %4379 = vmatprep.subr.mxu0 %v6993_v6  ;;  %v1966_v61 = vld [vmem:[#allocation5 + $0x208] sm:$0xff] }
 0x6fb   :  { %1806 = vmatpush1.msra.mxu1 %v7033_v25  ;;  %4380 = vmatpush3.msra.mxu0 %v7034_v42  ;;  %v1964_v25 = vld [vmem:[#allocation5 + $0x1f8] sm:$0xff]  ;;  %v1962_v42 = vld [vmem:[#allocation5 + $0x1e8] sm:$0xff] }
 0x6fc   :  { %1839 = vmatprep.mubr.f32.mxu1 %v6993_v6  ;;  %4381 = vmatprep.mubr.msk.f32.mxu0 %vm5021_vm2, %v6993_v6 }
 0x6fd   :  { %2015 = vmatprep.subr.mxu1 %v1995_v44  ;;  %4384 = vmatprep.subr.mxu0 %v1996_v8  ;;  %v1963_v44 = vld [vmem:[#allocation5 + $0x1f0] sm:$0xff] }
 0x79c   :  { %v1672_v23 = vpop.f32.mrf.mxu1  ;;  %v1743_v46 = vpop.f32.mrf.mxu0 }
 0x79d   :  { %v1747_v15 = vadd.f32 %v1672_v23, %v7035_v2  ;;  %v1761_v58 = vadd.f32 %v5983_v48, %v1743_v46  ;;  %v1959_v23 = vld [vmem:[#allocation5 + $0x1d0] sm:$0xff]  ;;  %v1960_v46 = vld [vmem:[#allocation5 + $0x1d8] sm:$0xff]  ;;  %v1958_v2 = vld [vmem:[#allocation5 + $0x1c8] sm:$0xff] }
 0x79e   :  { %v4348_v1 = vpop.f32.mrf.mxu0  ;;  %v1674_v18 = vpop.f32.mrf.mxu1 }
 0x79f   :  { %v3692_v16 = vmul.f32 -1.442695, %v1747_v15  ;;  %v1748_v63 = vadd.f32 %v1674_v18, %v7036_v45  ;;  %v1956_v15 = vld [vmem:[#allocation5 + $0x1b8] sm:$0xff]  ;;  %v1957_v1 = vld [vmem:[#allocation5 + $0x1c0] sm:$0xff]  ;;  %v1954_v45 = vld [vmem:[#allocation5 + $0x1a8] sm:$0xff] }
 0x7a0   :  { %v1953_v18 = vld [vmem:[#allocation5 + $0x1a0] sm:$0xff] }
 0x7a1   :  { %4774 = vpow2.f32 %v3692_v16  ;;  %v3693_v27 = vmul.f32 -1.442695, %v1748_v63  ;;  %v1955_v16 = vld [vmem:[#allocation5 + $0x1b0] sm:$0xff]  ;;  %v1952_v63 = vld [vmem:[#allocation5 + $0x198] sm:$0xff] }
 0x7a3   :  { %4776 = vpow2.f32 %v3693_v27  ;;  %v1950_v27 = vld [vmem:[#allocation5 + $0x188] sm:$0xff] }
 0x7ae   :  { %v4775_v59 = vpop.eup %4774 }
 0x7af   :  { %v1755_v12 = vadd.f32 1.0, %v4775_v59  ;;  %v1951_v59 = vld [vmem:[#allocation5 + $0x190] sm:$0xff] }
 0x7b0   :  { %v4777_v43 = vpop.eup %4776 }
 0x7b1   :  { %4778 = vrcp.f32 %v1755_v12  ;;  %v1756_v62 = vadd.f32 1.0, %v4777_v43  ;;  %v1949_v12 = vld [vmem:[#allocation5 + $0x180] sm:$0xff]  ;;  %v7039_v43 = vld [vmem:[#allocation12_spill] sm:$0xff] }
 0x7b3   :  { %4780 = vrcp.f32 %v1756_v62  ;;  %v7040_v62 = vld [vmem:[#allocation19_spill] sm:$0xff] }
 0x7be   :  { %v4779_v49 = vpop.eup %4778 }
 0x7bf   :  { %v1762_v47 = vmul.f32 %v4779_v49, %v1761_v58  ;;  %v7041_v58 = vld [vmem:[#allocation21_spill] sm:$0xff] }
 0x7c0   :  { %v4781_v51 = vpop.eup %4780  ;;  %v6015_v49 = vld [vmem:[#allocation7 + $0x2f0] sm:$0xff] }
 0x7c1   :  { %v1763_v60 = vadd.f32 %v1762_v47, %v7037_v50  ;;  %v1765_v20 = vsub.f32 1.0, %v4781_v51  ;;  %v1767_v53 = vmul.f32 %v4781_v51, %v5909_v39  ;;  %7042 = vst [vmem:[#allocation22_spill] sm:$0xff] %v6015_v49  ;;  %v6018_v47 = vld [vmem:[#allocation7 + $0x2e8] sm:$0xff]  ;;  %v6021_v50 = vld [vmem:[#allocation7 + $0x2d8] sm:$0xff] }
 0x7c2   :  { %v6033_v51 = vld [vmem:[#allocation7 + $0x2a8] sm:$0xff] }
 0x7c3   :  { %4782 = vtanh.f32 %v1763_v60  ;;  %v6030_v60 = vld [vmem:[#allocation7 + $0x2b8] sm:$0xff] }
 0x7d0   :  { %v4783_v52 = vpop.eup %4782 }
 0x7d1   :  { %v1766_v3 = vmul.f32 %v4783_v52, %v1765_v20  ;;  %v6036_v20 = vld [vmem:[#allocation7 + $0x2a0] sm:$0xff]  ;;  %v6039_v52 = vld [vmem:[#allocation7 + $0x290] sm:$0xff] }
 0x7d3   :  { %v5988_v4 = vadd.f32 %v1767_v53, %v1766_v3  ;;  %v6042_v3 = vld [vmem:[#allocation7 + $0x288] sm:$0xff]  ;;  %v6045_v53 = vld [vmem:[#allocation7 + $0x278] sm:$0xff] }
 0x7d5   :  { %1840 = vmatmul.mubr.f32.vlgmr.msra.gmra.mxu1 %v5988_v4  ;;  %4382 = vmatmul.mubr.f32.vlgmr.msra.gmra.mxu0 %v5988_v4 }
 0x7d6   :  { %2016 = vmatpush1.msra.mxu1 %v1994_v54  ;;  %4385 = vmatpush3.msra.mxu0 %v1996_v8  ;;  %v1961_v8 = vld [vmem:[#allocation5 + $0x1e0] sm:$0xff]  ;;  %v6048_v54 = vld [vmem:[#allocation7 + $0x270] sm:$0xff] }
 0x7d7   :  { %2017 = vmatprep.subr.mxu1 %v1992_v10  ;;  %4386 = vmatprep.subr.mxu0 %v1993_v55  ;;  %v6051_v10 = vld [vmem:[#allocation7 + $0x260] sm:$0xff] }
 0x7d8   :  { %4416 = vmatprep.mubr.f32.mxu0 %v7038_v14  ;;  %2018 = vmatpush1.msra.mxu1 %v1991_v11  ;;  %v6057_v11 = vld [vmem:[#allocation7 + $0x248] sm:$0xff] }
 0x7d9   :  { %4387 = vmatpush3.msra.mxu0 %v1993_v55  ;;  %2019 = vmatprep.subr.mxu1 %v1989_v56  ;;  %v6054_v55 = vld [vmem:[#allocation7 + $0x258] sm:$0xff]  ;;  %v6060_v56 = vld [vmem:[#allocation7 + $0x240] sm:$0xff] }
 0x7da   :  { %4388 = vmatprep.subr.mxu0 %v1990_v13  ;;  %2020 = vmatpush1.msra.mxu1 %v1988_v0  ;;  %v6066_v0 = vld [vmem:[#allocation7 + $0x228] sm:$0xff] }
 0x7db   :  { %4389 = vmatpush3.msra.mxu0 %v1990_v13  ;;  %2021 = vmatprep.subr.mxu1 %v1986_v17  ;;  %v6063_v13 = vld [vmem:[#allocation7 + $0x230] sm:$0xff] }
 0x7dc   :  { %4390 = vmatprep.subr.mxu0 %v1987_v19  ;;  %2022 = vmatpush1.msra.mxu1 %v1985_v21  ;;  %v6072_v17 = vld [vmem:[#allocation7 + $0x210] sm:$0xff]  ;;  %v6078_v21 = vld [vmem:[#allocation7 + $0x1f8] sm:$0xff] }
 0x7dd   :  { %4391 = vmatpush3.msra.mxu0 %v1987_v19  ;;  %2023 = vmatprep.subr.mxu1 %v1983_v22  ;;  %v6075_v19 = vld [vmem:[#allocation7 + $0x200] sm:$0xff]  ;;  %v6081_v22 = vld [vmem:[#allocation7 + $0x1e8] sm:$0xff] }
 0x7de   :  { %4392 = vmatprep.subr.mxu0 %v1984_v24  ;;  %2024 = vmatpush1.msra.mxu1 %v1982_v26  ;;  %v6087_v26 = vld [vmem:[#allocation7 + $0x1d0] sm:$0xff] }
 0x7df   :  { %4393 = vmatpush3.msra.mxu0 %v1984_v24  ;;  %2025 = vmatprep.subr.mxu1 %v1980_v28  ;;  %v6084_v24 = vld [vmem:[#allocation7 + $0x1e0] sm:$0xff]  ;;  %v6090_v28 = vld [vmem:[#allocation7 + $0x1c8] sm:$0xff] }
 0x7e0   :  { %4394 = vmatprep.subr.mxu0 %v1981_v5  ;;  %2026 = vmatpush1.msra.mxu1 %v1979_v29  ;;  %v6096_v29 = vld [vmem:[#allocation7 + $0x1b0] sm:$0xff] }
 0x7e1   :  { %4395 = vmatpush3.msra.mxu0 %v1981_v5  ;;  %2027 = vmatprep.subr.mxu1 %v1977_v30  ;;  %v6093_v5 = vld [vmem:[#allocation7 + $0x1b8] sm:$0xff]  ;;  %v6099_v30 = vld [vmem:[#allocation7 + $0x1a0] sm:$0xff] }
 0x7e2   :  { %4396 = vmatprep.subr.mxu0 %v1978_v31  ;;  %2028 = vmatpush1.msra.mxu1 %v1976_v33  ;;  %v6105_v33 = vld [vmem:[#allocation7 + $0x188] sm:$0xff] }
 0x7e3   :  { %4397 = vmatpush3.msra.mxu0 %v1978_v31  ;;  %2029 = vmatprep.subr.mxu1 %v1974_v40  ;;  %v6102_v31 = vld [vmem:[#allocation7 + $0x198] sm:$0xff]  ;;  %7044 = vst [vmem:[#allocation13_spill] sm:$0xff] %v6105_v33  ;;  %v6107_v40 = vld [vmem:[#allocation7 + $0x180] sm:$0xff] }
 0x7e4   :  { %4398 = vmatprep.subr.mxu0 %v1975_v41  ;;  %2030 = vmatpush1.msra.mxu1 %v1973_v7  ;;  %7043 = vst [vmem:[#allocation15_spill] sm:$0xff] %v6102_v31  ;;  %7045 = vst [vmem:[#allocation14_spill] sm:$0xff] %v6107_v40  ;;  %v6113_v7 = vld [vmem:[#allocation7 + $0x2e0] sm:$0xff] }
 0x7e5   :  { %4399 = vmatpush3.msra.mxu0 %v1975_v41  ;;  %2031 = vmatprep.subr.mxu1 %v1971_v32  ;;  %v6109_v41 = vld [vmem:[#allocation7 + $0x2f8] sm:$0xff]  ;;  %v6117_v32 = vld [vmem:[#allocation7 + $0x2c8] sm:$0xff] }
 0x7e6   :  { %4400 = vmatprep.subr.mxu0 %v1972_v34  ;;  %2032 = vmatpush1.msra.mxu1 %v1970_v35  ;;  %v6126_v35 = vld [vmem:[#allocation7 + $0x298] sm:$0xff] }
 0x7e7   :  { %4401 = vmatpush3.msra.mxu0 %v1972_v34  ;;  %2033 = vmatprep.subr.mxu1 %v1968_v36  ;;  %v6122_v34 = vld [vmem:[#allocation7 + $0x2b0] sm:$0xff]  ;;  %v6130_v36 = vld [vmem:[#allocation7 + $0x280] sm:$0xff] }
 0x7e8   :  { %4402 = vmatprep.subr.mxu0 %v1969_v37  ;;  %2034 = vmatpush1.msra.mxu1 %v1967_v38  ;;  %v6138_v38 = vld [vmem:[#allocation7 + $0x250] sm:$0xff] }
 0x7e9   :  { %4403 = vmatpush3.msra.mxu0 %v1969_v37  ;;  %2035 = vmatprep.subr.mxu1 %v1965_v9  ;;  %v6134_v37 = vld [vmem:[#allocation7 + $0x268] sm:$0xff]  ;;  %v6142_v9 = vld [vmem:[#allocation7 + $0x238] sm:$0xff] }
 0x7ea   :  { %4404 = vmatprep.subr.mxu0 %v1966_v61  ;;  %2036 = vmatpush1.msra.mxu1 %v1964_v25  ;;  %v6150_v25 = vld [vmem:[#allocation7 + $0x208] sm:$0xff] }
 0x7eb   :  { %4405 = vmatpush3.msra.mxu0 %v1966_v61  ;;  %2037 = vmatprep.subr.mxu1 %v1962_v42  ;;  %v6146_v61 = vld [vmem:[#allocation7 + $0x220] sm:$0xff]  ;;  %v6154_v42 = vld [vmem:[#allocation7 + $0x1f0] sm:$0xff] }
 0x7ec   :  { %4406 = vmatprep.subr.mxu0 %v1963_v44  ;;  %2038 = vmatpush1.msra.mxu1 %v1961_v8  ;;  %v6162_v8 = vld [vmem:[#allocation7 + $0x1c0] sm:$0xff] }
 0x7ed   :  { %4407 = vmatpush3.msra.mxu0 %v1963_v44  ;;  %2039 = vmatprep.subr.mxu1 %v1959_v23  ;;  %v6158_v44 = vld [vmem:[#allocation7 + $0x1d8] sm:$0xff]  ;;  %v6166_v23 = vld [vmem:[#allocation7 + $0x1a8] sm:$0xff] }
 0x7ee   :  { %4408 = vmatprep.subr.mxu0 %v1960_v46  ;;  %2040 = vmatpush1.msra.mxu1 %v1958_v2  ;;  %7046 = vst [vmem:[#allocation16_spill] sm:$0xff] %v6166_v23 }
 0x7ef   :  { %4409 = vmatpush3.msra.mxu0 %v1960_v46  ;;  %2041 = vmatprep.subr.mxu1 %v1956_v15  ;;  %v6170_v46 = vld [vmem:[#allocation7 + $0x190] sm:$0xff] }
 0x7f0   :  { %4410 = vmatprep.subr.mxu0 %v1957_v1  ;;  %2042 = vmatpush1.msra.mxu1 %v1955_v16  ;;  %7047 = vst [vmem:[#allocation26_spill] sm:$0xff] %v6170_v46 }
 0x7f1   :  { %4411 = vmatpush3.msra.mxu0 %v1957_v1  ;;  %2043 = vmatprep.subr.mxu1 %v1953_v18  ;;  %v7048_v1 = vld [vmem:[#allocation37_spill] sm:$0xff] }
 0x7f2   :  { %4412 = vmatprep.subr.mxu0 %v1954_v45  ;;  %2044 = vmatpush1.msra.mxu1 %v1952_v63 }
 0x7f3   :  { %4413 = vmatpush3.msra.mxu0 %v1954_v45  ;;  %2045 = vmatprep.subr.mxu1 %v1950_v27  ;;  %v7049_v27 = vld [vmem:[#allocation38_spill] sm:$0xff] }
 0x7f4   :  { %4414 = vmatprep.subr.mxu0 %v1951_v59  ;;  %2046 = vmatpush1.msra.mxu1 %v1949_v12 }
 0x7f5   :  { %2079 = vmatprep.mubr.f32.mxu1 %v6993_v6  ;;  %4415 = vmatpush3.msra.mxu0 %v1951_v59 }
 0x7f6   :  { %2080 = vmatmul.mubr.f32.vlgmr.msra.gmra.mxu1 %v7038_v14  ;;  %4417 = vmatmul.mubr.f32.vlgmr.msra.gmra.mxu0 %v7039_v43  ;;  %v6069_v14 = vld [vmem:[#allocation7 + $0x218] sm:$0xff] }
 0x7f7   :  { %4419 = vmatprep.mubr.f32.mxu0 %v7040_v62  ;;  %2085 = vmatprep.mubr.f32.mxu1 %v6993_v6 }
 0x7f8   :  { %4428 = vmatprep.subr.mxu0 %v6993_v6  ;;  %2311 = vmatprep.subr.mxu1 %v6015_v49 }
 0x7f9   :  { %2312 = vmatpush1.msra.mxu1 %v6018_v47  ;;  %4429 = vmatpush3.msra.mxu0 %v6109_v41 }
 0x7fa   :  { %2086 = vmatmul.mubr.f32.gmra.mxu1 %v7039_v43  ;;  %4420 = vmatmul.mubr.f32.gmra.mxu0 %v7041_v58 }
 0x7fb   :  { %4422 = vmatprep.mubr.f32.mxu0 %v5807_v57  ;;  %2091 = vmatprep.mubr.f32.mxu1 %v6993_v6 }
 0x7fc   :  { %2313 = vmatprep.subr.mxu1 %v6021_v50  ;;  %4430 = vmatprep.subr.mxu0 %v6993_v6 }
 0x7fd   :  { %4431 = vmatpush3.msra.mxu0 %v6113_v7 }
 0x7fe   :  { %2092 = vmatmul.mubr.f32.gmra.mxu1 %v7040_v62  ;;  %4423 = vmatmul.mubr.f32.gmra.mxu0 %v5909_v39 }
 0x7ff   :  { %4425 = vmatprep.mubr.f32.mxu0 %v5988_v4  ;;  %2097 = vmatprep.mubr.f32.mxu1 %v6993_v6 }
 0x800   :  { %4432 = vmatprep.subr.mxu0 %v6993_v6 }
 0x801   :  { %4433 = vmatpush3.msra.mxu0 %v6117_v32 }
 0x802   :  { %2098 = vmatmul.mubr.f32.gmra.mxu1 %v7041_v58  ;;  %4434 = vmatprep.subr.mxu0 %v6993_v6 }
 0x803   :  { %2103 = vmatprep.mubr.f32.mxu1 %v6993_v6  ;;  %4435 = vmatpush3.msra.mxu0 %v6122_v34 }
 0x804   :  { %4436 = vmatprep.subr.mxu0 %v6993_v6 }
 0x805   :  { %4437 = vmatpush3.msra.mxu0 %v6126_v35 }
 0x806   :  { %2104 = vmatmul.mubr.f32.gmra.mxu1 %v5807_v57  ;;  %v6024_v57 = vld [vmem:[#allocation7 + $0x2d0] sm:$0xff]  ;;  %4438 = vmatprep.subr.mxu0 %v6993_v6 }
 0x807   :  { %2109 = vmatprep.mubr.f32.mxu1 %v6993_v6  ;;  %2314 = vmatpush1.msra.mxu1 %v6024_v57 }
 0x808   :  { %4439 = vmatpush3.msra.mxu0 %v6130_v36 }
 0x809   :  { %4440 = vmatprep.subr.mxu0 %v6993_v6 }
 0x80a   :  { %2110 = vmatmul.mubr.f32.gmra.mxu1 %v5909_v39  ;;  %v6027_v39 = vld [vmem:[#allocation7 + $0x2c0] sm:$0xff]  ;;  %4441 = vmatpush3.msra.mxu0 %v6134_v37 }
 0x80b   :  { %2115 = vmatprep.mubr.f32.mxu1 %v6993_v6  ;;  %2315 = vmatprep.subr.mxu1 %v6027_v39 }
 0x80c   :  { %2316 = vmatpush1.msra.mxu1 %v6030_v60  ;;  %4442 = vmatprep.subr.mxu0 %v6993_v6 }
 0x80d   :  { %2317 = vmatprep.subr.mxu1 %v6033_v51  ;;  %4443 = vmatpush3.msra.mxu0 %v6138_v38 }
 0x80e   :  { %2116 = vmatmul.mubr.f32.gmra.mxu1 %v5988_v4  ;;  %4444 = vmatprep.subr.mxu0 %v6993_v6 }
 0x80f   :  { %2121 = vmatprep.mubr.f32.mxu1 %v6993_v6  ;;  %2318 = vmatpush1.msra.mxu1 %v6036_v20 }
 0x810   :  { %2319 = vmatprep.subr.mxu1 %v6039_v52  ;;  %4445 = vmatpush3.msra.mxu0 %v6142_v9 }
 0x811   :  { %2320 = vmatpush1.msra.mxu1 %v6042_v3  ;;  %4446 = vmatprep.subr.mxu0 %v6993_v6 }
 0x812   :  { %2321 = vmatprep.subr.mxu1 %v6045_v53  ;;  %4447 = vmatpush3.msra.mxu0 %v6146_v61 }
 0x813   :  { %2322 = vmatpush1.msra.mxu1 %v6048_v54  ;;  %4448 = vmatprep.subr.mxu0 %v6993_v6 }
 0x814   :  { %2323 = vmatprep.subr.mxu1 %v6051_v10  ;;  %4449 = vmatpush3.msra.mxu0 %v6150_v25 }
 0x815   :  { %2324 = vmatpush1.msra.mxu1 %v6054_v55  ;;  %4450 = vmatprep.subr.mxu0 %v6993_v6 }
 0x816   :  { %2325 = vmatprep.subr.mxu1 %v6057_v11  ;;  %4451 = vmatpush3.msra.mxu0 %v6154_v42 }
 0x817   :  { %2326 = vmatpush1.msra.mxu1 %v6060_v56  ;;  %4452 = vmatprep.subr.mxu0 %v6993_v6 }
 0x818   :  { %2327 = vmatprep.subr.mxu1 %v6063_v13  ;;  %4453 = vmatpush3.msra.mxu0 %v6158_v44 }
 0x819   :  { %2328 = vmatpush1.msra.mxu1 %v6066_v0  ;;  %4454 = vmatprep.subr.mxu0 %v6993_v6 }
 0x81a   :  { %2329 = vmatprep.subr.mxu1 %v6069_v14  ;;  %4455 = vmatpush3.msra.mxu0 %v6162_v8 }
 0x81b   :  { %2330 = vmatpush1.msra.mxu1 %v6072_v17  ;;  %4456 = vmatprep.subr.mxu0 %v6993_v6 }
 0x81c   :  { %2331 = vmatprep.subr.mxu1 %v6075_v19  ;;  %4457 = vmatpush3.msra.mxu0 %v6166_v23  ;;  %v7050_v23 = vld [vmem:[#allocation29_spill] sm:$0xff] }
 0x81d   :  { %2332 = vmatpush1.msra.mxu1 %v6078_v21  ;;  %4458 = vmatprep.subr.mxu0 %v6993_v6 }
 0x81e   :  { %2333 = vmatprep.subr.mxu1 %v6081_v22  ;;  %4459 = vmatpush3.msra.mxu0 %v6170_v46 }
 0x81f   :  { %2334 = vmatpush1.msra.mxu1 %v6084_v24  ;;  %4463 = vmatprep.subr.mxu0 %v6993_v6 }
 0x820   :  { %2335 = vmatprep.subr.mxu1 %v6087_v26 }
 0x821   :  { %2336 = vmatpush1.msra.mxu1 %v6090_v28 }
 0x822   :  { %2337 = vmatprep.subr.mxu1 %v6093_v5 }
 0x823   :  { %2338 = vmatpush1.msra.mxu1 %v6096_v29 }
 0x824   :  { %2339 = vmatprep.subr.mxu1 %v6099_v30 }
 0x825   :  { %2340 = vmatpush1.msra.mxu1 %v6102_v31 }
 0x826   :  { %2341 = vmatprep.subr.mxu1 %v6105_v33 }
 0x827   :  { %2342 = vmatpush1.msra.mxu1 %v6107_v40 }
 0x828   :  { %2483 = vmatprep.subr.mxu1 %v6015_v49 }
 0x895   :  { %v1841_v2 = vpop.f32.mrf.mxu1  ;;  %v1912_v15 = vpop.f32.mrf.mxu0 }
 0x896   :  { %v1916_v16 = vadd.f32 %v1841_v2, %v7048_v1  ;;  %v1930_v46 = vadd.f32 %v5983_v48, %v1912_v15  ;;  %v7051_v48 = vld [vmem:[#allocation16_spill] sm:$0xff] }
 0x897   :  { %v4383_v18 = vpop.f32.mrf.mxu0  ;;  %v1843_v63 = vpop.f32.mrf.mxu1 }
 0x898   :  { %v3694_v45 = vmul.f32 -1.442695, %v1916_v16  ;;  %v1917_v59 = vadd.f32 %v1843_v63, %v7049_v27 }
 0x89a   :  { %4784 = vpow2.f32 %v3694_v45  ;;  %v3695_v12 = vmul.f32 -1.442695, %v1917_v59 }
 0x89c   :  { %4786 = vpow2.f32 %v3695_v12 }
 0x8a7   :  { %v4785_v43 = vpop.eup %4784 }
 0x8a8   :  { %v1924_v62 = vadd.f32 1.0, %v4785_v43 }
 0x8a9   :  { %v4787_v58 = vpop.eup %4786 }
 0x8aa   :  { %4788 = vrcp.f32 %v1924_v62  ;;  %v1925_v49 = vadd.f32 1.0, %v4787_v58 }
 0x8ac   :  { %4790 = vrcp.f32 %v1925_v49  ;;  %v7053_v49 = vld [vmem:[#allocation14_spill] sm:$0xff] }
 0x8b7   :  { %v4789_v40 = vpop.eup %4788 }
 0x8b8   :  { %v1931_v33 = vmul.f32 %v4789_v40, %v1930_v46  ;;  %v7055_v40 = vld [vmem:[#allocation22_spill] sm:$0xff] }
 0x8b9   :  { %v4791_v1 = vpop.eup %4790 }
 0x8ba   :  { %v1932_v2 = vadd.f32 %v1931_v33, %v7050_v23  ;;  %v1934_v16 = vsub.f32 1.0, %v4791_v1  ;;  %v1936_v63 = vmul.f32 %v4791_v1, %v5988_v4  ;;  %v7052_v4 = vld [vmem:[#allocation13_spill] sm:$0xff]  ;;  %v7054_v33 = vld [vmem:[#allocation26_spill] sm:$0xff]  ;;  %v2081_v23 = vpop.f32.mrf.mxu1 }
 0x8bc   :  { %4792 = vtanh.f32 %v1932_v2  ;;  %v2083_v46 = vpop.f32.mrf.mxu1  ;;  %v6265_v2 = vpop.f32.mrf.mxu0 }
 0x8bd   :  { %7062 = vst [vmem:[#allocation34_spill] sm:$0xff] %v6265_v2 }
 0x8be   :  { %v6253_v15 = vpop.f32.mrf.mxu1 }
 0x8bf   :  { %7056 = vst [vmem:[#allocation28_spill] sm:$0xff] %v6253_v15 }
 0x8c0   :  { %v6255_v59 = vpop.f32.mrf.mxu1 }
 0x8c1   :  { %7057 = vst [vmem:[#allocation20_spill] sm:$0xff] %v6255_v59 }
 0x8c2   :  { %v6257_v12 = vpop.f32.mrf.mxu1 }
 0x8c3   :  { %7058 = vst [vmem:[#allocation30_spill] sm:$0xff] %v6257_v12 }
 0x8c4   :  { %v6259_v43 = vpop.f32.mrf.mxu1 }
 0x8c5   :  { %7059 = vst [vmem:[#allocation32_spill] sm:$0xff] %v6259_v43 }
 0x8c6   :  { %v6261_v62 = vpop.f32.mrf.mxu1 }
 0x8c7   :  { %7060 = vst [vmem:[#allocation27_spill] sm:$0xff] %v6261_v62 }
 0x8c8   :  { %v6263_v58 = vpop.f32.mrf.mxu1 }
 0x8c9   :  { %v4793_v18 = vpop.eup %4792  ;;  %7061 = vst [vmem:[#allocation33_spill] sm:$0xff] %v6263_v58  ;;  %v3696_v58 = vld [vmem:[%s6906_s5 + $0x3] sm:$0x7] }
 0x8ca   :  { %v1935_v45 = vmul.f32 %v4793_v18, %v1934_v16  ;;  %v6267_v1 = vpop.f32.mrf.mxu1  ;;  %v2194_v16 = vpop.f32.mrf.mxu0 }
 0x8cb   :  { %7063 = vst [vmem:[#allocation25_spill] sm:$0xff] %v6267_v1 }
 0x8cc   :  { %v1937_v27 = vadd.f32 %v1936_v63, %v1935_v45  ;;  %v6269_v18 = vpop.f32.mrf.mxu1  ;;  %v6271_v45 = vpop.f32.mrf.mxu0 }
 0x8cd   :  { %7064 = vst [vmem:[#allocation23_spill] sm:$0xff] %v6269_v18  ;;  %7065 = vst [vmem:[#allocation18_spill] sm:$0xff] %v6271_v45  ;;  %v7073_v18 = vld [vmem:[#allocation17_spill] sm:$0xff] }
 0x8ce   :  { %2122 = vmatmul.mubr.f32.gmra.mxu1 %v1937_v27  ;;  %4426 = vmatmul.mubr.f32.gmra.mxu0 %v1937_v27  ;;  %v6273_v63 = vpop.f32.mrf.mxu1  ;;  %v6275_v27 = vpop.f32.mrf.mxu0  ;;  %v7074_v45 = vsub.s32 0, %v7073_v18 }
 0x8cf   :  { %2375 = vmatprep.mubr.f32.mxu1 %v6993_v6  ;;  %4460 = vmatprep.mubr.msk.f32.mxu0 %vm5021_vm2, %v6993_v6  ;;  %7066 = vst [vmem:[#allocation11_spill] sm:$0xff] %v6273_v63  ;;  %7067 = vst [vmem:[#allocation24_spill] sm:$0xff] %v6275_v27 }
 0x8d0   :  { %v6277_v12 = vpop.f32.mrf.mxu1  ;;  %v6279_v43 = vpop.f32.mrf.mxu0  ;;  %v6292_v59 = vrot.slane %v3696_v58, %v7074_v45 }
 0x8d1   :  { %7068 = vst [vmem:[#allocation35_spill] sm:$0xff] %v6277_v12  ;;  %7069 = vst [vmem:[#allocation36_spill] sm:$0xff] %v6279_v43 }
 0x8d2   :  { %2376 = vmatmul.mubr.f32.vlgmr.msra.gmra.mxu1 %v6993_v6  ;;  %4461 = vmatmul.mubr.f32.vlgmr.msra.gmra.mxu0 %v6993_v6  ;;  %v6281_v62 = vpop.f32.mrf.mxu1  ;;  %v6286_v1 = vpop.f32.mrf.mxu0  ;;  %7075 = vst [vmem:[#allocation19_spill] sm:$0xff] %v6292_v59 }
 0x8d3   :  { %2484 = vmatpush1.msra.mxu1 %v6018_v47  ;;  %4464 = vmatpush3.msra.mxu0 %v6109_v41  ;;  %7070 = vst [vmem:[#allocation31_spill] sm:$0xff] %v6281_v62  ;;  %7071 = vst [vmem:[#allocation39_spill] sm:$0xff] %v6286_v1  ;;  %v2082_v62 = vadd.f32 %v2081_v23, %v6292_v59  ;;  %v7080_v1 = vsub.s32 1, %v7073_v18  ;;  %v6311_v59 = vld [vmem:[%s6907_s6 + $0x1] ss:$0 sm:$0xff] }
 0x8d4   :  { %2485 = vmatprep.subr.mxu1 %v6021_v50  ;;  %4465 = vmatprep.subr.mxu0 %v6993_v6  ;;  %v6288_v2 = vpop.f32.mrf.mxu1 }
 0x8d5   :  { %2486 = vmatpush1.msra.mxu1 %v6024_v57  ;;  %4466 = vmatpush3.msra.mxu0 %v6113_v7  ;;  %7072 = vst [vmem:[#allocation12_spill] sm:$0xff] %v6288_v2 }
 0x8d6   :  { %2487 = vmatprep.subr.mxu1 %v6027_v39  ;;  %4467 = vmatprep.subr.mxu0 %v6993_v6 }
 0x8d7   :  { %2488 = vmatpush1.msra.mxu1 %v6030_v60  ;;  %4468 = vmatpush3.msra.mxu0 %v6117_v32 }
 0x8d8   :  { %2489 = vmatprep.subr.mxu1 %v6033_v51  ;;  %4469 = vmatprep.subr.mxu0 %v6993_v6 }
 0x8d9   :  { %2490 = vmatpush1.msra.mxu1 %v6036_v20  ;;  %4470 = vmatpush3.msra.mxu0 %v6122_v34 }
 0x8da   :  { %2491 = vmatprep.subr.mxu1 %v6039_v52  ;;  %4471 = vmatprep.subr.mxu0 %v6993_v6 }
 0x8db   :  { %2492 = vmatpush1.msra.mxu1 %v6042_v3  ;;  %4472 = vmatpush3.msra.mxu0 %v6126_v35 }
 0x8dc   :  { %2493 = vmatprep.subr.mxu1 %v6045_v53  ;;  %4473 = vmatprep.subr.mxu0 %v6993_v6 }
 0x8dd   :  { %2494 = vmatpush1.msra.mxu1 %v6048_v54  ;;  %4474 = vmatpush3.msra.mxu0 %v6130_v36 }
 0x8de   :  { %2495 = vmatprep.subr.mxu1 %v6051_v10  ;;  %4475 = vmatprep.subr.mxu0 %v6993_v6 }
 0x8df   :  { %2496 = vmatpush1.msra.mxu1 %v6054_v55  ;;  %4476 = vmatpush3.msra.mxu0 %v6134_v37 }
 0x8e0   :  { %2497 = vmatprep.subr.mxu1 %v6057_v11  ;;  %4477 = vmatprep.subr.mxu0 %v6993_v6 }
 0x8e1   :  { %2498 = vmatpush1.msra.mxu1 %v6060_v56  ;;  %4478 = vmatpush3.msra.mxu0 %v6138_v38 }
 0x8e2   :  { %2499 = vmatprep.subr.mxu1 %v6063_v13  ;;  %4479 = vmatprep.subr.mxu0 %v6993_v6 }
 0x8e3   :  { %2500 = vmatpush1.msra.mxu1 %v6066_v0  ;;  %4480 = vmatpush3.msra.mxu0 %v6142_v9 }
 0x8e4   :  { %2501 = vmatprep.subr.mxu1 %v6069_v14  ;;  %4481 = vmatprep.subr.mxu0 %v6993_v6 }
 0x8e5   :  { %2502 = vmatpush1.msra.mxu1 %v6072_v17  ;;  %4482 = vmatpush3.msra.mxu0 %v6146_v61 }
 0x8e6   :  { %2503 = vmatprep.subr.mxu1 %v6075_v19  ;;  %4483 = vmatprep.subr.mxu0 %v6993_v6 }
 0x8e7   :  { %2504 = vmatpush1.msra.mxu1 %v6078_v21  ;;  %4484 = vmatpush3.msra.mxu0 %v6150_v25 }
 0x8e8   :  { %2505 = vmatprep.subr.mxu1 %v6081_v22  ;;  %4485 = vmatprep.subr.mxu0 %v6993_v6 }
 0x8e9   :  { %2506 = vmatpush1.msra.mxu1 %v6084_v24  ;;  %4486 = vmatpush3.msra.mxu0 %v6154_v42 }
 0x8ea   :  { %2507 = vmatprep.subr.mxu1 %v6087_v26  ;;  %4487 = vmatprep.subr.mxu0 %v6993_v6 }
 0x8eb   :  { %2508 = vmatpush1.msra.mxu1 %v6090_v28  ;;  %4488 = vmatpush3.msra.mxu0 %v6158_v44 }
 0x8ec   :  { %2509 = vmatprep.subr.mxu1 %v6093_v5  ;;  %4489 = vmatprep.subr.mxu0 %v6993_v6 }
 0x8ed   :  { %2510 = vmatpush1.msra.mxu1 %v6096_v29  ;;  %4490 = vmatpush3.msra.mxu0 %v6162_v8 }
 0x8ee   :  { %2511 = vmatprep.subr.mxu1 %v6099_v30  ;;  %4491 = vmatprep.subr.mxu0 %v6993_v6 }
 0x8ef   :  { %2512 = vmatpush1.msra.mxu1 %v6102_v31  ;;  %4492 = vmatpush3.msra.mxu0 %v7051_v48 }
 0x8f0   :  { %2513 = vmatprep.subr.mxu1 %v7052_v4  ;;  %4493 = vmatprep.subr.mxu0 %v6993_v6 }
 0x8f1   :  { %2514 = vmatpush1.msra.mxu1 %v7053_v49  ;;  %2547 = vmatprep.mubr.f32.mxu1 %v6993_v6 }
 0x8f2   :  { %4494 = vmatpush3.msra.mxu0 %v7054_v33  ;;  %4495 = vmatprep.mubr.msk.f32.mxu0 %vm5021_vm2, %v6993_v6  ;;  %v6305_v33 = vrot.slane %v3696_v58, %v7080_v1 }
 0x8f3   :  { %2649 = vmatprep.subr.mxu1 %v7055_v40  ;;  %4498 = vmatprep.subr.mxu0 %v6993_v6 }
 0x8f4   :  { %7081 = vst [vmem:[#allocation17_spill] sm:$0xff] %v6305_v33 }
 0x98e   :  { %v6294_v63 = vpop.f32.mrf.mxu1  ;;  %v6296_v27 = vpop.f32.mrf.mxu0 }
 0x98f   :  { %7076 = vst [vmem:[#allocation21_spill] sm:$0xff] %v6294_v63  ;;  %7077 = vst [vmem:[#allocation37_spill] sm:$0xff] %v6296_v27  ;;  %v2084_v63 = vadd.f32 %v2083_v46, %v6305_v33 }
 0x990   :  { %v6298_v12 = vpop.f32.mrf.mxu1  ;;  %v6300_v43 = vpop.f32.mrf.mxu0 }
 0x991   :  { %7078 = vst [vmem:[#allocation38_spill] sm:$0xff] %v6298_v12  ;;  %7079 = vst [vmem:[#allocation29_spill] sm:$0xff] %v6300_v43 }
 0x992   :  { %v2377_v15 = vpop.f32.mrf.mxu1  ;;  %v2448_v40 = vpop.f32.mrf.mxu0 }
 0x993   :  { %v2452_v2 = vadd.f32 %v2377_v15, %v2082_v62  ;;  %v7082_v15 = vsub.s32 2, %v7073_v18  ;;  %v7086_v18 = vld [vmem:[#allocation26_spill] sm:$0xff] }
 0x994   :  { %v4462_v49 = vpop.f32.mrf.mxu0  ;;  %v2379_v4 = vpop.f32.mrf.mxu1 }
 0x995   :  { %v3698_v45 = vmul.f32 -1.442695, %v2452_v2  ;;  %v2453_v27 = vadd.f32 %v2379_v4, %v2084_v63  ;;  %v2472_v49 = vadd.f32 %v6311_v59, %v2448_v40  ;;  %v6316_v62 = vrot.slane %v3696_v58, %v7082_v15  ;;  %v7083_v40 = vld [vmem:[#allocation16_spill] sm:$0xff]  ;;  %v7084_v58 = vld [vmem:[#allocation13_spill] sm:$0xff] }
 0x997   :  { %4794 = vpow2.f32 %v3698_v45  ;;  %v3699_v48 = vmul.f32 -1.442695, %v2453_v27  ;;  %v2195_v4 = vadd.f32 %v2194_v16, %v6316_v62  ;;  %v7085_v16 = vld [vmem:[#allocation14_spill] sm:$0xff] }
 0x999   :  { %4796 = vpow2.f32 %v3699_v48 }
 0x9a4   :  { %v4795_v12 = vpop.eup %4794 }
 0x9a5   :  { %v2460_v43 = vadd.f32 1.0, %v4795_v12 }
 0x9a6   :  { %v4797_v23 = vpop.eup %4796 }
 0x9a7   :  { %4798 = vrcp.f32 %v2460_v43  ;;  %v2461_v1 = vadd.f32 1.0, %v4797_v23  ;;  %v7087_v23 = vld [vmem:[#allocation22_spill] sm:$0xff] }
 0x9a9   :  { %4800 = vrcp.f32 %v2461_v1  ;;  %v7088_v1 = vld [vmem:[#allocation19_spill] sm:$0xff] }
 0x9b4   :  { %v4799_v46 = vpop.eup %4798 }
 0x9b5   :  { %v2473_v48 = vmul.f32 %v4799_v46, %v2472_v49  ;;  %v7089_v49 = vld [vmem:[#allocation28_spill] sm:$0xff] }
 0x9b6   :  { %v4801_v43 = vpop.eup %4800  ;;  %v2088_v15 = vadd.f32 %v7089_v49, %v7088_v1 }
 0x9b7   :  { %v2474_v12 = vadd.f32 %v2473_v48, %v2195_v4  ;;  %v2476_v2 = vsub.f32 1.0, %v4801_v43  ;;  %v2478_v45 = vmul.f32 0.0, %v4801_v43 }
 0x9b9   :  { %4802 = vtanh.f32 %v2474_v12 }
 0x9c6   :  { %v4803_v63 = vpop.eup %4802 }
 0x9c7   :  { %v2477_v27 = vmul.f32 %v4803_v63, %v2476_v2  ;;  %v7090_v63 = vld [vmem:[#allocation17_spill] sm:$0xff] }
 0x9c9   :  { %v6319_v33 = vadd.f32 %v2478_v45, %v2477_v27  ;;  %v7091_v27 = vld [vmem:[#allocation20_spill] sm:$0xff] }
 0x9ca   :  { %v2090_v45 = vadd.f32 %v7091_v27, %v7090_v63 }
 0x9cb   :  { %2548 = vmatmul.mubr.f32.vlgmr.msra.gmra.mxu1 %v6319_v33  ;;  %4496 = vmatmul.mubr.f32.vlgmr.msra.gmra.mxu0 %v6319_v33 }
 0x9cc   :  { %2650 = vmatpush1.msra.mxu1 %v6018_v47  ;;  %4499 = vmatpush3.msra.mxu0 %v6109_v41 }
 0x9cd   :  { %2651 = vmatprep.subr.mxu1 %v6021_v50  ;;  %4500 = vmatprep.subr.mxu0 %v6993_v6 }
 0x9ce   :  { %2652 = vmatpush1.msra.mxu1 %v6024_v57  ;;  %4501 = vmatpush3.msra.mxu0 %v6113_v7 }
 0x9cf   :  { %2653 = vmatprep.subr.mxu1 %v6027_v39  ;;  %4502 = vmatprep.subr.mxu0 %v6993_v6 }
 0x9d0   :  { %2654 = vmatpush1.msra.mxu1 %v6030_v60  ;;  %4503 = vmatpush3.msra.mxu0 %v6117_v32 }
 0x9d1   :  { %2655 = vmatprep.subr.mxu1 %v6033_v51  ;;  %4504 = vmatprep.subr.mxu0 %v6993_v6 }
 0x9d2   :  { %2656 = vmatpush1.msra.mxu1 %v6036_v20  ;;  %4505 = vmatpush3.msra.mxu0 %v6122_v34 }
 0x9d3   :  { %2657 = vmatprep.subr.mxu1 %v6039_v52  ;;  %4506 = vmatprep.subr.mxu0 %v6993_v6 }
 0x9d4   :  { %2658 = vmatpush1.msra.mxu1 %v6042_v3  ;;  %4507 = vmatpush3.msra.mxu0 %v6126_v35 }
 0x9d5   :  { %2659 = vmatprep.subr.mxu1 %v6045_v53  ;;  %4508 = vmatprep.subr.mxu0 %v6993_v6 }
 0x9d6   :  { %2660 = vmatpush1.msra.mxu1 %v6048_v54  ;;  %4509 = vmatpush3.msra.mxu0 %v6130_v36 }
 0x9d7   :  { %2661 = vmatprep.subr.mxu1 %v6051_v10  ;;  %4510 = vmatprep.subr.mxu0 %v6993_v6 }
 0x9d8   :  { %2662 = vmatpush1.msra.mxu1 %v6054_v55  ;;  %4511 = vmatpush3.msra.mxu0 %v6134_v37 }
 0x9d9   :  { %2663 = vmatprep.subr.mxu1 %v6057_v11  ;;  %4512 = vmatprep.subr.mxu0 %v6993_v6 }
 0x9da   :  { %2664 = vmatpush1.msra.mxu1 %v6060_v56  ;;  %4513 = vmatpush3.msra.mxu0 %v6138_v38 }
 0x9db   :  { %2665 = vmatprep.subr.mxu1 %v6063_v13  ;;  %4514 = vmatprep.subr.mxu0 %v6993_v6 }
 0x9dc   :  { %2666 = vmatpush1.msra.mxu1 %v6066_v0  ;;  %4515 = vmatpush3.msra.mxu0 %v6142_v9 }
 0x9dd   :  { %2667 = vmatprep.subr.mxu1 %v6069_v14  ;;  %4516 = vmatprep.subr.mxu0 %v6993_v6 }
 0x9de   :  { %2668 = vmatpush1.msra.mxu1 %v6072_v17  ;;  %4517 = vmatpush3.msra.mxu0 %v6146_v61 }
 0x9df   :  { %2669 = vmatprep.subr.mxu1 %v6075_v19  ;;  %4518 = vmatprep.subr.mxu0 %v6993_v6 }
 0x9e0   :  { %2670 = vmatpush1.msra.mxu1 %v6078_v21  ;;  %4519 = vmatpush3.msra.mxu0 %v6150_v25 }
 0x9e1   :  { %2671 = vmatprep.subr.mxu1 %v6081_v22  ;;  %4520 = vmatprep.subr.mxu0 %v6993_v6 }
 0x9e2   :  { %2672 = vmatpush1.msra.mxu1 %v6084_v24  ;;  %4521 = vmatpush3.msra.mxu0 %v6154_v42 }
 0x9e3   :  { %2673 = vmatprep.subr.mxu1 %v6087_v26  ;;  %4522 = vmatprep.subr.mxu0 %v6993_v6 }
 0x9e4   :  { %2674 = vmatpush1.msra.mxu1 %v6090_v28  ;;  %4523 = vmatpush3.msra.mxu0 %v6158_v44 }
 0x9e5   :  { %2675 = vmatprep.subr.mxu1 %v6093_v5  ;;  %4524 = vmatprep.subr.mxu0 %v6993_v6 }
 0x9e6   :  { %2676 = vmatpush1.msra.mxu1 %v6096_v29  ;;  %4525 = vmatpush3.msra.mxu0 %v6162_v8 }
 0x9e7   :  { %2677 = vmatprep.subr.mxu1 %v6099_v30  ;;  %4526 = vmatprep.subr.mxu0 %v6993_v6 }
 0x9e8   :  { %2678 = vmatpush1.msra.mxu1 %v6102_v31  ;;  %4527 = vmatpush3.msra.mxu0 %v7083_v40 }
 0x9e9   :  { %2679 = vmatprep.subr.mxu1 %v7084_v58  ;;  %4528 = vmatprep.subr.mxu0 %v6993_v6 }
 0x9ea   :  { %2680 = vmatpush1.msra.mxu1 %v7085_v16  ;;  %2713 = vmatprep.mubr.f32.mxu1 %v6993_v6 }
 0x9eb   :  { %4529 = vmatpush3.msra.mxu0 %v7086_v18  ;;  %4530 = vmatprep.mubr.msk.f32.mxu0 %vm5021_vm2, %v6993_v6 }
 0x9ec   :  { %2815 = vmatprep.subr.mxu1 %v7087_v23  ;;  %4533 = vmatprep.subr.mxu0 %v6993_v6 }
 0xa8b   :  { %v2549_v46 = vpop.f32.mrf.mxu1  ;;  %v2620_v4 = vpop.f32.mrf.mxu0 }
 0xa8c   :  { %v2624_v48 = vadd.f32 %v2549_v46, %v2088_v15  ;;  %v2638_v49 = vadd.f32 %v6311_v59, %v2620_v4  ;;  %v7092_v15 = vld [vmem:[#allocation34_spill] sm:$0xff] }
 0xa8d   :  { %v4497_v12 = vpop.f32.mrf.mxu0  ;;  %v2551_v2 = vpop.f32.mrf.mxu1  ;;  %v2200_v46 = vadd.f32 %v7092_v15, %v6316_v62  ;;  %v7098_v4 = vld [vmem:[#allocation22_spill] sm:$0xff] }
 0xa8e   :  { %v3701_v43 = vmul.f32 -1.442695, %v2624_v48  ;;  %v2625_v18 = vadd.f32 %v2551_v2, %v2090_v45  ;;  %v7099_v45 = vld [vmem:[#allocation19_spill] sm:$0xff] }
 0xa90   :  { %4804 = vpow2.f32 %v3701_v43  ;;  %v3702_v16 = vmul.f32 -1.442695, %v2625_v18 }
 0xa92   :  { %4806 = vpow2.f32 %v3702_v16 }
 0xa9d   :  { %v4805_v58 = vpop.eup %4804 }
 0xa9e   :  { %v2632_v23 = vadd.f32 1.0, %v4805_v58 }
 0xa9f   :  { %v4807_v40 = vpop.eup %4806 }
 0xaa0   :  { %4808 = vrcp.f32 %v2632_v23  ;;  %v2633_v31 = vadd.f32 1.0, %v4807_v40  ;;  %v7095_v40 = vld [vmem:[#allocation13_spill] sm:$0xff]  ;;  %v7096_v23 = vld [vmem:[#allocation14_spill] sm:$0xff] }
 0xaa2   :  { %4810 = vrcp.f32 %v2633_v31  ;;  %v7093_v31 = vld [vmem:[#allocation15_spill] sm:$0xff] }
 0xaad   :  { %v4809_v1 = vpop.eup %4808 }
 0xaae   :  { %v2639_v48 = vmul.f32 %v4809_v1, %v2638_v49  ;;  %v7097_v1 = vld [vmem:[#allocation26_spill] sm:$0xff] }
 0xaaf   :  { %v4811_v27 = vpop.eup %4810  ;;  %v7100_v49 = vld [vmem:[#allocation30_spill] sm:$0xff] }
 0xab0   :  { %v2640_v12 = vadd.f32 %v2639_v48, %v2200_v46  ;;  %v2642_v43 = vsub.f32 1.0, %v4811_v27  ;;  %v2644_v16 = vmul.f32 %v4811_v27, %v6319_v33  ;;  %v7094_v33 = vld [vmem:[#allocation16_spill] sm:$0xff]  ;;  %v2094_v15 = vadd.f32 %v7100_v49, %v7099_v45 }
 0xab2   :  { %4812 = vtanh.f32 %v2640_v12 }
 0xabf   :  { %v4813_v2 = vpop.eup %4812 }
 0xac0   :  { %v2643_v18 = vmul.f32 %v4813_v2, %v2642_v43 }
 0xac2   :  { %v6398_v58 = vadd.f32 %v2644_v16, %v2643_v18  ;;  %v7101_v18 = vld [vmem:[#allocation32_spill] sm:$0xff] }
 0xac3   :  { %v2096_v16 = vadd.f32 %v7101_v18, %v7090_v63 }
 0xac4   :  { %2714 = vmatmul.mubr.f32.vlgmr.msra.gmra.mxu1 %v6398_v58  ;;  %4531 = vmatmul.mubr.f32.vlgmr.msra.gmra.mxu0 %v6398_v58 }
 0xac5   :  { %2816 = vmatpush1.msra.mxu1 %v6018_v47  ;;  %4534 = vmatpush3.msra.mxu0 %v6109_v41 }
 0xac6   :  { %2817 = vmatprep.subr.mxu1 %v6021_v50  ;;  %4535 = vmatprep.subr.mxu0 %v6993_v6 }
 0xac7   :  { %2818 = vmatpush1.msra.mxu1 %v6024_v57  ;;  %4536 = vmatpush3.msra.mxu0 %v6113_v7 }
 0xac8   :  { %2819 = vmatprep.subr.mxu1 %v6027_v39  ;;  %4537 = vmatprep.subr.mxu0 %v6993_v6 }
 0xac9   :  { %2820 = vmatpush1.msra.mxu1 %v6030_v60  ;;  %4538 = vmatpush3.msra.mxu0 %v6117_v32 }
 0xaca   :  { %2821 = vmatprep.subr.mxu1 %v6033_v51  ;;  %4539 = vmatprep.subr.mxu0 %v6993_v6 }
 0xacb   :  { %2822 = vmatpush1.msra.mxu1 %v6036_v20  ;;  %4540 = vmatpush3.msra.mxu0 %v6122_v34 }
 0xacc   :  { %2823 = vmatprep.subr.mxu1 %v6039_v52  ;;  %4541 = vmatprep.subr.mxu0 %v6993_v6 }
 0xacd   :  { %2824 = vmatpush1.msra.mxu1 %v6042_v3  ;;  %4542 = vmatpush3.msra.mxu0 %v6126_v35 }
 0xace   :  { %2825 = vmatprep.subr.mxu1 %v6045_v53  ;;  %4543 = vmatprep.subr.mxu0 %v6993_v6 }
 0xacf   :  { %2826 = vmatpush1.msra.mxu1 %v6048_v54  ;;  %4544 = vmatpush3.msra.mxu0 %v6130_v36 }
 0xad0   :  { %2827 = vmatprep.subr.mxu1 %v6051_v10  ;;  %4545 = vmatprep.subr.mxu0 %v6993_v6 }
 0xad1   :  { %2828 = vmatpush1.msra.mxu1 %v6054_v55  ;;  %4546 = vmatpush3.msra.mxu0 %v6134_v37 }
 0xad2   :  { %2829 = vmatprep.subr.mxu1 %v6057_v11  ;;  %4547 = vmatprep.subr.mxu0 %v6993_v6 }
 0xad3   :  { %2830 = vmatpush1.msra.mxu1 %v6060_v56  ;;  %4548 = vmatpush3.msra.mxu0 %v6138_v38 }
 0xad4   :  { %2831 = vmatprep.subr.mxu1 %v6063_v13  ;;  %4549 = vmatprep.subr.mxu0 %v6993_v6 }
 0xad5   :  { %2832 = vmatpush1.msra.mxu1 %v6066_v0  ;;  %4550 = vmatpush3.msra.mxu0 %v6142_v9 }
 0xad6   :  { %2833 = vmatprep.subr.mxu1 %v6069_v14  ;;  %4551 = vmatprep.subr.mxu0 %v6993_v6 }
 0xad7   :  { %2834 = vmatpush1.msra.mxu1 %v6072_v17  ;;  %4552 = vmatpush3.msra.mxu0 %v6146_v61 }
 0xad8   :  { %2835 = vmatprep.subr.mxu1 %v6075_v19  ;;  %4553 = vmatprep.subr.mxu0 %v6993_v6 }
 0xad9   :  { %2836 = vmatpush1.msra.mxu1 %v6078_v21  ;;  %4554 = vmatpush3.msra.mxu0 %v6150_v25 }
 0xada   :  { %2837 = vmatprep.subr.mxu1 %v6081_v22  ;;  %4555 = vmatprep.subr.mxu0 %v6993_v6 }
 0xadb   :  { %2838 = vmatpush1.msra.mxu1 %v6084_v24  ;;  %4556 = vmatpush3.msra.mxu0 %v6154_v42 }
 0xadc   :  { %2839 = vmatprep.subr.mxu1 %v6087_v26  ;;  %4557 = vmatprep.subr.mxu0 %v6993_v6 }
 0xadd   :  { %2840 = vmatpush1.msra.mxu1 %v6090_v28  ;;  %4558 = vmatpush3.msra.mxu0 %v6158_v44 }
 0xade   :  { %2841 = vmatprep.subr.mxu1 %v6093_v5  ;;  %4559 = vmatprep.subr.mxu0 %v6993_v6 }
 0xadf   :  { %2842 = vmatpush1.msra.mxu1 %v6096_v29  ;;  %4560 = vmatpush3.msra.mxu0 %v6162_v8 }
 0xae0   :  { %2843 = vmatprep.subr.mxu1 %v6099_v30  ;;  %4561 = vmatprep.subr.mxu0 %v6993_v6 }
 0xae1   :  { %2844 = vmatpush1.msra.mxu1 %v7093_v31  ;;  %4562 = vmatpush3.msra.mxu0 %v7094_v33 }
 0xae2   :  { %2845 = vmatprep.subr.mxu1 %v7095_v40  ;;  %4563 = vmatprep.subr.mxu0 %v6993_v6 }
 0xae3   :  { %2846 = vmatpush1.msra.mxu1 %v7096_v23  ;;  %2879 = vmatprep.mubr.f32.mxu1 %v6993_v6 }
 0xae4   :  { %4564 = vmatpush3.msra.mxu0 %v7097_v1  ;;  %4565 = vmatprep.mubr.msk.f32.mxu0 %vm5021_vm2, %v6993_v6 }
 0xae5   :  { %2981 = vmatprep.subr.mxu1 %v7098_v4  ;;  %4568 = vmatprep.subr.mxu0 %v6993_v6 }
 0xb84   :  { %v2715_v46 = vpop.f32.mrf.mxu1  ;;  %v2786_v48 = vpop.f32.mrf.mxu0 }
 0xb85   :  { %v2790_v12 = vadd.f32 %v2715_v46, %v2094_v15  ;;  %v2804_v49 = vadd.f32 %v6311_v59, %v2786_v48  ;;  %v7102_v15 = vld [vmem:[#allocation24_spill] sm:$0xff]  ;;  %v6578_v48 = vld [vmem:[#allocation7 + $0x2b8] sm:$0xff] }
 0xb86   :  { %v4532_v27 = vpop.f32.mrf.mxu0  ;;  %v2717_v2 = vpop.f32.mrf.mxu1  ;;  %v2205_v46 = vadd.f32 %v7102_v15, %v6316_v62  ;;  %v6610_v15 = vld [vmem:[#allocation7 + $0x258] sm:$0xff] }
 0xb87   :  { %v3703_v43 = vmul.f32 -1.442695, %v2790_v12  ;;  %v2791_v1 = vadd.f32 %v2717_v2, %v2096_v16  ;;  %v6586_v16 = vld [vmem:[#allocation7 + $0x2a0] sm:$0xff] }
 0xb89   :  { %4814 = vpow2.f32 %v3703_v43  ;;  %v3704_v23 = vmul.f32 -1.442695, %v2791_v1 }
 0xb8b   :  { %4816 = vpow2.f32 %v3704_v23 }
 0xb96   :  { %v4815_v40 = vpop.eup %4814 }
 0xb97   :  { %v2798_v4 = vadd.f32 1.0, %v4815_v40 }
 0xb98   :  { %v4817_v33 = vpop.eup %4816 }
 0xb99   :  { %4818 = vrcp.f32 %v2798_v4  ;;  %v2799_v31 = vadd.f32 1.0, %v4817_v33  ;;  %v6570_v33 = vld [vmem:[#allocation7 + $0x2d0] sm:$0xff]  ;;  %v6594_v4 = vld [vmem:[#allocation7 + $0x288] sm:$0xff] }
 0xb9b   :  { %4820 = vrcp.f32 %v2799_v31  ;;  %v6566_v31 = vld [vmem:[#allocation7 + $0x2d8] sm:$0xff] }
 0xba6   :  { %v4819_v45 = vpop.eup %4818 }
 0xba7   :  { %v2805_v12 = vmul.f32 %v4819_v45, %v2804_v49  ;;  %v6574_v45 = vld [vmem:[#allocation7 + $0x2c0] sm:$0xff]  ;;  %v6602_v49 = vld [vmem:[#allocation7 + $0x270] sm:$0xff] }
 0xba8   :  { %v4821_v18 = vpop.eup %4820 }
 0xba9   :  { %v2806_v27 = vadd.f32 %v2805_v12, %v2205_v46  ;;  %v2808_v43 = vsub.f32 1.0, %v4821_v18  ;;  %v2810_v23 = vmul.f32 %v4821_v18, %v6398_v58  ;;  %v6562_v58 = vld [vmem:[#allocation7 + $0x2e8] sm:$0xff]  ;;  %v6618_v46 = vld [vmem:[#allocation7 + $0x240] sm:$0xff]  ;;  %v6624_v12 = vld [vmem:[#allocation7 + $0x230] sm:$0xff] }
 0xbaa   :  { %v6634_v18 = vld [vmem:[#allocation7 + $0x218] sm:$0xff] }
 0xbab   :  { %4822 = vtanh.f32 %v2806_v27  ;;  %v6631_v27 = vld [vmem:[#allocation7 + $0x238] sm:$0xff] }
 0xbb8   :  { %v4823_v2 = vpop.eup %4822 }
 0xbb9   :  { %v2809_v1 = vmul.f32 %v4823_v2, %v2808_v43  ;;  %v6638_v43 = vld [vmem:[#allocation7 + $0x210] sm:$0xff]  ;;  %v6641_v2 = vld [vmem:[#allocation7 + $0x220] sm:$0xff] }
 0xbbb   :  { %v6477_v40 = vadd.f32 %v2810_v23, %v2809_v1  ;;  %v6644_v1 = vld [vmem:[#allocation7 + $0x200] sm:$0xff]  ;;  %v6648_v23 = vld [vmem:[#allocation7 + $0x1f8] sm:$0xff] }
 0xbbd   :  { %2880 = vmatmul.mubr.f32.vlgmr.msra.gmra.mxu1 %v6477_v40  ;;  %4566 = vmatmul.mubr.f32.vlgmr.msra.gmra.mxu0 %v6477_v40 }
 0xbbe   :  { %2982 = vmatpush1.msra.mxu1 %v6018_v47  ;;  %4569 = vmatpush3.msra.mxu0 %v6109_v41  ;;  %v7103_v47 = vld [vmem:[#allocation15_spill] sm:$0xff] }
 0xbbf   :  { %2983 = vmatprep.subr.mxu1 %v6021_v50  ;;  %4570 = vmatprep.subr.mxu0 %v6993_v6  ;;  %v7104_v50 = vld [vmem:[#allocation16_spill] sm:$0xff] }
 0xbc0   :  { %2984 = vmatpush1.msra.mxu1 %v6024_v57  ;;  %4571 = vmatpush3.msra.mxu0 %v6113_v7  ;;  %v7105_v57 = vld [vmem:[#allocation13_spill] sm:$0xff] }
 0xbc1   :  { %2985 = vmatprep.subr.mxu1 %v6027_v39  ;;  %4572 = vmatprep.subr.mxu0 %v6993_v6  ;;  %v7106_v39 = vld [vmem:[#allocation14_spill] sm:$0xff] }
 0xbc2   :  { %2986 = vmatpush1.msra.mxu1 %v6030_v60  ;;  %4573 = vmatpush3.msra.mxu0 %v6117_v32  ;;  %v7107_v60 = vld [vmem:[#allocation26_spill] sm:$0xff] }
 0xbc3   :  { %2987 = vmatprep.subr.mxu1 %v6033_v51  ;;  %4574 = vmatprep.subr.mxu0 %v6993_v6  ;;  %v6546_v51 = vld [vmem:[#allocation7 + $0x2f0] sm:$0xff] }
 0xbc4   :  { %2988 = vmatpush1.msra.mxu1 %v6036_v20  ;;  %4575 = vmatpush3.msra.mxu0 %v6122_v34  ;;  %v7108_v20 = vld [vmem:[#allocation19_spill] sm:$0xff] }
 0xbc5   :  { %2989 = vmatprep.subr.mxu1 %v6039_v52  ;;  %4576 = vmatprep.subr.mxu0 %v6993_v6  ;;  %v7109_v52 = vld [vmem:[#allocation27_spill] sm:$0xff] }
 0xbc6   :  { %2990 = vmatpush1.msra.mxu1 %v6042_v3  ;;  %4577 = vmatpush3.msra.mxu0 %v6126_v35  ;;  %v2100_v3 = vadd.f32 %v7109_v52, %v7108_v20  ;;  %v6671_v52 = vld [vmem:[#allocation7 + $0x1d8] sm:$0xff] }
 0xbc7   :  { %2991 = vmatprep.subr.mxu1 %v6045_v53  ;;  %4578 = vmatprep.subr.mxu0 %v6993_v6 }
 0xbc8   :  { %2992 = vmatpush1.msra.mxu1 %v6048_v54  ;;  %4579 = vmatpush3.msra.mxu0 %v6130_v36 }
 0xbc9   :  { %2993 = vmatprep.subr.mxu1 %v6051_v10  ;;  %4580 = vmatprep.subr.mxu0 %v6993_v6 }
 0xbca   :  { %2994 = vmatpush1.msra.mxu1 %v6054_v55  ;;  %4581 = vmatpush3.msra.mxu0 %v6134_v37 }
 0xbcb   :  { %2995 = vmatprep.subr.mxu1 %v6057_v11  ;;  %4582 = vmatprep.subr.mxu0 %v6993_v6 }
 0xbcc   :  { %2996 = vmatpush1.msra.mxu1 %v6060_v56  ;;  %4583 = vmatpush3.msra.mxu0 %v6138_v38 }
 0xbcd   :  { %2997 = vmatprep.subr.mxu1 %v6063_v13  ;;  %4584 = vmatprep.subr.mxu0 %v6993_v6  ;;  %v7110_v13 = vld [vmem:[#allocation33_spill] sm:$0xff] }
 0xbce   :  { %2998 = vmatpush1.msra.mxu1 %v6066_v0  ;;  %4585 = vmatpush3.msra.mxu0 %v6142_v9  ;;  %v2102_v0 = vadd.f32 %v7110_v13, %v7090_v63  ;;  %v6698_v13 = vld [vmem:[#allocation7 + $0x180] sm:$0xff] }
 0xbcf   :  { %2999 = vmatprep.subr.mxu1 %v6069_v14  ;;  %4586 = vmatprep.subr.mxu0 %v6993_v6  ;;  %7115 = vst [vmem:[#allocation34_spill] sm:$0xff] %v6698_v13 }
 0xbd0   :  { %3000 = vmatpush1.msra.mxu1 %v6072_v17  ;;  %4587 = vmatpush3.msra.mxu0 %v6146_v61 }
 0xbd1   :  { %3001 = vmatprep.subr.mxu1 %v6075_v19  ;;  %4588 = vmatprep.subr.mxu0 %v6993_v6 }
 0xbd2   :  { %3002 = vmatpush1.msra.mxu1 %v6078_v21  ;;  %4589 = vmatpush3.msra.mxu0 %v6150_v25 }
 0xbd3   :  { %3003 = vmatprep.subr.mxu1 %v6081_v22  ;;  %4590 = vmatprep.subr.mxu0 %v6993_v6 }
 0xbd4   :  { %3004 = vmatpush1.msra.mxu1 %v6084_v24  ;;  %4591 = vmatpush3.msra.mxu0 %v6154_v42 }
 0xbd5   :  { %3005 = vmatprep.subr.mxu1 %v6087_v26  ;;  %4592 = vmatprep.subr.mxu0 %v6993_v6 }
 0xbd6   :  { %3006 = vmatpush1.msra.mxu1 %v6090_v28  ;;  %4593 = vmatpush3.msra.mxu0 %v6158_v44 }
 0xbd7   :  { %3007 = vmatprep.subr.mxu1 %v6093_v5  ;;  %4594 = vmatprep.subr.mxu0 %v6993_v6  ;;  %v7111_v5 = vld [vmem:[#allocation18_spill] sm:$0xff] }
 0xbd8   :  { %3008 = vmatpush1.msra.mxu1 %v6096_v29  ;;  %4595 = vmatpush3.msra.mxu0 %v6162_v8  ;;  %v2210_v29 = vadd.f32 %v7111_v5, %v6316_v62  ;;  %v7118_v5 = vld [vmem:[#allocation23_spill] sm:$0xff] }
 0xbd9   :  { %3009 = vmatprep.subr.mxu1 %v6099_v30  ;;  %4596 = vmatprep.subr.mxu0 %v6993_v6 }
 0xbda   :  { %3010 = vmatpush1.msra.mxu1 %v7103_v47  ;;  %4597 = vmatpush3.msra.mxu0 %v7104_v50  ;;  %v6654_v47 = vld [vmem:[#allocation7 + $0x1e8] sm:$0xff]  ;;  %v6658_v50 = vld [vmem:[#allocation7 + $0x1e0] sm:$0xff] }
 0xbdb   :  { %3011 = vmatprep.subr.mxu1 %v7105_v57  ;;  %4598 = vmatprep.subr.mxu0 %v6993_v6  ;;  %v6661_v57 = vld [vmem:[#allocation7 + $0x1f0] sm:$0xff] }
 0xbdc   :  { %3012 = vmatpush1.msra.mxu1 %v7106_v39  ;;  %3045 = vmatprep.mubr.f32.mxu1 %v6993_v6  ;;  %v6664_v39 = vld [vmem:[#allocation7 + $0x1d0] sm:$0xff] }
 0xbdd   :  { %4599 = vmatpush3.msra.mxu0 %v7107_v60  ;;  %4600 = vmatprep.mubr.msk.f32.mxu0 %vm5021_vm2, %v6993_v6  ;;  %v6668_v60 = vld [vmem:[#allocation7 + $0x1c8] sm:$0xff] }
 0xbde   :  { %3147 = vmatprep.subr.mxu1 %v6546_v51  ;;  %4603 = vmatprep.subr.mxu0 %v6993_v6 }
 0xc7d   :  { %v2881_v53 = vpop.f32.mrf.mxu1  ;;  %v2952_v54 = vpop.f32.mrf.mxu0 }
 0xc7e   :  { %v2956_v10 = vadd.f32 %v2881_v53, %v2100_v3  ;;  %v2970_v26 = vadd.f32 %v6311_v59, %v2952_v54  ;;  %v6674_v3 = vld [vmem:[#allocation7 + $0x1b8] sm:$0xff]  ;;  %v6678_v53 = vld [vmem:[#allocation7 + $0x1b0] sm:$0xff]  ;;  %v6681_v54 = vld [vmem:[#allocation7 + $0x1c0] sm:$0xff] }
 0xc7f   :  { %v4567_v55 = vpop.f32.mrf.mxu0  ;;  %v2883_v56 = vpop.f32.mrf.mxu1 }
 0xc80   :  { %v3705_v11 = vmul.f32 -1.442695, %v2956_v10  ;;  %v2957_v14 = vadd.f32 %v2883_v56, %v2102_v0  ;;  %v6684_v10 = vld [vmem:[#allocation7 + $0x1a0] sm:$0xff]  ;;  %v6688_v55 = vld [vmem:[#allocation7 + $0x198] sm:$0xff]  ;;  %v6694_v56 = vld [vmem:[#allocation7 + $0x188] sm:$0xff] }
 0xc81   :  { %7112 = vst [vmem:[#allocation28_spill] sm:$0xff] %v6688_v55  ;;  %7114 = vst [vmem:[#allocation20_spill] sm:$0xff] %v6694_v56  ;;  %v6702_v0 = vld [vmem:[#allocation7 + $0x190] sm:$0xff] }
 0xc82   :  { %4824 = vpow2.f32 %v3705_v11  ;;  %v3706_v17 = vmul.f32 -1.442695, %v2957_v14  ;;  %v6691_v11 = vld [vmem:[#allocation7 + $0x1a8] sm:$0xff]  ;;  %7116 = vst [vmem:[#allocation22_spill] sm:$0xff] %v6702_v0  ;;  %v7117_v14 = vld [vmem:[#allocation25_spill] sm:$0xff] }
 0xc83   :  { %7113 = vst [vmem:[#allocation17_spill] sm:$0xff] %v6691_v11 }
 0xc84   :  { %4826 = vpow2.f32 %v3706_v17  ;;  %v2106_v17 = vadd.f32 %v7117_v14, %v7108_v20 }
 0xc8f   :  { %v4825_v19 = vpop.eup %4824 }
 0xc90   :  { %v2964_v21 = vadd.f32 1.0, %v4825_v19 }
 0xc91   :  { %v4827_v22 = vpop.eup %4826 }
 0xc92   :  { %4828 = vrcp.f32 %v2964_v21  ;;  %v2965_v24 = vadd.f32 1.0, %v4827_v22 }
 0xc94   :  { %4830 = vrcp.f32 %v2965_v24 }
 0xc9f   :  { %v4829_v28 = vpop.eup %4828 }
 0xca0   :  { %v2971_v30 = vmul.f32 %v4829_v28, %v2970_v26 }
 0xca1   :  { %v4831_v9 = vpop.eup %4830 }
 0xca2   :  { %v2972_v38 = vadd.f32 %v2971_v30, %v2210_v29  ;;  %v2974_v61 = vsub.f32 1.0, %v4831_v9  ;;  %v2976_v44 = vmul.f32 %v4831_v9, %v6477_v40  ;;  %v6651_v40 = vld [vmem:[#allocation7 + $0x208] sm:$0xff]  ;;  %v2108_v29 = vadd.f32 %v7118_v5, %v7090_v63 }
 0xca4   :  { %4832 = vtanh.f32 %v2972_v38 }
 0xcb1   :  { %v4833_v25 = vpop.eup %4832 }
 0xcb2   :  { %v2975_v42 = vmul.f32 %v4833_v25, %v2974_v61 }
 0xcb4   :  { %v6558_v8 = vadd.f32 %v2976_v44, %v2975_v42 }
 0xcb6   :  { %3046 = vmatmul.mubr.f32.vlgmr.msra.gmra.mxu1 %v6558_v8  ;;  %4601 = vmatmul.mubr.f32.vlgmr.msra.gmra.mxu0 %v6558_v8 }
 0xcb7   :  { %3148 = vmatpush1.msra.mxu1 %v6562_v58  ;;  %4604 = vmatpush3.msra.mxu0 %v6109_v41  ;;  %v6582_v41 = vld [vmem:[#allocation7 + $0x2a8] sm:$0xff] }
 0xcb8   :  { %3149 = vmatprep.subr.mxu1 %v6566_v31  ;;  %4605 = vmatprep.subr.mxu0 %v6993_v6 }
 0xcb9   :  { %3150 = vmatpush1.msra.mxu1 %v6570_v33  ;;  %4606 = vmatpush3.msra.mxu0 %v6113_v7  ;;  %v6590_v7 = vld [vmem:[#allocation7 + $0x290] sm:$0xff] }
 0xcba   :  { %3151 = vmatprep.subr.mxu1 %v6574_v45  ;;  %4607 = vmatprep.subr.mxu0 %v6993_v6 }
 0xcbb   :  { %3152 = vmatpush1.msra.mxu1 %v6578_v48  ;;  %4608 = vmatpush3.msra.mxu0 %v6117_v32  ;;  %v6598_v32 = vld [vmem:[#allocation7 + $0x278] sm:$0xff] }
 0xcbc   :  { %3153 = vmatprep.subr.mxu1 %v6582_v41  ;;  %4609 = vmatprep.subr.mxu0 %v6993_v6 }
 0xcbd   :  { %3154 = vmatpush1.msra.mxu1 %v6586_v16  ;;  %4610 = vmatpush3.msra.mxu0 %v6122_v34  ;;  %v6606_v34 = vld [vmem:[#allocation7 + $0x260] sm:$0xff] }
 0xcbe   :  { %3155 = vmatprep.subr.mxu1 %v6590_v7  ;;  %4611 = vmatprep.subr.mxu0 %v6993_v6 }
 0xcbf   :  { %3156 = vmatpush1.msra.mxu1 %v6594_v4  ;;  %4612 = vmatpush3.msra.mxu0 %v6126_v35  ;;  %v6614_v35 = vld [vmem:[#allocation7 + $0x248] sm:$0xff] }
 0xcc0   :  { %3157 = vmatprep.subr.mxu1 %v6598_v32  ;;  %4613 = vmatprep.subr.mxu0 %v6993_v6 }
 0xcc1   :  { %3158 = vmatpush1.msra.mxu1 %v6602_v49  ;;  %4614 = vmatpush3.msra.mxu0 %v6130_v36  ;;  %v6621_v36 = vld [vmem:[#allocation7 + $0x250] sm:$0xff] }
 0xcc2   :  { %3159 = vmatprep.subr.mxu1 %v6606_v34  ;;  %4615 = vmatprep.subr.mxu0 %v6993_v6 }
 0xcc3   :  { %3160 = vmatpush1.msra.mxu1 %v6610_v15  ;;  %4616 = vmatpush3.msra.mxu0 %v6134_v37  ;;  %v6628_v37 = vld [vmem:[#allocation7 + $0x228] sm:$0xff] }
 0xcc4   :  { %3161 = vmatprep.subr.mxu1 %v6614_v35  ;;  %4617 = vmatprep.subr.mxu0 %v6993_v6 }
 0xcc5   :  { %3162 = vmatpush1.msra.mxu1 %v6618_v46  ;;  %4618 = vmatpush3.msra.mxu0 %v6621_v36 }
 0xcc6   :  { %3163 = vmatprep.subr.mxu1 %v6624_v12  ;;  %4619 = vmatprep.subr.mxu0 %v6993_v6 }
 0xcc7   :  { %3164 = vmatpush1.msra.mxu1 %v6628_v37  ;;  %4620 = vmatpush3.msra.mxu0 %v6631_v27 }
 0xcc8   :  { %3165 = vmatprep.subr.mxu1 %v6634_v18  ;;  %4621 = vmatprep.subr.mxu0 %v6993_v6 }
 0xcc9   :  { %3166 = vmatpush1.msra.mxu1 %v6638_v43  ;;  %4622 = vmatpush3.msra.mxu0 %v6641_v2 }
 0xcca   :  { %3167 = vmatprep.subr.mxu1 %v6644_v1  ;;  %4623 = vmatprep.subr.mxu0 %v6993_v6 }
 0xccb   :  { %3168 = vmatpush1.msra.mxu1 %v6648_v23  ;;  %4624 = vmatpush3.msra.mxu0 %v6651_v40 }
 0xccc   :  { %3169 = vmatprep.subr.mxu1 %v6654_v47  ;;  %4625 = vmatprep.subr.mxu0 %v6993_v6 }
 0xccd   :  { %3170 = vmatpush1.msra.mxu1 %v6658_v50  ;;  %4626 = vmatpush3.msra.mxu0 %v6661_v57 }
 0xcce   :  { %3171 = vmatprep.subr.mxu1 %v6664_v39  ;;  %4627 = vmatprep.subr.mxu0 %v6993_v6 }
 0xccf   :  { %3172 = vmatpush1.msra.mxu1 %v6668_v60  ;;  %4628 = vmatpush3.msra.mxu0 %v6671_v52 }
 0xcd0   :  { %3173 = vmatprep.subr.mxu1 %v6674_v3  ;;  %4629 = vmatprep.subr.mxu0 %v6993_v6 }
 0xcd1   :  { %3174 = vmatpush1.msra.mxu1 %v6678_v53  ;;  %4630 = vmatpush3.msra.mxu0 %v6681_v54 }
 0xcd2   :  { %3175 = vmatprep.subr.mxu1 %v6684_v10  ;;  %4631 = vmatprep.subr.mxu0 %v6993_v6 }
 0xcd3   :  { %3176 = vmatpush1.msra.mxu1 %v6688_v55  ;;  %4632 = vmatpush3.msra.mxu0 %v6691_v11 }
 0xcd4   :  { %3177 = vmatprep.subr.mxu1 %v6694_v56  ;;  %4633 = vmatprep.subr.mxu0 %v6993_v6 }
 0xcd5   :  { %3178 = vmatpush1.msra.mxu1 %v6698_v13  ;;  %3211 = vmatprep.mubr.f32.mxu1 %v6993_v6 }
 0xcd6   :  { %4634 = vmatpush3.msra.mxu0 %v6702_v0  ;;  %4635 = vmatprep.mubr.msk.f32.mxu0 %vm5021_vm2, %v6993_v6 }
 0xcd7   :  { %3313 = vmatprep.subr.mxu1 %v6546_v51  ;;  %4638 = vmatprep.subr.mxu0 %v6993_v6 }
 0xd76   :  { %v3047_v19 = vpop.f32.mrf.mxu1  ;;  %v3118_v21 = vpop.f32.mrf.mxu0 }
 0xd77   :  { %v3122_v22 = vadd.f32 %v3047_v19, %v2106_v17  ;;  %v3136_v44 = vadd.f32 %v6311_v59, %v3118_v21  ;;  %v7119_v17 = vld [vmem:[#allocation39_spill] sm:$0xff]  ;;  %v6722_v21 = vld [vmem:[#allocation7 + $0x2f8] sm:$0xff] }
 0xd78   :  { %v4602_v24 = vpop.f32.mrf.mxu0  ;;  %v3049_v28 = vpop.f32.mrf.mxu1  ;;  %v2215_v19 = vadd.f32 %v7119_v17, %v6316_v62 }
 0xd79   :  { %v3707_v26 = vmul.f32 -1.442695, %v3122_v22  ;;  %v3123_v30 = vadd.f32 %v3049_v28, %v2108_v29 }
 0xd7b   :  { %4834 = vpow2.f32 %v3707_v26  ;;  %v3708_v38 = vmul.f32 -1.442695, %v3123_v30 }
 0xd7d   :  { %4836 = vpow2.f32 %v3708_v38 }
 0xd88   :  { %v4835_v9 = vpop.eup %4834 }
 0xd89   :  { %v3130_v61 = vadd.f32 1.0, %v4835_v9  ;;  %v6728_v9 = vld [vmem:[#allocation7 + $0x2e0] sm:$0xff] }
 0xd8a   :  { %v4837_v25 = vpop.eup %4836 }
 0xd8b   :  { %4838 = vrcp.f32 %v3130_v61  ;;  %v3131_v42 = vadd.f32 1.0, %v4837_v25  ;;  %v6740_v61 = vld [vmem:[#allocation7 + $0x2b0] sm:$0xff]  ;;  %v6746_v25 = vld [vmem:[#allocation7 + $0x298] sm:$0xff] }
 0xd8d   :  { %4840 = vrcp.f32 %v3131_v42  ;;  %v6752_v42 = vld [vmem:[#allocation7 + $0x280] sm:$0xff] }
 0xd98   :  { %v4839_v14 = vpop.eup %4838 }
 0xd99   :  { %v3137_v22 = vmul.f32 %v4839_v14, %v3136_v44  ;;  %v6758_v44 = vld [vmem:[#allocation7 + $0x268] sm:$0xff]  ;;  %v7120_v14 = vld [vmem:[#allocation11_spill] sm:$0xff] }
 0xd9a   :  { %v4841_v5 = vpop.eup %4840  ;;  %v2112_v17 = vadd.f32 %v7120_v14, %v7108_v20 }
 0xd9b   :  { %v3138_v24 = vadd.f32 %v3137_v22, %v2215_v19  ;;  %v3140_v26 = vsub.f32 1.0, %v4841_v5  ;;  %v3142_v30 = vmul.f32 %v4841_v5, %v6558_v8  ;;  %v6734_v8 = vld [vmem:[#allocation7 + $0x2c8] sm:$0xff] }
 0xd9d   :  { %4842 = vtanh.f32 %v3138_v24 }
 0xdaa   :  { %v4843_v28 = vpop.eup %4842 }
 0xdab   :  { %v3141_v29 = vmul.f32 %v4843_v28, %v3140_v26 }
 0xdad   :  { %v6717_v38 = vadd.f32 %v3142_v30, %v3141_v29  ;;  %v7121_v29 = vld [vmem:[#allocation35_spill] sm:$0xff] }
 0xdae   :  { %v2114_v30 = vadd.f32 %v7121_v29, %v7090_v63 }
 0xdaf   :  { %3212 = vmatmul.mubr.f32.vlgmr.msra.gmra.mxu1 %v6717_v38  ;;  %4636 = vmatmul.mubr.f32.vlgmr.msra.gmra.mxu0 %v6717_v38 }
 0xdb0   :  { %3314 = vmatpush1.msra.mxu1 %v6562_v58  ;;  %4639 = vmatpush3.msra.mxu0 %v6722_v21 }
 0xdb1   :  { %3315 = vmatprep.subr.mxu1 %v6566_v31  ;;  %4640 = vmatprep.subr.mxu0 %v6993_v6 }
 0xdb2   :  { %3316 = vmatpush1.msra.mxu1 %v6570_v33  ;;  %4641 = vmatpush3.msra.mxu0 %v6728_v9 }
 0xdb3   :  { %3317 = vmatprep.subr.mxu1 %v6574_v45  ;;  %4642 = vmatprep.subr.mxu0 %v6993_v6 }
 0xdb4   :  { %3318 = vmatpush1.msra.mxu1 %v6578_v48  ;;  %4643 = vmatpush3.msra.mxu0 %v6734_v8 }
 0xdb5   :  { %3319 = vmatprep.subr.mxu1 %v6582_v41  ;;  %4644 = vmatprep.subr.mxu0 %v6993_v6 }
 0xdb6   :  { %3320 = vmatpush1.msra.mxu1 %v6586_v16  ;;  %4645 = vmatpush3.msra.mxu0 %v6740_v61 }
 0xdb7   :  { %3321 = vmatprep.subr.mxu1 %v6590_v7  ;;  %4646 = vmatprep.subr.mxu0 %v6993_v6 }
 0xdb8   :  { %3322 = vmatpush1.msra.mxu1 %v6594_v4  ;;  %4647 = vmatpush3.msra.mxu0 %v6746_v25 }
 0xdb9   :  { %3323 = vmatprep.subr.mxu1 %v6598_v32  ;;  %4648 = vmatprep.subr.mxu0 %v6993_v6 }
 0xdba   :  { %3324 = vmatpush1.msra.mxu1 %v6602_v49  ;;  %4649 = vmatpush3.msra.mxu0 %v6752_v42 }
 0xdbb   :  { %3325 = vmatprep.subr.mxu1 %v6606_v34  ;;  %4650 = vmatprep.subr.mxu0 %v6993_v6 }
 0xdbc   :  { %3326 = vmatpush1.msra.mxu1 %v6610_v15  ;;  %4651 = vmatpush3.msra.mxu0 %v6758_v44 }
 0xdbd   :  { %3327 = vmatprep.subr.mxu1 %v6614_v35  ;;  %4652 = vmatprep.subr.mxu0 %v6993_v6 }
 0xdbe   :  { %3328 = vmatpush1.msra.mxu1 %v6618_v46  ;;  %4653 = vmatpush3.msra.mxu0 %v6621_v36 }
 0xdbf   :  { %3329 = vmatprep.subr.mxu1 %v6624_v12  ;;  %4654 = vmatprep.subr.mxu0 %v6993_v6 }
 0xdc0   :  { %3330 = vmatpush1.msra.mxu1 %v6628_v37  ;;  %4655 = vmatpush3.msra.mxu0 %v6631_v27 }
 0xdc1   :  { %3331 = vmatprep.subr.mxu1 %v6634_v18  ;;  %4656 = vmatprep.subr.mxu0 %v6993_v6 }
 0xdc2   :  { %3332 = vmatpush1.msra.mxu1 %v6638_v43  ;;  %4657 = vmatpush3.msra.mxu0 %v6641_v2 }
 0xdc3   :  { %3333 = vmatprep.subr.mxu1 %v6644_v1  ;;  %4658 = vmatprep.subr.mxu0 %v6993_v6 }
 0xdc4   :  { %3334 = vmatpush1.msra.mxu1 %v6648_v23  ;;  %4659 = vmatpush3.msra.mxu0 %v6651_v40 }
 0xdc5   :  { %3335 = vmatprep.subr.mxu1 %v6654_v47  ;;  %4660 = vmatprep.subr.mxu0 %v6993_v6 }
 0xdc6   :  { %3336 = vmatpush1.msra.mxu1 %v6658_v50  ;;  %4661 = vmatpush3.msra.mxu0 %v6661_v57 }
 0xdc7   :  { %3337 = vmatprep.subr.mxu1 %v6664_v39  ;;  %4662 = vmatprep.subr.mxu0 %v6993_v6 }
 0xdc8   :  { %3338 = vmatpush1.msra.mxu1 %v6668_v60  ;;  %4663 = vmatpush3.msra.mxu0 %v6671_v52 }
 0xdc9   :  { %3339 = vmatprep.subr.mxu1 %v6674_v3  ;;  %4664 = vmatprep.subr.mxu0 %v6993_v6 }
 0xdca   :  { %3340 = vmatpush1.msra.mxu1 %v6678_v53  ;;  %4665 = vmatpush3.msra.mxu0 %v6681_v54 }
 0xdcb   :  { %3341 = vmatprep.subr.mxu1 %v6684_v10  ;;  %4666 = vmatprep.subr.mxu0 %v6993_v6 }
 0xdcc   :  { %3342 = vmatpush1.msra.mxu1 %v6688_v55  ;;  %4667 = vmatpush3.msra.mxu0 %v6691_v11 }
 0xdcd   :  { %3343 = vmatprep.subr.mxu1 %v6694_v56  ;;  %4668 = vmatprep.subr.mxu0 %v6993_v6 }
 0xdce   :  { %3344 = vmatpush1.msra.mxu1 %v6698_v13  ;;  %3377 = vmatprep.mubr.f32.mxu1 %v6993_v6 }
 0xdcf   :  { %4669 = vmatpush3.msra.mxu0 %v6702_v0  ;;  %4670 = vmatprep.mubr.msk.f32.mxu0 %vm5021_vm2, %v6993_v6 }
 0xdd0   :  { %3479 = vmatprep.subr.mxu1 %v6546_v51  ;;  %4673 = vmatprep.subr.mxu0 %v6993_v6 }
 0xe6f   :  { %v3213_v19 = vpop.f32.mrf.mxu1  ;;  %v3284_v22 = vpop.f32.mrf.mxu0 }
 0xe70   :  { %v3288_v24 = vadd.f32 %v3213_v19, %v2112_v17  ;;  %v3302_v14 = vadd.f32 %v6311_v59, %v3284_v22  ;;  %v7122_v17 = vld [vmem:[#allocation36_spill] sm:$0xff] }
 0xe71   :  { %v4637_v5 = vpop.f32.mrf.mxu0  ;;  %v3215_v28 = vpop.f32.mrf.mxu1  ;;  %v2220_v19 = vadd.f32 %v7122_v17, %v6316_v62  ;;  %v7123_v59 = vld [vmem:[#allocation28_spill] sm:$0xff] }
 0xe72   :  { %v3709_v26 = vmul.f32 -1.442695, %v3288_v24  ;;  %v3289_v0 = vadd.f32 %v3215_v28, %v2114_v30 }
 0xe74   :  { %4844 = vpow2.f32 %v3709_v26  ;;  %v3710_v13 = vmul.f32 -1.442695, %v3289_v0 }
 0xe76   :  { %4846 = vpow2.f32 %v3710_v13 }
 0xe81   :  { %v4845_v56 = vpop.eup %4844 }
 0xe82   :  { %v3296_v51 = vadd.f32 1.0, %v4845_v56 }
 0xe83   :  { %v4847_v11 = vpop.eup %4846 }
 0xe84   :  { %4848 = vrcp.f32 %v3296_v51  ;;  %v3297_v55 = vadd.f32 1.0, %v4847_v11 }
 0xe86   :  { %4850 = vrcp.f32 %v3297_v55 }
 0xe91   :  { %v4849_v20 = vpop.eup %4848 }
 0xe92   :  { %v3303_v24 = vmul.f32 %v4849_v20, %v3302_v14  ;;  %v7124_v20 = vld [vmem:[#allocation17_spill] sm:$0xff] }
 0xe93   :  { %v4851_v29 = vpop.eup %4850 }
 0xe94   :  { %v3304_v5 = vadd.f32 %v3303_v24, %v2220_v19  ;;  %v3306_v26 = vsub.f32 1.0, %v4851_v29  ;;  %v3308_v13 = vmul.f32 %v4851_v29, %v6717_v38  ;;  %v7134_v19 = vld [vmem:[#allocation37_spill] sm:$0xff] }
 0xe95   :  { %v2230_v24 = vadd.f32 %v7134_v19, %v6316_v62 }
 0xe96   :  { %4852 = vtanh.f32 %v3304_v5 }
 0xea3   :  { %v4853_v28 = vpop.eup %4852 }
 0xea4   :  { %v3307_v0 = vmul.f32 %v4853_v28, %v3306_v26 }
 0xea6   :  { %v6810_v56 = vadd.f32 %v3308_v13, %v3307_v0 }
 0xea8   :  { %3378 = vmatmul.mubr.f32.vlgmr.msra.gmra.mxu1 %v6810_v56  ;;  %4671 = vmatmul.mubr.f32.vlgmr.msra.gmra.mxu0 %v6810_v56 }
 0xea9   :  { %3480 = vmatpush1.msra.mxu1 %v6562_v58  ;;  %4674 = vmatpush3.msra.mxu0 %v6722_v21  ;;  %v7125_v58 = vld [vmem:[#allocation20_spill] sm:$0xff] }
 0xeaa   :  { %3481 = vmatprep.subr.mxu1 %v6566_v31  ;;  %4675 = vmatprep.subr.mxu0 %v6993_v6  ;;  %v7126_v31 = vld [vmem:[#allocation34_spill] sm:$0xff] }
 0xeab   :  { %3482 = vmatpush1.msra.mxu1 %v6570_v33  ;;  %4676 = vmatpush3.msra.mxu0 %v6728_v9  ;;  %v7127_v33 = vld [vmem:[#allocation22_spill] sm:$0xff] }
 0xeac   :  { %3483 = vmatprep.subr.mxu1 %v6574_v45  ;;  %4677 = vmatprep.subr.mxu0 %v6993_v6  ;;  %v7128_v45 = vld [vmem:[#allocation19_spill] sm:$0xff] }
 0xead   :  { %3484 = vmatpush1.msra.mxu1 %v6578_v48  ;;  %4678 = vmatpush3.msra.mxu0 %v6734_v8  ;;  %v7129_v48 = vld [vmem:[#allocation31_spill] sm:$0xff]  ;;  %v7133_v8 = vld [vmem:[#allocation38_spill] sm:$0xff] }
 0xeae   :  { %3485 = vmatprep.subr.mxu1 %v6582_v41  ;;  %4679 = vmatprep.subr.mxu0 %v6993_v6  ;;  %v2118_v41 = vadd.f32 %v7129_v48, %v7128_v45 }
 0xeaf   :  { %3486 = vmatpush1.msra.mxu1 %v6586_v16  ;;  %4680 = vmatpush3.msra.mxu0 %v6740_v61  ;;  %v2126_v61 = vadd.f32 %v7133_v8, %v7090_v63 }
 0xeb0   :  { %3487 = vmatprep.subr.mxu1 %v6590_v7  ;;  %4681 = vmatprep.subr.mxu0 %v6993_v6 }
 0xeb1   :  { %3488 = vmatpush1.msra.mxu1 %v6594_v4  ;;  %4682 = vmatpush3.msra.mxu0 %v6746_v25 }
 0xeb2   :  { %3489 = vmatprep.subr.mxu1 %v6598_v32  ;;  %4683 = vmatprep.subr.mxu0 %v6993_v6 }
 0xeb3   :  { %3490 = vmatpush1.msra.mxu1 %v6602_v49  ;;  %4684 = vmatpush3.msra.mxu0 %v6752_v42 }
 0xeb4   :  { %3491 = vmatprep.subr.mxu1 %v6606_v34  ;;  %4685 = vmatprep.subr.mxu0 %v6993_v6 }
 0xeb5   :  { %3492 = vmatpush1.msra.mxu1 %v6610_v15  ;;  %4686 = vmatpush3.msra.mxu0 %v6758_v44  ;;  %v7130_v15 = vld [vmem:[#allocation12_spill] sm:$0xff] }
 0xeb6   :  { %3493 = vmatprep.subr.mxu1 %v6614_v35  ;;  %4687 = vmatprep.subr.mxu0 %v6993_v6  ;;  %v2120_v35 = vadd.f32 %v7130_v15, %v7090_v63 }
 0xeb7   :  { %3494 = vmatpush1.msra.mxu1 %v6618_v46  ;;  %4688 = vmatpush3.msra.mxu0 %v6621_v36 }
 0xeb8   :  { %3495 = vmatprep.subr.mxu1 %v6624_v12  ;;  %4689 = vmatprep.subr.mxu0 %v6993_v6 }
 0xeb9   :  { %3496 = vmatpush1.msra.mxu1 %v6628_v37  ;;  %4690 = vmatpush3.msra.mxu0 %v6631_v27 }
 0xeba   :  { %3497 = vmatprep.subr.mxu1 %v6634_v18  ;;  %4691 = vmatprep.subr.mxu0 %v6993_v6  ;;  %v4971_v18 = vld [vmem:[%s6907_s6 + $0x1] ss:$0 sm:$0xff] }
 0xebb   :  { %3498 = vmatpush1.msra.mxu1 %v6638_v43  ;;  %4692 = vmatpush3.msra.mxu0 %v6641_v2 }
 0xebc   :  { %3499 = vmatprep.subr.mxu1 %v6644_v1  ;;  %4693 = vmatprep.subr.mxu0 %v6993_v6  ;;  %v7131_v1 = vld [vmem:[#allocation29_spill] sm:$0xff] }
 0xebd   :  { %3500 = vmatpush1.msra.mxu1 %v6648_v23  ;;  %4694 = vmatpush3.msra.mxu0 %v6651_v40  ;;  %v2225_v23 = vadd.f32 %v7131_v1, %v6316_v62 }
 0xebe   :  { %3501 = vmatprep.subr.mxu1 %v6654_v47  ;;  %4695 = vmatprep.subr.mxu0 %v6993_v6 }
 0xebf   :  { %3502 = vmatpush1.msra.mxu1 %v6658_v50  ;;  %4696 = vmatpush3.msra.mxu0 %v6661_v57 }
 0xec0   :  { %3503 = vmatprep.subr.mxu1 %v6664_v39  ;;  %4697 = vmatprep.subr.mxu0 %v6993_v6 }
 0xec1   :  { %3504 = vmatpush1.msra.mxu1 %v6668_v60  ;;  %4698 = vmatpush3.msra.mxu0 %v6671_v52 }
 0xec2   :  { %3505 = vmatprep.subr.mxu1 %v6674_v3  ;;  %4699 = vmatprep.subr.mxu0 %v6993_v6 }
 0xec3   :  { %3506 = vmatpush1.msra.mxu1 %v6678_v53  ;;  %4700 = vmatpush3.msra.mxu0 %v6681_v54  ;;  %v7132_v53 = vld [vmem:[#allocation21_spill] sm:$0xff] }
 0xec4   :  { %3507 = vmatprep.subr.mxu1 %v6684_v10  ;;  %4701 = vmatprep.subr.mxu0 %v6993_v6  ;;  %v2124_v54 = vadd.f32 %v7132_v53, %v7128_v45 }
 0xec5   :  { %3508 = vmatpush1.msra.mxu1 %v7123_v59  ;;  %4702 = vmatpush3.msra.mxu0 %v7124_v20  ;;  %v3715_v59 = vld [vmem:[%s6908_s7] ss:$0 sm:$0xff] }
 0xec6   :  { %3509 = vmatprep.subr.mxu1 %v7125_v58  ;;  %4703 = vmatprep.subr.mxu0 %v6993_v6 }
 0xec7   :  { %3510 = vmatpush1.msra.mxu1 %v7126_v31  ;;  %3543 = vmatprep.mubr.f32.mxu1 %v6993_v6  ;;  %v3716_v31 = vld [vmem:[#allocation4] ss:$0 sm:$0xff] }
 0xec8   :  { %4704 = vmatpush3.msra.mxu0 %v7127_v33  ;;  %4705 = vmatprep.mubr.msk.f32.mxu0 %vm5021_vm2, %v6993_v6 }
 0xf68   :  { %v3379_v16 = vpop.f32.mrf.mxu1  ;;  %v3450_v7 = vpop.f32.mrf.mxu0 }
 0xf69   :  { %v3454_v4 = vadd.f32 %v3379_v16, %v2118_v41  ;;  %v3468_v43 = vadd.f32 %v4971_v18, %v3450_v7 }
 0xf6a   :  { %v4672_v32 = vpop.f32.mrf.mxu0  ;;  %v3381_v34 = vpop.f32.mrf.mxu1 }
 0xf6b   :  { %v3711_v49 = vmul.f32 -1.442695, %v3454_v4  ;;  %v3455_v46 = vadd.f32 %v3381_v34, %v2120_v35 }
 0xf6d   :  { %4854 = vpow2.f32 %v3711_v49  ;;  %v3712_v36 = vmul.f32 -1.442695, %v3455_v46 }
 0xf6f   :  { %4856 = vpow2.f32 %v3712_v36 }
 0xf7a   :  { %v4855_v12 = vpop.eup %4854 }
 0xf7b   :  { %v3462_v37 = vadd.f32 1.0, %v4855_v12 }
 0xf7c   :  { %v4857_v6 = vpop.eup %4856 }
 0xf7d   :  { %4858 = vrcp.f32 %v3462_v37  ;;  %v3463_v27 = vadd.f32 1.0, %v4857_v6 }
 0xf7f   :  { %4860 = vrcp.f32 %v3463_v27 }
 0xf8a   :  { %v4859_v2 = vpop.eup %4858 }
 0xf8b   :  { %v3469_v40 = vmul.f32 %v4859_v2, %v3468_v43 }
 0xf8c   :  { %v4861_v50 = vpop.eup %4860 }
 0xf8d   :  { %v3470_v47 = vadd.f32 %v3469_v40, %v2225_v23  ;;  %v3472_v57 = vsub.f32 1.0, %v4861_v50  ;;  %v3474_v52 = vmul.f32 %v4861_v50, %v6810_v56 }
 0xf8f   :  { %4862 = vtanh.f32 %v3470_v47 }
 0xf9c   :  { %v4863_v39 = vpop.eup %4862 }
 0xf9d   :  { %v3473_v60 = vmul.f32 %v4863_v39, %v3472_v57 }
 0xf9f   :  { %v3475_v3 = vadd.f32 %v3474_v52, %v3473_v60 }
 0xfa1   :  { %3544 = vmatmul.mubr.f32.vlgmr.msra.gmra.mxu1 %v3475_v3  ;;  %4706 = vmatmul.mubr.f32.vlgmr.msra.gmra.mxu0 %v3475_v3 }
0x1061   :  { %v3545_v10 = vpop.f32.mrf.mxu1  ;;  %v3616_v55 = vpop.f32.mrf.mxu0 }
0x1062   :  { %v3620_v11 = vadd.f32 %v3545_v10, %v2124_v54  ;;  %v3634_v14 = vadd.f32 %v4971_v18, %v3616_v55 }
0x1063   :  { %v4707_v38 = vpop.f32.mrf.mxu0  ;;  %v3547_v9 = vpop.f32.mrf.mxu1 }
0x1064   :  { %v3713_v21 = vmul.f32 -1.442695, %v3620_v11  ;;  %v3621_v25 = vadd.f32 %v3547_v9, %v2126_v61 }
0x1066   :  { %4864 = vpow2.f32 %v3713_v21  ;;  %v3714_v42 = vmul.f32 -1.442695, %v3621_v25 }
0x1068   :  { %4866 = vpow2.f32 %v3714_v42 }
0x1073   :  { %v4865_v44 = vpop.eup %4864 }
0x1074   :  { %v3628_v22 = vadd.f32 1.0, %v4865_v44 }
0x1075   :  { %v4867_v30 = vpop.eup %4866 }
0x1076   :  { %4868 = vrcp.f32 %v3628_v22  ;;  %v3629_v51 = vadd.f32 1.0, %v4867_v30 }
0x1078   :  { %4870 = vrcp.f32 %v3629_v51 }
0x1083   :  { %v4869_v17 = vpop.eup %4868 }
0x1084   :  { %v3635_v5 = vmul.f32 %v4869_v17, %v3634_v14 }
0x1085   :  { %v4871_v26 = vpop.eup %4870 }
0x1086   :  { %v3636_v29 = vadd.f32 %v3635_v5, %v2230_v24  ;;  %v3638_v63 = vsub.f32 1.0, %v4871_v26  ;;  %v3640_v13 = vmul.f32 %v4871_v26, %v3475_v3 }
0x1088   :  { %4872 = vtanh.f32 %v3636_v29 }
0x1095   :  { %v4873_v28 = vpop.eup %4872 }
0x1096   :  { %v3639_v0 = vmul.f32 %v4873_v28, %v3638_v63 }
0x1098   :  { %v3641_v56 = vadd.f32 %v3640_v13, %v3639_v0 }
0x109a   :  { %v3642_v20 = vmax.f32 %v3641_v56, 0.0 }
0x109c   :  { %v3650_v58 = vmul.f32 %v3715_v59, %v3642_v20 }
0x109e   :  { %3651 = vadd.xlane.f32.xlu0 %v3650_v58 }
0x1127   :  { %v3652_v33 = vpop.xlane.xlu0 %3651 }
0x1128   :  { %v3660_v62 = vadd.f32 %v3716_v31, %v3652_v33 }
0x112a   :  { %3662 = vst.msk [vmem:[%s6910_s9] sm:$0xff] %vm3661_vm3, %v3660_v62 }
0x112b   :  { %3667 = vsyncpa [#allocation6], 1 }
0x112c   :  { %3668 = vsyncpa [#allocation8], 1 }

// kernel: tpu_custom_call.1
= control target key start
LH: loop header
LB: loop body
LE: loop exit
PB: predicated region body
PF: predicated region fallthrough
CT: control target
= control target key end

     0   :  { %s6901_s0 = inlined_call_operand.vmem [shape: f32[8,8,4], index: 0, kind: input, shape index: {}]   ;;  %s6902_s1 = inlined_call_operand.vmem [shape: f32[4,128], index: 1, kind: input, shape index: {}]   ;;  %s6903_s2 = inlined_call_operand.vmem [shape: f32[1,128], index: 2, kind: input, shape index: {}]   ;;  %s6904_s3 = inlined_call_operand.hbm [shape: f32[2,128,384], index: 3, kind: input, shape index: {}]   ;;  %s6905_s4 = inlined_call_operand.hbm [shape: f32[2,128,384], index: 4, kind: input, shape index: {}]   ;;  %s6906_s5 = inlined_call_operand.vmem [shape: f32[2,1,384], index: 5, kind: input, shape index: {}]   ;;  %s6907_s6 = inlined_call_operand.vmem [shape: f32[2,1,128], index: 6, kind: input, shape index: {}]   ;;  %s6908_s7 = inlined_call_operand.vmem [shape: f32[1,128], index: 7, kind: input, shape index: {}]   ;;  %s6909_s8 = inlined_call_operand.<no memory space> [shape: f32[1,1], index: 8, kind: input, shape index: {}]   ;;  %s6910_s9 = inlined_call_operand.vmem [shape: f32[8,1], index: 9, kind: output, shape index: {}]  }
   0x1   :  { %v14_v0 = vstv %s6909_s8 }
   0x2   :  { %15 = vst [vmem:[#allocation4] sm:$0x1] %v14_v0 }
   0x3   :  { %16 = vsyncpa [#allocation6], 0 }
   0x4   :  { %17 = vsyncpa [#allocation8], 0  ;;  %s5016_s11 = smov [#allocation5]  }
   0x5   :  { %s29_s12 = sshll.u32 %s5016_s11, 4  ;;  %s30_s12 = int_to_ptr.vmem [resolvable:$true] %s29_s12 }
   0x6   :  { %s4980_s13 = scalar_lea.vmem %s30_s12, 12288  ;;  %p4985_p1 = scmp.lt.s32.totalorder %s30_s12, %s30_s12 }
   0x7   :  { %p4981_p0 = scmp.ne.s32.totalorder %s30_s12, %s4980_s13  ;;  %p4986_p2 = scmp.lt.s32.totalorder %s4980_s13, %s4980_s13 }
   0x9   :  { %p4987_p3 = por %p4986_p2, %p4985_p1 }
   0xb   :  { %p4988_p4 = pnand %p4987_p3, %p4981_p0 }
   0xd   :  { %4991 = shalt.err (!%p4988_p4)
}
   0xe   :  { %s5017_s14 = smov 384   ;;  %s5018_s15 = smov 24  }
   0xf   :  { %35 = dma.hbm_to_vmem [thread:$0]  %s6904_s3, 12288, %s30_s12, [#allocation6], %s5017_s14, %s5017_s14, %s5018_s15  }
  0x10   :  { %s5019_s8 = smov [#allocation7]  }
  0x11   :  { %s41_s18 = sshll.u32 %s5019_s8, 4  ;;  %s42_s18 = int_to_ptr.vmem [resolvable:$true] %s41_s18 }
  0x12   :  { %s5000_s19 = scalar_lea.vmem %s42_s18, 12288  ;;  %p5005_p6 = scmp.lt.s32.totalorder %s42_s18, %s42_s18 }
  0x13   :  { %p5001_p5 = scmp.ne.s32.totalorder %s42_s18, %s5000_s19  ;;  %p5006_p7 = scmp.lt.s32.totalorder %s5000_s19, %s5000_s19 }
  0x15   :  { %p5007_p8 = por %p5006_p7, %p5005_p6 }
  0x17   :  { %p5008_p9 = pnand %p5007_p8, %p5001_p5 }
  0x19   :  { %5011 = shalt.err (!%p5008_p9)
}
  0x1a   :  { %47 = dma.hbm_to_vmem [thread:$0]  %s6905_s4, 12288, %s42_s18, [#allocation8], %s5017_s14, %s5017_s14, %s5018_s15  }
  0x1b   :  { %5012 = dma.done.wait [#allocation6], 12288  }
  0x1c   :  { %5013 = vsyncadd [#allocation6], 4294955008 }
  0x1d   :  { %5014 = dma.done.wait [#allocation8], 12288  }
  0x1e   :  { %5015 = vsyncadd [#allocation8], 4294955008  ;;  %vm103_vm0 = vcmask 1043456   ;;  %vm78_vm1 = vcmask 31744   ;;  %v70_v1 = vld [vmem:[%s6902_s1] sm:$0xf] }
  0x1f   :  { %v62_v2 = vld [vmem:[%s6901_s0] sm:$0xff]  ;;  %v63_v3 = vld [vmem:[%s6901_s0 + $0x8] sm:$0xff]  ;;  %4046 = vmatprep.subr.msk.mxu0 %vm103_vm0, %v70_v1  ;;  %v64_v4 = vld [vmem:[%s6901_s0 + $0x10] sm:$0xff]  ;;  %v6912_v58 = vmov 0.0   ;;  %vm5021_vm2 = vmmov 0   ;;  %vm3661_vm3 = vcmask 7168  }
  0x20   :  { %4048 = vmatprep.mubr.msk.f32.mxu0 %vm78_vm1, %v62_v2  ;;  %4047 = vmatpush3.msk.msra.mxu0 %vm103_vm0, %v70_v1  ;;  %v274_v5 = vld [vmem:[#allocation5 + $0x170] sm:$0xff]  ;;  %v273_v6 = vld [vmem:[#allocation5 + $0x168] sm:$0xff]  ;;  %v271_v7 = vld [vmem:[#allocation5 + $0x158] sm:$0xff] }
  0x21   :  { %4049 = vmatmul.mubr.msk.f32.vlgmr.msra.gmra.mxu0 %vm78_vm1, %v63_v3  ;;  %v65_v8 = vld [vmem:[%s6901_s0 + $0x18] sm:$0xff]  ;;  %293 = vmatprep.subr.mxu1 %v274_v5  ;;  %v66_v11 = vld [vmem:[%s6901_s0 + $0x20] sm:$0xff]  ;;  %v265_v15 = vld [vmem:[#allocation5 + $0x128] sm:$0xff] }
  0x22   :  { %4051 = vmatprep.mubr.msk.f32.mxu0 %vm78_vm1, %v64_v4  ;;  %v275_v9 = vld [vmem:[#allocation5 + $0x178] sm:$0xff]  ;;  %v270_v10 = vld [vmem:[#allocation5 + $0x150] sm:$0xff]  ;;  %294 = vmatpush1.msra.mxu1 %v273_v6  ;;  %v268_v12 = vld [vmem:[#allocation5 + $0x140] sm:$0xff] }
  0x23   :  { %4060 = vmatprep.subr.mxu0 %v275_v9  ;;  %295 = vmatprep.subr.mxu1 %v271_v7  ;;  %v272_v13 = vld [vmem:[#allocation5 + $0x160] sm:$0xff]  ;;  %v267_v14 = vld [vmem:[#allocation5 + $0x138] sm:$0xff]  ;;  %v269_v17 = vld [vmem:[#allocation5 + $0x148] sm:$0xff] }
  0x24   :  { %4061 = vmatpush3.msra.mxu0 %v275_v9  ;;  %296 = vmatpush1.msra.mxu1 %v270_v10  ;;  %v67_v16 = vld [vmem:[%s6901_s0 + $0x28] sm:$0xff]  ;;  %v68_v18 = vld [vmem:[%s6901_s0 + $0x30] sm:$0xff]  ;;  %v69_v23 = vld [vmem:[%s6901_s0 + $0x38] sm:$0xff] }
  0x25   :  { %4052 = vmatmul.mubr.msk.f32.gmra.mxu0 %vm78_vm1, %v65_v8  ;;  %297 = vmatprep.subr.mxu1 %v268_v12  ;;  %v264_v19 = vld [vmem:[#allocation5 + $0x120] sm:$0xff]  ;;  %v262_v20 = vld [vmem:[#allocation5 + $0x110] sm:$0xff]  ;;  %v261_v22 = vld [vmem:[#allocation5 + $0x108] sm:$0xff] }
  0x26   :  { %4054 = vmatprep.mubr.msk.f32.mxu0 %vm78_vm1, %v66_v11  ;;  %4062 = vmatprep.subr.mxu0 %v272_v13  ;;  %v266_v21 = vld [vmem:[#allocation5 + $0x130] sm:$0xff]  ;;  %v259_v24 = vld [vmem:[#allocation5 + $0xf8] sm:$0xff]  ;;  %v256_v27 = vld [vmem:[#allocation5 + $0xe0] sm:$0xff] }
  0x27   :  { %298 = vmatpush1.msra.mxu1 %v267_v14  ;;  %4063 = vmatpush3.msra.mxu0 %v272_v13  ;;  %v258_v25 = vld [vmem:[#allocation5 + $0xf0] sm:$0xff]  ;;  %v263_v26 = vld [vmem:[#allocation5 + $0x118] sm:$0xff]  ;;  %v260_v29 = vld [vmem:[#allocation5 + $0x100] sm:$0xff] }
  0x28   :  { %299 = vmatprep.subr.mxu1 %v265_v15  ;;  %4064 = vmatprep.subr.mxu0 %v269_v17  ;;  %v255_v28 = vld [vmem:[#allocation5 + $0xd8] sm:$0xff]  ;;  %v253_v30 = vld [vmem:[#allocation5 + $0xc8] sm:$0xff]  ;;  %v252_v31 = vld [vmem:[#allocation5 + $0xc0] sm:$0xff] }
  0x29   :  { %4055 = vmatmul.mubr.msk.f32.gmra.mxu0 %vm78_vm1, %v67_v16  ;;  %300 = vmatpush1.msra.mxu1 %v264_v19  ;;  %v257_v32 = vld [vmem:[#allocation5 + $0xe8] sm:$0xff]  ;;  %v250_v33 = vld [vmem:[#allocation5 + $0xb0] sm:$0xff]  ;;  %v247_v36 = vld [vmem:[#allocation5 + $0x98] sm:$0xff] }
  0x2a   :  { %4057 = vmatprep.mubr.msk.f32.mxu0 %vm78_vm1, %v68_v18  ;;  %4065 = vmatpush3.msra.mxu0 %v269_v17  ;;  %v249_v34 = vld [vmem:[#allocation5 + $0xa8] sm:$0xff]  ;;  %v254_v35 = vld [vmem:[#allocation5 + $0xd0] sm:$0xff]  ;;  %v251_v38 = vld [vmem:[#allocation5 + $0xb8] sm:$0xff] }
  0x2b   :  { %301 = vmatprep.subr.mxu1 %v262_v20  ;;  %4066 = vmatprep.subr.mxu0 %v266_v21  ;;  %v246_v37 = vld [vmem:[#allocation5 + $0x90] sm:$0xff]  ;;  %v244_v39 = vld [vmem:[#allocation5 + $0x80] sm:$0xff]  ;;  %v243_v40 = vld [vmem:[#allocation5 + $0x78] sm:$0xff] }
  0x2c   :  { %302 = vmatpush1.msra.mxu1 %v261_v22  ;;  %4067 = vmatpush3.msra.mxu0 %v266_v21  ;;  %v248_v41 = vld [vmem:[#allocation5 + $0xa0] sm:$0xff]  ;;  %v241_v42 = vld [vmem:[#allocation5 + $0x68] sm:$0xff]  ;;  %v238_v45 = vld [vmem:[#allocation5 + $0x50] sm:$0xff] }
  0x2d   :  { %4058 = vmatmul.mubr.msk.f32.gmra.mxu0 %vm78_vm1, %v69_v23  ;;  %303 = vmatprep.subr.mxu1 %v259_v24  ;;  %v240_v43 = vld [vmem:[#allocation5 + $0x60] sm:$0xff]  ;;  %v245_v44 = vld [vmem:[#allocation5 + $0x88] sm:$0xff]  ;;  %v242_v47 = vld [vmem:[#allocation5 + $0x70] sm:$0xff] }
  0x2e   :  { %304 = vmatpush1.msra.mxu1 %v258_v25  ;;  %4068 = vmatprep.subr.mxu0 %v263_v26  ;;  %v237_v46 = vld [vmem:[#allocation5 + $0x48] sm:$0xff]  ;;  %v235_v48 = vld [vmem:[#allocation5 + $0x38] sm:$0xff]  ;;  %v234_v49 = vld [vmem:[#allocation5 + $0x30] sm:$0xff] }
  0x2f   :  { %305 = vmatprep.subr.mxu1 %v256_v27  ;;  %4069 = vmatpush3.msra.mxu0 %v263_v26  ;;  %v239_v50 = vld [vmem:[#allocation5 + $0x58] sm:$0xff]  ;;  %v236_v51 = vld [vmem:[#allocation5 + $0x40] sm:$0xff]  ;;  %v233_v54 = vld [vmem:[#allocation5 + $0x28] sm:$0xff] }
  0x30   :  { %306 = vmatpush1.msra.mxu1 %v255_v28  ;;  %4070 = vmatprep.subr.mxu0 %v260_v29  ;;  %v232_v52 = vld [vmem:[#allocation5 + $0x20] sm:$0xff]  ;;  %v231_v53 = vld [vmem:[#allocation5 + $0x18] sm:$0xff]  ;;  %v229_v55 = vld [vmem:[#allocation5 + $0x8] sm:$0xff] }
  0x31   :  { %307 = vmatprep.subr.mxu1 %v253_v30  ;;  %4071 = vmatpush3.msra.mxu0 %v260_v29  ;;  %v228_v56 = vld [vmem:[#allocation5] sm:$0xff]  ;;  %v230_v57 = vld [vmem:[#allocation5 + $0x10] sm:$0xff]  ;;  %v3669_v61 = vld [vmem:[%s6903_s2] ss:$0 sm:$0xff] }
  0x32   :  { %308 = vmatpush1.msra.mxu1 %v252_v31  ;;  %4072 = vmatprep.subr.mxu0 %v257_v32  ;;  %v5117_v59 = vld [vmem:[#allocation7 + $0x170] sm:$0xff]  ;;  %v5124_v0 = vld [vmem:[#allocation7 + $0x168] sm:$0xff]  ;;  %v5126_v3 = vld [vmem:[#allocation7 + $0x158] sm:$0xff] }
  0x33   :  { %309 = vmatprep.subr.mxu1 %v250_v33  ;;  %4073 = vmatpush3.msra.mxu0 %v257_v32  ;;  %6964 = vst [vmem:[#allocation11_spill] sm:$0xff] %v5117_v59  ;;  %v5128_v4 = vld [vmem:[#allocation7 + $0x150] sm:$0xff]  ;;  %v5130_v5 = vld [vmem:[#allocation7 + $0x178] sm:$0xff]  ;;  %v5133_v7 = vld [vmem:[#allocation7 + $0x140] sm:$0xff] }
  0x34   :  { %310 = vmatpush1.msra.mxu1 %v249_v34  ;;  %4074 = vmatprep.subr.mxu0 %v254_v35  ;;  %v5137_v10 = vld [vmem:[#allocation7 + $0x138] sm:$0xff]  ;;  %v5140_v11 = vld [vmem:[#allocation7 + $0x128] sm:$0xff]  ;;  %v5144_v13 = vld [vmem:[#allocation7 + $0x120] sm:$0xff] }
  0x35   :  { %311 = vmatprep.subr.mxu1 %v247_v36  ;;  %4075 = vmatpush3.msra.mxu0 %v254_v35  ;;  %v5147_v14 = vld [vmem:[#allocation7 + $0x110] sm:$0xff]  ;;  %v5150_v17 = vld [vmem:[#allocation7 + $0x108] sm:$0xff]  ;;  %v5154_v19 = vld [vmem:[#allocation7 + $0xf8] sm:$0xff] }
  0x36   :  { %312 = vmatpush1.msra.mxu1 %v246_v37  ;;  %4076 = vmatprep.subr.mxu0 %v251_v38  ;;  %v5157_v21 = vld [vmem:[#allocation7 + $0xf0] sm:$0xff]  ;;  %v5161_v22 = vld [vmem:[#allocation7 + $0xe0] sm:$0xff]  ;;  %v5164_v24 = vld [vmem:[#allocation7 + $0xd8] sm:$0xff] }
  0x37   :  { %313 = vmatprep.subr.mxu1 %v244_v39  ;;  %4077 = vmatpush3.msra.mxu0 %v251_v38  ;;  %v5167_v26 = vld [vmem:[#allocation7 + $0xc8] sm:$0xff]  ;;  %v5170_v28 = vld [vmem:[#allocation7 + $0xc0] sm:$0xff]  ;;  %v5174_v29 = vld [vmem:[#allocation7 + $0xb0] sm:$0xff] }
  0x38   :  { %314 = vmatpush1.msra.mxu1 %v243_v40  ;;  %4078 = vmatprep.subr.mxu0 %v248_v41  ;;  %v5177_v30 = vld [vmem:[#allocation7 + $0xa8] sm:$0xff]  ;;  %v5180_v31 = vld [vmem:[#allocation7 + $0x98] sm:$0xff]  ;;  %v5183_v32 = vld [vmem:[#allocation7 + $0x90] sm:$0xff] }
  0x39   :  { %315 = vmatprep.subr.mxu1 %v241_v42  ;;  %4079 = vmatpush3.msra.mxu0 %v248_v41  ;;  %v5185_v33 = vld [vmem:[#allocation7 + $0x160] sm:$0xff]  ;;  %v5192_v35 = vld [vmem:[#allocation7 + $0x78] sm:$0xff]  ;;  %v5196_v36 = vld [vmem:[#allocation7 + $0x68] sm:$0xff] }
  0x3a   :  { %316 = vmatpush1.msra.mxu1 %v240_v43  ;;  %4080 = vmatprep.subr.mxu0 %v245_v44  ;;  %v5189_v34 = vld [vmem:[#allocation7 + $0x80] sm:$0xff]  ;;  %v5202_v38 = vld [vmem:[#allocation7 + $0x148] sm:$0xff]  ;;  %v5206_v39 = vld [vmem:[#allocation7 + $0x50] sm:$0xff] }
  0x3b   :  { %317 = vmatprep.subr.mxu1 %v238_v45  ;;  %4081 = vmatpush3.msra.mxu0 %v245_v44  ;;  %v5200_v37 = vld [vmem:[#allocation7 + $0x60] sm:$0xff]  ;;  %v5209_v40 = vld [vmem:[#allocation7 + $0x48] sm:$0xff]  ;;  %v5213_v41 = vld [vmem:[#allocation7 + $0x38] sm:$0xff] }
  0x3c   :  { %318 = vmatpush1.msra.mxu1 %v237_v46  ;;  %4082 = vmatprep.subr.mxu0 %v242_v47  ;;  %v5217_v42 = vld [vmem:[#allocation7 + $0x30] sm:$0xff]  ;;  %v5223_v44 = vld [vmem:[#allocation7 + $0x20] sm:$0xff]  ;;  %v5226_v45 = vld [vmem:[#allocation7 + $0x18] sm:$0xff] }
  0x3d   :  { %319 = vmatprep.subr.mxu1 %v235_v48  ;;  %4083 = vmatpush3.msra.mxu0 %v242_v47  ;;  %v5219_v43 = vld [vmem:[#allocation7 + $0x130] sm:$0xff]  ;;  %6965 = vst [vmem:[#allocation12_spill] sm:$0xff] %v5226_v45  ;;  %v5230_v46 = vld [vmem:[#allocation7 + $0x8] sm:$0xff]  ;;  %v5234_v47 = vld [vmem:[#allocation7] sm:$0xff] }
  0x3e   :  { %320 = vmatpush1.msra.mxu1 %v234_v49  ;;  %4084 = vmatprep.subr.mxu0 %v239_v50  ;;  %6966 = vst [vmem:[#allocation13_spill] sm:$0xff] %v5230_v46  ;;  %6967 = vst [vmem:[#allocation14_spill] sm:$0xff] %v5234_v47  ;;  %v5236_v48 = vld [vmem:[#allocation7 + $0x118] sm:$0xff]  ;;  %v5242_v49 = vld [vmem:[#allocation7 + $0x100] sm:$0xff] }
  0x3f   :  { %4085 = vmatpush3.msra.mxu0 %v239_v50  ;;  %321 = vmatprep.subr.mxu1 %v232_v52  ;;  %v5248_v50 = vld [vmem:[#allocation7 + $0xe8] sm:$0xff]  ;;  %v5260_v52 = vld [vmem:[#allocation7 + $0xb8] sm:$0xff] }
  0x40   :  { %4086 = vmatprep.subr.mxu0 %v236_v51  ;;  %322 = vmatpush1.msra.mxu1 %v231_v53  ;;  %v5266_v53 = vld [vmem:[#allocation7 + $0xa0] sm:$0xff] }
  0x41   :  { %4087 = vmatpush3.msra.mxu0 %v236_v51  ;;  %323 = vmatprep.subr.mxu1 %v229_v55  ;;  %v5254_v51 = vld [vmem:[#allocation7 + $0xd0] sm:$0xff] }
  0x42   :  { %4088 = vmatprep.subr.mxu0 %v233_v54  ;;  %324 = vmatpush1.msra.mxu1 %v228_v56  ;;  %v5278_v55 = vld [vmem:[#allocation7 + $0x70] sm:$0xff]  ;;  %v5284_v56 = vld [vmem:[#allocation7 + $0x58] sm:$0xff] }
  0x43   :  { %4089 = vmatpush3.msra.mxu0 %v233_v54  ;;  %357 = vmatprep.mubr.f32.mxu1 %v6912_v58  ;;  %v5272_v54 = vld [vmem:[#allocation7 + $0x88] sm:$0xff] }
  0x44   :  { %4090 = vmatprep.subr.mxu0 %v230_v57  ;;  %587 = vmatprep.subr.mxu1 %v5117_v59 }
  0x45   :  { %4091 = vmatpush3.msra.mxu0 %v230_v57  ;;  %v5290_v57 = vld [vmem:[#allocation7 + $0x40] sm:$0xff] }
  0x46   :  { %4104 = vmatprep.subr.mxu0 %v6912_v58 }
  0xe1   :  { %v4050_v60 = vpop.f32.mrf.mxu0 }
  0xe2   :  { %v179_v1 = vadd.f32 %v4050_v60, %v3669_v61  ;;  %v5296_v60 = vld [vmem:[#allocation7 + $0x28] sm:$0xff] }
  0xe3   :  { %v173_v62 = vpop.f32.mrf.mxu0  ;;  %6968 = vst [vmem:[#allocation15_spill] sm:$0xff] %v5296_v60 }
  0xe4   :  { %v174_v63 = vadd.f32 %v3669_v61, %v173_v62  ;;  %v278_v62 = vlaneseq }
  0xe5   :  { %v4053_v2 = vpop.f32.mrf.mxu0 }
  0xe6   :  { %358 = vmatmul.mubr.f32.vlgmr.msra.gmra.mxu1 %v174_v63  ;;  %4092 = vmatprep.mubr.f32.mxu0 %v174_v63  ;;  %v189_v8 = vadd.f32 %v4053_v2, %v3669_v61  ;;  %v5361_v63 = vshrl.u32 %v278_v62, 7  ;;  %v276_v2 = vld [vmem:[%s6906_s5] sm:$0x7] }
  0xe7   :  { %588 = vmatpush1.msra.mxu1 %v5124_v0  ;;  %v183_v6 = vpop.f32.mrf.mxu0  ;;  %4093 = vmatmul.mubr.f32.vlgmr.msra.gmra.mxu0 %v179_v1 }
  0xe8   :  { %v184_v9 = vadd.f32 %v3669_v61, %v183_v6  ;;  %589 = vmatprep.subr.mxu1 %v5126_v3  ;;  %363 = vmatprep.mubr.f32.mxu1 %v6912_v58  ;;  %6970 = vst [vmem:[#allocation17_spill] sm:$0xff] %v5361_v63 }
  0xe9   :  { %590 = vmatpush1.msra.mxu1 %v5128_v4  ;;  %v4056_v12 = vpop.f32.mrf.mxu0  ;;  %4105 = vmatpush3.msra.mxu0 %v5130_v5 }
  0xea   :  { %591 = vmatprep.subr.mxu1 %v5133_v7  ;;  %364 = vmatmul.mubr.f32.gmra.mxu1 %v179_v1  ;;  %v199_v18 = vadd.f32 %v4056_v12, %v3669_v61  ;;  %v6911_v1 = vsub.s32 2, %v5361_v63 }
  0xeb   :  { %4095 = vmatprep.mubr.f32.mxu0 %v184_v9  ;;  %592 = vmatpush1.msra.mxu1 %v5137_v10  ;;  %v193_v15 = vpop.f32.mrf.mxu0 }
  0xec   :  { %4096 = vmatmul.mubr.f32.gmra.mxu0 %v189_v8  ;;  %593 = vmatprep.subr.mxu1 %v5140_v11  ;;  %v194_v16 = vadd.f32 %v3669_v61, %v193_v15  ;;  %v5369_v6 = vrot.slane %v276_v2, %v6911_v1  ;;  %v6925_v15 = vsub.s32 1, %v5361_v63 }
  0xed   :  { %594 = vmatpush1.msra.mxu1 %v5144_v13  ;;  %369 = vmatprep.mubr.f32.mxu1 %v6912_v58  ;;  %v4059_v20 = vpop.f32.mrf.mxu0 }
  0xee   :  { %595 = vmatprep.subr.mxu1 %v5147_v14  ;;  %370 = vmatmul.mubr.f32.gmra.mxu1 %v184_v9  ;;  %v209_v27 = vadd.f32 %v4059_v20, %v3669_v61 }
  0xef   :  { %596 = vmatpush1.msra.mxu1 %v5150_v17  ;;  %375 = vmatprep.mubr.f32.mxu1 %v6912_v58  ;;  %v203_v23 = vpop.f32.mrf.mxu0 }
  0xf0   :  { %597 = vmatprep.subr.mxu1 %v5154_v19  ;;  %4098 = vmatprep.mubr.f32.mxu0 %v194_v16  ;;  %v204_v25 = vadd.f32 %v3669_v61, %v203_v23  ;;  %v5302_v61 = vld [vmem:[#allocation7 + $0x10] sm:$0xff] }
  0xf1   :  { %598 = vmatpush1.msra.mxu1 %v5157_v21  ;;  %4099 = vmatmul.mubr.f32.gmra.mxu0 %v199_v18  ;;  %6969 = vst [vmem:[#allocation16_spill] sm:$0xff] %v5302_v61 }
  0xf2   :  { %599 = vmatprep.subr.mxu1 %v5161_v22  ;;  %376 = vmatmul.mubr.f32.gmra.mxu1 %v189_v8  ;;  %v6920_v8 = vsub.s32 0, %v5361_v63 }
  0xf3   :  { %600 = vmatpush1.msra.mxu1 %v5164_v24  ;;  %381 = vmatprep.mubr.f32.mxu1 %v6912_v58 }
  0xf4   :  { %601 = vmatprep.subr.mxu1 %v5167_v26  ;;  %4101 = vmatprep.mubr.f32.mxu0 %v204_v25  ;;  %v281_v20 = vrot.slane %v276_v2, %v6920_v8 }
  0xf5   :  { %602 = vmatpush1.msra.mxu1 %v5170_v28  ;;  %4102 = vmatmul.mubr.f32.gmra.mxu0 %v209_v27 }
  0xf6   :  { %603 = vmatprep.subr.mxu1 %v5174_v29  ;;  %382 = vmatmul.mubr.f32.gmra.mxu1 %v194_v16 }
  0xf7   :  { %604 = vmatpush1.msra.mxu1 %v5177_v30  ;;  %387 = vmatprep.mubr.f32.mxu1 %v6912_v58 }
  0xf8   :  { %605 = vmatprep.subr.mxu1 %v5180_v31  ;;  %4106 = vmatprep.subr.mxu0 %v6912_v58 }
  0xf9   :  { %606 = vmatpush1.msra.mxu1 %v5183_v32  ;;  %4107 = vmatpush3.msra.mxu0 %v5185_v33 }
  0xfa   :  { %607 = vmatprep.subr.mxu1 %v5189_v34  ;;  %388 = vmatmul.mubr.f32.gmra.mxu1 %v199_v18 }
  0xfb   :  { %608 = vmatpush1.msra.mxu1 %v5192_v35  ;;  %393 = vmatprep.mubr.f32.mxu1 %v6912_v58 }
  0xfc   :  { %609 = vmatprep.subr.mxu1 %v5196_v36  ;;  %4108 = vmatprep.subr.mxu0 %v6912_v58 }
  0xfd   :  { %610 = vmatpush1.msra.mxu1 %v5200_v37  ;;  %4109 = vmatpush3.msra.mxu0 %v5202_v38 }
  0xfe   :  { %611 = vmatprep.subr.mxu1 %v5206_v39  ;;  %394 = vmatmul.mubr.f32.gmra.mxu1 %v204_v25 }
  0xff   :  { %612 = vmatpush1.msra.mxu1 %v5209_v40  ;;  %399 = vmatprep.mubr.f32.mxu1 %v6912_v58 }
 0x100   :  { %613 = vmatprep.subr.mxu1 %v5213_v41  ;;  %4110 = vmatprep.subr.mxu0 %v6912_v58 }
 0x101   :  { %614 = vmatpush1.msra.mxu1 %v5217_v42  ;;  %4111 = vmatpush3.msra.mxu0 %v5219_v43 }
 0x102   :  { %615 = vmatprep.subr.mxu1 %v5223_v44  ;;  %400 = vmatmul.mubr.f32.gmra.mxu1 %v209_v27  ;;  %v285_v27 = vrot.slane %v276_v2, %v6925_v15 }
 0x103   :  { %616 = vmatpush1.msra.mxu1 %v5226_v45  ;;  %651 = vmatprep.mubr.f32.mxu1 %v6912_v58 }
 0x104   :  { %617 = vmatprep.subr.mxu1 %v5230_v46  ;;  %4112 = vmatprep.subr.mxu0 %v6912_v58 }
 0x105   :  { %618 = vmatpush1.msra.mxu1 %v5234_v47  ;;  %4113 = vmatpush3.msra.mxu0 %v5236_v48 }
 0x106   :  { %652 = vmatmul.mubr.f32.vlgmr.msra.gmra.mxu1 %v6912_v58  ;;  %4114 = vmatprep.subr.mxu0 %v6912_v58 }
 0x107   :  { %4115 = vmatpush3.msra.mxu0 %v5242_v49  ;;  %4136 = vmatprep.mubr.msk.f32.mxu0 %vm5021_vm2, %v6912_v58 }
 0x108   :  { %4116 = vmatprep.subr.mxu0 %v6912_v58  ;;  %761 = vmatprep.subr.mxu1 %v5117_v59 }
 0x109   :  { %4117 = vmatpush3.msra.mxu0 %v5248_v50  ;;  %762 = vmatpush1.msra.mxu1 %v5124_v0 }
 0x10a   :  { %4118 = vmatprep.subr.mxu0 %v6912_v58  ;;  %763 = vmatprep.subr.mxu1 %v5126_v3 }
 0x10b   :  { %4119 = vmatpush3.msra.mxu0 %v5254_v51  ;;  %764 = vmatpush1.msra.mxu1 %v5128_v4 }
 0x10c   :  { %4120 = vmatprep.subr.mxu0 %v6912_v58  ;;  %765 = vmatprep.subr.mxu1 %v5133_v7 }
 0x10d   :  { %4121 = vmatpush3.msra.mxu0 %v5260_v52  ;;  %766 = vmatpush1.msra.mxu1 %v5137_v10 }
 0x10e   :  { %4122 = vmatprep.subr.mxu0 %v6912_v58  ;;  %767 = vmatprep.subr.mxu1 %v5140_v11 }
 0x10f   :  { %4123 = vmatpush3.msra.mxu0 %v5266_v53  ;;  %768 = vmatpush1.msra.mxu1 %v5144_v13 }
 0x110   :  { %4124 = vmatprep.subr.mxu0 %v6912_v58  ;;  %769 = vmatprep.subr.mxu1 %v5147_v14 }
 0x111   :  { %4125 = vmatpush3.msra.mxu0 %v5272_v54  ;;  %770 = vmatpush1.msra.mxu1 %v5150_v17 }
 0x112   :  { %4126 = vmatprep.subr.mxu0 %v6912_v58  ;;  %771 = vmatprep.subr.mxu1 %v5154_v19 }
 0x113   :  { %4127 = vmatpush3.msra.mxu0 %v5278_v55  ;;  %772 = vmatpush1.msra.mxu1 %v5157_v21 }
 0x114   :  { %4128 = vmatprep.subr.mxu0 %v6912_v58  ;;  %773 = vmatprep.subr.mxu1 %v5161_v22 }
 0x115   :  { %4129 = vmatpush3.msra.mxu0 %v5284_v56  ;;  %774 = vmatpush1.msra.mxu1 %v5164_v24 }
 0x116   :  { %4130 = vmatprep.subr.mxu0 %v6912_v58  ;;  %775 = vmatprep.subr.mxu1 %v5167_v26 }
 0x117   :  { %4131 = vmatpush3.msra.mxu0 %v5290_v57  ;;  %776 = vmatpush1.msra.mxu1 %v5170_v28 }
 0x118   :  { %4132 = vmatprep.subr.mxu0 %v6912_v58  ;;  %777 = vmatprep.subr.mxu1 %v5174_v29 }
 0x119   :  { %4133 = vmatpush3.msra.mxu0 %v5296_v60  ;;  %778 = vmatpush1.msra.mxu1 %v5177_v30 }
 0x11a   :  { %4134 = vmatprep.subr.mxu0 %v6912_v58  ;;  %779 = vmatprep.subr.mxu1 %v5180_v31 }
 0x11b   :  { %4135 = vmatpush3.msra.mxu0 %v5302_v61  ;;  %780 = vmatpush1.msra.mxu1 %v5183_v32 }
 0x11c   :  { %4137 = vmatmul.mubr.f32.vlgmr.msra.gmra.mxu0 %v6912_v58  ;;  %4139 = vmatprep.subr.mxu0 %v6912_v58 }
 0x11d   :  { %4140 = vmatpush3.msra.mxu0 %v5130_v5  ;;  %781 = vmatprep.subr.mxu1 %v5189_v34 }
 0x11e   :  { %4141 = vmatprep.subr.mxu0 %v6912_v58  ;;  %782 = vmatpush1.msra.mxu1 %v5192_v35 }
 0x11f   :  { %4142 = vmatpush3.msra.mxu0 %v5185_v33  ;;  %783 = vmatprep.subr.mxu1 %v5196_v36 }
 0x120   :  { %4143 = vmatprep.subr.mxu0 %v6912_v58  ;;  %784 = vmatpush1.msra.mxu1 %v5200_v37 }
 0x121   :  { %4144 = vmatpush3.msra.mxu0 %v5202_v38  ;;  %785 = vmatprep.subr.mxu1 %v5206_v39 }
 0x122   :  { %4145 = vmatprep.subr.mxu0 %v6912_v58  ;;  %786 = vmatpush1.msra.mxu1 %v5209_v40 }
 0x123   :  { %4146 = vmatpush3.msra.mxu0 %v5219_v43  ;;  %787 = vmatprep.subr.mxu1 %v5213_v41 }
 0x124   :  { %4147 = vmatprep.subr.mxu0 %v6912_v58  ;;  %788 = vmatpush1.msra.mxu1 %v5217_v42 }
 0x125   :  { %4148 = vmatpush3.msra.mxu0 %v5236_v48  ;;  %789 = vmatprep.subr.mxu1 %v5223_v44 }
 0x126   :  { %4149 = vmatprep.subr.mxu0 %v6912_v58  ;;  %790 = vmatpush1.msra.mxu1 %v5226_v45 }
 0x127   :  { %4150 = vmatpush3.msra.mxu0 %v5242_v49  ;;  %791 = vmatprep.subr.mxu1 %v5230_v46 }
 0x128   :  { %4151 = vmatprep.subr.mxu0 %v6912_v58  ;;  %792 = vmatpush1.msra.mxu1 %v5234_v47 }
 0x129   :  { %4152 = vmatpush3.msra.mxu0 %v5248_v50  ;;  %825 = vmatprep.mubr.f32.mxu1 %v6912_v58 }
 0x12a   :  { %4153 = vmatprep.subr.mxu0 %v6912_v58  ;;  %4171 = vmatprep.mubr.msk.f32.mxu0 %vm5021_vm2, %v6912_v58 }
 0x12b   :  { %4154 = vmatpush3.msra.mxu0 %v5254_v51  ;;  %930 = vmatprep.subr.mxu1 %v5117_v59 }
 0x12c   :  { %4155 = vmatprep.subr.mxu0 %v6912_v58 }
 0x12d   :  { %4156 = vmatpush3.msra.mxu0 %v5260_v52 }
 0x12e   :  { %4157 = vmatprep.subr.mxu0 %v6912_v58 }
 0x12f   :  { %4158 = vmatpush3.msra.mxu0 %v5266_v53 }
 0x130   :  { %4159 = vmatprep.subr.mxu0 %v6912_v58 }
 0x131   :  { %4160 = vmatpush3.msra.mxu0 %v5272_v54 }
 0x132   :  { %4161 = vmatprep.subr.mxu0 %v6912_v58 }
 0x133   :  { %4162 = vmatpush3.msra.mxu0 %v5278_v55 }
 0x134   :  { %4163 = vmatprep.subr.mxu0 %v6912_v58 }
 0x135   :  { %4164 = vmatpush3.msra.mxu0 %v5284_v56 }
 0x136   :  { %4165 = vmatprep.subr.mxu0 %v6912_v58 }
 0x137   :  { %4166 = vmatpush3.msra.mxu0 %v5290_v57 }
 0x138   :  { %4167 = vmatprep.subr.mxu0 %v6912_v58 }
 0x139   :  { %4168 = vmatpush3.msra.mxu0 %v5296_v60 }
 0x13a   :  { %4169 = vmatprep.subr.mxu0 %v6912_v58 }
 0x13b   :  { %4170 = vmatpush3.msra.mxu0 %v5302_v61 }
 0x13c   :  { %4174 = vmatprep.subr.mxu0 %v6912_v58 }
 0x1a6   :  { %v359_v9 = vpop.f32.mrf.mxu1 }
 0x1a7   :  { %v4094_v12 = vpop.f32.mrf.mxu0 }
 0x1a8   :  { %v5374_v16 = vadd.f32 %v4094_v12, %v5369_v6  ;;  %v361_v18 = vpop.f32.mrf.mxu1 }
 0x1a9   :  { %v472_v23 = vpop.f32.mrf.mxu0  ;;  %v362_v45 = vadd.f32 %v361_v18, %v285_v27 }
 0x1aa   :  { %6971 = vst [vmem:[#allocation18_spill] sm:$0xff] %v5374_v16  ;;  %v365_v25 = vpop.f32.mrf.mxu1  ;;  %v473_v18 = vadd.f32 %v472_v23, %v5369_v6  ;;  %v6994_v23 = vld [vmem:[#allocation12_spill] sm:$0xff] }
 0x1ab   :  { %v5380_v62 = vadd.f32 %v365_v25, %v281_v20 }
 0x1ac   :  { %v4097_v1 = vpop.f32.mrf.mxu0  ;;  %v367_v58 = vpop.f32.mrf.mxu1 }
 0x1ad   :  { %6972 = vst [vmem:[#allocation19_spill] sm:$0xff] %v5380_v62  ;;  %v5383_v59 = vadd.f32 %v4097_v1, %v5369_v6  ;;  %v5385_v61 = vadd.f32 %v367_v58, %v285_v27 }
 0x1ae   :  { %v482_v12 = vpop.f32.mrf.mxu0  ;;  %v371_v16 = vpop.f32.mrf.mxu1 }
 0x1af   :  { %6973 = vst [vmem:[#allocation20_spill] sm:$0xff] %v5383_v59  ;;  %6974 = vst [vmem:[#allocation21_spill] sm:$0xff] %v5385_v61  ;;  %v5388_v47 = vadd.f32 %v482_v12, %v5369_v6  ;;  %v5390_v8 = vadd.f32 %v371_v16, %v281_v20 }
 0x1b0   :  { %v373_v46 = vpop.f32.mrf.mxu1 }
 0x1b1   :  { %6975 = vst [vmem:[#allocation22_spill] sm:$0xff] %v5388_v47  ;;  %6976 = vst [vmem:[#allocation23_spill] sm:$0xff] %v5390_v8  ;;  %v5392_v60 = vadd.f32 %v373_v46, %v285_v27  ;;  %v4100_v2 = vpop.f32.mrf.mxu0 }
 0x1b2   :  { %v377_v25 = vpop.f32.mrf.mxu1  ;;  %v5395_v15 = vadd.f32 %v4100_v2, %v5369_v6 }
 0x1b3   :  { %6977 = vst [vmem:[#allocation24_spill] sm:$0xff] %v5392_v60  ;;  %v5397_v63 = vadd.f32 %v377_v25, %v281_v20  ;;  %v492_v1 = vpop.f32.mrf.mxu0 }
 0x1b4   :  { %6978 = vst [vmem:[#allocation25_spill] sm:$0xff] %v5395_v15  ;;  %v379_v58 = vpop.f32.mrf.mxu1  ;;  %v5400_v59 = vadd.f32 %v492_v1, %v5369_v6 }
 0x1b5   :  { %6979 = vst [vmem:[#allocation26_spill] sm:$0xff] %v5397_v63  ;;  %v5402_v61 = vadd.f32 %v379_v58, %v285_v27  ;;  %v4103_v12 = vpop.f32.mrf.mxu0 }
 0x1b6   :  { %6980 = vst [vmem:[#allocation27_spill] sm:$0xff] %v5400_v59  ;;  %v383_v16 = vpop.f32.mrf.mxu1  ;;  %v5405_v47 = vadd.f32 %v4103_v12, %v5369_v6 }
 0x1b7   :  { %6981 = vst [vmem:[#allocation28_spill] sm:$0xff] %v5402_v61  ;;  %v5407_v46 = vadd.f32 %v383_v16, %v281_v20  ;;  %v502_v60 = vpop.f32.mrf.mxu0 }
 0x1b8   :  { %6982 = vst [vmem:[#allocation29_spill] sm:$0xff] %v5405_v47  ;;  %v385_v8 = vpop.f32.mrf.mxu1  ;;  %v5410_v2 = vadd.f32 %v502_v60, %v5369_v6  ;;  %v360_v60 = vadd.f32 %v359_v9, %v281_v20  ;;  %v5429_v9 = vld [vmem:[%s6907_s6] ss:$0 sm:$0xff]  ;;  %v6993_v6 = vmov 0.0  }
 0x1b9   :  { %6983 = vst [vmem:[#allocation30_spill] sm:$0xff] %v5407_v46  ;;  %v5412_v25 = vadd.f32 %v385_v8, %v285_v27 }
 0x1ba   :  { %6984 = vst [vmem:[#allocation31_spill] sm:$0xff] %v5410_v2  ;;  %v389_v15 = vpop.f32.mrf.mxu1 }
 0x1bb   :  { %6985 = vst [vmem:[#allocation32_spill] sm:$0xff] %v5412_v25  ;;  %v5414_v63 = vadd.f32 %v389_v15, %v281_v20 }
 0x1bc   :  { %v391_v1 = vpop.f32.mrf.mxu1 }
 0x1bd   :  { %6986 = vst [vmem:[#allocation33_spill] sm:$0xff] %v5414_v63  ;;  %v5416_v58 = vadd.f32 %v391_v1, %v285_v27 }
 0x1be   :  { %v395_v59 = vpop.f32.mrf.mxu1 }
 0x1bf   :  { %6987 = vst [vmem:[#allocation34_spill] sm:$0xff] %v5416_v58  ;;  %v5418_v61 = vadd.f32 %v395_v59, %v281_v20 }
 0x1c0   :  { %v397_v12 = vpop.f32.mrf.mxu1 }
 0x1c1   :  { %6988 = vst [vmem:[#allocation35_spill] sm:$0xff] %v5418_v61  ;;  %v5420_v47 = vadd.f32 %v397_v12, %v285_v27 }
 0x1c2   :  { %v401_v16 = vpop.f32.mrf.mxu1 }
 0x1c3   :  { %6989 = vst [vmem:[#allocation36_spill] sm:$0xff] %v5420_v47  ;;  %v5422_v46 = vadd.f32 %v401_v16, %v281_v20 }
 0x1c4   :  { %v403_v62 = vpop.f32.mrf.mxu1 }
 0x1c5   :  { %6990 = vst [vmem:[#allocation37_spill] sm:$0xff] %v5422_v46  ;;  %v5424_v2 = vadd.f32 %v403_v62, %v285_v27 }
 0x1c6   :  { %v653_v8 = vpop.f32.mrf.mxu1 }
 0x1c7   :  { %6991 = vst [vmem:[#allocation38_spill] sm:$0xff] %v5424_v2  ;;  %v728_v25 = vadd.f32 %v653_v8, %v360_v60 }
 0x1c8   :  { %v655_v63 = vpop.f32.mrf.mxu1 }
 0x1c9   :  { %v3679_v15 = vmul.f32 -1.442695, %v728_v25  ;;  %v729_v1 = vadd.f32 %v655_v63, %v362_v45 }
 0x1cb   :  { %4714 = vpow2.f32 %v3679_v15  ;;  %v3680_v58 = vmul.f32 -1.442695, %v729_v1  ;;  %v6995_v15 = vld [vmem:[#allocation15_spill] sm:$0xff]  ;;  %v6996_v1 = vld [vmem:[#allocation13_spill] sm:$0xff] }
 0x1cd   :  { %4716 = vpow2.f32 %v3680_v58 }
 0x1d8   :  { %v4715_v59 = vpop.eup %4714 }
 0x1d9   :  { %v736_v61 = vadd.f32 1.0, %v4715_v59  ;;  %v6997_v59 = vld [vmem:[#allocation14_spill] sm:$0xff] }
 0x1da   :  { %v4717_v16 = vpop.eup %4716 }
 0x1db   :  { %4718 = vrcp.f32 %v736_v61  ;;  %v737_v20 = vadd.f32 1.0, %v4717_v16  ;;  %v6999_v16 = vld [vmem:[#allocation11_spill] sm:$0xff] }
 0x1dc   :  { %v724_v12 = vpop.f32.mrf.mxu0 }
 0x1dd   :  { %v748_v62 = vadd.f32 %v5429_v9, %v724_v12  ;;  %4720 = vrcp.f32 %v737_v20  ;;  %v6998_v12 = vld [vmem:[#allocation16_spill] sm:$0xff] }
 0x1de   :  { %v4138_v47 = vpop.f32.mrf.mxu0 }
 0x1e8   :  { %v4719_v25 = vpop.eup %4718 }
 0x1e9   :  { %v749_v45 = vmul.f32 %v4719_v25, %v748_v62  ;;  %v7000_v25 = vld [vmem:[#allocation19_spill] sm:$0xff] }
 0x1ea   :  { %v4721_v27 = vpop.eup %4720 }
 0x1eb   :  { %v750_v63 = vadd.f32 %v749_v45, %v473_v18  ;;  %v752_v61 = vsub.f32 1.0, %v4721_v27  ;;  %v754_v60 = vmul.f32 0.0, %v4721_v27 }
 0x1ed   :  { %4722 = vtanh.f32 %v750_v63 }
 0x1fa   :  { %v4723_v58 = vpop.eup %4722 }
 0x1fb   :  { %v753_v47 = vmul.f32 %v4723_v58, %v752_v61  ;;  %v7001_v61 = vld [vmem:[#allocation21_spill] sm:$0xff] }
 0x1fd   :  { %v5433_v8 = vadd.f32 %v754_v60, %v753_v47 }
 0x1ff   :  { %6992 = vst [vmem:[#allocation39_spill] sm:$0xff] %v5433_v8  ;;  %826 = vmatmul.mubr.f32.vlgmr.msra.gmra.mxu1 %v5433_v8  ;;  %4172 = vmatmul.mubr.f32.vlgmr.msra.gmra.mxu0 %v5433_v8 }
 0x200   :  { %931 = vmatpush1.msra.mxu1 %v5124_v0  ;;  %4175 = vmatpush3.msra.mxu0 %v5130_v5 }
 0x201   :  { %932 = vmatprep.subr.mxu1 %v5126_v3  ;;  %4176 = vmatprep.subr.mxu0 %v6993_v6 }
 0x202   :  { %933 = vmatpush1.msra.mxu1 %v5128_v4  ;;  %4177 = vmatpush3.msra.mxu0 %v5185_v33 }
 0x203   :  { %934 = vmatprep.subr.mxu1 %v5133_v7  ;;  %4178 = vmatprep.subr.mxu0 %v6993_v6 }
 0x204   :  { %935 = vmatpush1.msra.mxu1 %v5137_v10  ;;  %4179 = vmatpush3.msra.mxu0 %v5202_v38 }
 0x205   :  { %936 = vmatprep.subr.mxu1 %v5140_v11  ;;  %4180 = vmatprep.subr.mxu0 %v6993_v6 }
 0x206   :  { %937 = vmatpush1.msra.mxu1 %v5144_v13  ;;  %4181 = vmatpush3.msra.mxu0 %v5219_v43 }
 0x207   :  { %938 = vmatprep.subr.mxu1 %v5147_v14  ;;  %4182 = vmatprep.subr.mxu0 %v6993_v6 }
 0x208   :  { %939 = vmatpush1.msra.mxu1 %v5150_v17  ;;  %4183 = vmatpush3.msra.mxu0 %v5236_v48 }
 0x209   :  { %940 = vmatprep.subr.mxu1 %v5154_v19  ;;  %4184 = vmatprep.subr.mxu0 %v6993_v6 }
 0x20a   :  { %941 = vmatpush1.msra.mxu1 %v5157_v21  ;;  %4185 = vmatpush3.msra.mxu0 %v5242_v49 }
 0x20b   :  { %942 = vmatprep.subr.mxu1 %v5161_v22  ;;  %4186 = vmatprep.subr.mxu0 %v6993_v6 }
 0x20c   :  { %943 = vmatpush1.msra.mxu1 %v5164_v24  ;;  %4187 = vmatpush3.msra.mxu0 %v5248_v50 }
 0x20d   :  { %944 = vmatprep.subr.mxu1 %v5167_v26  ;;  %4188 = vmatprep.subr.mxu0 %v6993_v6 }
 0x20e   :  { %945 = vmatpush1.msra.mxu1 %v5170_v28  ;;  %4189 = vmatpush3.msra.mxu0 %v5254_v51 }
 0x20f   :  { %946 = vmatprep.subr.mxu1 %v5174_v29  ;;  %4190 = vmatprep.subr.mxu0 %v6993_v6 }
 0x210   :  { %947 = vmatpush1.msra.mxu1 %v5177_v30  ;;  %4191 = vmatpush3.msra.mxu0 %v5260_v52 }
 0x211   :  { %948 = vmatprep.subr.mxu1 %v5180_v31  ;;  %4192 = vmatprep.subr.mxu0 %v6993_v6 }
 0x212   :  { %949 = vmatpush1.msra.mxu1 %v5183_v32  ;;  %4193 = vmatpush3.msra.mxu0 %v5266_v53 }
 0x213   :  { %950 = vmatprep.subr.mxu1 %v5189_v34  ;;  %4194 = vmatprep.subr.mxu0 %v6993_v6 }
 0x214   :  { %951 = vmatpush1.msra.mxu1 %v5192_v35  ;;  %4195 = vmatpush3.msra.mxu0 %v5272_v54 }
 0x215   :  { %952 = vmatprep.subr.mxu1 %v5196_v36  ;;  %4196 = vmatprep.subr.mxu0 %v6993_v6 }
 0x216   :  { %953 = vmatpush1.msra.mxu1 %v5200_v37  ;;  %4197 = vmatpush3.msra.mxu0 %v5278_v55 }
 0x217   :  { %954 = vmatprep.subr.mxu1 %v5206_v39  ;;  %4198 = vmatprep.subr.mxu0 %v6993_v6 }
 0x218   :  { %955 = vmatpush1.msra.mxu1 %v5209_v40  ;;  %4199 = vmatpush3.msra.mxu0 %v5284_v56 }
 0x219   :  { %956 = vmatprep.subr.mxu1 %v5213_v41  ;;  %4200 = vmatprep.subr.mxu0 %v6993_v6 }
 0x21a   :  { %957 = vmatpush1.msra.mxu1 %v5217_v42  ;;  %4201 = vmatpush3.msra.mxu0 %v5290_v57 }
 0x21b   :  { %958 = vmatprep.subr.mxu1 %v5223_v44  ;;  %4202 = vmatprep.subr.mxu0 %v6993_v6 }
 0x21c   :  { %959 = vmatpush1.msra.mxu1 %v6994_v23  ;;  %4203 = vmatpush3.msra.mxu0 %v6995_v15  ;;  %v7002_v15 = vld [vmem:[#allocation18_spill] sm:$0xff] }
 0x21d   :  { %960 = vmatprep.subr.mxu1 %v6996_v1  ;;  %4204 = vmatprep.subr.mxu0 %v6993_v6 }
 0x21e   :  { %961 = vmatpush1.msra.mxu1 %v6997_v59  ;;  %994 = vmatprep.mubr.f32.mxu1 %v6993_v6 }
 0x21f   :  { %4205 = vmatpush3.msra.mxu0 %v6998_v12  ;;  %4206 = vmatprep.mubr.msk.f32.mxu0 %vm5021_vm2, %v6993_v6 }
 0x220   :  { %1099 = vmatprep.subr.mxu1 %v6999_v16  ;;  %4209 = vmatprep.subr.mxu0 %v6993_v6 }
 0x2bf   :  { %v827_v20 = vpop.f32.mrf.mxu1  ;;  %v898_v62 = vpop.f32.mrf.mxu0 }
 0x2c0   :  { %v902_v18 = vadd.f32 %v827_v20, %v7000_v25  ;;  %v916_v16 = vadd.f32 %v5429_v9, %v898_v62  ;;  %v7009_v62 = vld [vmem:[#allocation23_spill] sm:$0xff] }
 0x2c1   :  { %v4173_v45 = vpop.f32.mrf.mxu0  ;;  %v829_v27 = vpop.f32.mrf.mxu1 }
 0x2c2   :  { %v3682_v63 = vmul.f32 -1.442695, %v902_v18  ;;  %v903_v58 = vadd.f32 %v829_v27, %v7001_v61 }
 0x2c4   :  { %4724 = vpow2.f32 %v3682_v63  ;;  %v3683_v47 = vmul.f32 -1.442695, %v903_v58 }
 0x2c6   :  { %4726 = vpow2.f32 %v3683_v47 }
 0x2d1   :  { %v4725_v60 = vpop.eup %4724 }
 0x2d2   :  { %v910_v2 = vadd.f32 1.0, %v4725_v60 }
 0x2d3   :  { %v4727_v46 = vpop.eup %4726 }
 0x2d4   :  { %4728 = vrcp.f32 %v910_v2  ;;  %v911_v12 = vadd.f32 1.0, %v4727_v46  ;;  %v7004_v46 = vld [vmem:[#allocation15_spill] sm:$0xff]  ;;  %v7005_v2 = vld [vmem:[#allocation13_spill] sm:$0xff] }
 0x2d6   :  { %4730 = vrcp.f32 %v911_v12 }
 0x2e1   :  { %v4729_v59 = vpop.eup %4728 }
 0x2e2   :  { %v917_v1 = vmul.f32 %v4729_v59, %v916_v16  ;;  %v7008_v59 = vld [vmem:[#allocation11_spill] sm:$0xff] }
 0x2e3   :  { %v4731_v25 = vpop.eup %4730 }
 0x2e4   :  { %v918_v20 = vadd.f32 %v917_v1, %v7002_v15  ;;  %v920_v18 = vsub.f32 1.0, %v4731_v25  ;;  %v922_v27 = vmul.f32 %v4731_v25, %v5433_v8  ;;  %v7006_v15 = vld [vmem:[#allocation14_spill] sm:$0xff]  ;;  %v7007_v1 = vld [vmem:[#allocation16_spill] sm:$0xff] }
 0x2e5   :  { %v7010_v25 = vld [vmem:[#allocation24_spill] sm:$0xff] }
 0x2e6   :  { %4732 = vtanh.f32 %v918_v20 }
 0x2f3   :  { %v4733_v45 = vpop.eup %4732 }
 0x2f4   :  { %v921_v63 = vmul.f32 %v4733_v45, %v920_v18 }
 0x2f6   :  { %v5509_v61 = vadd.f32 %v922_v27, %v921_v63 }
 0x2f8   :  { %7003 = vst [vmem:[#allocation12_spill] sm:$0xff] %v5509_v61  ;;  %995 = vmatmul.mubr.f32.vlgmr.msra.gmra.mxu1 %v5509_v61  ;;  %4207 = vmatmul.mubr.f32.vlgmr.msra.gmra.mxu0 %v5509_v61 }
 0x2f9   :  { %1100 = vmatpush1.msra.mxu1 %v5124_v0  ;;  %4210 = vmatpush3.msra.mxu0 %v5130_v5 }
 0x2fa   :  { %1101 = vmatprep.subr.mxu1 %v5126_v3  ;;  %4211 = vmatprep.subr.mxu0 %v6993_v6 }
 0x2fb   :  { %1102 = vmatpush1.msra.mxu1 %v5128_v4  ;;  %4212 = vmatpush3.msra.mxu0 %v5185_v33 }
 0x2fc   :  { %1103 = vmatprep.subr.mxu1 %v5133_v7  ;;  %4213 = vmatprep.subr.mxu0 %v6993_v6 }
 0x2fd   :  { %1104 = vmatpush1.msra.mxu1 %v5137_v10  ;;  %4214 = vmatpush3.msra.mxu0 %v5202_v38 }
 0x2fe   :  { %1105 = vmatprep.subr.mxu1 %v5140_v11  ;;  %4215 = vmatprep.subr.mxu0 %v6993_v6 }
 0x2ff   :  { %1106 = vmatpush1.msra.mxu1 %v5144_v13  ;;  %4216 = vmatpush3.msra.mxu0 %v5219_v43 }
 0x300   :  { %1107 = vmatprep.subr.mxu1 %v5147_v14  ;;  %4217 = vmatprep.subr.mxu0 %v6993_v6 }
 0x301   :  { %1108 = vmatpush1.msra.mxu1 %v5150_v17  ;;  %4218 = vmatpush3.msra.mxu0 %v5236_v48 }
 0x302   :  { %1109 = vmatprep.subr.mxu1 %v5154_v19  ;;  %4219 = vmatprep.subr.mxu0 %v6993_v6 }
 0x303   :  { %1110 = vmatpush1.msra.mxu1 %v5157_v21  ;;  %4220 = vmatpush3.msra.mxu0 %v5242_v49 }
 0x304   :  { %1111 = vmatprep.subr.mxu1 %v5161_v22  ;;  %4221 = vmatprep.subr.mxu0 %v6993_v6 }
 0x305   :  { %1112 = vmatpush1.msra.mxu1 %v5164_v24  ;;  %4222 = vmatpush3.msra.mxu0 %v5248_v50 }
 0x306   :  { %1113 = vmatprep.subr.mxu1 %v5167_v26  ;;  %4223 = vmatprep.subr.mxu0 %v6993_v6 }
 0x307   :  { %1114 = vmatpush1.msra.mxu1 %v5170_v28  ;;  %4224 = vmatpush3.msra.mxu0 %v5254_v51 }
 0x308   :  { %1115 = vmatprep.subr.mxu1 %v5174_v29  ;;  %4225 = vmatprep.subr.mxu0 %v6993_v6 }
 0x309   :  { %1116 = vmatpush1.msra.mxu1 %v5177_v30  ;;  %4226 = vmatpush3.msra.mxu0 %v5260_v52 }
 0x30a   :  { %1117 = vmatprep.subr.mxu1 %v5180_v31  ;;  %4227 = vmatprep.subr.mxu0 %v6993_v6 }
 0x30b   :  { %1118 = vmatpush1.msra.mxu1 %v5183_v32  ;;  %4228 = vmatpush3.msra.mxu0 %v5266_v53 }
 0x30c   :  { %1119 = vmatprep.subr.mxu1 %v5189_v34  ;;  %4229 = vmatprep.subr.mxu0 %v6993_v6 }
 0x30d   :  { %1120 = vmatpush1.msra.mxu1 %v5192_v35  ;;  %4230 = vmatpush3.msra.mxu0 %v5272_v54 }
 0x30e   :  { %1121 = vmatprep.subr.mxu1 %v5196_v36  ;;  %4231 = vmatprep.subr.mxu0 %v6993_v6 }
 0x30f   :  { %1122 = vmatpush1.msra.mxu1 %v5200_v37  ;;  %4232 = vmatpush3.msra.mxu0 %v5278_v55 }
 0x310   :  { %1123 = vmatprep.subr.mxu1 %v5206_v39  ;;  %4233 = vmatprep.subr.mxu0 %v6993_v6 }
 0x311   :  { %1124 = vmatpush1.msra.mxu1 %v5209_v40  ;;  %4234 = vmatpush3.msra.mxu0 %v5284_v56 }
 0x312   :  { %1125 = vmatprep.subr.mxu1 %v5213_v41  ;;  %4235 = vmatprep.subr.mxu0 %v6993_v6 }
 0x313   :  { %1126 = vmatpush1.msra.mxu1 %v5217_v42  ;;  %4236 = vmatpush3.msra.mxu0 %v5290_v57 }
 0x314   :  { %1127 = vmatprep.subr.mxu1 %v5223_v44  ;;  %4237 = vmatprep.subr.mxu0 %v6993_v6 }
 0x315   :  { %1128 = vmatpush1.msra.mxu1 %v6994_v23  ;;  %4238 = vmatpush3.msra.mxu0 %v7004_v46  ;;  %v7011_v46 = vld [vmem:[#allocation22_spill] sm:$0xff] }
 0x316   :  { %1129 = vmatprep.subr.mxu1 %v7005_v2  ;;  %4239 = vmatprep.subr.mxu0 %v6993_v6 }
 0x317   :  { %1130 = vmatpush1.msra.mxu1 %v7006_v15  ;;  %1163 = vmatprep.mubr.f32.mxu1 %v6993_v6 }
 0x318   :  { %4240 = vmatpush3.msra.mxu0 %v7007_v1  ;;  %4241 = vmatprep.mubr.msk.f32.mxu0 %vm5021_vm2, %v6993_v6 }
 0x319   :  { %1268 = vmatprep.subr.mxu1 %v7008_v59  ;;  %4244 = vmatprep.subr.mxu0 %v6993_v6 }
 0x3b8   :  { %v996_v12 = vpop.f32.mrf.mxu1  ;;  %v1067_v16 = vpop.f32.mrf.mxu0 }
 0x3b9   :  { %v1071_v58 = vadd.f32 %v996_v12, %v7009_v62  ;;  %v1085_v59 = vadd.f32 %v5429_v9, %v1067_v16  ;;  %v5690_v16 = vld [vmem:[#allocation7 + $0x148] sm:$0xff] }
 0x3ba   :  { %v4208_v47 = vpop.f32.mrf.mxu0  ;;  %v998_v20 = vpop.f32.mrf.mxu1 }
 0x3bb   :  { %v3684_v60 = vmul.f32 -1.442695, %v1071_v58  ;;  %v1072_v18 = vadd.f32 %v998_v20, %v7010_v25 }
 0x3bd   :  { %4734 = vpow2.f32 %v3684_v60  ;;  %v3685_v45 = vmul.f32 -1.442695, %v1072_v18  ;;  %v5693_v18 = vld [vmem:[#allocation7 + $0x128] sm:$0xff] }
 0x3bf   :  { %4736 = vpow2.f32 %v3685_v45  ;;  %v5697_v45 = vld [vmem:[#allocation7 + $0x120] sm:$0xff] }
 0x3ca   :  { %v4735_v63 = vpop.eup %4734 }
 0x3cb   :  { %v1079_v27 = vadd.f32 1.0, %v4735_v63  ;;  %v5701_v63 = vld [vmem:[#allocation7 + $0x110] sm:$0xff] }
 0x3cc   :  { %v4737_v8 = vpop.eup %4736 }
 0x3cd   :  { %4738 = vrcp.f32 %v1079_v27  ;;  %v1080_v1 = vadd.f32 1.0, %v4737_v8  ;;  %v5670_v8 = vld [vmem:[#allocation7 + $0x178] sm:$0xff]  ;;  %v5705_v27 = vld [vmem:[#allocation7 + $0x108] sm:$0xff] }
 0x3cf   :  { %4740 = vrcp.f32 %v1080_v1  ;;  %v5687_v1 = vld [vmem:[#allocation7 + $0x138] sm:$0xff] }
 0x3da   :  { %v4739_v15 = vpop.eup %4738 }
 0x3db   :  { %v1086_v2 = vmul.f32 %v4739_v15, %v1085_v59  ;;  %v5683_v15 = vld [vmem:[#allocation7 + $0x140] sm:$0xff]  ;;  %v5709_v59 = vld [vmem:[#allocation7 + $0xf8] sm:$0xff] }
 0x3dc   :  { %v4741_v62 = vpop.eup %4740 }
 0x3dd   :  { %v1087_v12 = vadd.f32 %v1086_v2, %v7011_v46  ;;  %v1089_v58 = vsub.f32 1.0, %v4741_v62  ;;  %v1091_v20 = vmul.f32 %v4741_v62, %v5509_v61  ;;  %v5677_v46 = vld [vmem:[#allocation7 + $0x150] sm:$0xff]  ;;  %v5680_v2 = vld [vmem:[#allocation7 + $0x160] sm:$0xff]  ;;  %v5721_v62 = vld [vmem:[#allocation7 + $0xd8] sm:$0xff] }
 0x3df   :  { %4742 = vtanh.f32 %v1087_v12  ;;  %v5713_v12 = vld [vmem:[#allocation7 + $0xf0] sm:$0xff] }
 0x3ec   :  { %v4743_v47 = vpop.eup %4742 }
 0x3ed   :  { %v1090_v60 = vmul.f32 %v4743_v47, %v1089_v58  ;;  %v5729_v58 = vld [vmem:[#allocation7 + $0xc0] sm:$0xff]  ;;  %v5737_v47 = vld [vmem:[#allocation7 + $0xa8] sm:$0xff] }
 0x3ef   :  { %v5585_v25 = vadd.f32 %v1091_v20, %v1090_v60  ;;  %v5745_v60 = vld [vmem:[#allocation7 + $0x90] sm:$0xff]  ;;  %v5753_v20 = vld [vmem:[#allocation7 + $0x78] sm:$0xff] }
 0x3f1   :  { %7012 = vst [vmem:[#allocation19_spill] sm:$0xff] %v5585_v25  ;;  %1164 = vmatmul.mubr.f32.vlgmr.msra.gmra.mxu1 %v5585_v25  ;;  %4242 = vmatmul.mubr.f32.vlgmr.msra.gmra.mxu0 %v5585_v25 }
 0x3f2   :  { %1269 = vmatpush1.msra.mxu1 %v5124_v0  ;;  %4245 = vmatpush3.msra.mxu0 %v5130_v5  ;;  %v7013_v0 = vld [vmem:[#allocation15_spill] sm:$0xff]  ;;  %v7016_v5 = vld [vmem:[#allocation16_spill] sm:$0xff] }
 0x3f3   :  { %1270 = vmatprep.subr.mxu1 %v5126_v3  ;;  %4246 = vmatprep.subr.mxu0 %v6993_v6  ;;  %v7014_v3 = vld [vmem:[#allocation13_spill] sm:$0xff] }
 0x3f4   :  { %1271 = vmatpush1.msra.mxu1 %v5128_v4  ;;  %4247 = vmatpush3.msra.mxu0 %v5185_v33  ;;  %v7015_v4 = vld [vmem:[#allocation14_spill] sm:$0xff] }
 0x3f5   :  { %1272 = vmatprep.subr.mxu1 %v5133_v7  ;;  %4248 = vmatprep.subr.mxu0 %v6993_v6  ;;  %v5654_v7 = vld [vmem:[#allocation7 + $0x170] sm:$0xff] }
 0x3f6   :  { %1273 = vmatpush1.msra.mxu1 %v5137_v10  ;;  %4249 = vmatpush3.msra.mxu0 %v5202_v38 }
 0x3f7   :  { %1274 = vmatprep.subr.mxu1 %v5140_v11  ;;  %4250 = vmatprep.subr.mxu0 %v6993_v6 }
 0x3f8   :  { %1275 = vmatpush1.msra.mxu1 %v5144_v13  ;;  %4251 = vmatpush3.msra.mxu0 %v5219_v43  ;;  %v7017_v13 = vld [vmem:[#allocation26_spill] sm:$0xff] }
 0x3f9   :  { %1276 = vmatprep.subr.mxu1 %v5147_v14  ;;  %4252 = vmatprep.subr.mxu0 %v6993_v6 }
 0x3fa   :  { %1277 = vmatpush1.msra.mxu1 %v5150_v17  ;;  %4253 = vmatpush3.msra.mxu0 %v5236_v48 }
 0x3fb   :  { %1278 = vmatprep.subr.mxu1 %v5154_v19  ;;  %4254 = vmatprep.subr.mxu0 %v6993_v6 }
 0x3fc   :  { %1279 = vmatpush1.msra.mxu1 %v5157_v21  ;;  %4255 = vmatpush3.msra.mxu0 %v5242_v49 }
 0x3fd   :  { %1280 = vmatprep.subr.mxu1 %v5161_v22  ;;  %4256 = vmatprep.subr.mxu0 %v6993_v6  ;;  %v7018_v22 = vld [vmem:[#allocation28_spill] sm:$0xff] }
 0x3fe   :  { %1281 = vmatpush1.msra.mxu1 %v5164_v24  ;;  %4257 = vmatpush3.msra.mxu0 %v5248_v50 }
 0x3ff   :  { %1282 = vmatprep.subr.mxu1 %v5167_v26  ;;  %4258 = vmatprep.subr.mxu0 %v6993_v6 }
 0x400   :  { %1283 = vmatpush1.msra.mxu1 %v5170_v28  ;;  %4259 = vmatpush3.msra.mxu0 %v5254_v51 }
 0x401   :  { %1284 = vmatprep.subr.mxu1 %v5174_v29  ;;  %4260 = vmatprep.subr.mxu0 %v6993_v6 }
 0x402   :  { %1285 = vmatpush1.msra.mxu1 %v5177_v30  ;;  %4261 = vmatpush3.msra.mxu0 %v5260_v52 }
 0x403   :  { %1286 = vmatprep.subr.mxu1 %v5180_v31  ;;  %4262 = vmatprep.subr.mxu0 %v6993_v6 }
 0x404   :  { %1287 = vmatpush1.msra.mxu1 %v5183_v32  ;;  %4263 = vmatpush3.msra.mxu0 %v5266_v53 }
 0x405   :  { %1288 = vmatprep.subr.mxu1 %v5189_v34  ;;  %4264 = vmatprep.subr.mxu0 %v6993_v6 }
 0x406   :  { %1289 = vmatpush1.msra.mxu1 %v5192_v35  ;;  %4265 = vmatpush3.msra.mxu0 %v5272_v54  ;;  %v7019_v35 = vld [vmem:[#allocation20_spill] sm:$0xff] }
 0x407   :  { %1290 = vmatprep.subr.mxu1 %v5196_v36  ;;  %4266 = vmatprep.subr.mxu0 %v6993_v6 }
 0x408   :  { %1291 = vmatpush1.msra.mxu1 %v5200_v37  ;;  %4267 = vmatpush3.msra.mxu0 %v5278_v55 }
 0x409   :  { %1292 = vmatprep.subr.mxu1 %v5206_v39  ;;  %4268 = vmatprep.subr.mxu0 %v6993_v6 }
 0x40a   :  { %1293 = vmatpush1.msra.mxu1 %v5209_v40  ;;  %4269 = vmatpush3.msra.mxu0 %v5284_v56 }
 0x40b   :  { %1294 = vmatprep.subr.mxu1 %v5213_v41  ;;  %4270 = vmatprep.subr.mxu0 %v6993_v6 }
 0x40c   :  { %1295 = vmatpush1.msra.mxu1 %v5217_v42  ;;  %4271 = vmatpush3.msra.mxu0 %v5290_v57 }
 0x40d   :  { %1296 = vmatprep.subr.mxu1 %v5223_v44  ;;  %4272 = vmatprep.subr.mxu0 %v6993_v6  ;;  %v5667_v44 = vld [vmem:[#allocation7 + $0x168] sm:$0xff] }
 0x40e   :  { %1297 = vmatpush1.msra.mxu1 %v6994_v23  ;;  %4273 = vmatpush3.msra.mxu0 %v7013_v0  ;;  %v5673_v23 = vld [vmem:[#allocation7 + $0x158] sm:$0xff] }
 0x40f   :  { %1298 = vmatprep.subr.mxu1 %v7014_v3  ;;  %4274 = vmatprep.subr.mxu0 %v6993_v6  ;;  %v5761_v3 = vld [vmem:[#allocation7 + $0x60] sm:$0xff] }
 0x410   :  { %1299 = vmatpush1.msra.mxu1 %v7015_v4  ;;  %1332 = vmatprep.mubr.f32.mxu1 %v6993_v6  ;;  %v5769_v4 = vld [vmem:[#allocation7 + $0x48] sm:$0xff] }
 0x411   :  { %4275 = vmatpush3.msra.mxu0 %v7016_v5  ;;  %4276 = vmatprep.mubr.msk.f32.mxu0 %vm5021_vm2, %v6993_v6 }
 0x412   :  { %1437 = vmatprep.subr.mxu1 %v5654_v7  ;;  %4279 = vmatprep.subr.mxu0 %v6993_v6 }
 0x4b1   :  { %v1165_v10 = vpop.f32.mrf.mxu1  ;;  %v1236_v11 = vpop.f32.mrf.mxu0 }
 0x4b2   :  { %v1240_v14 = vadd.f32 %v1165_v10, %v7017_v13  ;;  %v1254_v32 = vadd.f32 %v5429_v9, %v1236_v11  ;;  %v5777_v10 = vld [vmem:[#allocation7 + $0x30] sm:$0xff]  ;;  %v5785_v11 = vld [vmem:[#allocation7 + $0x18] sm:$0xff]  ;;  %v5793_v13 = vld [vmem:[#allocation7] sm:$0xff] }
 0x4b3   :  { %v4243_v17 = vpop.f32.mrf.mxu0  ;;  %v1167_v21 = vpop.f32.mrf.mxu1  ;;  %7022 = vst [vmem:[#allocation11_spill] sm:$0xff] %v5793_v13 }
 0x4b4   :  { %v3686_v19 = vmul.f32 -1.442695, %v1240_v14  ;;  %v1241_v24 = vadd.f32 %v1167_v21, %v7018_v22  ;;  %v7023_v14 = vld [vmem:[#allocation30_spill] sm:$0xff] }
 0x4b6   :  { %4744 = vpow2.f32 %v3686_v19  ;;  %v3687_v26 = vmul.f32 -1.442695, %v1241_v24  ;;  %v7024_v24 = vld [vmem:[#allocation32_spill] sm:$0xff] }
 0x4b8   :  { %4746 = vpow2.f32 %v3687_v26 }
 0x4c3   :  { %v4745_v28 = vpop.eup %4744 }
 0x4c4   :  { %v1248_v29 = vadd.f32 1.0, %v4745_v28 }
 0x4c5   :  { %v4747_v30 = vpop.eup %4746 }
 0x4c6   :  { %4748 = vrcp.f32 %v1248_v29  ;;  %v1249_v31 = vadd.f32 1.0, %v4747_v30 }
 0x4c8   :  { %4750 = vrcp.f32 %v1249_v31 }
 0x4d3   :  { %v4749_v33 = vpop.eup %4748 }
 0x4d4   :  { %v1255_v34 = vmul.f32 %v4749_v33, %v1254_v32 }
 0x4d5   :  { %v4751_v37 = vpop.eup %4750 }
 0x4d6   :  { %v1256_v36 = vadd.f32 %v1255_v34, %v7019_v35  ;;  %v1258_v38 = vsub.f32 1.0, %v4751_v37  ;;  %v1260_v41 = vmul.f32 %v4751_v37, %v5585_v25  ;;  %v7025_v35 = vld [vmem:[#allocation27_spill] sm:$0xff] }
 0x4d8   :  { %4752 = vtanh.f32 %v1256_v36 }
 0x4e5   :  { %v4753_v39 = vpop.eup %4752 }
 0x4e6   :  { %v1259_v40 = vmul.f32 %v4753_v39, %v1258_v38 }
 0x4e8   :  { %v5663_v42 = vadd.f32 %v1260_v41, %v1259_v40 }
 0x4ea   :  { %7020 = vst [vmem:[#allocation21_spill] sm:$0xff] %v5663_v42  ;;  %1333 = vmatmul.mubr.f32.vlgmr.msra.gmra.mxu1 %v5663_v42  ;;  %4277 = vmatmul.mubr.f32.vlgmr.msra.gmra.mxu0 %v5663_v42 }
 0x4eb   :  { %1438 = vmatpush1.msra.mxu1 %v5667_v44  ;;  %4280 = vmatpush3.msra.mxu0 %v5670_v8 }
 0x4ec   :  { %1439 = vmatprep.subr.mxu1 %v5673_v23  ;;  %4281 = vmatprep.subr.mxu0 %v6993_v6 }
 0x4ed   :  { %1440 = vmatpush1.msra.mxu1 %v5677_v46  ;;  %4282 = vmatpush3.msra.mxu0 %v5680_v2 }
 0x4ee   :  { %1441 = vmatprep.subr.mxu1 %v5683_v15  ;;  %4283 = vmatprep.subr.mxu0 %v6993_v6 }
 0x4ef   :  { %1442 = vmatpush1.msra.mxu1 %v5687_v1  ;;  %4284 = vmatpush3.msra.mxu0 %v5690_v16 }
 0x4f0   :  { %1443 = vmatprep.subr.mxu1 %v5693_v18  ;;  %4285 = vmatprep.subr.mxu0 %v6993_v6 }
 0x4f1   :  { %1444 = vmatpush1.msra.mxu1 %v5697_v45  ;;  %4286 = vmatpush3.msra.mxu0 %v5219_v43  ;;  %v5717_v43 = vld [vmem:[#allocation7 + $0xe0] sm:$0xff] }
 0x4f2   :  { %1445 = vmatprep.subr.mxu1 %v5701_v63  ;;  %4287 = vmatprep.subr.mxu0 %v6993_v6 }
 0x4f3   :  { %1446 = vmatpush1.msra.mxu1 %v5705_v27  ;;  %4288 = vmatpush3.msra.mxu0 %v5236_v48  ;;  %v5725_v48 = vld [vmem:[#allocation7 + $0xc8] sm:$0xff] }
 0x4f4   :  { %1447 = vmatprep.subr.mxu1 %v5709_v59  ;;  %4289 = vmatprep.subr.mxu0 %v6993_v6 }
 0x4f5   :  { %1448 = vmatpush1.msra.mxu1 %v5713_v12  ;;  %4290 = vmatpush3.msra.mxu0 %v5242_v49  ;;  %v5733_v49 = vld [vmem:[#allocation7 + $0xb0] sm:$0xff] }
 0x4f6   :  { %1449 = vmatprep.subr.mxu1 %v5717_v43  ;;  %4291 = vmatprep.subr.mxu0 %v6993_v6 }
 0x4f7   :  { %1450 = vmatpush1.msra.mxu1 %v5721_v62  ;;  %4292 = vmatpush3.msra.mxu0 %v5248_v50  ;;  %v5741_v50 = vld [vmem:[#allocation7 + $0x98] sm:$0xff] }
 0x4f8   :  { %1451 = vmatprep.subr.mxu1 %v5725_v48  ;;  %4293 = vmatprep.subr.mxu0 %v6993_v6 }
 0x4f9   :  { %1452 = vmatpush1.msra.mxu1 %v5729_v58  ;;  %4294 = vmatpush3.msra.mxu0 %v5254_v51  ;;  %v5749_v51 = vld [vmem:[#allocation7 + $0x80] sm:$0xff] }
 0x4fa   :  { %1453 = vmatprep.subr.mxu1 %v5733_v49  ;;  %4295 = vmatprep.subr.mxu0 %v6993_v6 }
 0x4fb   :  { %1454 = vmatpush1.msra.mxu1 %v5737_v47  ;;  %4296 = vmatpush3.msra.mxu0 %v5260_v52  ;;  %v5757_v52 = vld [vmem:[#allocation7 + $0x68] sm:$0xff] }
 0x4fc   :  { %1455 = vmatprep.subr.mxu1 %v5741_v50  ;;  %4297 = vmatprep.subr.mxu0 %v6993_v6 }
 0x4fd   :  { %1456 = vmatpush1.msra.mxu1 %v5745_v60  ;;  %4298 = vmatpush3.msra.mxu0 %v5266_v53  ;;  %v5765_v53 = vld [vmem:[#allocation7 + $0x50] sm:$0xff] }
 0x4fe   :  { %1457 = vmatprep.subr.mxu1 %v5749_v51  ;;  %4299 = vmatprep.subr.mxu0 %v6993_v6 }
 0x4ff   :  { %1458 = vmatpush1.msra.mxu1 %v5753_v20  ;;  %4300 = vmatpush3.msra.mxu0 %v5272_v54  ;;  %v5773_v54 = vld [vmem:[#allocation7 + $0x38] sm:$0xff] }
 0x500   :  { %1459 = vmatprep.subr.mxu1 %v5757_v52  ;;  %4301 = vmatprep.subr.mxu0 %v6993_v6 }
 0x501   :  { %1460 = vmatpush1.msra.mxu1 %v5761_v3  ;;  %4302 = vmatpush3.msra.mxu0 %v5278_v55  ;;  %v5781_v55 = vld [vmem:[#allocation7 + $0x20] sm:$0xff] }
 0x502   :  { %1461 = vmatprep.subr.mxu1 %v5765_v53  ;;  %4303 = vmatprep.subr.mxu0 %v6993_v6 }
 0x503   :  { %1462 = vmatpush1.msra.mxu1 %v5769_v4  ;;  %4304 = vmatpush3.msra.mxu0 %v5284_v56  ;;  %v5789_v56 = vld [vmem:[#allocation7 + $0x8] sm:$0xff] }
 0x504   :  { %1463 = vmatprep.subr.mxu1 %v5773_v54  ;;  %4305 = vmatprep.subr.mxu0 %v6993_v6  ;;  %7021 = vst [vmem:[#allocation18_spill] sm:$0xff] %v5789_v56 }
 0x505   :  { %1464 = vmatpush1.msra.mxu1 %v5777_v10  ;;  %4306 = vmatpush3.msra.mxu0 %v5290_v57 }
 0x506   :  { %1465 = vmatprep.subr.mxu1 %v5781_v55  ;;  %4307 = vmatprep.subr.mxu0 %v6993_v6 }
 0x507   :  { %1466 = vmatpush1.msra.mxu1 %v5785_v11  ;;  %4308 = vmatpush3.msra.mxu0 %v7013_v0 }
 0x508   :  { %1467 = vmatprep.subr.mxu1 %v5789_v56  ;;  %4309 = vmatprep.subr.mxu0 %v6993_v6 }
 0x509   :  { %1468 = vmatpush1.msra.mxu1 %v5793_v13  ;;  %1501 = vmatprep.mubr.f32.mxu1 %v6993_v6 }
 0x50a   :  { %4310 = vmatpush3.msra.mxu0 %v7016_v5  ;;  %4311 = vmatprep.mubr.msk.f32.mxu0 %vm5021_vm2, %v6993_v6 }
 0x50b   :  { %1606 = vmatprep.subr.mxu1 %v5654_v7  ;;  %4314 = vmatprep.subr.mxu0 %v6993_v6 }
 0x5aa   :  { %v1334_v57 = vpop.f32.mrf.mxu1  ;;  %v1405_v0 = vpop.f32.mrf.mxu0 }
 0x5ab   :  { %v1409_v17 = vadd.f32 %v1334_v57, %v7023_v14  ;;  %v1423_v32 = vadd.f32 %v5429_v9, %v1405_v0  ;;  %v5824_v0 = vld [vmem:[#allocation7 + $0x130] sm:$0xff]  ;;  %v5830_v14 = vld [vmem:[#allocation7 + $0x118] sm:$0xff] }
 0x5ac   :  { %v4278_v19 = vpop.f32.mrf.mxu0  ;;  %v1336_v22 = vpop.f32.mrf.mxu1 }
 0x5ad   :  { %v3688_v21 = vmul.f32 -1.442695, %v1409_v17  ;;  %v1410_v26 = vadd.f32 %v1336_v22, %v7024_v24  ;;  %v5836_v17 = vld [vmem:[#allocation7 + $0x100] sm:$0xff]  ;;  %v5842_v19 = vld [vmem:[#allocation7 + $0xe8] sm:$0xff]  ;;  %v5854_v22 = vld [vmem:[#allocation7 + $0xb8] sm:$0xff] }
 0x5ae   :  { %v5860_v24 = vld [vmem:[#allocation7 + $0xa0] sm:$0xff] }
 0x5af   :  { %4754 = vpow2.f32 %v3688_v21  ;;  %v3689_v28 = vmul.f32 -1.442695, %v1410_v26  ;;  %v5848_v21 = vld [vmem:[#allocation7 + $0xd0] sm:$0xff]  ;;  %v5866_v26 = vld [vmem:[#allocation7 + $0x88] sm:$0xff] }
 0x5b1   :  { %4756 = vpow2.f32 %v3689_v28  ;;  %v5872_v28 = vld [vmem:[#allocation7 + $0x70] sm:$0xff] }
 0x5bc   :  { %v4755_v5 = vpop.eup %4754 }
 0x5bd   :  { %v1417_v29 = vadd.f32 1.0, %v4755_v5  ;;  %v5878_v5 = vld [vmem:[#allocation7 + $0x58] sm:$0xff] }
 0x5be   :  { %v4757_v30 = vpop.eup %4756 }
 0x5bf   :  { %4758 = vrcp.f32 %v1417_v29  ;;  %v1418_v31 = vadd.f32 1.0, %v4757_v30  ;;  %v5884_v29 = vld [vmem:[#allocation7 + $0x40] sm:$0xff]  ;;  %v5890_v30 = vld [vmem:[#allocation7 + $0x28] sm:$0xff] }
 0x5c0   :  { %7026 = vst [vmem:[#allocation23_spill] sm:$0xff] %v5890_v30 }
 0x5c1   :  { %4760 = vrcp.f32 %v1418_v31  ;;  %v5897_v31 = vld [vmem:[#allocation7 + $0x10] sm:$0xff] }
 0x5c2   :  { %7027 = vst [vmem:[#allocation24_spill] sm:$0xff] %v5897_v31 }
 0x5cc   :  { %v4759_v33 = vpop.eup %4758 }
 0x5cd   :  { %v1424_v34 = vmul.f32 %v4759_v33, %v1423_v32 }
 0x5ce   :  { %v4761_v37 = vpop.eup %4760 }
 0x5cf   :  { %v1425_v36 = vadd.f32 %v1424_v34, %v7025_v35  ;;  %v1427_v38 = vsub.f32 1.0, %v4761_v37  ;;  %v1429_v41 = vmul.f32 %v4761_v37, %v5663_v42  ;;  %v7028_v34 = vld [vmem:[#allocation33_spill] sm:$0xff] }
 0x5d1   :  { %4762 = vtanh.f32 %v1425_v36 }
 0x5de   :  { %v4763_v39 = vpop.eup %4762 }
 0x5df   :  { %v1428_v40 = vmul.f32 %v4763_v39, %v1427_v38  ;;  %v7029_v39 = vld [vmem:[#allocation34_spill] sm:$0xff] }
 0x5e1   :  { %v5807_v57 = vadd.f32 %v1429_v41, %v1428_v40 }
 0x5e3   :  { %1502 = vmatmul.mubr.f32.vlgmr.msra.gmra.mxu1 %v5807_v57  ;;  %4312 = vmatmul.mubr.f32.vlgmr.msra.gmra.mxu0 %v5807_v57 }
 0x5e4   :  { %1607 = vmatpush1.msra.mxu1 %v5667_v44  ;;  %4315 = vmatpush3.msra.mxu0 %v5670_v8 }
 0x5e5   :  { %1608 = vmatprep.subr.mxu1 %v5673_v23  ;;  %4316 = vmatprep.subr.mxu0 %v6993_v6 }
 0x5e6   :  { %1609 = vmatpush1.msra.mxu1 %v5677_v46  ;;  %4317 = vmatpush3.msra.mxu0 %v5680_v2 }
 0x5e7   :  { %1610 = vmatprep.subr.mxu1 %v5683_v15  ;;  %4318 = vmatprep.subr.mxu0 %v6993_v6 }
 0x5e8   :  { %1611 = vmatpush1.msra.mxu1 %v5687_v1  ;;  %4319 = vmatpush3.msra.mxu0 %v5690_v16 }
 0x5e9   :  { %1612 = vmatprep.subr.mxu1 %v5693_v18  ;;  %4320 = vmatprep.subr.mxu0 %v6993_v6 }
 0x5ea   :  { %1613 = vmatpush1.msra.mxu1 %v5697_v45  ;;  %4321 = vmatpush3.msra.mxu0 %v5824_v0 }
 0x5eb   :  { %1614 = vmatprep.subr.mxu1 %v5701_v63  ;;  %4322 = vmatprep.subr.mxu0 %v6993_v6 }
 0x5ec   :  { %1615 = vmatpush1.msra.mxu1 %v5705_v27  ;;  %4323 = vmatpush3.msra.mxu0 %v5830_v14 }
 0x5ed   :  { %1616 = vmatprep.subr.mxu1 %v5709_v59  ;;  %4324 = vmatprep.subr.mxu0 %v6993_v6 }
 0x5ee   :  { %1617 = vmatpush1.msra.mxu1 %v5713_v12  ;;  %4325 = vmatpush3.msra.mxu0 %v5836_v17 }
 0x5ef   :  { %1618 = vmatprep.subr.mxu1 %v5717_v43  ;;  %4326 = vmatprep.subr.mxu0 %v6993_v6 }
 0x5f0   :  { %1619 = vmatpush1.msra.mxu1 %v5721_v62  ;;  %4327 = vmatpush3.msra.mxu0 %v5842_v19 }
 0x5f1   :  { %1620 = vmatprep.subr.mxu1 %v5725_v48  ;;  %4328 = vmatprep.subr.mxu0 %v6993_v6 }
 0x5f2   :  { %1621 = vmatpush1.msra.mxu1 %v5729_v58  ;;  %4329 = vmatpush3.msra.mxu0 %v5848_v21 }
 0x5f3   :  { %1622 = vmatprep.subr.mxu1 %v5733_v49  ;;  %4330 = vmatprep.subr.mxu0 %v6993_v6 }
 0x5f4   :  { %1623 = vmatpush1.msra.mxu1 %v5737_v47  ;;  %4331 = vmatpush3.msra.mxu0 %v5854_v22 }
 0x5f5   :  { %1624 = vmatprep.subr.mxu1 %v5741_v50  ;;  %4332 = vmatprep.subr.mxu0 %v6993_v6 }
 0x5f6   :  { %1625 = vmatpush1.msra.mxu1 %v5745_v60  ;;  %4333 = vmatpush3.msra.mxu0 %v5860_v24 }
 0x5f7   :  { %1626 = vmatprep.subr.mxu1 %v5749_v51  ;;  %4334 = vmatprep.subr.mxu0 %v6993_v6 }
 0x5f8   :  { %1627 = vmatpush1.msra.mxu1 %v5753_v20  ;;  %4335 = vmatpush3.msra.mxu0 %v5866_v26 }
 0x5f9   :  { %1628 = vmatprep.subr.mxu1 %v5757_v52  ;;  %4336 = vmatprep.subr.mxu0 %v6993_v6 }
 0x5fa   :  { %1629 = vmatpush1.msra.mxu1 %v5761_v3  ;;  %4337 = vmatpush3.msra.mxu0 %v5872_v28 }
 0x5fb   :  { %1630 = vmatprep.subr.mxu1 %v5765_v53  ;;  %4338 = vmatprep.subr.mxu0 %v6993_v6 }
 0x5fc   :  { %1631 = vmatpush1.msra.mxu1 %v5769_v4  ;;  %4339 = vmatpush3.msra.mxu0 %v5878_v5 }
 0x5fd   :  { %1632 = vmatprep.subr.mxu1 %v5773_v54  ;;  %4340 = vmatprep.subr.mxu0 %v6993_v6 }
 0x5fe   :  { %1633 = vmatpush1.msra.mxu1 %v5777_v10  ;;  %4341 = vmatpush3.msra.mxu0 %v5884_v29 }
 0x5ff   :  { %1634 = vmatprep.subr.mxu1 %v5781_v55  ;;  %4342 = vmatprep.subr.mxu0 %v6993_v6 }
 0x600   :  { %1635 = vmatpush1.msra.mxu1 %v5785_v11  ;;  %4343 = vmatpush3.msra.mxu0 %v5890_v30  ;;  %v7030_v30 = vld [vmem:[#allocation25_spill] sm:$0xff] }
 0x601   :  { %1636 = vmatprep.subr.mxu1 %v5789_v56  ;;  %4344 = vmatprep.subr.mxu0 %v6993_v6 }
 0x602   :  { %1637 = vmatpush1.msra.mxu1 %v5793_v13  ;;  %1670 = vmatprep.mubr.f32.mxu1 %v6993_v6 }
 0x603   :  { %4345 = vmatpush3.msra.mxu0 %v5897_v31  ;;  %4346 = vmatprep.mubr.msk.f32.mxu0 %vm5021_vm2, %v6993_v6 }
 0x604   :  { %1775 = vmatprep.subr.mxu1 %v5654_v7  ;;  %4349 = vmatprep.subr.mxu0 %v6993_v6 }
 0x6a3   :  { %v1503_v32 = vpop.f32.mrf.mxu1  ;;  %v1574_v33 = vpop.f32.mrf.mxu0 }
 0x6a4   :  { %v1578_v35 = vadd.f32 %v1503_v32, %v7028_v34  ;;  %v1592_v7 = vadd.f32 %v5429_v9, %v1574_v33  ;;  %v7031_v9 = vld [vmem:[#allocation23_spill] sm:$0xff]  ;;  %v1976_v33 = vld [vmem:[#allocation5 + $0x258] sm:$0xff] }
 0x6a5   :  { %v4313_v36 = vpop.f32.mrf.mxu0  ;;  %v1505_v38 = vpop.f32.mrf.mxu1 }
 0x6a6   :  { %v3690_v37 = vmul.f32 -1.442695, %v1578_v35  ;;  %v1579_v40 = vadd.f32 %v1505_v38, %v7029_v39 }
 0x6a8   :  { %4764 = vpow2.f32 %v3690_v37  ;;  %v3691_v41 = vmul.f32 -1.442695, %v1579_v40  ;;  %v1974_v40 = vld [vmem:[#allocation5 + $0x248] sm:$0xff] }
 0x6aa   :  { %4766 = vpow2.f32 %v3691_v41  ;;  %v1975_v41 = vld [vmem:[#allocation5 + $0x250] sm:$0xff] }
 0x6b5   :  { %v4765_v42 = vpop.eup %4764 }
 0x6b6   :  { %v1586_v25 = vadd.f32 1.0, %v4765_v42  ;;  %v7034_v42 = vld [vmem:[#allocation24_spill] sm:$0xff] }
 0x6b7   :  { %v4767_v61 = vpop.eup %4766 }
 0x6b8   :  { %4768 = vrcp.f32 %v1586_v25  ;;  %v1587_v31 = vadd.f32 1.0, %v4767_v61  ;;  %v7032_v61 = vld [vmem:[#allocation18_spill] sm:$0xff]  ;;  %v7033_v25 = vld [vmem:[#allocation11_spill] sm:$0xff] }
 0x6ba   :  { %4770 = vrcp.f32 %v1587_v31  ;;  %v1978_v31 = vld [vmem:[#allocation5 + $0x268] sm:$0xff] }
 0x6c5   :  { %v4769_v13 = vpop.eup %4768 }
 0x6c6   :  { %v1593_v56 = vmul.f32 %v4769_v13, %v1592_v7  ;;  %v1990_v13 = vld [vmem:[#allocation5 + $0x2c8] sm:$0xff]  ;;  %v1973_v7 = vld [vmem:[#allocation5 + $0x240] sm:$0xff] }
 0x6c7   :  { %v4771_v34 = vpop.eup %4770 }
 0x6c8   :  { %v1594_v32 = vadd.f32 %v1593_v56, %v7030_v30  ;;  %v1596_v35 = vsub.f32 1.0, %v4771_v34  ;;  %v1598_v38 = vmul.f32 %v4771_v34, %v5807_v57  ;;  %v1989_v56 = vld [vmem:[#allocation5 + $0x2c0] sm:$0xff]  ;;  %v1972_v34 = vld [vmem:[#allocation5 + $0x238] sm:$0xff] }
 0x6c9   :  { %v1977_v30 = vld [vmem:[#allocation5 + $0x260] sm:$0xff] }
 0x6ca   :  { %4772 = vtanh.f32 %v1594_v32  ;;  %v1971_v32 = vld [vmem:[#allocation5 + $0x230] sm:$0xff] }
 0x6d7   :  { %v4773_v36 = vpop.eup %4772 }
 0x6d8   :  { %v1597_v37 = vmul.f32 %v4773_v36, %v1596_v35  ;;  %v1970_v35 = vld [vmem:[#allocation5 + $0x228] sm:$0xff]  ;;  %v1968_v36 = vld [vmem:[#allocation5 + $0x218] sm:$0xff] }
 0x6da   :  { %v5909_v39 = vadd.f32 %v1598_v38, %v1597_v37  ;;  %v1969_v37 = vld [vmem:[#allocation5 + $0x220] sm:$0xff]  ;;  %v1967_v38 = vld [vmem:[#allocation5 + $0x210] sm:$0xff] }
 0x6dc   :  { %1671 = vmatmul.mubr.f32.vlgmr.msra.gmra.mxu1 %v5909_v39  ;;  %4347 = vmatmul.mubr.f32.vlgmr.msra.gmra.mxu0 %v5909_v39 }
 0x6dd   :  { %1776 = vmatpush1.msra.mxu1 %v5667_v44  ;;  %4350 = vmatpush3.msra.mxu0 %v5670_v8  ;;  %v1995_v44 = vld [vmem:[#allocation5 + $0x2f0] sm:$0xff]  ;;  %v1996_v8 = vld [vmem:[#allocation5 + $0x2f8] sm:$0xff] }
 0x6de   :  { %1777 = vmatprep.subr.mxu1 %v5673_v23  ;;  %4351 = vmatprep.subr.mxu0 %v6993_v6 }
 0x6df   :  { %1778 = vmatpush1.msra.mxu1 %v5677_v46  ;;  %4352 = vmatpush3.msra.mxu0 %v5680_v2  ;;  %v7035_v2 = vld [vmem:[#allocation35_spill] sm:$0xff] }
 0x6e0   :  { %1779 = vmatprep.subr.mxu1 %v5683_v15  ;;  %4353 = vmatprep.subr.mxu0 %v6993_v6 }
 0x6e1   :  { %1780 = vmatpush1.msra.mxu1 %v5687_v1  ;;  %4354 = vmatpush3.msra.mxu0 %v5690_v16 }
 0x6e2   :  { %1781 = vmatprep.subr.mxu1 %v5693_v18  ;;  %4355 = vmatprep.subr.mxu0 %v6993_v6 }
 0x6e3   :  { %1782 = vmatpush1.msra.mxu1 %v5697_v45  ;;  %4356 = vmatpush3.msra.mxu0 %v5824_v0  ;;  %v7036_v45 = vld [vmem:[#allocation36_spill] sm:$0xff]  ;;  %v1988_v0 = vld [vmem:[#allocation5 + $0x2b8] sm:$0xff] }
 0x6e4   :  { %1783 = vmatprep.subr.mxu1 %v5701_v63  ;;  %4357 = vmatprep.subr.mxu0 %v6993_v6 }
 0x6e5   :  { %1784 = vmatpush1.msra.mxu1 %v5705_v27  ;;  %4358 = vmatpush3.msra.mxu0 %v5830_v14  ;;  %v7038_v14 = vld [vmem:[#allocation39_spill] sm:$0xff] }
 0x6e6   :  { %1785 = vmatprep.subr.mxu1 %v5709_v59  ;;  %4359 = vmatprep.subr.mxu0 %v6993_v6 }
 0x6e7   :  { %1786 = vmatpush1.msra.mxu1 %v5713_v12  ;;  %4360 = vmatpush3.msra.mxu0 %v5836_v17  ;;  %v1986_v17 = vld [vmem:[#allocation5 + $0x2a8] sm:$0xff] }
 0x6e8   :  { %1787 = vmatprep.subr.mxu1 %v5717_v43  ;;  %4361 = vmatprep.subr.mxu0 %v6993_v6 }
 0x6e9   :  { %1788 = vmatpush1.msra.mxu1 %v5721_v62  ;;  %4362 = vmatpush3.msra.mxu0 %v5842_v19  ;;  %v1987_v19 = vld [vmem:[#allocation5 + $0x2b0] sm:$0xff] }
 0x6ea   :  { %1789 = vmatprep.subr.mxu1 %v5725_v48  ;;  %4363 = vmatprep.subr.mxu0 %v6993_v6  ;;  %v5983_v48 = vld [vmem:[%s6907_s6] ss:$0 sm:$0xff] }
 0x6eb   :  { %1790 = vmatpush1.msra.mxu1 %v5729_v58  ;;  %4364 = vmatpush3.msra.mxu0 %v5848_v21  ;;  %v1985_v21 = vld [vmem:[#allocation5 + $0x2a0] sm:$0xff] }
 0x6ec   :  { %1791 = vmatprep.subr.mxu1 %v5733_v49  ;;  %4365 = vmatprep.subr.mxu0 %v6993_v6 }
 0x6ed   :  { %1792 = vmatpush1.msra.mxu1 %v5737_v47  ;;  %4366 = vmatpush3.msra.mxu0 %v5854_v22  ;;  %v1983_v22 = vld [vmem:[#allocation5 + $0x290] sm:$0xff] }
 0x6ee   :  { %1793 = vmatprep.subr.mxu1 %v5741_v50  ;;  %4367 = vmatprep.subr.mxu0 %v6993_v6  ;;  %v7037_v50 = vld [vmem:[#allocation31_spill] sm:$0xff] }
 0x6ef   :  { %1794 = vmatpush1.msra.mxu1 %v5745_v60  ;;  %4368 = vmatpush3.msra.mxu0 %v5860_v24  ;;  %v1984_v24 = vld [vmem:[#allocation5 + $0x298] sm:$0xff] }
 0x6f0   :  { %1795 = vmatprep.subr.mxu1 %v5749_v51  ;;  %4369 = vmatprep.subr.mxu0 %v6993_v6 }
 0x6f1   :  { %1796 = vmatpush1.msra.mxu1 %v5753_v20  ;;  %4370 = vmatpush3.msra.mxu0 %v5866_v26  ;;  %v1982_v26 = vld [vmem:[#allocation5 + $0x288] sm:$0xff] }
 0x6f2   :  { %1797 = vmatprep.subr.mxu1 %v5757_v52  ;;  %4371 = vmatprep.subr.mxu0 %v6993_v6 }
 0x6f3   :  { %1798 = vmatpush1.msra.mxu1 %v5761_v3  ;;  %4372 = vmatpush3.msra.mxu0 %v5872_v28  ;;  %v1980_v28 = vld [vmem:[#allocation5 + $0x278] sm:$0xff] }
 0x6f4   :  { %1799 = vmatprep.subr.mxu1 %v5765_v53  ;;  %4373 = vmatprep.subr.mxu0 %v6993_v6 }
 0x6f5   :  { %1800 = vmatpush1.msra.mxu1 %v5769_v4  ;;  %4374 = vmatpush3.msra.mxu0 %v5878_v5  ;;  %v1981_v5 = vld [vmem:[#allocation5 + $0x280] sm:$0xff] }
 0x6f6   :  { %1801 = vmatprep.subr.mxu1 %v5773_v54  ;;  %4375 = vmatprep.subr.mxu0 %v6993_v6  ;;  %v1994_v54 = vld [vmem:[#allocation5 + $0x2e8] sm:$0xff] }
 0x6f7   :  { %1802 = vmatpush1.msra.mxu1 %v5777_v10  ;;  %4376 = vmatpush3.msra.mxu0 %v5884_v29  ;;  %v1992_v10 = vld [vmem:[#allocation5 + $0x2d8] sm:$0xff]  ;;  %v1979_v29 = vld [vmem:[#allocation5 + $0x270] sm:$0xff] }
 0x6f8   :  { %1803 = vmatprep.subr.mxu1 %v5781_v55  ;;  %4377 = vmatprep.subr.mxu0 %v6993_v6  ;;  %v1993_v55 = vld [vmem:[#allocation5 + $0x2e0] sm:$0xff] }
 0x6f9   :  { %1804 = vmatpush1.msra.mxu1 %v5785_v11  ;;  %4378 = vmatpush3.msra.mxu0 %v7031_v9  ;;  %v1991_v11 = vld [vmem:[#allocation5 + $0x2d0] sm:$0xff]  ;;  %v1965_v9 = vld [vmem:[#allocation5 + $0x200] sm:$0xff] }
 0x6fa   :  { %1805 = vmatprep.subr.mxu1 %v7032_v61  ;;  %4379 = vmatprep.subr.mxu0 %v6993_v6  ;;  %v1966_v61 = vld [vmem:[#allocation5 + $0x208] sm:$0xff] }
 0x6fb   :  { %1806 = vmatpush1.msra.mxu1 %v7033_v25  ;;  %4380 = vmatpush3.msra.mxu0 %v7034_v42  ;;  %v1964_v25 = vld [vmem:[#allocation5 + $0x1f8] sm:$0xff]  ;;  %v1962_v42 = vld [vmem:[#allocation5 + $0x1e8] sm:$0xff] }
 0x6fc   :  { %1839 = vmatprep.mubr.f32.mxu1 %v6993_v6  ;;  %4381 = vmatprep.mubr.msk.f32.mxu0 %vm5021_vm2, %v6993_v6 }
 0x6fd   :  { %2015 = vmatprep.subr.mxu1 %v1995_v44  ;;  %4384 = vmatprep.subr.mxu0 %v1996_v8  ;;  %v1963_v44 = vld [vmem:[#allocation5 + $0x1f0] sm:$0xff] }
 0x79c   :  { %v1672_v23 = vpop.f32.mrf.mxu1  ;;  %v1743_v46 = vpop.f32.mrf.mxu0 }
 0x79d   :  { %v1747_v15 = vadd.f32 %v1672_v23, %v7035_v2  ;;  %v1761_v58 = vadd.f32 %v5983_v48, %v1743_v46  ;;  %v1959_v23 = vld [vmem:[#allocation5 + $0x1d0] sm:$0xff]  ;;  %v1960_v46 = vld [vmem:[#allocation5 + $0x1d8] sm:$0xff]  ;;  %v1958_v2 = vld [vmem:[#allocation5 + $0x1c8] sm:$0xff] }
 0x79e   :  { %v4348_v1 = vpop.f32.mrf.mxu0  ;;  %v1674_v18 = vpop.f32.mrf.mxu1 }
 0x79f   :  { %v3692_v16 = vmul.f32 -1.442695, %v1747_v15  ;;  %v1748_v63 = vadd.f32 %v1674_v18, %v7036_v45  ;;  %v1956_v15 = vld [vmem:[#allocation5 + $0x1b8] sm:$0xff]  ;;  %v1957_v1 = vld [vmem:[#allocation5 + $0x1c0] sm:$0xff]  ;;  %v1954_v45 = vld [vmem:[#allocation5 + $0x1a8] sm:$0xff] }
 0x7a0   :  { %v1953_v18 = vld [vmem:[#allocation5 + $0x1a0] sm:$0xff] }
 0x7a1   :  { %4774 = vpow2.f32 %v3692_v16  ;;  %v3693_v27 = vmul.f32 -1.442695, %v1748_v63  ;;  %v1955_v16 = vld [vmem:[#allocation5 + $0x1b0] sm:$0xff]  ;;  %v1952_v63 = vld [vmem:[#allocation5 + $0x198] sm:$0xff] }
 0x7a3   :  { %4776 = vpow2.f32 %v3693_v27  ;;  %v1950_v27 = vld [vmem:[#allocation5 + $0x188] sm:$0xff] }
 0x7ae   :  { %v4775_v59 = vpop.eup %4774 }
 0x7af   :  { %v1755_v12 = vadd.f32 1.0, %v4775_v59  ;;  %v1951_v59 = vld [vmem:[#allocation5 + $0x190] sm:$0xff] }
 0x7b0   :  { %v4777_v43 = vpop.eup %4776 }
 0x7b1   :  { %4778 = vrcp.f32 %v1755_v12  ;;  %v1756_v62 = vadd.f32 1.0, %v4777_v43  ;;  %v1949_v12 = vld [vmem:[#allocation5 + $0x180] sm:$0xff]  ;;  %v7039_v43 = vld [vmem:[#allocation12_spill] sm:$0xff] }
 0x7b3   :  { %4780 = vrcp.f32 %v1756_v62  ;;  %v7040_v62 = vld [vmem:[#allocation19_spill] sm:$0xff] }
 0x7be   :  { %v4779_v49 = vpop.eup %4778 }
 0x7bf   :  { %v1762_v47 = vmul.f32 %v4779_v49, %v1761_v58  ;;  %v7041_v58 = vld [vmem:[#allocation21_spill] sm:$0xff] }
 0x7c0   :  { %v4781_v51 = vpop.eup %4780  ;;  %v6015_v49 = vld [vmem:[#allocation7 + $0x2f0] sm:$0xff] }
 0x7c1   :  { %v1763_v60 = vadd.f32 %v1762_v47, %v7037_v50  ;;  %v1765_v20 = vsub.f32 1.0, %v4781_v51  ;;  %v1767_v53 = vmul.f32 %v4781_v51, %v5909_v39  ;;  %7042 = vst [vmem:[#allocation22_spill] sm:$0xff] %v6015_v49  ;;  %v6018_v47 = vld [vmem:[#allocation7 + $0x2e8] sm:$0xff]  ;;  %v6021_v50 = vld [vmem:[#allocation7 + $0x2d8] sm:$0xff] }
 0x7c2   :  { %v6033_v51 = vld [vmem:[#allocation7 + $0x2a8] sm:$0xff] }
 0x7c3   :  { %4782 = vtanh.f32 %v1763_v60  ;;  %v6030_v60 = vld [vmem:[#allocation7 + $0x2b8] sm:$0xff] }
 0x7d0   :  { %v4783_v52 = vpop.eup %4782 }
 0x7d1   :  { %v1766_v3 = vmul.f32 %v4783_v52, %v1765_v20  ;;  %v6036_v20 = vld [vmem:[#allocation7 + $0x2a0] sm:$0xff]  ;;  %v6039_v52 = vld [vmem:[#allocation7 + $0x290] sm:$0xff] }
 0x7d3   :  { %v5988_v4 = vadd.f32 %v1767_v53, %v1766_v3  ;;  %v6042_v3 = vld [vmem:[#allocation7 + $0x288] sm:$0xff]  ;;  %v6045_v53 = vld [vmem:[#allocation7 + $0x278] sm:$0xff] }
 0x7d5   :  { %1840 = vmatmul.mubr.f32.vlgmr.msra.gmra.mxu1 %v5988_v4  ;;  %4382 = vmatmul.mubr.f32.vlgmr.msra.gmra.mxu0 %v5988_v4 }
 0x7d6   :  { %2016 = vmatpush1.msra.mxu1 %v1994_v54  ;;  %4385 = vmatpush3.msra.mxu0 %v1996_v8  ;;  %v1961_v8 = vld [vmem:[#allocation5 + $0x1e0] sm:$0xff]  ;;  %v6048_v54 = vld [vmem:[#allocation7 + $0x270] sm:$0xff] }
 0x7d7   :  { %2017 = vmatprep.subr.mxu1 %v1992_v10  ;;  %4386 = vmatprep.subr.mxu0 %v1993_v55  ;;  %v6051_v10 = vld [vmem:[#allocation7 + $0x260] sm:$0xff] }
 0x7d8   :  { %4416 = vmatprep.mubr.f32.mxu0 %v7038_v14  ;;  %2018 = vmatpush1.msra.mxu1 %v1991_v11  ;;  %v6057_v11 = vld [vmem:[#allocation7 + $0x248] sm:$0xff] }
 0x7d9   :  { %4387 = vmatpush3.msra.mxu0 %v1993_v55  ;;  %2019 = vmatprep.subr.mxu1 %v1989_v56  ;;  %v6054_v55 = vld [vmem:[#allocation7 + $0x258] sm:$0xff]  ;;  %v6060_v56 = vld [vmem:[#allocation7 + $0x240] sm:$0xff] }
 0x7da   :  { %4388 = vmatprep.subr.mxu0 %v1990_v13  ;;  %2020 = vmatpush1.msra.mxu1 %v1988_v0  ;;  %v6066_v0 = vld [vmem:[#allocation7 + $0x228] sm:$0xff] }
 0x7db   :  { %4389 = vmatpush3.msra.mxu0 %v1990_v13  ;;  %2021 = vmatprep.subr.mxu1 %v1986_v17  ;;  %v6063_v13 = vld [vmem:[#allocation7 + $0x230] sm:$0xff] }
 0x7dc   :  { %4390 = vmatprep.subr.mxu0 %v1987_v19  ;;  %2022 = vmatpush1.msra.mxu1 %v1985_v21  ;;  %v6072_v17 = vld [vmem:[#allocation7 + $0x210] sm:$0xff]  ;;  %v6078_v21 = vld [vmem:[#allocation7 + $0x1f8] sm:$0xff] }
 0x7dd   :  { %4391 = vmatpush3.msra.mxu0 %v1987_v19  ;;  %2023 = vmatprep.subr.mxu1 %v1983_v22  ;;  %v6075_v19 = vld [vmem:[#allocation7 + $0x200] sm:$0xff]  ;;  %v6081_v22 = vld [vmem:[#allocation7 + $0x1e8] sm:$0xff] }
 0x7de   :  { %4392 = vmatprep.subr.mxu0 %v1984_v24  ;;  %2024 = vmatpush1.msra.mxu1 %v1982_v26  ;;  %v6087_v26 = vld [vmem:[#allocation7 + $0x1d0] sm:$0xff] }
 0x7df   :  { %4393 = vmatpush3.msra.mxu0 %v1984_v24  ;;  %2025 = vmatprep.subr.mxu1 %v1980_v28  ;;  %v6084_v24 = vld [vmem:[#allocation7 + $0x1e0] sm:$0xff]  ;;  %v6090_v28 = vld [vmem:[#allocation7 + $0x1c8] sm:$0xff] }
 0x7e0   :  { %4394 = vmatprep.subr.mxu0 %v1981_v5  ;;  %2026 = vmatpush1.msra.mxu1 %v1979_v29  ;;  %v6096_v29 = vld [vmem:[#allocation7 + $0x1b0] sm:$0xff] }
 0x7e1   :  { %4395 = vmatpush3.msra.mxu0 %v1981_v5  ;;  %2027 = vmatprep.subr.mxu1 %v1977_v30  ;;  %v6093_v5 = vld [vmem:[#allocation7 + $0x1b8] sm:$0xff]  ;;  %v6099_v30 = vld [vmem:[#allocation7 + $0x1a0] sm:$0xff] }
 0x7e2   :  { %4396 = vmatprep.subr.mxu0 %v1978_v31  ;;  %2028 = vmatpush1.msra.mxu1 %v1976_v33  ;;  %v6105_v33 = vld [vmem:[#allocation7 + $0x188] sm:$0xff] }
 0x7e3   :  { %4397 = vmatpush3.msra.mxu0 %v1978_v31  ;;  %2029 = vmatprep.subr.mxu1 %v1974_v40  ;;  %v6102_v31 = vld [vmem:[#allocation7 + $0x198] sm:$0xff]  ;;  %7044 = vst [vmem:[#allocation13_spill] sm:$0xff] %v6105_v33  ;;  %v6107_v40 = vld [vmem:[#allocation7 + $0x180] sm:$0xff] }
 0x7e4   :  { %4398 = vmatprep.subr.mxu0 %v1975_v41  ;;  %2030 = vmatpush1.msra.mxu1 %v1973_v7  ;;  %7043 = vst [vmem:[#allocation15_spill] sm:$0xff] %v6102_v31  ;;  %7045 = vst [vmem:[#allocation14_spill] sm:$0xff] %v6107_v40  ;;  %v6113_v7 = vld [vmem:[#allocation7 + $0x2e0] sm:$0xff] }
 0x7e5   :  { %4399 = vmatpush3.msra.mxu0 %v1975_v41  ;;  %2031 = vmatprep.subr.mxu1 %v1971_v32  ;;  %v6109_v41 = vld [vmem:[#allocation7 + $0x2f8] sm:$0xff]  ;;  %v6117_v32 = vld [vmem:[#allocation7 + $0x2c8] sm:$0xff] }
 0x7e6   :  { %4400 = vmatprep.subr.mxu0 %v1972_v34  ;;  %2032 = vmatpush1.msra.mxu1 %v1970_v35  ;;  %v6126_v35 = vld [vmem:[#allocation7 + $0x298] sm:$0xff] }
 0x7e7   :  { %4401 = vmatpush3.msra.mxu0 %v1972_v34  ;;  %2033 = vmatprep.subr.mxu1 %v1968_v36  ;;  %v6122_v34 = vld [vmem:[#allocation7 + $0x2b0] sm:$0xff]  ;;  %v6130_v36 = vld [vmem:[#allocation7 + $0x280] sm:$0xff] }
 0x7e8   :  { %4402 = vmatprep.subr.mxu0 %v1969_v37  ;;  %2034 = vmatpush1.msra.mxu1 %v1967_v38  ;;  %v6138_v38 = vld [vmem:[#allocation7 + $0x250] sm:$0xff] }
 0x7e9   :  { %4403 = vmatpush3.msra.mxu0 %v1969_v37  ;;  %2035 = vmatprep.subr.mxu1 %v1965_v9  ;;  %v6134_v37 = vld [vmem:[#allocation7 + $0x268] sm:$0xff]  ;;  %v6142_v9 = vld [vmem:[#allocation7 + $0x238] sm:$0xff] }
 0x7ea   :  { %4404 = vmatprep.subr.mxu0 %v1966_v61  ;;  %2036 = vmatpush1.msra.mxu1 %v1964_v25  ;;  %v6150_v25 = vld [vmem:[#allocation7 + $0x208] sm:$0xff] }
 0x7eb   :  { %4405 = vmatpush3.msra.mxu0 %v1966_v61  ;;  %2037 = vmatprep.subr.mxu1 %v1962_v42  ;;  %v6146_v61 = vld [vmem:[#allocation7 + $0x220] sm:$0xff]  ;;  %v6154_v42 = vld [vmem:[#allocation7 + $0x1f0] sm:$0xff] }
 0x7ec   :  { %4406 = vmatprep.subr.mxu0 %v1963_v44  ;;  %2038 = vmatpush1.msra.mxu1 %v1961_v8  ;;  %v6162_v8 = vld [vmem:[#allocation7 + $0x1c0] sm:$0xff] }
 0x7ed   :  { %4407 = vmatpush3.msra.mxu0 %v1963_v44  ;;  %2039 = vmatprep.subr.mxu1 %v1959_v23  ;;  %v6158_v44 = vld [vmem:[#allocation7 + $0x1d8] sm:$0xff]  ;;  %v6166_v23 = vld [vmem:[#allocation7 + $0x1a8] sm:$0xff] }
 0x7ee   :  { %4408 = vmatprep.subr.mxu0 %v1960_v46  ;;  %2040 = vmatpush1.msra.mxu1 %v1958_v2  ;;  %7046 = vst [vmem:[#allocation16_spill] sm:$0xff] %v6166_v23 }
 0x7ef   :  { %4409 = vmatpush3.msra.mxu0 %v1960_v46  ;;  %2041 = vmatprep.subr.mxu1 %v1956_v15  ;;  %v6170_v46 = vld [vmem:[#allocation7 + $0x190] sm:$0xff] }
 0x7f0   :  { %4410 = vmatprep.subr.mxu0 %v1957_v1  ;;  %2042 = vmatpush1.msra.mxu1 %v1955_v16  ;;  %7047 = vst [vmem:[#allocation26_spill] sm:$0xff] %v6170_v46 }
 0x7f1   :  { %4411 = vmatpush3.msra.mxu0 %v1957_v1  ;;  %2043 = vmatprep.subr.mxu1 %v1953_v18  ;;  %v7048_v1 = vld [vmem:[#allocation37_spill] sm:$0xff] }
 0x7f2   :  { %4412 = vmatprep.subr.mxu0 %v1954_v45  ;;  %2044 = vmatpush1.msra.mxu1 %v1952_v63 }
 0x7f3   :  { %4413 = vmatpush3.msra.mxu0 %v1954_v45  ;;  %2045 = vmatprep.subr.mxu1 %v1950_v27  ;;  %v7049_v27 = vld [vmem:[#allocation38_spill] sm:$0xff] }
 0x7f4   :  { %4414 = vmatprep.subr.mxu0 %v1951_v59  ;;  %2046 = vmatpush1.msra.mxu1 %v1949_v12 }
 0x7f5   :  { %2079 = vmatprep.mubr.f32.mxu1 %v6993_v6  ;;  %4415 = vmatpush3.msra.mxu0 %v1951_v59 }
 0x7f6   :  { %2080 = vmatmul.mubr.f32.vlgmr.msra.gmra.mxu1 %v7038_v14  ;;  %4417 = vmatmul.mubr.f32.vlgmr.msra.gmra.mxu0 %v7039_v43  ;;  %v6069_v14 = vld [vmem:[#allocation7 + $0x218] sm:$0xff] }
 0x7f7   :  { %4419 = vmatprep.mubr.f32.mxu0 %v7040_v62  ;;  %2085 = vmatprep.mubr.f32.mxu1 %v6993_v6 }
 0x7f8   :  { %4428 = vmatprep.subr.mxu0 %v6993_v6  ;;  %2311 = vmatprep.subr.mxu1 %v6015_v49 }
 0x7f9   :  { %2312 = vmatpush1.msra.mxu1 %v6018_v47  ;;  %4429 = vmatpush3.msra.mxu0 %v6109_v41 }
 0x7fa   :  { %2086 = vmatmul.mubr.f32.gmra.mxu1 %v7039_v43  ;;  %4420 = vmatmul.mubr.f32.gmra.mxu0 %v7041_v58 }
 0x7fb   :  { %4422 = vmatprep.mubr.f32.mxu0 %v5807_v57  ;;  %2091 = vmatprep.mubr.f32.mxu1 %v6993_v6 }
 0x7fc   :  { %2313 = vmatprep.subr.mxu1 %v6021_v50  ;;  %4430 = vmatprep.subr.mxu0 %v6993_v6 }
 0x7fd   :  { %4431 = vmatpush3.msra.mxu0 %v6113_v7 }
 0x7fe   :  { %2092 = vmatmul.mubr.f32.gmra.mxu1 %v7040_v62  ;;  %4423 = vmatmul.mubr.f32.gmra.mxu0 %v5909_v39 }
 0x7ff   :  { %4425 = vmatprep.mubr.f32.mxu0 %v5988_v4  ;;  %2097 = vmatprep.mubr.f32.mxu1 %v6993_v6 }
 0x800   :  { %4432 = vmatprep.subr.mxu0 %v6993_v6 }
 0x801   :  { %4433 = vmatpush3.msra.mxu0 %v6117_v32 }
 0x802   :  { %2098 = vmatmul.mubr.f32.gmra.mxu1 %v7041_v58  ;;  %4434 = vmatprep.subr.mxu0 %v6993_v6 }
 0x803   :  { %2103 = vmatprep.mubr.f32.mxu1 %v6993_v6  ;;  %4435 = vmatpush3.msra.mxu0 %v6122_v34 }
 0x804   :  { %4436 = vmatprep.subr.mxu0 %v6993_v6 }
 0x805   :  { %4437 = vmatpush3.msra.mxu0 %v6126_v35 }
 0x806   :  { %2104 = vmatmul.mubr.f32.gmra.mxu1 %v5807_v57  ;;  %v6024_v57 = vld [vmem:[#allocation7 + $0x2d0] sm:$0xff]  ;;  %4438 = vmatprep.subr.mxu0 %v6993_v6 }
 0x807   :  { %2109 = vmatprep.mubr.f32.mxu1 %v6993_v6  ;;  %2314 = vmatpush1.msra.mxu1 %v6024_v57 }
 0x808   :  { %4439 = vmatpush3.msra.mxu0 %v6130_v36 }
 0x809   :  { %4440 = vmatprep.subr.mxu0 %v6993_v6 }
 0x80a   :  { %2110 = vmatmul.mubr.f32.gmra.mxu1 %v5909_v39  ;;  %v6027_v39 = vld [vmem:[#allocation7 + $0x2c0] sm:$0xff]  ;;  %4441 = vmatpush3.msra.mxu0 %v6134_v37 }
 0x80b   :  { %2115 = vmatprep.mubr.f32.mxu1 %v6993_v6  ;;  %2315 = vmatprep.subr.mxu1 %v6027_v39 }
 0x80c   :  { %2316 = vmatpush1.msra.mxu1 %v6030_v60  ;;  %4442 = vmatprep.subr.mxu0 %v6993_v6 }
 0x80d   :  { %2317 = vmatprep.subr.mxu1 %v6033_v51  ;;  %4443 = vmatpush3.msra.mxu0 %v6138_v38 }
 0x80e   :  { %2116 = vmatmul.mubr.f32.gmra.mxu1 %v5988_v4  ;;  %4444 = vmatprep.subr.mxu0 %v6993_v6 }
 0x80f   :  { %2121 = vmatprep.mubr.f32.mxu1 %v6993_v6  ;;  %2318 = vmatpush1.msra.mxu1 %v6036_v20 }
 0x810   :  { %2319 = vmatprep.subr.mxu1 %v6039_v52  ;;  %4445 = vmatpush3.msra.mxu0 %v6142_v9 }
 0x811   :  { %2320 = vmatpush1.msra.mxu1 %v6042_v3  ;;  %4446 = vmatprep.subr.mxu0 %v6993_v6 }
 0x812   :  { %2321 = vmatprep.subr.mxu1 %v6045_v53  ;;  %4447 = vmatpush3.msra.mxu0 %v6146_v61 }
 0x813   :  { %2322 = vmatpush1.msra.mxu1 %v6048_v54  ;;  %4448 = vmatprep.subr.mxu0 %v6993_v6 }
 0x814   :  { %2323 = vmatprep.subr.mxu1 %v6051_v10  ;;  %4449 = vmatpush3.msra.mxu0 %v6150_v25 }
 0x815   :  { %2324 = vmatpush1.msra.mxu1 %v6054_v55  ;;  %4450 = vmatprep.subr.mxu0 %v6993_v6 }
 0x816   :  { %2325 = vmatprep.subr.mxu1 %v6057_v11  ;;  %4451 = vmatpush3.msra.mxu0 %v6154_v42 }
 0x817   :  { %2326 = vmatpush1.msra.mxu1 %v6060_v56  ;;  %4452 = vmatprep.subr.mxu0 %v6993_v6 }
 0x818   :  { %2327 = vmatprep.subr.mxu1 %v6063_v13  ;;  %4453 = vmatpush3.msra.mxu0 %v6158_v44 }
 0x819   :  { %2328 = vmatpush1.msra.mxu1 %v6066_v0  ;;  %4454 = vmatprep.subr.mxu0 %v6993_v6 }
 0x81a   :  { %2329 = vmatprep.subr.mxu1 %v6069_v14  ;;  %4455 = vmatpush3.msra.mxu0 %v6162_v8 }
 0x81b   :  { %2330 = vmatpush1.msra.mxu1 %v6072_v17  ;;  %4456 = vmatprep.subr.mxu0 %v6993_v6 }
 0x81c   :  { %2331 = vmatprep.subr.mxu1 %v6075_v19  ;;  %4457 = vmatpush3.msra.mxu0 %v6166_v23  ;;  %v7050_v23 = vld [vmem:[#allocation29_spill] sm:$0xff] }
 0x81d   :  { %2332 = vmatpush1.msra.mxu1 %v6078_v21  ;;  %4458 = vmatprep.subr.mxu0 %v6993_v6 }
 0x81e   :  { %2333 = vmatprep.subr.mxu1 %v6081_v22  ;;  %4459 = vmatpush3.msra.mxu0 %v6170_v46 }
 0x81f   :  { %2334 = vmatpush1.msra.mxu1 %v6084_v24  ;;  %4463 = vmatprep.subr.mxu0 %v6993_v6 }
 0x820   :  { %2335 = vmatprep.subr.mxu1 %v6087_v26 }
 0x821   :  { %2336 = vmatpush1.msra.mxu1 %v6090_v28 }
 0x822   :  { %2337 = vmatprep.subr.mxu1 %v6093_v5 }
 0x823   :  { %2338 = vmatpush1.msra.mxu1 %v6096_v29 }
 0x824   :  { %2339 = vmatprep.subr.mxu1 %v6099_v30 }
 0x825   :  { %2340 = vmatpush1.msra.mxu1 %v6102_v31 }
 0x826   :  { %2341 = vmatprep.subr.mxu1 %v6105_v33 }
 0x827   :  { %2342 = vmatpush1.msra.mxu1 %v6107_v40 }
 0x828   :  { %2483 = vmatprep.subr.mxu1 %v6015_v49 }
 0x895   :  { %v1841_v2 = vpop.f32.mrf.mxu1  ;;  %v1912_v15 = vpop.f32.mrf.mxu0 }
 0x896   :  { %v1916_v16 = vadd.f32 %v1841_v2, %v7048_v1  ;;  %v1930_v46 = vadd.f32 %v5983_v48, %v1912_v15  ;;  %v7051_v48 = vld [vmem:[#allocation16_spill] sm:$0xff] }
 0x897   :  { %v4383_v18 = vpop.f32.mrf.mxu0  ;;  %v1843_v63 = vpop.f32.mrf.mxu1 }
 0x898   :  { %v3694_v45 = vmul.f32 -1.442695, %v1916_v16  ;;  %v1917_v59 = vadd.f32 %v1843_v63, %v7049_v27 }
 0x89a   :  { %4784 = vpow2.f32 %v3694_v45  ;;  %v3695_v12 = vmul.f32 -1.442695, %v1917_v59 }
 0x89c   :  { %4786 = vpow2.f32 %v3695_v12 }
 0x8a7   :  { %v4785_v43 = vpop.eup %4784 }
 0x8a8   :  { %v1924_v62 = vadd.f32 1.0, %v4785_v43 }
 0x8a9   :  { %v4787_v58 = vpop.eup %4786 }
 0x8aa   :  { %4788 = vrcp.f32 %v1924_v62  ;;  %v1925_v49 = vadd.f32 1.0, %v4787_v58 }
 0x8ac   :  { %4790 = vrcp.f32 %v1925_v49  ;;  %v7053_v49 = vld [vmem:[#allocation14_spill] sm:$0xff] }
 0x8b7   :  { %v4789_v40 = vpop.eup %4788 }
 0x8b8   :  { %v1931_v33 = vmul.f32 %v4789_v40, %v1930_v46  ;;  %v7055_v40 = vld [vmem:[#allocation22_spill] sm:$0xff] }
 0x8b9   :  { %v4791_v1 = vpop.eup %4790 }
 0x8ba   :  { %v1932_v2 = vadd.f32 %v1931_v33, %v7050_v23  ;;  %v1934_v16 = vsub.f32 1.0, %v4791_v1  ;;  %v1936_v63 = vmul.f32 %v4791_v1, %v5988_v4  ;;  %v7052_v4 = vld [vmem:[#allocation13_spill] sm:$0xff]  ;;  %v7054_v33 = vld [vmem:[#allocation26_spill] sm:$0xff]  ;;  %v2081_v23 = vpop.f32.mrf.mxu1 }
 0x8bc   :  { %4792 = vtanh.f32 %v1932_v2  ;;  %v2083_v46 = vpop.f32.mrf.mxu1  ;;  %v6265_v2 = vpop.f32.mrf.mxu0 }
 0x8bd   :  { %7062 = vst [vmem:[#allocation34_spill] sm:$0xff] %v6265_v2 }
 0x8be   :  { %v6253_v15 = vpop.f32.mrf.mxu1 }
 0x8bf   :  { %7056 = vst [vmem:[#allocation28_spill] sm:$0xff] %v6253_v15 }
 0x8c0   :  { %v6255_v59 = vpop.f32.mrf.mxu1 }
 0x8c1   :  { %7057 = vst [vmem:[#allocation20_spill] sm:$0xff] %v6255_v59 }
 0x8c2   :  { %v6257_v12 = vpop.f32.mrf.mxu1 }
 0x8c3   :  { %7058 = vst [vmem:[#allocation30_spill] sm:$0xff] %v6257_v12 }
 0x8c4   :  { %v6259_v43 = vpop.f32.mrf.mxu1 }
 0x8c5   :  { %7059 = vst [vmem:[#allocation32_spill] sm:$0xff] %v6259_v43 }
 0x8c6   :  { %v6261_v62 = vpop.f32.mrf.mxu1 }
 0x8c7   :  { %7060 = vst [vmem:[#allocation27_spill] sm:$0xff] %v6261_v62 }
 0x8c8   :  { %v6263_v58 = vpop.f32.mrf.mxu1 }
 0x8c9   :  { %v4793_v18 = vpop.eup %4792  ;;  %7061 = vst [vmem:[#allocation33_spill] sm:$0xff] %v6263_v58  ;;  %v3696_v58 = vld [vmem:[%s6906_s5 + $0x3] sm:$0x7] }
 0x8ca   :  { %v1935_v45 = vmul.f32 %v4793_v18, %v1934_v16  ;;  %v6267_v1 = vpop.f32.mrf.mxu1  ;;  %v2194_v16 = vpop.f32.mrf.mxu0 }
 0x8cb   :  { %7063 = vst [vmem:[#allocation25_spill] sm:$0xff] %v6267_v1 }
 0x8cc   :  { %v1937_v27 = vadd.f32 %v1936_v63, %v1935_v45  ;;  %v6269_v18 = vpop.f32.mrf.mxu1  ;;  %v6271_v45 = vpop.f32.mrf.mxu0 }
 0x8cd   :  { %7064 = vst [vmem:[#allocation23_spill] sm:$0xff] %v6269_v18  ;;  %7065 = vst [vmem:[#allocation18_spill] sm:$0xff] %v6271_v45  ;;  %v7073_v18 = vld [vmem:[#allocation17_spill] sm:$0xff] }
 0x8ce   :  { %2122 = vmatmul.mubr.f32.gmra.mxu1 %v1937_v27  ;;  %4426 = vmatmul.mubr.f32.gmra.mxu0 %v1937_v27  ;;  %v6273_v63 = vpop.f32.mrf.mxu1  ;;  %v6275_v27 = vpop.f32.mrf.mxu0  ;;  %v7074_v45 = vsub.s32 0, %v7073_v18 }
 0x8cf   :  { %2375 = vmatprep.mubr.f32.mxu1 %v6993_v6  ;;  %4460 = vmatprep.mubr.msk.f32.mxu0 %vm5021_vm2, %v6993_v6  ;;  %7066 = vst [vmem:[#allocation11_spill] sm:$0xff] %v6273_v63  ;;  %7067 = vst [vmem:[#allocation24_spill] sm:$0xff] %v6275_v27 }
 0x8d0   :  { %v6277_v12 = vpop.f32.mrf.mxu1  ;;  %v6279_v43 = vpop.f32.mrf.mxu0  ;;  %v6292_v59 = vrot.slane %v3696_v58, %v7074_v45 }
 0x8d1   :  { %7068 = vst [vmem:[#allocation35_spill] sm:$0xff] %v6277_v12  ;;  %7069 = vst [vmem:[#allocation36_spill] sm:$0xff] %v6279_v43 }
 0x8d2   :  { %2376 = vmatmul.mubr.f32.vlgmr.msra.gmra.mxu1 %v6993_v6  ;;  %4461 = vmatmul.mubr.f32.vlgmr.msra.gmra.mxu0 %v6993_v6  ;;  %v6281_v62 = vpop.f32.mrf.mxu1  ;;  %v6286_v1 = vpop.f32.mrf.mxu0  ;;  %7075 = vst [vmem:[#allocation19_spill] sm:$0xff] %v6292_v59 }
 0x8d3   :  { %2484 = vmatpush1.msra.mxu1 %v6018_v47  ;;  %4464 = vmatpush3.msra.mxu0 %v6109_v41  ;;  %7070 = vst [vmem:[#allocation31_spill] sm:$0xff] %v6281_v62  ;;  %7071 = vst [vmem:[#allocation39_spill] sm:$0xff] %v6286_v1  ;;  %v2082_v62 = vadd.f32 %v2081_v23, %v6292_v59  ;;  %v7080_v1 = vsub.s32 1, %v7073_v18  ;;  %v6311_v59 = vld [vmem:[%s6907_s6 + $0x1] ss:$0 sm:$0xff] }
 0x8d4   :  { %2485 = vmatprep.subr.mxu1 %v6021_v50  ;;  %4465 = vmatprep.subr.mxu0 %v6993_v6  ;;  %v6288_v2 = vpop.f32.mrf.mxu1 }
 0x8d5   :  { %2486 = vmatpush1.msra.mxu1 %v6024_v57  ;;  %4466 = vmatpush3.msra.mxu0 %v6113_v7  ;;  %7072 = vst [vmem:[#allocation12_spill] sm:$0xff] %v6288_v2 }
 0x8d6   :  { %2487 = vmatprep.subr.mxu1 %v6027_v39  ;;  %4467 = vmatprep.subr.mxu0 %v6993_v6 }
 0x8d7   :  { %2488 = vmatpush1.msra.mxu1 %v6030_v60  ;;  %4468 = vmatpush3.msra.mxu0 %v6117_v32 }
 0x8d8   :  { %2489 = vmatprep.subr.mxu1 %v6033_v51  ;;  %4469 = vmatprep.subr.mxu0 %v6993_v6 }
 0x8d9   :  { %2490 = vmatpush1.msra.mxu1 %v6036_v20  ;;  %4470 = vmatpush3.msra.mxu0 %v6122_v34 }
 0x8da   :  { %2491 = vmatprep.subr.mxu1 %v6039_v52  ;;  %4471 = vmatprep.subr.mxu0 %v6993_v6 }
 0x8db   :  { %2492 = vmatpush1.msra.mxu1 %v6042_v3  ;;  %4472 = vmatpush3.msra.mxu0 %v6126_v35 }
 0x8dc   :  { %2493 = vmatprep.subr.mxu1 %v6045_v53  ;;  %4473 = vmatprep.subr.mxu0 %v6993_v6 }
 0x8dd   :  { %2494 = vmatpush1.msra.mxu1 %v6048_v54  ;;  %4474 = vmatpush3.msra.mxu0 %v6130_v36 }
 0x8de   :  { %2495 = vmatprep.subr.mxu1 %v6051_v10  ;;  %4475 = vmatprep.subr.mxu0 %v6993_v6 }
 0x8df   :  { %2496 = vmatpush1.msra.mxu1 %v6054_v55  ;;  %4476 = vmatpush3.msra.mxu0 %v6134_v37 }
 0x8e0   :  { %2497 = vmatprep.subr.mxu1 %v6057_v11  ;;  %4477 = vmatprep.subr.mxu0 %v6993_v6 }
 0x8e1   :  { %2498 = vmatpush1.msra.mxu1 %v6060_v56  ;;  %4478 = vmatpush3.msra.mxu0 %v6138_v38 }
 0x8e2   :  { %2499 = vmatprep.subr.mxu1 %v6063_v13  ;;  %4479 = vmatprep.subr.mxu0 %v6993_v6 }
 0x8e3   :  { %2500 = vmatpush1.msra.mxu1 %v6066_v0  ;;  %4480 = vmatpush3.msra.mxu0 %v6142_v9 }
 0x8e4   :  { %2501 = vmatprep.subr.mxu1 %v6069_v14  ;;  %4481 = vmatprep.subr.mxu0 %v6993_v6 }
 0x8e5   :  { %2502 = vmatpush1.msra.mxu1 %v6072_v17  ;;  %4482 = vmatpush3.msra.mxu0 %v6146_v61 }
 0x8e6   :  { %2503 = vmatprep.subr.mxu1 %v6075_v19  ;;  %4483 = vmatprep.subr.mxu0 %v6993_v6 }
 0x8e7   :  { %2504 = vmatpush1.msra.mxu1 %v6078_v21  ;;  %4484 = vmatpush3.msra.mxu0 %v6150_v25 }
 0x8e8   :  { %2505 = vmatprep.subr.mxu1 %v6081_v22  ;;  %4485 = vmatprep.subr.mxu0 %v6993_v6 }
 0x8e9   :  { %2506 = vmatpush1.msra.mxu1 %v6084_v24  ;;  %4486 = vmatpush3.msra.mxu0 %v6154_v42 }
 0x8ea   :  { %2507 = vmatprep.subr.mxu1 %v6087_v26  ;;  %4487 = vmatprep.subr.mxu0 %v6993_v6 }
 0x8eb   :  { %2508 = vmatpush1.msra.mxu1 %v6090_v28  ;;  %4488 = vmatpush3.msra.mxu0 %v6158_v44 }
 0x8ec   :  { %2509 = vmatprep.subr.mxu1 %v6093_v5  ;;  %4489 = vmatprep.subr.mxu0 %v6993_v6 }
 0x8ed   :  { %2510 = vmatpush1.msra.mxu1 %v6096_v29  ;;  %4490 = vmatpush3.msra.mxu0 %v6162_v8 }
 0x8ee   :  { %2511 = vmatprep.subr.mxu1 %v6099_v30  ;;  %4491 = vmatprep.subr.mxu0 %v6993_v6 }
 0x8ef   :  { %2512 = vmatpush1.msra.mxu1 %v6102_v31  ;;  %4492 = vmatpush3.msra.mxu0 %v7051_v48 }
 0x8f0   :  { %2513 = vmatprep.subr.mxu1 %v7052_v4  ;;  %4493 = vmatprep.subr.mxu0 %v6993_v6 }
 0x8f1   :  { %2514 = vmatpush1.msra.mxu1 %v7053_v49  ;;  %2547 = vmatprep.mubr.f32.mxu1 %v6993_v6 }
 0x8f2   :  { %4494 = vmatpush3.msra.mxu0 %v7054_v33  ;;  %4495 = vmatprep.mubr.msk.f32.mxu0 %vm5021_vm2, %v6993_v6  ;;  %v6305_v33 = vrot.slane %v3696_v58, %v7080_v1 }
 0x8f3   :  { %2649 = vmatprep.subr.mxu1 %v7055_v40  ;;  %4498 = vmatprep.subr.mxu0 %v6993_v6 }
 0x8f4   :  { %7081 = vst [vmem:[#allocation17_spill] sm:$0xff] %v6305_v33 }
 0x98e   :  { %v6294_v63 = vpop.f32.mrf.mxu1  ;;  %v6296_v27 = vpop.f32.mrf.mxu0 }
 0x98f   :  { %7076 = vst [vmem:[#allocation21_spill] sm:$0xff] %v6294_v63  ;;  %7077 = vst [vmem:[#allocation37_spill] sm:$0xff] %v6296_v27  ;;  %v2084_v63 = vadd.f32 %v2083_v46, %v6305_v33 }
 0x990   :  { %v6298_v12 = vpop.f32.mrf.mxu1  ;;  %v6300_v43 = vpop.f32.mrf.mxu0 }
 0x991   :  { %7078 = vst [vmem:[#allocation38_spill] sm:$0xff] %v6298_v12  ;;  %7079 = vst [vmem:[#allocation29_spill] sm:$0xff] %v6300_v43 }
 0x992   :  { %v2377_v15 = vpop.f32.mrf.mxu1  ;;  %v2448_v40 = vpop.f32.mrf.mxu0 }
 0x993   :  { %v2452_v2 = vadd.f32 %v2377_v15, %v2082_v62  ;;  %v7082_v15 = vsub.s32 2, %v7073_v18  ;;  %v7086_v18 = vld [vmem:[#allocation26_spill] sm:$0xff] }
 0x994   :  { %v4462_v49 = vpop.f32.mrf.mxu0  ;;  %v2379_v4 = vpop.f32.mrf.mxu1 }
 0x995   :  { %v3698_v45 = vmul.f32 -1.442695, %v2452_v2  ;;  %v2453_v27 = vadd.f32 %v2379_v4, %v2084_v63  ;;  %v2472_v49 = vadd.f32 %v6311_v59, %v2448_v40  ;;  %v6316_v62 = vrot.slane %v3696_v58, %v7082_v15  ;;  %v7083_v40 = vld [vmem:[#allocation16_spill] sm:$0xff]  ;;  %v7084_v58 = vld [vmem:[#allocation13_spill] sm:$0xff] }
 0x997   :  { %4794 = vpow2.f32 %v3698_v45  ;;  %v3699_v48 = vmul.f32 -1.442695, %v2453_v27  ;;  %v2195_v4 = vadd.f32 %v2194_v16, %v6316_v62  ;;  %v7085_v16 = vld [vmem:[#allocation14_spill] sm:$0xff] }
 0x999   :  { %4796 = vpow2.f32 %v3699_v48 }
 0x9a4   :  { %v4795_v12 = vpop.eup %4794 }
 0x9a5   :  { %v2460_v43 = vadd.f32 1.0, %v4795_v12 }
 0x9a6   :  { %v4797_v23 = vpop.eup %4796 }
 0x9a7   :  { %4798 = vrcp.f32 %v2460_v43  ;;  %v2461_v1 = vadd.f32 1.0, %v4797_v23  ;;  %v7087_v23 = vld [vmem:[#allocation22_spill] sm:$0xff] }
 0x9a9   :  { %4800 = vrcp.f32 %v2461_v1  ;;  %v7088_v1 = vld [vmem:[#allocation19_spill] sm:$0xff] }
 0x9b4   :  { %v4799_v46 = vpop.eup %4798 }
 0x9b5   :  { %v2473_v48 = vmul.f32 %v4799_v46, %v2472_v49  ;;  %v7089_v49 = vld [vmem:[#allocation28_spill] sm:$0xff] }
 0x9b6   :  { %v4801_v43 = vpop.eup %4800  ;;  %v2088_v15 = vadd.f32 %v7089_v49, %v7088_v1 }
 0x9b7   :  { %v2474_v12 = vadd.f32 %v2473_v48, %v2195_v4  ;;  %v2476_v2 = vsub.f32 1.0, %v4801_v43  ;;  %v2478_v45 = vmul.f32 0.0, %v4801_v43 }
 0x9b9   :  { %4802 = vtanh.f32 %v2474_v12 }
 0x9c6   :  { %v4803_v63 = vpop.eup %4802 }
 0x9c7   :  { %v2477_v27 = vmul.f32 %v4803_v63, %v2476_v2  ;;  %v7090_v63 = vld [vmem:[#allocation17_spill] sm:$0xff] }
 0x9c9   :  { %v6319_v33 = vadd.f32 %v2478_v45, %v2477_v27  ;;  %v7091_v27 = vld [vmem:[#allocation20_spill] sm:$0xff] }
 0x9ca   :  { %v2090_v45 = vadd.f32 %v7091_v27, %v7090_v63 }
 0x9cb   :  { %2548 = vmatmul.mubr.f32.vlgmr.msra.gmra.mxu1 %v6319_v33  ;;  %4496 = vmatmul.mubr.f32.vlgmr.msra.gmra.mxu0 %v6319_v33 }
 0x9cc   :  { %2650 = vmatpush1.msra.mxu1 %v6018_v47  ;;  %4499 = vmatpush3.msra.mxu0 %v6109_v41 }
 0x9cd   :  { %2651 = vmatprep.subr.mxu1 %v6021_v50  ;;  %4500 = vmatprep.subr.mxu0 %v6993_v6 }
 0x9ce   :  { %2652 = vmatpush1.msra.mxu1 %v6024_v57  ;;  %4501 = vmatpush3.msra.mxu0 %v6113_v7 }
 0x9cf   :  { %2653 = vmatprep.subr.mxu1 %v6027_v39  ;;  %4502 = vmatprep.subr.mxu0 %v6993_v6 }
 0x9d0   :  { %2654 = vmatpush1.msra.mxu1 %v6030_v60  ;;  %4503 = vmatpush3.msra.mxu0 %v6117_v32 }
 0x9d1   :  { %2655 = vmatprep.subr.mxu1 %v6033_v51  ;;  %4504 = vmatprep.subr.mxu0 %v6993_v6 }
 0x9d2   :  { %2656 = vmatpush1.msra.mxu1 %v6036_v20  ;;  %4505 = vmatpush3.msra.mxu0 %v6122_v34 }
 0x9d3   :  { %2657 = vmatprep.subr.mxu1 %v6039_v52  ;;  %4506 = vmatprep.subr.mxu0 %v6993_v6 }
 0x9d4   :  { %2658 = vmatpush1.msra.mxu1 %v6042_v3  ;;  %4507 = vmatpush3.msra.mxu0 %v6126_v35 }
 0x9d5   :  { %2659 = vmatprep.subr.mxu1 %v6045_v53  ;;  %4508 = vmatprep.subr.mxu0 %v6993_v6 }
 0x9d6   :  { %2660 = vmatpush1.msra.mxu1 %v6048_v54  ;;  %4509 = vmatpush3.msra.mxu0 %v6130_v36 }
 0x9d7   :  { %2661 = vmatprep.subr.mxu1 %v6051_v10  ;;  %4510 = vmatprep.subr.mxu0 %v6993_v6 }
 0x9d8   :  { %2662 = vmatpush1.msra.mxu1 %v6054_v55  ;;  %4511 = vmatpush3.msra.mxu0 %v6134_v37 }
 0x9d9   :  { %2663 = vmatprep.subr.mxu1 %v6057_v11  ;;  %4512 = vmatprep.subr.mxu0 %v6993_v6 }
 0x9da   :  { %2664 = vmatpush1.msra.mxu1 %v6060_v56  ;;  %4513 = vmatpush3.msra.mxu0 %v6138_v38 }
 0x9db   :  { %2665 = vmatprep.subr.mxu1 %v6063_v13  ;;  %4514 = vmatprep.subr.mxu0 %v6993_v6 }
 0x9dc   :  { %2666 = vmatpush1.msra.mxu1 %v6066_v0  ;;  %4515 = vmatpush3.msra.mxu0 %v6142_v9 }
 0x9dd   :  { %2667 = vmatprep.subr.mxu1 %v6069_v14  ;;  %4516 = vmatprep.subr.mxu0 %v6993_v6 }
 0x9de   :  { %2668 = vmatpush1.msra.mxu1 %v6072_v17  ;;  %4517 = vmatpush3.msra.mxu0 %v6146_v61 }
 0x9df   :  { %2669 = vmatprep.subr.mxu1 %v6075_v19  ;;  %4518 = vmatprep.subr.mxu0 %v6993_v6 }
 0x9e0   :  { %2670 = vmatpush1.msra.mxu1 %v6078_v21  ;;  %4519 = vmatpush3.msra.mxu0 %v6150_v25 }
 0x9e1   :  { %2671 = vmatprep.subr.mxu1 %v6081_v22  ;;  %4520 = vmatprep.subr.mxu0 %v6993_v6 }
 0x9e2   :  { %2672 = vmatpush1.msra.mxu1 %v6084_v24  ;;  %4521 = vmatpush3.msra.mxu0 %v6154_v42 }
 0x9e3   :  { %2673 = vmatprep.subr.mxu1 %v6087_v26  ;;  %4522 = vmatprep.subr.mxu0 %v6993_v6 }
 0x9e4   :  { %2674 = vmatpush1.msra.mxu1 %v6090_v28  ;;  %4523 = vmatpush3.msra.mxu0 %v6158_v44 }
 0x9e5   :  { %2675 = vmatprep.subr.mxu1 %v6093_v5  ;;  %4524 = vmatprep.subr.mxu0 %v6993_v6 }
 0x9e6   :  { %2676 = vmatpush1.msra.mxu1 %v6096_v29  ;;  %4525 = vmatpush3.msra.mxu0 %v6162_v8 }
 0x9e7   :  { %2677 = vmatprep.subr.mxu1 %v6099_v30  ;;  %4526 = vmatprep.subr.mxu0 %v6993_v6 }
 0x9e8   :  { %2678 = vmatpush1.msra.mxu1 %v6102_v31  ;;  %4527 = vmatpush3.msra.mxu0 %v7083_v40 }
 0x9e9   :  { %2679 = vmatprep.subr.mxu1 %v7084_v58  ;;  %4528 = vmatprep.subr.mxu0 %v6993_v6 }
 0x9ea   :  { %2680 = vmatpush1.msra.mxu1 %v7085_v16  ;;  %2713 = vmatprep.mubr.f32.mxu1 %v6993_v6 }
 0x9eb   :  { %4529 = vmatpush3.msra.mxu0 %v7086_v18  ;;  %4530 = vmatprep.mubr.msk.f32.mxu0 %vm5021_vm2, %v6993_v6 }
 0x9ec   :  { %2815 = vmatprep.subr.mxu1 %v7087_v23  ;;  %4533 = vmatprep.subr.mxu0 %v6993_v6 }
 0xa8b   :  { %v2549_v46 = vpop.f32.mrf.mxu1  ;;  %v2620_v4 = vpop.f32.mrf.mxu0 }
 0xa8c   :  { %v2624_v48 = vadd.f32 %v2549_v46, %v2088_v15  ;;  %v2638_v49 = vadd.f32 %v6311_v59, %v2620_v4  ;;  %v7092_v15 = vld [vmem:[#allocation34_spill] sm:$0xff] }
 0xa8d   :  { %v4497_v12 = vpop.f32.mrf.mxu0  ;;  %v2551_v2 = vpop.f32.mrf.mxu1  ;;  %v2200_v46 = vadd.f32 %v7092_v15, %v6316_v62  ;;  %v7098_v4 = vld [vmem:[#allocation22_spill] sm:$0xff] }
 0xa8e   :  { %v3701_v43 = vmul.f32 -1.442695, %v2624_v48  ;;  %v2625_v18 = vadd.f32 %v2551_v2, %v2090_v45  ;;  %v7099_v45 = vld [vmem:[#allocation19_spill] sm:$0xff] }
 0xa90   :  { %4804 = vpow2.f32 %v3701_v43  ;;  %v3702_v16 = vmul.f32 -1.442695, %v2625_v18 }
 0xa92   :  { %4806 = vpow2.f32 %v3702_v16 }
 0xa9d   :  { %v4805_v58 = vpop.eup %4804 }
 0xa9e   :  { %v2632_v23 = vadd.f32 1.0, %v4805_v58 }
 0xa9f   :  { %v4807_v40 = vpop.eup %4806 }
 0xaa0   :  { %4808 = vrcp.f32 %v2632_v23  ;;  %v2633_v31 = vadd.f32 1.0, %v4807_v40  ;;  %v7095_v40 = vld [vmem:[#allocation13_spill] sm:$0xff]  ;;  %v7096_v23 = vld [vmem:[#allocation14_spill] sm:$0xff] }
 0xaa2   :  { %4810 = vrcp.f32 %v2633_v31  ;;  %v7093_v31 = vld [vmem:[#allocation15_spill] sm:$0xff] }
 0xaad   :  { %v4809_v1 = vpop.eup %4808 }
 0xaae   :  { %v2639_v48 = vmul.f32 %v4809_v1, %v2638_v49  ;;  %v7097_v1 = vld [vmem:[#allocation26_spill] sm:$0xff] }
 0xaaf   :  { %v4811_v27 = vpop.eup %4810  ;;  %v7100_v49 = vld [vmem:[#allocation30_spill] sm:$0xff] }
 0xab0   :  { %v2640_v12 = vadd.f32 %v2639_v48, %v2200_v46  ;;  %v2642_v43 = vsub.f32 1.0, %v4811_v27  ;;  %v2644_v16 = vmul.f32 %v4811_v27, %v6319_v33  ;;  %v7094_v33 = vld [vmem:[#allocation16_spill] sm:$0xff]  ;;  %v2094_v15 = vadd.f32 %v7100_v49, %v7099_v45 }
 0xab2   :  { %4812 = vtanh.f32 %v2640_v12 }
 0xabf   :  { %v4813_v2 = vpop.eup %4812 }
 0xac0   :  { %v2643_v18 = vmul.f32 %v4813_v2, %v2642_v43 }
 0xac2   :  { %v6398_v58 = vadd.f32 %v2644_v16, %v2643_v18  ;;  %v7101_v18 = vld [vmem:[#allocation32_spill] sm:$0xff] }
 0xac3   :  { %v2096_v16 = vadd.f32 %v7101_v18, %v7090_v63 }
 0xac4   :  { %2714 = vmatmul.mubr.f32.vlgmr.msra.gmra.mxu1 %v6398_v58  ;;  %4531 = vmatmul.mubr.f32.vlgmr.msra.gmra.mxu0 %v6398_v58 }
 0xac5   :  { %2816 = vmatpush1.msra.mxu1 %v6018_v47  ;;  %4534 = vmatpush3.msra.mxu0 %v6109_v41 }
 0xac6   :  { %2817 = vmatprep.subr.mxu1 %v6021_v50  ;;  %4535 = vmatprep.subr.mxu0 %v6993_v6 }
 0xac7   :  { %2818 = vmatpush1.msra.mxu1 %v6024_v57  ;;  %4536 = vmatpush3.msra.mxu0 %v6113_v7 }
 0xac8   :  { %2819 = vmatprep.subr.mxu1 %v6027_v39  ;;  %4537 = vmatprep.subr.mxu0 %v6993_v6 }
 0xac9   :  { %2820 = vmatpush1.msra.mxu1 %v6030_v60  ;;  %4538 = vmatpush3.msra.mxu0 %v6117_v32 }
 0xaca   :  { %2821 = vmatprep.subr.mxu1 %v6033_v51  ;;  %4539 = vmatprep.subr.mxu0 %v6993_v6 }
 0xacb   :  { %2822 = vmatpush1.msra.mxu1 %v6036_v20  ;;  %4540 = vmatpush3.msra.mxu0 %v6122_v34 }
 0xacc   :  { %2823 = vmatprep.subr.mxu1 %v6039_v52  ;;  %4541 = vmatprep.subr.mxu0 %v6993_v6 }
 0xacd   :  { %2824 = vmatpush1.msra.mxu1 %v6042_v3  ;;  %4542 = vmatpush3.msra.mxu0 %v6126_v35 }
 0xace   :  { %2825 = vmatprep.subr.mxu1 %v6045_v53  ;;  %4543 = vmatprep.subr.mxu0 %v6993_v6 }
 0xacf   :  { %2826 = vmatpush1.msra.mxu1 %v6048_v54  ;;  %4544 = vmatpush3.msra.mxu0 %v6130_v36 }
 0xad0   :  { %2827 = vmatprep.subr.mxu1 %v6051_v10  ;;  %4545 = vmatprep.subr.mxu0 %v6993_v6 }
 0xad1   :  { %2828 = vmatpush1.msra.mxu1 %v6054_v55  ;;  %4546 = vmatpush3.msra.mxu0 %v6134_v37 }
 0xad2   :  { %2829 = vmatprep.subr.mxu1 %v6057_v11  ;;  %4547 = vmatprep.subr.mxu0 %v6993_v6 }
 0xad3   :  { %2830 = vmatpush1.msra.mxu1 %v6060_v56  ;;  %4548 = vmatpush3.msra.mxu0 %v6138_v38 }
 0xad4   :  { %2831 = vmatprep.subr.mxu1 %v6063_v13  ;;  %4549 = vmatprep.subr.mxu0 %v6993_v6 }
 0xad5   :  { %2832 = vmatpush1.msra.mxu1 %v6066_v0  ;;  %4550 = vmatpush3.msra.mxu0 %v6142_v9 }
 0xad6   :  { %2833 = vmatprep.subr.mxu1 %v6069_v14  ;;  %4551 = vmatprep.subr.mxu0 %v6993_v6 }
 0xad7   :  { %2834 = vmatpush1.msra.mxu1 %v6072_v17  ;;  %4552 = vmatpush3.msra.mxu0 %v6146_v61 }
 0xad8   :  { %2835 = vmatprep.subr.mxu1 %v6075_v19  ;;  %4553 = vmatprep.subr.mxu0 %v6993_v6 }
 0xad9   :  { %2836 = vmatpush1.msra.mxu1 %v6078_v21  ;;  %4554 = vmatpush3.msra.mxu0 %v6150_v25 }
 0xada   :  { %2837 = vmatprep.subr.mxu1 %v6081_v22  ;;  %4555 = vmatprep.subr.mxu0 %v6993_v6 }
 0xadb   :  { %2838 = vmatpush1.msra.mxu1 %v6084_v24  ;;  %4556 = vmatpush3.msra.mxu0 %v6154_v42 }
 0xadc   :  { %2839 = vmatprep.subr.mxu1 %v6087_v26  ;;  %4557 = vmatprep.subr.mxu0 %v6993_v6 }
 0xadd   :  { %2840 = vmatpush1.msra.mxu1 %v6090_v28  ;;  %4558 = vmatpush3.msra.mxu0 %v6158_v44 }
 0xade   :  { %2841 = vmatprep.subr.mxu1 %v6093_v5  ;;  %4559 = vmatprep.subr.mxu0 %v6993_v6 }
 0xadf   :  { %2842 = vmatpush1.msra.mxu1 %v6096_v29  ;;  %4560 = vmatpush3.msra.mxu0 %v6162_v8 }
 0xae0   :  { %2843 = vmatprep.subr.mxu1 %v6099_v30  ;;  %4561 = vmatprep.subr.mxu0 %v6993_v6 }
 0xae1   :  { %2844 = vmatpush1.msra.mxu1 %v7093_v31  ;;  %4562 = vmatpush3.msra.mxu0 %v7094_v33 }
 0xae2   :  { %2845 = vmatprep.subr.mxu1 %v7095_v40  ;;  %4563 = vmatprep.subr.mxu0 %v6993_v6 }
 0xae3   :  { %2846 = vmatpush1.msra.mxu1 %v7096_v23  ;;  %2879 = vmatprep.mubr.f32.mxu1 %v6993_v6 }
 0xae4   :  { %4564 = vmatpush3.msra.mxu0 %v7097_v1  ;;  %4565 = vmatprep.mubr.msk.f32.mxu0 %vm5021_vm2, %v6993_v6 }
 0xae5   :  { %2981 = vmatprep.subr.mxu1 %v7098_v4  ;;  %4568 = vmatprep.subr.mxu0 %v6993_v6 }
 0xb84   :  { %v2715_v46 = vpop.f32.mrf.mxu1  ;;  %v2786_v48 = vpop.f32.mrf.mxu0 }
 0xb85   :  { %v2790_v12 = vadd.f32 %v2715_v46, %v2094_v15  ;;  %v2804_v49 = vadd.f32 %v6311_v59, %v2786_v48  ;;  %v7102_v15 = vld [vmem:[#allocation24_spill] sm:$0xff]  ;;  %v6578_v48 = vld [vmem:[#allocation7 + $0x2b8] sm:$0xff] }
 0xb86   :  { %v4532_v27 = vpop.f32.mrf.mxu0  ;;  %v2717_v2 = vpop.f32.mrf.mxu1  ;;  %v2205_v46 = vadd.f32 %v7102_v15, %v6316_v62  ;;  %v6610_v15 = vld [vmem:[#allocation7 + $0x258] sm:$0xff] }
 0xb87   :  { %v3703_v43 = vmul.f32 -1.442695, %v2790_v12  ;;  %v2791_v1 = vadd.f32 %v2717_v2, %v2096_v16  ;;  %v6586_v16 = vld [vmem:[#allocation7 + $0x2a0] sm:$0xff] }
 0xb89   :  { %4814 = vpow2.f32 %v3703_v43  ;;  %v3704_v23 = vmul.f32 -1.442695, %v2791_v1 }
 0xb8b   :  { %4816 = vpow2.f32 %v3704_v23 }
 0xb96   :  { %v4815_v40 = vpop.eup %4814 }
 0xb97   :  { %v2798_v4 = vadd.f32 1.0, %v4815_v40 }
 0xb98   :  { %v4817_v33 = vpop.eup %4816 }
 0xb99   :  { %4818 = vrcp.f32 %v2798_v4  ;;  %v2799_v31 = vadd.f32 1.0, %v4817_v33  ;;  %v6570_v33 = vld [vmem:[#allocation7 + $0x2d0] sm:$0xff]  ;;  %v6594_v4 = vld [vmem:[#allocation7 + $0x288] sm:$0xff] }
 0xb9b   :  { %4820 = vrcp.f32 %v2799_v31  ;;  %v6566_v31 = vld [vmem:[#allocation7 + $0x2d8] sm:$0xff] }
 0xba6   :  { %v4819_v45 = vpop.eup %4818 }
 0xba7   :  { %v2805_v12 = vmul.f32 %v4819_v45, %v2804_v49  ;;  %v6574_v45 = vld [vmem:[#allocation7 + $0x2c0] sm:$0xff]  ;;  %v6602_v49 = vld [vmem:[#allocation7 + $0x270] sm:$0xff] }
 0xba8   :  { %v4821_v18 = vpop.eup %4820 }
 0xba9   :  { %v2806_v27 = vadd.f32 %v2805_v12, %v2205_v46  ;;  %v2808_v43 = vsub.f32 1.0, %v4821_v18  ;;  %v2810_v23 = vmul.f32 %v4821_v18, %v6398_v58  ;;  %v6562_v58 = vld [vmem:[#allocation7 + $0x2e8] sm:$0xff]  ;;  %v6618_v46 = vld [vmem:[#allocation7 + $0x240] sm:$0xff]  ;;  %v6624_v12 = vld [vmem:[#allocation7 + $0x230] sm:$0xff] }
 0xbaa   :  { %v6634_v18 = vld [vmem:[#allocation7 + $0x218] sm:$0xff] }
 0xbab   :  { %4822 = vtanh.f32 %v2806_v27  ;;  %v6631_v27 = vld [vmem:[#allocation7 + $0x238] sm:$0xff] }
 0xbb8   :  { %v4823_v2 = vpop.eup %4822 }
 0xbb9   :  { %v2809_v1 = vmul.f32 %v4823_v2, %v2808_v43  ;;  %v6638_v43 = vld [vmem:[#allocation7 + $0x210] sm:$0xff]  ;;  %v6641_v2 = vld [vmem:[#allocation7 + $0x220] sm:$0xff] }
 0xbbb   :  { %v6477_v40 = vadd.f32 %v2810_v23, %v2809_v1  ;;  %v6644_v1 = vld [vmem:[#allocation7 + $0x200] sm:$0xff]  ;;  %v6648_v23 = vld [vmem:[#allocation7 + $0x1f8] sm:$0xff] }
 0xbbd   :  { %2880 = vmatmul.mubr.f32.vlgmr.msra.gmra.mxu1 %v6477_v40  ;;  %4566 = vmatmul.mubr.f32.vlgmr.msra.gmra.mxu0 %v6477_v40 }
 0xbbe   :  { %2982 = vmatpush1.msra.mxu1 %v6018_v47  ;;  %4569 = vmatpush3.msra.mxu0 %v6109_v41  ;;  %v7103_v47 = vld [vmem:[#allocation15_spill] sm:$0xff] }
 0xbbf   :  { %2983 = vmatprep.subr.mxu1 %v6021_v50  ;;  %4570 = vmatprep.subr.mxu0 %v6993_v6  ;;  %v7104_v50 = vld [vmem:[#allocation16_spill] sm:$0xff] }
 0xbc0   :  { %2984 = vmatpush1.msra.mxu1 %v6024_v57  ;;  %4571 = vmatpush3.msra.mxu0 %v6113_v7  ;;  %v7105_v57 = vld [vmem:[#allocation13_spill] sm:$0xff] }
 0xbc1   :  { %2985 = vmatprep.subr.mxu1 %v6027_v39  ;;  %4572 = vmatprep.subr.mxu0 %v6993_v6  ;;  %v7106_v39 = vld [vmem:[#allocation14_spill] sm:$0xff] }
 0xbc2   :  { %2986 = vmatpush1.msra.mxu1 %v6030_v60  ;;  %4573 = vmatpush3.msra.mxu0 %v6117_v32  ;;  %v7107_v60 = vld [vmem:[#allocation26_spill] sm:$0xff] }
 0xbc3   :  { %2987 = vmatprep.subr.mxu1 %v6033_v51  ;;  %4574 = vmatprep.subr.mxu0 %v6993_v6  ;;  %v6546_v51 = vld [vmem:[#allocation7 + $0x2f0] sm:$0xff] }
 0xbc4   :  { %2988 = vmatpush1.msra.mxu1 %v6036_v20  ;;  %4575 = vmatpush3.msra.mxu0 %v6122_v34  ;;  %v7108_v20 = vld [vmem:[#allocation19_spill] sm:$0xff] }
 0xbc5   :  { %2989 = vmatprep.subr.mxu1 %v6039_v52  ;;  %4576 = vmatprep.subr.mxu0 %v6993_v6  ;;  %v7109_v52 = vld [vmem:[#allocation27_spill] sm:$0xff] }
 0xbc6   :  { %2990 = vmatpush1.msra.mxu1 %v6042_v3  ;;  %4577 = vmatpush3.msra.mxu0 %v6126_v35  ;;  %v2100_v3 = vadd.f32 %v7109_v52, %v7108_v20  ;;  %v6671_v52 = vld [vmem:[#allocation7 + $0x1d8] sm:$0xff] }
 0xbc7   :  { %2991 = vmatprep.subr.mxu1 %v6045_v53  ;;  %4578 = vmatprep.subr.mxu0 %v6993_v6 }
 0xbc8   :  { %2992 = vmatpush1.msra.mxu1 %v6048_v54  ;;  %4579 = vmatpush3.msra.mxu0 %v6130_v36 }
 0xbc9   :  { %2993 = vmatprep.subr.mxu1 %v6051_v10  ;;  %4580 = vmatprep.subr.mxu0 %v6993_v6 }
 0xbca   :  { %2994 = vmatpush1.msra.mxu1 %v6054_v55  ;;  %4581 = vmatpush3.msra.mxu0 %v6134_v37 }
 0xbcb   :  { %2995 = vmatprep.subr.mxu1 %v6057_v11  ;;  %4582 = vmatprep.subr.mxu0 %v6993_v6 }
 0xbcc   :  { %2996 = vmatpush1.msra.mxu1 %v6060_v56  ;;  %4583 = vmatpush3.msra.mxu0 %v6138_v38 }
 0xbcd   :  { %2997 = vmatprep.subr.mxu1 %v6063_v13  ;;  %4584 = vmatprep.subr.mxu0 %v6993_v6  ;;  %v7110_v13 = vld [vmem:[#allocation33_spill] sm:$0xff] }
 0xbce   :  { %2998 = vmatpush1.msra.mxu1 %v6066_v0  ;;  %4585 = vmatpush3.msra.mxu0 %v6142_v9  ;;  %v2102_v0 = vadd.f32 %v7110_v13, %v7090_v63  ;;  %v6698_v13 = vld [vmem:[#allocation7 + $0x180] sm:$0xff] }
 0xbcf   :  { %2999 = vmatprep.subr.mxu1 %v6069_v14  ;;  %4586 = vmatprep.subr.mxu0 %v6993_v6  ;;  %7115 = vst [vmem:[#allocation34_spill] sm:$0xff] %v6698_v13 }
 0xbd0   :  { %3000 = vmatpush1.msra.mxu1 %v6072_v17  ;;  %4587 = vmatpush3.msra.mxu0 %v6146_v61 }
 0xbd1   :  { %3001 = vmatprep.subr.mxu1 %v6075_v19  ;;  %4588 = vmatprep.subr.mxu0 %v6993_v6 }
 0xbd2   :  { %3002 = vmatpush1.msra.mxu1 %v6078_v21  ;;  %4589 = vmatpush3.msra.mxu0 %v6150_v25 }
 0xbd3   :  { %3003 = vmatprep.subr.mxu1 %v6081_v22  ;;  %4590 = vmatprep.subr.mxu0 %v6993_v6 }
 0xbd4   :  { %3004 = vmatpush1.msra.mxu1 %v6084_v24  ;;  %4591 = vmatpush3.msra.mxu0 %v6154_v42 }
 0xbd5   :  { %3005 = vmatprep.subr.mxu1 %v6087_v26  ;;  %4592 = vmatprep.subr.mxu0 %v6993_v6 }
 0xbd6   :  { %3006 = vmatpush1.msra.mxu1 %v6090_v28  ;;  %4593 = vmatpush3.msra.mxu0 %v6158_v44 }
 0xbd7   :  { %3007 = vmatprep.subr.mxu1 %v6093_v5  ;;  %4594 = vmatprep.subr.mxu0 %v6993_v6  ;;  %v7111_v5 = vld [vmem:[#allocation18_spill] sm:$0xff] }
 0xbd8   :  { %3008 = vmatpush1.msra.mxu1 %v6096_v29  ;;  %4595 = vmatpush3.msra.mxu0 %v6162_v8  ;;  %v2210_v29 = vadd.f32 %v7111_v5, %v6316_v62  ;;  %v7118_v5 = vld [vmem:[#allocation23_spill] sm:$0xff] }
 0xbd9   :  { %3009 = vmatprep.subr.mxu1 %v6099_v30  ;;  %4596 = vmatprep.subr.mxu0 %v6993_v6 }
 0xbda   :  { %3010 = vmatpush1.msra.mxu1 %v7103_v47  ;;  %4597 = vmatpush3.msra.mxu0 %v7104_v50  ;;  %v6654_v47 = vld [vmem:[#allocation7 + $0x1e8] sm:$0xff]  ;;  %v6658_v50 = vld [vmem:[#allocation7 + $0x1e0] sm:$0xff] }
 0xbdb   :  { %3011 = vmatprep.subr.mxu1 %v7105_v57  ;;  %4598 = vmatprep.subr.mxu0 %v6993_v6  ;;  %v6661_v57 = vld [vmem:[#allocation7 + $0x1f0] sm:$0xff] }
 0xbdc   :  { %3012 = vmatpush1.msra.mxu1 %v7106_v39  ;;  %3045 = vmatprep.mubr.f32.mxu1 %v6993_v6  ;;  %v6664_v39 = vld [vmem:[#allocation7 + $0x1d0] sm:$0xff] }
 0xbdd   :  { %4599 = vmatpush3.msra.mxu0 %v7107_v60  ;;  %4600 = vmatprep.mubr.msk.f32.mxu0 %vm5021_vm2, %v6993_v6  ;;  %v6668_v60 = vld [vmem:[#allocation7 + $0x1c8] sm:$0xff] }
 0xbde   :  { %3147 = vmatprep.subr.mxu1 %v6546_v51  ;;  %4603 = vmatprep.subr.mxu0 %v6993_v6 }
 0xc7d   :  { %v2881_v53 = vpop.f32.mrf.mxu1  ;;  %v2952_v54 = vpop.f32.mrf.mxu0 }
 0xc7e   :  { %v2956_v10 = vadd.f32 %v2881_v53, %v2100_v3  ;;  %v2970_v26 = vadd.f32 %v6311_v59, %v2952_v54  ;;  %v6674_v3 = vld [vmem:[#allocation7 + $0x1b8] sm:$0xff]  ;;  %v6678_v53 = vld [vmem:[#allocation7 + $0x1b0] sm:$0xff]  ;;  %v6681_v54 = vld [vmem:[#allocation7 + $0x1c0] sm:$0xff] }
 0xc7f   :  { %v4567_v55 = vpop.f32.mrf.mxu0  ;;  %v2883_v56 = vpop.f32.mrf.mxu1 }
 0xc80   :  { %v3705_v11 = vmul.f32 -1.442695, %v2956_v10  ;;  %v2957_v14 = vadd.f32 %v2883_v56, %v2102_v0  ;;  %v6684_v10 = vld [vmem:[#allocation7 + $0x1a0] sm:$0xff]  ;;  %v6688_v55 = vld [vmem:[#allocation7 + $0x198] sm:$0xff]  ;;  %v6694_v56 = vld [vmem:[#allocation7 + $0x188] sm:$0xff] }
 0xc81   :  { %7112 = vst [vmem:[#allocation28_spill] sm:$0xff] %v6688_v55  ;;  %7114 = vst [vmem:[#allocation20_spill] sm:$0xff] %v6694_v56  ;;  %v6702_v0 = vld [vmem:[#allocation7 + $0x190] sm:$0xff] }
 0xc82   :  { %4824 = vpow2.f32 %v3705_v11  ;;  %v3706_v17 = vmul.f32 -1.442695, %v2957_v14  ;;  %v6691_v11 = vld [vmem:[#allocation7 + $0x1a8] sm:$0xff]  ;;  %7116 = vst [vmem:[#allocation22_spill] sm:$0xff] %v6702_v0  ;;  %v7117_v14 = vld [vmem:[#allocation25_spill] sm:$0xff] }
 0xc83   :  { %7113 = vst [vmem:[#allocation17_spill] sm:$0xff] %v6691_v11 }
 0xc84   :  { %4826 = vpow2.f32 %v3706_v17  ;;  %v2106_v17 = vadd.f32 %v7117_v14, %v7108_v20 }
 0xc8f   :  { %v4825_v19 = vpop.eup %4824 }
 0xc90   :  { %v2964_v21 = vadd.f32 1.0, %v4825_v19 }
 0xc91   :  { %v4827_v22 = vpop.eup %4826 }
 0xc92   :  { %4828 = vrcp.f32 %v2964_v21  ;;  %v2965_v24 = vadd.f32 1.0, %v4827_v22 }
 0xc94   :  { %4830 = vrcp.f32 %v2965_v24 }
 0xc9f   :  { %v4829_v28 = vpop.eup %4828 }
 0xca0   :  { %v2971_v30 = vmul.f32 %v4829_v28, %v2970_v26 }
 0xca1   :  { %v4831_v9 = vpop.eup %4830 }
 0xca2   :  { %v2972_v38 = vadd.f32 %v2971_v30, %v2210_v29  ;;  %v2974_v61 = vsub.f32 1.0, %v4831_v9  ;;  %v2976_v44 = vmul.f32 %v4831_v9, %v6477_v40  ;;  %v6651_v40 = vld [vmem:[#allocation7 + $0x208] sm:$0xff]  ;;  %v2108_v29 = vadd.f32 %v7118_v5, %v7090_v63 }
 0xca4   :  { %4832 = vtanh.f32 %v2972_v38 }
 0xcb1   :  { %v4833_v25 = vpop.eup %4832 }
 0xcb2   :  { %v2975_v42 = vmul.f32 %v4833_v25, %v2974_v61 }
 0xcb4   :  { %v6558_v8 = vadd.f32 %v2976_v44, %v2975_v42 }
 0xcb6   :  { %3046 = vmatmul.mubr.f32.vlgmr.msra.gmra.mxu1 %v6558_v8  ;;  %4601 = vmatmul.mubr.f32.vlgmr.msra.gmra.mxu0 %v6558_v8 }
 0xcb7   :  { %3148 = vmatpush1.msra.mxu1 %v6562_v58  ;;  %4604 = vmatpush3.msra.mxu0 %v6109_v41  ;;  %v6582_v41 = vld [vmem:[#allocation7 + $0x2a8] sm:$0xff] }
 0xcb8   :  { %3149 = vmatprep.subr.mxu1 %v6566_v31  ;;  %4605 = vmatprep.subr.mxu0 %v6993_v6 }
 0xcb9   :  { %3150 = vmatpush1.msra.mxu1 %v6570_v33  ;;  %4606 = vmatpush3.msra.mxu0 %v6113_v7  ;;  %v6590_v7 = vld [vmem:[#allocation7 + $0x290] sm:$0xff] }
 0xcba   :  { %3151 = vmatprep.subr.mxu1 %v6574_v45  ;;  %4607 = vmatprep.subr.mxu0 %v6993_v6 }
 0xcbb   :  { %3152 = vmatpush1.msra.mxu1 %v6578_v48  ;;  %4608 = vmatpush3.msra.mxu0 %v6117_v32  ;;  %v6598_v32 = vld [vmem:[#allocation7 + $0x278] sm:$0xff] }
 0xcbc   :  { %3153 = vmatprep.subr.mxu1 %v6582_v41  ;;  %4609 = vmatprep.subr.mxu0 %v6993_v6 }
 0xcbd   :  { %3154 = vmatpush1.msra.mxu1 %v6586_v16  ;;  %4610 = vmatpush3.msra.mxu0 %v6122_v34  ;;  %v6606_v34 = vld [vmem:[#allocation7 + $0x260] sm:$0xff] }
 0xcbe   :  { %3155 = vmatprep.subr.mxu1 %v6590_v7  ;;  %4611 = vmatprep.subr.mxu0 %v6993_v6 }
 0xcbf   :  { %3156 = vmatpush1.msra.mxu1 %v6594_v4  ;;  %4612 = vmatpush3.msra.mxu0 %v6126_v35  ;;  %v6614_v35 = vld [vmem:[#allocation7 + $0x248] sm:$0xff] }
 0xcc0   :  { %3157 = vmatprep.subr.mxu1 %v6598_v32  ;;  %4613 = vmatprep.subr.mxu0 %v6993_v6 }
 0xcc1   :  { %3158 = vmatpush1.msra.mxu1 %v6602_v49  ;;  %4614 = vmatpush3.msra.mxu0 %v6130_v36  ;;  %v6621_v36 = vld [vmem:[#allocation7 + $0x250] sm:$0xff] }
 0xcc2   :  { %3159 = vmatprep.subr.mxu1 %v6606_v34  ;;  %4615 = vmatprep.subr.mxu0 %v6993_v6 }
 0xcc3   :  { %3160 = vmatpush1.msra.mxu1 %v6610_v15  ;;  %4616 = vmatpush3.msra.mxu0 %v6134_v37  ;;  %v6628_v37 = vld [vmem:[#allocation7 + $0x228] sm:$0xff] }
 0xcc4   :  { %3161 = vmatprep.subr.mxu1 %v6614_v35  ;;  %4617 = vmatprep.subr.mxu0 %v6993_v6 }
 0xcc5   :  { %3162 = vmatpush1.msra.mxu1 %v6618_v46  ;;  %4618 = vmatpush3.msra.mxu0 %v6621_v36 }
 0xcc6   :  { %3163 = vmatprep.subr.mxu1 %v6624_v12  ;;  %4619 = vmatprep.subr.mxu0 %v6993_v6 }
 0xcc7   :  { %3164 = vmatpush1.msra.mxu1 %v6628_v37  ;;  %4620 = vmatpush3.msra.mxu0 %v6631_v27 }
 0xcc8   :  { %3165 = vmatprep.subr.mxu1 %v6634_v18  ;;  %4621 = vmatprep.subr.mxu0 %v6993_v6 }
 0xcc9   :  { %3166 = vmatpush1.msra.mxu1 %v6638_v43  ;;  %4622 = vmatpush3.msra.mxu0 %v6641_v2 }
 0xcca   :  { %3167 = vmatprep.subr.mxu1 %v6644_v1  ;;  %4623 = vmatprep.subr.mxu0 %v6993_v6 }
 0xccb   :  { %3168 = vmatpush1.msra.mxu1 %v6648_v23  ;;  %4624 = vmatpush3.msra.mxu0 %v6651_v40 }
 0xccc   :  { %3169 = vmatprep.subr.mxu1 %v6654_v47  ;;  %4625 = vmatprep.subr.mxu0 %v6993_v6 }
 0xccd   :  { %3170 = vmatpush1.msra.mxu1 %v6658_v50  ;;  %4626 = vmatpush3.msra.mxu0 %v6661_v57 }
 0xcce   :  { %3171 = vmatprep.subr.mxu1 %v6664_v39  ;;  %4627 = vmatprep.subr.mxu0 %v6993_v6 }
 0xccf   :  { %3172 = vmatpush1.msra.mxu1 %v6668_v60  ;;  %4628 = vmatpush3.msra.mxu0 %v6671_v52 }
 0xcd0   :  { %3173 = vmatprep.subr.mxu1 %v6674_v3  ;;  %4629 = vmatprep.subr.mxu0 %v6993_v6 }
 0xcd1   :  { %3174 = vmatpush1.msra.mxu1 %v6678_v53  ;;  %4630 = vmatpush3.msra.mxu0 %v6681_v54 }
 0xcd2   :  { %3175 = vmatprep.subr.mxu1 %v6684_v10  ;;  %4631 = vmatprep.subr.mxu0 %v6993_v6 }
 0xcd3   :  { %3176 = vmatpush1.msra.mxu1 %v6688_v55  ;;  %4632 = vmatpush3.msra.mxu0 %v6691_v11 }
 0xcd4   :  { %3177 = vmatprep.subr.mxu1 %v6694_v56  ;;  %4633 = vmatprep.subr.mxu0 %v6993_v6 }
 0xcd5   :  { %3178 = vmatpush1.msra.mxu1 %v6698_v13  ;;  %3211 = vmatprep.mubr.f32.mxu1 %v6993_v6 }
 0xcd6   :  { %4634 = vmatpush3.msra.mxu0 %v6702_v0  ;;  %4635 = vmatprep.mubr.msk.f32.mxu0 %vm5021_vm2, %v6993_v6 }
 0xcd7   :  { %3313 = vmatprep.subr.mxu1 %v6546_v51  ;;  %4638 = vmatprep.subr.mxu0 %v6993_v6 }
 0xd76   :  { %v3047_v19 = vpop.f32.mrf.mxu1  ;;  %v3118_v21 = vpop.f32.mrf.mxu0 }
 0xd77   :  { %v3122_v22 = vadd.f32 %v3047_v19, %v2106_v17  ;;  %v3136_v44 = vadd.f32 %v6311_v59, %v3118_v21  ;;  %v7119_v17 = vld [vmem:[#allocation39_spill] sm:$0xff]  ;;  %v6722_v21 = vld [vmem:[#allocation7 + $0x2f8] sm:$0xff] }
 0xd78   :  { %v4602_v24 = vpop.f32.mrf.mxu0  ;;  %v3049_v28 = vpop.f32.mrf.mxu1  ;;  %v2215_v19 = vadd.f32 %v7119_v17, %v6316_v62 }
 0xd79   :  { %v3707_v26 = vmul.f32 -1.442695, %v3122_v22  ;;  %v3123_v30 = vadd.f32 %v3049_v28, %v2108_v29 }
 0xd7b   :  { %4834 = vpow2.f32 %v3707_v26  ;;  %v3708_v38 = vmul.f32 -1.442695, %v3123_v30 }
 0xd7d   :  { %4836 = vpow2.f32 %v3708_v38 }
 0xd88   :  { %v4835_v9 = vpop.eup %4834 }
 0xd89   :  { %v3130_v61 = vadd.f32 1.0, %v4835_v9  ;;  %v6728_v9 = vld [vmem:[#allocation7 + $0x2e0] sm:$0xff] }
 0xd8a   :  { %v4837_v25 = vpop.eup %4836 }
 0xd8b   :  { %4838 = vrcp.f32 %v3130_v61  ;;  %v3131_v42 = vadd.f32 1.0, %v4837_v25  ;;  %v6740_v61 = vld [vmem:[#allocation7 + $0x2b0] sm:$0xff]  ;;  %v6746_v25 = vld [vmem:[#allocation7 + $0x298] sm:$0xff] }
 0xd8d   :  { %4840 = vrcp.f32 %v3131_v42  ;;  %v6752_v42 = vld [vmem:[#allocation7 + $0x280] sm:$0xff] }
 0xd98   :  { %v4839_v14 = vpop.eup %4838 }
 0xd99   :  { %v3137_v22 = vmul.f32 %v4839_v14, %v3136_v44  ;;  %v6758_v44 = vld [vmem:[#allocation7 + $0x268] sm:$0xff]  ;;  %v7120_v14 = vld [vmem:[#allocation11_spill] sm:$0xff] }
 0xd9a   :  { %v4841_v5 = vpop.eup %4840  ;;  %v2112_v17 = vadd.f32 %v7120_v14, %v7108_v20 }
 0xd9b   :  { %v3138_v24 = vadd.f32 %v3137_v22, %v2215_v19  ;;  %v3140_v26 = vsub.f32 1.0, %v4841_v5  ;;  %v3142_v30 = vmul.f32 %v4841_v5, %v6558_v8  ;;  %v6734_v8 = vld [vmem:[#allocation7 + $0x2c8] sm:$0xff] }
 0xd9d   :  { %4842 = vtanh.f32 %v3138_v24 }
 0xdaa   :  { %v4843_v28 = vpop.eup %4842 }
 0xdab   :  { %v3141_v29 = vmul.f32 %v4843_v28, %v3140_v26 }
 0xdad   :  { %v6717_v38 = vadd.f32 %v3142_v30, %v3141_v29  ;;  %v7121_v29 = vld [vmem:[#allocation35_spill] sm:$0xff] }
 0xdae   :  { %v2114_v30 = vadd.f32 %v7121_v29, %v7090_v63 }
 0xdaf   :  { %3212 = vmatmul.mubr.f32.vlgmr.msra.gmra.mxu1 %v6717_v38  ;;  %4636 = vmatmul.mubr.f32.vlgmr.msra.gmra.mxu0 %v6717_v38 }
 0xdb0   :  { %3314 = vmatpush1.msra.mxu1 %v6562_v58  ;;  %4639 = vmatpush3.msra.mxu0 %v6722_v21 }
 0xdb1   :  { %3315 = vmatprep.subr.mxu1 %v6566_v31  ;;  %4640 = vmatprep.subr.mxu0 %v6993_v6 }
 0xdb2   :  { %3316 = vmatpush1.msra.mxu1 %v6570_v33  ;;  %4641 = vmatpush3.msra.mxu0 %v6728_v9 }
 0xdb3   :  { %3317 = vmatprep.subr.mxu1 %v6574_v45  ;;  %4642 = vmatprep.subr.mxu0 %v6993_v6 }
 0xdb4   :  { %3318 = vmatpush1.msra.mxu1 %v6578_v48  ;;  %4643 = vmatpush3.msra.mxu0 %v6734_v8 }
 0xdb5   :  { %3319 = vmatprep.subr.mxu1 %v6582_v41  ;;  %4644 = vmatprep.subr.mxu0 %v6993_v6 }
 0xdb6   :  { %3320 = vmatpush1.msra.mxu1 %v6586_v16  ;;  %4645 = vmatpush3.msra.mxu0 %v6740_v61 }
 0xdb7   :  { %3321 = vmatprep.subr.mxu1 %v6590_v7  ;;  %4646 = vmatprep.subr.mxu0 %v6993_v6 }
 0xdb8   :  { %3322 = vmatpush1.msra.mxu1 %v6594_v4  ;;  %4647 = vmatpush3.msra.mxu0 %v6746_v25 }
 0xdb9   :  { %3323 = vmatprep.subr.mxu1 %v6598_v32  ;;  %4648 = vmatprep.subr.mxu0 %v6993_v6 }
 0xdba   :  { %3324 = vmatpush1.msra.mxu1 %v6602_v49  ;;  %4649 = vmatpush3.msra.mxu0 %v6752_v42 }
 0xdbb   :  { %3325 = vmatprep.subr.mxu1 %v6606_v34  ;;  %4650 = vmatprep.subr.mxu0 %v6993_v6 }
 0xdbc   :  { %3326 = vmatpush1.msra.mxu1 %v6610_v15  ;;  %4651 = vmatpush3.msra.mxu0 %v6758_v44 }
 0xdbd   :  { %3327 = vmatprep.subr.mxu1 %v6614_v35  ;;  %4652 = vmatprep.subr.mxu0 %v6993_v6 }
 0xdbe   :  { %3328 = vmatpush1.msra.mxu1 %v6618_v46  ;;  %4653 = vmatpush3.msra.mxu0 %v6621_v36 }
 0xdbf   :  { %3329 = vmatprep.subr.mxu1 %v6624_v12  ;;  %4654 = vmatprep.subr.mxu0 %v6993_v6 }
 0xdc0   :  { %3330 = vmatpush1.msra.mxu1 %v6628_v37  ;;  %4655 = vmatpush3.msra.mxu0 %v6631_v27 }
 0xdc1   :  { %3331 = vmatprep.subr.mxu1 %v6634_v18  ;;  %4656 = vmatprep.subr.mxu0 %v6993_v6 }
 0xdc2   :  { %3332 = vmatpush1.msra.mxu1 %v6638_v43  ;;  %4657 = vmatpush3.msra.mxu0 %v6641_v2 }
 0xdc3   :  { %3333 = vmatprep.subr.mxu1 %v6644_v1  ;;  %4658 = vmatprep.subr.mxu0 %v6993_v6 }
 0xdc4   :  { %3334 = vmatpush1.msra.mxu1 %v6648_v23  ;;  %4659 = vmatpush3.msra.mxu0 %v6651_v40 }
 0xdc5   :  { %3335 = vmatprep.subr.mxu1 %v6654_v47  ;;  %4660 = vmatprep.subr.mxu0 %v6993_v6 }
 0xdc6   :  { %3336 = vmatpush1.msra.mxu1 %v6658_v50  ;;  %4661 = vmatpush3.msra.mxu0 %v6661_v57 }
 0xdc7   :  { %3337 = vmatprep.subr.mxu1 %v6664_v39  ;;  %4662 = vmatprep.subr.mxu0 %v6993_v6 }
 0xdc8   :  { %3338 = vmatpush1.msra.mxu1 %v6668_v60  ;;  %4663 = vmatpush3.msra.mxu0 %v6671_v52 }
 0xdc9   :  { %3339 = vmatprep.subr.mxu1 %v6674_v3  ;;  %4664 = vmatprep.subr.mxu0 %v6993_v6 }
 0xdca   :  { %3340 = vmatpush1.msra.mxu1 %v6678_v53  ;;  %4665 = vmatpush3.msra.mxu0 %v6681_v54 }
 0xdcb   :  { %3341 = vmatprep.subr.mxu1 %v6684_v10  ;;  %4666 = vmatprep.subr.mxu0 %v6993_v6 }
 0xdcc   :  { %3342 = vmatpush1.msra.mxu1 %v6688_v55  ;;  %4667 = vmatpush3.msra.mxu0 %v6691_v11 }
 0xdcd   :  { %3343 = vmatprep.subr.mxu1 %v6694_v56  ;;  %4668 = vmatprep.subr.mxu0 %v6993_v6 }
 0xdce   :  { %3344 = vmatpush1.msra.mxu1 %v6698_v13  ;;  %3377 = vmatprep.mubr.f32.mxu1 %v6993_v6 }
 0xdcf   :  { %4669 = vmatpush3.msra.mxu0 %v6702_v0  ;;  %4670 = vmatprep.mubr.msk.f32.mxu0 %vm5021_vm2, %v6993_v6 }
 0xdd0   :  { %3479 = vmatprep.subr.mxu1 %v6546_v51  ;;  %4673 = vmatprep.subr.mxu0 %v6993_v6 }
 0xe6f   :  { %v3213_v19 = vpop.f32.mrf.mxu1  ;;  %v3284_v22 = vpop.f32.mrf.mxu0 }
 0xe70   :  { %v3288_v24 = vadd.f32 %v3213_v19, %v2112_v17  ;;  %v3302_v14 = vadd.f32 %v6311_v59, %v3284_v22  ;;  %v7122_v17 = vld [vmem:[#allocation36_spill] sm:$0xff] }
 0xe71   :  { %v4637_v5 = vpop.f32.mrf.mxu0  ;;  %v3215_v28 = vpop.f32.mrf.mxu1  ;;  %v2220_v19 = vadd.f32 %v7122_v17, %v6316_v62  ;;  %v7123_v59 = vld [vmem:[#allocation28_spill] sm:$0xff] }
 0xe72   :  { %v3709_v26 = vmul.f32 -1.442695, %v3288_v24  ;;  %v3289_v0 = vadd.f32 %v3215_v28, %v2114_v30 }
 0xe74   :  { %4844 = vpow2.f32 %v3709_v26  ;;  %v3710_v13 = vmul.f32 -1.442695, %v3289_v0 }
 0xe76   :  { %4846 = vpow2.f32 %v3710_v13 }
 0xe81   :  { %v4845_v56 = vpop.eup %4844 }
 0xe82   :  { %v3296_v51 = vadd.f32 1.0, %v4845_v56 }
 0xe83   :  { %v4847_v11 = vpop.eup %4846 }
 0xe84   :  { %4848 = vrcp.f32 %v3296_v51  ;;  %v3297_v55 = vadd.f32 1.0, %v4847_v11 }
 0xe86   :  { %4850 = vrcp.f32 %v3297_v55 }
 0xe91   :  { %v4849_v20 = vpop.eup %4848 }
 0xe92   :  { %v3303_v24 = vmul.f32 %v4849_v20, %v3302_v14  ;;  %v7124_v20 = vld [vmem:[#allocation17_spill] sm:$0xff] }
 0xe93   :  { %v4851_v29 = vpop.eup %4850 }
 0xe94   :  { %v3304_v5 = vadd.f32 %v3303_v24, %v2220_v19  ;;  %v3306_v26 = vsub.f32 1.0, %v4851_v29  ;;  %v3308_v13 = vmul.f32 %v4851_v29, %v6717_v38  ;;  %v7134_v19 = vld [vmem:[#allocation37_spill] sm:$0xff] }
 0xe95   :  { %v2230_v24 = vadd.f32 %v7134_v19, %v6316_v62 }
 0xe96   :  { %4852 = vtanh.f32 %v3304_v5 }
 0xea3   :  { %v4853_v28 = vpop.eup %4852 }
 0xea4   :  { %v3307_v0 = vmul.f32 %v4853_v28, %v3306_v26 }
 0xea6   :  { %v6810_v56 = vadd.f32 %v3308_v13, %v3307_v0 }
 0xea8   :  { %3378 = vmatmul.mubr.f32.vlgmr.msra.gmra.mxu1 %v6810_v56  ;;  %4671 = vmatmul.mubr.f32.vlgmr.msra.gmra.mxu0 %v6810_v56 }
 0xea9   :  { %3480 = vmatpush1.msra.mxu1 %v6562_v58  ;;  %4674 = vmatpush3.msra.mxu0 %v6722_v21  ;;  %v7125_v58 = vld [vmem:[#allocation20_spill] sm:$0xff] }
 0xeaa   :  { %3481 = vmatprep.subr.mxu1 %v6566_v31  ;;  %4675 = vmatprep.subr.mxu0 %v6993_v6  ;;  %v7126_v31 = vld [vmem:[#allocation34_spill] sm:$0xff] }
 0xeab   :  { %3482 = vmatpush1.msra.mxu1 %v6570_v33  ;;  %4676 = vmatpush3.msra.mxu0 %v6728_v9  ;;  %v7127_v33 = vld [vmem:[#allocation22_spill] sm:$0xff] }
 0xeac   :  { %3483 = vmatprep.subr.mxu1 %v6574_v45  ;;  %4677 = vmatprep.subr.mxu0 %v6993_v6  ;;  %v7128_v45 = vld [vmem:[#allocation19_spill] sm:$0xff] }
 0xead   :  { %3484 = vmatpush1.msra.mxu1 %v6578_v48  ;;  %4678 = vmatpush3.msra.mxu0 %v6734_v8  ;;  %v7129_v48 = vld [vmem:[#allocation31_spill] sm:$0xff]  ;;  %v7133_v8 = vld [vmem:[#allocation38_spill] sm:$0xff] }
 0xeae   :  { %3485 = vmatprep.subr.mxu1 %v6582_v41  ;;  %4679 = vmatprep.subr.mxu0 %v6993_v6  ;;  %v2118_v41 = vadd.f32 %v7129_v48, %v7128_v45 }
 0xeaf   :  { %3486 = vmatpush1.msra.mxu1 %v6586_v16  ;;  %4680 = vmatpush3.msra.mxu0 %v6740_v61  ;;  %v2126_v61 = vadd.f32 %v7133_v8, %v7090_v63 }
 0xeb0   :  { %3487 = vmatprep.subr.mxu1 %v6590_v7  ;;  %4681 = vmatprep.subr.mxu0 %v6993_v6 }
 0xeb1   :  { %3488 = vmatpush1.msra.mxu1 %v6594_v4  ;;  %4682 = vmatpush3.msra.mxu0 %v6746_v25 }
 0xeb2   :  { %3489 = vmatprep.subr.mxu1 %v6598_v32  ;;  %4683 = vmatprep.subr.mxu0 %v6993_v6 }
 0xeb3   :  { %3490 = vmatpush1.msra.mxu1 %v6602_v49  ;;  %4684 = vmatpush3.msra.mxu0 %v6752_v42 }
 0xeb4   :  { %3491 = vmatprep.subr.mxu1 %v6606_v34  ;;  %4685 = vmatprep.subr.mxu0 %v6993_v6 }
 0xeb5   :  { %3492 = vmatpush1.msra.mxu1 %v6610_v15  ;;  %4686 = vmatpush3.msra.mxu0 %v6758_v44  ;;  %v7130_v15 = vld [vmem:[#allocation12_spill] sm:$0xff] }
 0xeb6   :  { %3493 = vmatprep.subr.mxu1 %v6614_v35  ;;  %4687 = vmatprep.subr.mxu0 %v6993_v6  ;;  %v2120_v35 = vadd.f32 %v7130_v15, %v7090_v63 }
 0xeb7   :  { %3494 = vmatpush1.msra.mxu1 %v6618_v46  ;;  %4688 = vmatpush3.msra.mxu0 %v6621_v36 }
 0xeb8   :  { %3495 = vmatprep.subr.mxu1 %v6624_v12  ;;  %4689 = vmatprep.subr.mxu0 %v6993_v6 }
 0xeb9   :  { %3496 = vmatpush1.msra.mxu1 %v6628_v37  ;;  %4690 = vmatpush3.msra.mxu0 %v6631_v27 }
 0xeba   :  { %3497 = vmatprep.subr.mxu1 %v6634_v18  ;;  %4691 = vmatprep.subr.mxu0 %v6993_v6  ;;  %v4971_v18 = vld [vmem:[%s6907_s6 + $0x1] ss:$0 sm:$0xff] }
 0xebb   :  { %3498 = vmatpush1.msra.mxu1 %v6638_v43  ;;  %4692 = vmatpush3.msra.mxu0 %v6641_v2 }
 0xebc   :  { %3499 = vmatprep.subr.mxu1 %v6644_v1  ;;  %4693 = vmatprep.subr.mxu0 %v6993_v6  ;;  %v7131_v1 = vld [vmem:[#allocation29_spill] sm:$0xff] }
 0xebd   :  { %3500 = vmatpush1.msra.mxu1 %v6648_v23  ;;  %4694 = vmatpush3.msra.mxu0 %v6651_v40  ;;  %v2225_v23 = vadd.f32 %v7131_v1, %v6316_v62 }
 0xebe   :  { %3501 = vmatprep.subr.mxu1 %v6654_v47  ;;  %4695 = vmatprep.subr.mxu0 %v6993_v6 }
 0xebf   :  { %3502 = vmatpush1.msra.mxu1 %v6658_v50  ;;  %4696 = vmatpush3.msra.mxu0 %v6661_v57 }
 0xec0   :  { %3503 = vmatprep.subr.mxu1 %v6664_v39  ;;  %4697 = vmatprep.subr.mxu0 %v6993_v6 }
 0xec1   :  { %3504 = vmatpush1.msra.mxu1 %v6668_v60  ;;  %4698 = vmatpush3.msra.mxu0 %v6671_v52 }
 0xec2   :  { %3505 = vmatprep.subr.mxu1 %v6674_v3  ;;  %4699 = vmatprep.subr.mxu0 %v6993_v6 }
 0xec3   :  { %3506 = vmatpush1.msra.mxu1 %v6678_v53  ;;  %4700 = vmatpush3.msra.mxu0 %v6681_v54  ;;  %v7132_v53 = vld [vmem:[#allocation21_spill] sm:$0xff] }
 0xec4   :  { %3507 = vmatprep.subr.mxu1 %v6684_v10  ;;  %4701 = vmatprep.subr.mxu0 %v6993_v6  ;;  %v2124_v54 = vadd.f32 %v7132_v53, %v7128_v45 }
 0xec5   :  { %3508 = vmatpush1.msra.mxu1 %v7123_v59  ;;  %4702 = vmatpush3.msra.mxu0 %v7124_v20  ;;  %v3715_v59 = vld [vmem:[%s6908_s7] ss:$0 sm:$0xff] }
 0xec6   :  { %3509 = vmatprep.subr.mxu1 %v7125_v58  ;;  %4703 = vmatprep.subr.mxu0 %v6993_v6 }
 0xec7   :  { %3510 = vmatpush1.msra.mxu1 %v7126_v31  ;;  %3543 = vmatprep.mubr.f32.mxu1 %v6993_v6  ;;  %v3716_v31 = vld [vmem:[#allocation4] ss:$0 sm:$0xff] }
 0xec8   :  { %4704 = vmatpush3.msra.mxu0 %v7127_v33  ;;  %4705 = vmatprep.mubr.msk.f32.mxu0 %vm5021_vm2, %v6993_v6 }
 0xf68   :  { %v3379_v16 = vpop.f32.mrf.mxu1  ;;  %v3450_v7 = vpop.f32.mrf.mxu0 }
 0xf69   :  { %v3454_v4 = vadd.f32 %v3379_v16, %v2118_v41  ;;  %v3468_v43 = vadd.f32 %v4971_v18, %v3450_v7 }
 0xf6a   :  { %v4672_v32 = vpop.f32.mrf.mxu0  ;;  %v3381_v34 = vpop.f32.mrf.mxu1 }
 0xf6b   :  { %v3711_v49 = vmul.f32 -1.442695, %v3454_v4  ;;  %v3455_v46 = vadd.f32 %v3381_v34, %v2120_v35 }
 0xf6d   :  { %4854 = vpow2.f32 %v3711_v49  ;;  %v3712_v36 = vmul.f32 -1.442695, %v3455_v46 }
 0xf6f   :  { %4856 = vpow2.f32 %v3712_v36 }
 0xf7a   :  { %v4855_v12 = vpop.eup %4854 }
 0xf7b   :  { %v3462_v37 = vadd.f32 1.0, %v4855_v12 }
 0xf7c   :  { %v4857_v6 = vpop.eup %4856 }
 0xf7d   :  { %4858 = vrcp.f32 %v3462_v37  ;;  %v3463_v27 = vadd.f32 1.0, %v4857_v6 }
 0xf7f   :  { %4860 = vrcp.f32 %v3463_v27 }
 0xf8a   :  { %v4859_v2 = vpop.eup %4858 }
 0xf8b   :  { %v3469_v40 = vmul.f32 %v4859_v2, %v3468_v43 }
 0xf8c   :  { %v4861_v50 = vpop.eup %4860 }
 0xf8d   :  { %v3470_v47 = vadd.f32 %v3469_v40, %v2225_v23  ;;  %v3472_v57 = vsub.f32 1.0, %v4861_v50  ;;  %v3474_v52 = vmul.f32 %v4861_v50, %v6810_v56 }
 0xf8f   :  { %4862 = vtanh.f32 %v3470_v47 }
 0xf9c   :  { %v4863_v39 = vpop.eup %4862 }
 0xf9d   :  { %v3473_v60 = vmul.f32 %v4863_v39, %v3472_v57 }
 0xf9f   :  { %v3475_v3 = vadd.f32 %v3474_v52, %v3473_v60 }
 0xfa1   :  { %3544 = vmatmul.mubr.f32.vlgmr.msra.gmra.mxu1 %v3475_v3  ;;  %4706 = vmatmul.mubr.f32.vlgmr.msra.gmra.mxu0 %v3475_v3 }
0x1061   :  { %v3545_v10 = vpop.f32.mrf.mxu1  ;;  %v3616_v55 = vpop.f32.mrf.mxu0 }
0x1062   :  { %v3620_v11 = vadd.f32 %v3545_v10, %v2124_v54  ;;  %v3634_v14 = vadd.f32 %v4971_v18, %v3616_v55 }
0x1063   :  { %v4707_v38 = vpop.f32.mrf.mxu0  ;;  %v3547_v9 = vpop.f32.mrf.mxu1 }
0x1064   :  { %v3713_v21 = vmul.f32 -1.442695, %v3620_v11  ;;  %v3621_v25 = vadd.f32 %v3547_v9, %v2126_v61 }
0x1066   :  { %4864 = vpow2.f32 %v3713_v21  ;;  %v3714_v42 = vmul.f32 -1.442695, %v3621_v25 }
0x1068   :  { %4866 = vpow2.f32 %v3714_v42 }
0x1073   :  { %v4865_v44 = vpop.eup %4864 }
0x1074   :  { %v3628_v22 = vadd.f32 1.0, %v4865_v44 }
0x1075   :  { %v4867_v30 = vpop.eup %4866 }
0x1076   :  { %4868 = vrcp.f32 %v3628_v22  ;;  %v3629_v51 = vadd.f32 1.0, %v4867_v30 }
0x1078   :  { %4870 = vrcp.f32 %v3629_v51 }
0x1083   :  { %v4869_v17 = vpop.eup %4868 }
0x1084   :  { %v3635_v5 = vmul.f32 %v4869_v17, %v3634_v14 }
0x1085   :  { %v4871_v26 = vpop.eup %4870 }
0x1086   :  { %v3636_v29 = vadd.f32 %v3635_v5, %v2230_v24  ;;  %v3638_v63 = vsub.f32 1.0, %v4871_v26  ;;  %v3640_v13 = vmul.f32 %v4871_v26, %v3475_v3 }
0x1088   :  { %4872 = vtanh.f32 %v3636_v29 }
0x1095   :  { %v4873_v28 = vpop.eup %4872 }
0x1096   :  { %v3639_v0 = vmul.f32 %v4873_v28, %v3638_v63 }
0x1098   :  { %v3641_v56 = vadd.f32 %v3640_v13, %v3639_v0 }
0x109a   :  { %v3642_v20 = vmax.f32 %v3641_v56, 0.0 }
0x109c   :  { %v3650_v58 = vmul.f32 %v3715_v59, %v3642_v20 }
0x109e   :  { %3651 = vadd.xlane.f32.xlu0 %v3650_v58 }
0x1127   :  { %v3652_v33 = vpop.xlane.xlu0 %3651 }
0x1128   :  { %v3660_v62 = vadd.f32 %v3716_v31, %v3652_v33 }
0x112a   :  { %3662 = vst.msk [vmem:[%s6910_s9] sm:$0xff] %vm3661_vm3, %v3660_v62 }
0x112b   :  { %3667 = vsyncpa [#allocation6], 1 }
0x112c   :  { %3668 = vsyncpa [#allocation8], 1 }

</bundles_post_ra>
